<compile_context>
chip_gen: v7x
topology: tpu7x:2x2x1
jax: 0.10.0
libtpu: 0.0.40
codegen_flags: <defaults>
</compile_context>

<pallas_src>
import functools

import jax
import jax.numpy as jnp
import numpy as np
from jax import lax
from jax.experimental import pallas as pl
from jax.experimental.pallas import tpu as pltpu

V = 28      # input_size (vocab)
VP = 128    # lane-padded vocab (fc output dim inside the kernel)
H = 256     # RNN_hidden_size
CHUNK = 8   # LSTM steps per grid iteration (multiple of 8 -> sublane-dense logits)


def decoder_kernel(tok_ref,                       # SMEM prefetch: (T_pad,) int32 tokens
                   emb_ref,                       # (V, H)    f32 embedding table
                   h0_ref, c0_ref,                # (1, H)    f32 initial hidden / cell
                   wih_ref,                       # (H, 4H)   bf16  W_ih^T
                   whh_ref,                       # (H, 4H)   f32   W_hh^T (f32: recurrent path)
                   b_ref,                         # (1, 4H)   f32   b_ih + b_hh
                   wfc_ref, bfc_ref,              # (H, VP) bf16, (1, VP) f32 (zero-padded)
                   logits_ref,                    # (U, VP)   per-chunk output block
                   h_out_ref, c_out_ref,          # (1, H)    final-state outputs
                   x_sc,                          # (U, H)  f32 gathered embeddings
                   xg_sc,                         # (U, 4H) f32 precomputed x-side gates
                   hrows_sc,                      # (U, H)  f32 h_t rows for deferred FC
                   h_sc, c_sc,                    # (1, H)  f32 recurrent carry
                   *, seq_len, chunk):
    i = pl.program_id(0)

    # Load initial recurrent state into VMEM scratch on the first chunk only.
    @pl.when(i == 0)
    def _():
        h_sc[...] = h0_ref[...]
        c_sc[...] = c0_ref[...]

    # ---- Preamble: gather this chunk's embeddings (dynamic row reads from the
    # VMEM-resident table) and batch the input-side gate matmul: ONE
    # (U,H) x (H,4H) MXU matmul instead of U per-step (1,H) matmuls.
    def gather(u, carry):
        tok = tok_ref[i * chunk + u]
        x_sc[pl.ds(u, 1), :] = emb_ref[pl.ds(tok, 1), :]
        return carry

    lax.fori_loop(0, chunk, gather, 0, unroll=True)

    xg_sc[...] = (jnp.dot(x_sc[...].astype(jnp.bfloat16), wih_ref[...],
                          preferred_element_type=jnp.float32)
                  + b_ref[...])                                   # (U, 4H) f32

    # ---- Serial recurrence: only h @ W_hh^T (f32) per step.
    def step(u, carry):
        h, c = carry
        gates = xg_sc[pl.ds(u, 1), :] + jnp.dot(
            h, whh_ref[...], preferred_element_type=jnp.float32)  # (1, 4H)

        # PyTorch gate ordering: i, f, g, o
        i_g = jax.nn.sigmoid(gates[:, 0 * H:1 * H])
        f_g = jax.nn.sigmoid(gates[:, 1 * H:2 * H])
        g_g = jnp.tanh(gates[:, 2 * H:3 * H])
        o_g = jax.nn.sigmoid(gates[:, 3 * H:4 * H])

        c_new = f_g * c + i_g * g_g
        h_new = o_g * jnp.tanh(c_new)

        # Tail masking: steps beyond the true sequence length keep the state
        # (multiply-mask form lowers to plain scalar*vector ops).
        m = ((i * chunk + u) < seq_len).astype(jnp.float32)
        h_new = m * h_new + (1.0 - m) * h
        c_new = m * c_new + (1.0 - m) * c

        hrows_sc[pl.ds(u, 1), :] = h_new
        return (h_new, c_new)

    h_fin, c_fin = lax.fori_loop(0, chunk, step, (h_sc[...], c_sc[...]),
                                 unroll=True)

    # Carry recurrent state to the next chunk.
    h_sc[...] = h_fin
    c_sc[...] = c_fin

    # ---- Deferred FC projection: one (U,H) x (H,VP) matmul per chunk,
    # lane/sublane-dense (U,128) f32 store.
    logits_ref[...] = (jnp.dot(hrows_sc[...].astype(jnp.bfloat16), wfc_ref[...],
                               preferred_element_type=jnp.float32)
                       + bfc_ref[...])

    # Final-state outputs: constant-index output blocks are only flushed to HBM
    # at grid end; writing every chunk is cheap and avoids relying on
    # last-step-only writeback semantics.
    h_out_ref[...] = h_fin
    c_out_ref[...] = c_fin


def decoder_decode(tokens, h0, c0, params, *, chunk=CHUNK):
    """Run T teacher-forced decoder steps (== T calls of Decoder.forward) fused
    into a single pallas_call.

    tokens: (T,) int32; h0, c0: (1, 1, H) float32.
    Returns (logits (T, V), h (1,1,H), c (1,1,H)).
    """
    assert chunk % 8 == 0
    emb, wih_t, whh_t, b_fused, wfc_pad, bfc_pad = params

    tok = jnp.asarray(tokens, dtype=jnp.int32)
    T = int(tok.shape[0])
    n_chunks = pl.cdiv(T, chunk)
    T_pad = n_chunks * chunk
    tok_pad = jnp.zeros((T_pad,), jnp.int32).at[:T].set(tok)

    h2 = h0.reshape(1, H).astype(jnp.float32)
    c2 = c0.reshape(1, H).astype(jnp.float32)

    grid_spec = pltpu.PrefetchScalarGridSpec(
        num_scalar_prefetch=1,
        grid=(n_chunks,),
        in_specs=[
            pl.BlockSpec((V, H), lambda i, tok: (0, 0)),          # embedding table
            pl.BlockSpec((1, H), lambda i, tok: (0, 0)),          # h0
            pl.BlockSpec((1, H), lambda i, tok: (0, 0)),          # c0
            pl.BlockSpec((H, 4 * H), lambda i, tok: (0, 0)),      # W_ih^T (bf16)
            pl.BlockSpec((H, 4 * H), lambda i, tok: (0, 0)),      # W_hh^T (f32)
            pl.BlockSpec((1, 4 * H), lambda i, tok: (0, 0)),      # fused bias
            pl.BlockSpec((H, VP), lambda i, tok: (0, 0)),         # W_fc^T (padded)
            pl.BlockSpec((1, VP), lambda i, tok: (0, 0)),         # b_fc (padded)
        ],
        out_specs=[
            pl.BlockSpec((chunk, VP), lambda i, tok: (i, 0)),     # per-chunk logits slab
            pl.BlockSpec((1, H), lambda i, tok: (0, 0)),          # final h
            pl.BlockSpec((1, H), lambda i, tok: (0, 0)),          # final c
        ],
        scratch_shapes=[
            pltpu.VMEM((chunk, H), jnp.float32),       # gathered embeddings
            pltpu.VMEM((chunk, 4 * H), jnp.float32),   # precomputed x-side gates
            pltpu.VMEM((chunk, H), jnp.float32),       # h rows for deferred FC
            pltpu.VMEM((1, H), jnp.float32),           # h carry
            pltpu.VMEM((1, H), jnp.float32),           # c carry
        ],
    )

    logits_pad, h_new, c_new = pl.pallas_call(
        functools.partial(decoder_kernel, seq_len=T, chunk=chunk),
        out_shape=(
            jax.ShapeDtypeStruct((T_pad, VP), jnp.float32),
            jax.ShapeDtypeStruct((1, H), jnp.float32),
            jax.ShapeDtypeStruct((1, H), jnp.float32),
        ),
        grid_spec=grid_spec,
        compiler_params=pltpu.CompilerParams(
            dimension_semantics=("arbitrary",)),   # sequential: carried h/c state
    )(tok_pad, emb, h2, c2, wih_t, whh_t, b_fused, wfc_pad, bfc_pad)

    logits = logits_pad[:T, :V]
    return logits, h_new.reshape(1, 1, H), c_new.reshape(1, 1, H)


def decoder_forward(token, h, c, params):
    """Single-step Decoder.forward (the module's API) == fused kernel with T=1."""
    logits, h_new, c_new = decoder_decode(
        jnp.asarray([token], dtype=jnp.int32), h, c, params)
    return logits, h_new, c_new            # logits: (1, V)


def reference_decode(tokens, h0, c0, raw_params):
    """Pure-JAX f32 reference implementing the PyTorch forward, T times."""
    emb, w_ih, w_hh, b_ih, b_hh, w_fc, b_fc = raw_params
    h = h0.reshape(1, H)
    c = c0.reshape(1, H)
    outs = []
    for tkn in np.asarray(tokens):
        x = emb[int(tkn)][None, :]
        gates = x @ w_ih.T + h @ w_hh.T + b_ih[None, :] + b_hh[None, :]
        i_g = jax.nn.sigmoid(gates[:, 0 * H:1 * H])
        f_g = jax.nn.sigmoid(gates[:, 1 * H:2 * H])
        g_g = jnp.tanh(gates[:, 2 * H:3 * H])
        o_g = jax.nn.sigmoid(gates[:, 3 * H:4 * H])
        c = f_g * c + i_g * g_g
        h = o_g * jnp.tanh(c)
        outs.append(h @ w_fc.T + b_fc[None, :])
    return (jnp.concatenate(outs, axis=0),
            h.reshape(1, 1, H), c.reshape(1, 1, H))


def init_params(key):
    """Deterministic synthetic parameters (shapes match nn.Module.__init__).

    Returns (raw_f32_params_for_reference, packed_kernel_params)."""
    ks = jax.random.split(key, 6)
    scale = 0.1
    emb  = scale * jax.random.normal(ks[0], (V, H), jnp.float32)       # input_embedding.weight
    w_ih = scale * jax.random.normal(ks[1], (4 * H, H), jnp.float32)   # lstm.weight_ih_l0
    w_hh = scale * jax.random.normal(ks[2], (4 * H, H), jnp.float32)   # lstm.weight_hh_l0
    b_ih = scale * jax.random.normal(ks[3], (4 * H,), jnp.float32)
    b_hh = scale * jax.random.normal(ks[4], (4 * H,), jnp.float32)
    w_fc = scale * jax.random.normal(ks[5], (V, H), jnp.float32)       # fc.weight
    b_fc = jnp.zeros((V,), jnp.float32)                                # fc.bias

    raw = (emb, w_ih, w_hh, b_ih, b_hh, w_fc, b_fc)

    # Kernel packing (pure layout glue):
    #  - W_ih^T as bf16 (batched preamble matmul), W_hh^T kept f32 (recurrent path)
    #  - fuse the two biases
    #  - zero-pad the fc weight/bias vocab dim from V=28 to 128 lanes
    wih_t = w_ih.T.astype(jnp.bfloat16)                                         # (H, 4H)
    whh_t = w_hh.T.astype(jnp.float32)                                          # (H, 4H)
    b_fused = (b_ih + b_hh)[None, :]                                            # (1, 4H)
    wfc_pad = (jnp.zeros((H, VP), jnp.float32)
               .at[:, :V].set(w_fc.T).astype(jnp.bfloat16))                     # (H, VP)
    bfc_pad = jnp.zeros((1, VP), jnp.float32).at[:, :V].set(b_fc[None, :])      # (1, VP)

    packed = (emb, wih_t, whh_t, b_fused, wfc_pad, bfc_pad)
    return raw, packed


if __name__ == "__main__":
    key = jax.random.PRNGKey(0)
    kp, kh, kc, kt = jax.random.split(key, 4)

    raw_params, packed_params = init_params(kp)

    h0 = 0.5 * jax.random.normal(kh, (1, 1, H), jnp.float32)           # hidden
    c0 = 0.5 * jax.random.normal(kc, (1, 1, H), jnp.float32)           # cell

    # ---- Case 1: T=8 teacher-forced steps (single chunk, grid=(1,)).
    T1 = 8
    tokens1 = jax.random.randint(kt, (T1,), 0, V, dtype=jnp.int32)
    logits1, h1, c1 = decoder_decode(tokens1, h0, c0, packed_params)
    jax.block_until_ready((logits1, h1, c1))

    ref_l1, ref_h1, ref_c1 = reference_decode(tokens1, h0, c0, raw_params)
    np.testing.assert_allclose(np.asarray(logits1), np.asarray(ref_l1),
                               rtol=5e-2, atol=5e-2)   # bf16 W_ih / W_fc
    np.testing.assert_allclose(np.asarray(h1), np.asarray(ref_h1),
                               rtol=5e-2, atol=5e-2)
    np.testing.assert_allclose(np.asarray(c1), np.asarray(ref_c1),
                               rtol=5e-2, atol=5e-2)

    # ---- Case 2: T=11 (two chunks; exercises cross-chunk carry + tail masking).
    T2 = 11
    tokens2 = jax.random.randint(jax.random.fold_in(kt, 1), (T2,), 0, V,
                                 dtype=jnp.int32)
    logits2, h2o, c2o = decoder_decode(tokens2, h0, c0, packed_params)
    jax.block_until_ready((logits2, h2o, c2o))

    ref_l2, ref_h2, ref_c2 = reference_decode(tokens2, h0, c0, raw_params)
    np.testing.assert_allclose(np.asarray(logits2), np.asarray(ref_l2),
                               rtol=5e-2, atol=5e-2)
    np.testing.assert_allclose(np.asarray(h2o), np.asarray(ref_h2),
                               rtol=5e-2, atol=5e-2)
    np.testing.assert_allclose(np.asarray(c2o), np.asarray(ref_c2),
                               rtol=5e-2, atol=5e-2)

    # ---- Case 3: single-step Decoder.forward API (T=1 case of the same kernel).
    logits_s, h_s, c_s = decoder_forward(int(tokens1[0]), h0, c0, packed_params)
    jax.block_until_ready((logits_s, h_s, c_s))
    np.testing.assert_allclose(np.asarray(logits_s), np.asarray(ref_l1[:1]),
                               rtol=5e-2, atol=5e-2)

    assert logits1.shape == (T1, V)
    assert logits2.shape == (T2, V)
    assert logits_s.shape == (1, V)
    assert h1.shape == (1, 1, H) and c1.shape == (1, 1, H)
    assert h_s.shape == (1, 1, H) and c_s.shape == (1, 1, H)
    print("KERNEL_OK")
</pallas_src>

<mosaic_0001>
module attributes {stable_mosaic.version = 11 : i64} {
  func.func @decoder_kernel(%arg0: i32, %arg1: memref<8xi32, #tpu.memory_space<smem>>, %arg2: memref<28x256xf32, #tpu.memory_space<vmem>>, %arg3: memref<1x256xf32, #tpu.memory_space<vmem>>, %arg4: memref<1x256xf32, #tpu.memory_space<vmem>>, %arg5: memref<256x1024xbf16, #tpu.memory_space<vmem>>, %arg6: memref<256x1024xf32, #tpu.memory_space<vmem>>, %arg7: memref<1x1024xf32, #tpu.memory_space<vmem>>, %arg8: memref<256x128xbf16, #tpu.memory_space<vmem>>, %arg9: memref<1x128xf32, #tpu.memory_space<vmem>>, %arg10: memref<8x128xf32, #tpu.memory_space<vmem>>, %arg11: memref<1x256xf32, #tpu.memory_space<vmem>>, %arg12: memref<1x256xf32, #tpu.memory_space<vmem>>, %arg13: memref<8x256xf32, #tpu.memory_space<vmem>>, %arg14: memref<8x1024xf32, #tpu.memory_space<vmem>>, %arg15: memref<8x256xf32, #tpu.memory_space<vmem>>, %arg16: memref<1x256xf32, #tpu.memory_space<vmem>>, %arg17: memref<1x256xf32, #tpu.memory_space<vmem>>) attributes {dimension_semantics = [#tpu.dimension_semantics<arbitrary>], iteration_bounds = array<i64: 1>, scalar_prefetch = 1 : i64, scratch_operands = 5 : i64, tpu.core_type = #tpu.core_type<tc>, window_params = [{pipeline_mode = #tpu.pipeline_mode<synchronous>, transform_indices = @transform_0, window_bounds = array<i64: 28, 256>}, {pipeline_mode = #tpu.pipeline_mode<synchronous>, transform_indices = @transform_1, window_bounds = array<i64: 1, 256>}, {pipeline_mode = #tpu.pipeline_mode<synchronous>, transform_indices = @transform_2, window_bounds = array<i64: 1, 256>}, {pipeline_mode = #tpu.pipeline_mode<synchronous>, transform_indices = @transform_3, window_bounds = array<i64: 256, 1024>}, {pipeline_mode = #tpu.pipeline_mode<synchronous>, transform_indices = @transform_4, window_bounds = array<i64: 256, 1024>}, {pipeline_mode = #tpu.pipeline_mode<synchronous>, transform_indices = @transform_5, window_bounds = array<i64: 1, 1024>}, {pipeline_mode = #tpu.pipeline_mode<synchronous>, transform_indices = @transform_6, window_bounds = array<i64: 256, 128>}, {pipeline_mode = #tpu.pipeline_mode<synchronous>, transform_indices = @transform_7, window_bounds = array<i64: 1, 128>}, {transform_indices = @transform_8, window_bounds = array<i64: 8, 128>}, {pipeline_mode = #tpu.pipeline_mode<synchronous>, transform_indices = @transform_9, window_bounds = array<i64: 1, 256>}, {pipeline_mode = #tpu.pipeline_mode<synchronous>, transform_indices = @transform_10, window_bounds = array<i64: 1, 256>}]} {
    %c0_i32 = arith.constant 0 : i32
    %0 = arith.cmpi eq, %arg0, %c0_i32 : i32
    %1 = arith.extui %0 : i1 to i32
    %c0_i32_0 = arith.constant 0 : i32
    %2 = arith.cmpi ne, %1, %c0_i32_0 : i32
    scf.if %2 {
      %c0_159 = arith.constant 0 : index
      %c0_160 = arith.constant 0 : index
      %481 = vector.load %arg3[%c0_159, %c0_160] : memref<1x256xf32, #tpu.memory_space<vmem>>, vector<1x256xf32>
      %c0_161 = arith.constant 0 : index
      %c0_162 = arith.constant 0 : index
      %482 = vector.load %arg16[%c0_161, %c0_162] : memref<1x256xf32, #tpu.memory_space<vmem>>, vector<1x256xf32>
      tpu.vector_store %arg16[%c0_161, %c0_162], %481 {strides = array<i32>} : memref<1x256xf32, #tpu.memory_space<vmem>>, vector<1x256xf32>,
      %c0_163 = arith.constant 0 : index
      %c0_164 = arith.constant 0 : index
      %483 = vector.load %arg4[%c0_163, %c0_164] : memref<1x256xf32, #tpu.memory_space<vmem>>, vector<1x256xf32>
      %c0_165 = arith.constant 0 : index
      %c0_166 = arith.constant 0 : index
      %484 = vector.load %arg17[%c0_165, %c0_166] : memref<1x256xf32, #tpu.memory_space<vmem>>, vector<1x256xf32>
      tpu.vector_store %arg17[%c0_165, %c0_166], %483 {strides = array<i32>} : memref<1x256xf32, #tpu.memory_space<vmem>>, vector<1x256xf32>,
    } else {
    }
    %c0_i32_1 = arith.constant 0 : i32
    %c8_i32 = arith.constant 8 : i32
    %3 = arith.muli %arg0, %c8_i32 : i32
    %4 = arith.addi %3, %c0_i32_1 : i32
    %5 = arith.index_cast %4 : i32 to index
    %6 = memref.load %arg1[%5] : memref<8xi32, #tpu.memory_space<smem>>
    %7 = arith.index_cast %6 : i32 to index
    %c0 = arith.constant 0 : index
    %8 = vector.load %arg2[%7, %c0] : memref<28x256xf32, #tpu.memory_space<vmem>>, vector<1x256xf32>
    %9 = arith.index_cast %c0_i32_1 : i32 to index
    %c0_2 = arith.constant 0 : index
    %10 = vector.load %arg13[%9, %c0_2] : memref<8x256xf32, #tpu.memory_space<vmem>>, vector<1x256xf32>
    tpu.vector_store %arg13[%9, %c0_2], %8 {strides = array<i32>} : memref<8x256xf32, #tpu.memory_space<vmem>>, vector<1x256xf32>,
    %c1_i32 = arith.constant 1 : i32
    %c8_i32_3 = arith.constant 8 : i32
    %11 = arith.muli %arg0, %c8_i32_3 : i32
    %12 = arith.addi %11, %c1_i32 : i32
    %13 = arith.index_cast %12 : i32 to index
    %14 = memref.load %arg1[%13] : memref<8xi32, #tpu.memory_space<smem>>
    %15 = arith.index_cast %14 : i32 to index
    %c0_4 = arith.constant 0 : index
    %16 = vector.load %arg2[%15, %c0_4] : memref<28x256xf32, #tpu.memory_space<vmem>>, vector<1x256xf32>
    %17 = arith.index_cast %c1_i32 : i32 to index
    %c0_5 = arith.constant 0 : index
    %18 = vector.load %arg13[%17, %c0_5] : memref<8x256xf32, #tpu.memory_space<vmem>>, vector<1x256xf32>
    tpu.vector_store %arg13[%17, %c0_5], %16 {strides = array<i32>} : memref<8x256xf32, #tpu.memory_space<vmem>>, vector<1x256xf32>,
    %c2_i32 = arith.constant 2 : i32
    %c8_i32_6 = arith.constant 8 : i32
    %19 = arith.muli %arg0, %c8_i32_6 : i32
    %20 = arith.addi %19, %c2_i32 : i32
    %21 = arith.index_cast %20 : i32 to index
    %22 = memref.load %arg1[%21] : memref<8xi32, #tpu.memory_space<smem>>
    %23 = arith.index_cast %22 : i32 to index
    %c0_7 = arith.constant 0 : index
    %24 = vector.load %arg2[%23, %c0_7] : memref<28x256xf32, #tpu.memory_space<vmem>>, vector<1x256xf32>
    %25 = arith.index_cast %c2_i32 : i32 to index
    %c0_8 = arith.constant 0 : index
    %26 = vector.load %arg13[%25, %c0_8] : memref<8x256xf32, #tpu.memory_space<vmem>>, vector<1x256xf32>
    tpu.vector_store %arg13[%25, %c0_8], %24 {strides = array<i32>} : memref<8x256xf32, #tpu.memory_space<vmem>>, vector<1x256xf32>,
    %c3_i32 = arith.constant 3 : i32
    %c8_i32_9 = arith.constant 8 : i32
    %27 = arith.muli %arg0, %c8_i32_9 : i32
    %28 = arith.addi %27, %c3_i32 : i32
    %29 = arith.index_cast %28 : i32 to index
    %30 = memref.load %arg1[%29] : memref<8xi32, #tpu.memory_space<smem>>
    %31 = arith.index_cast %30 : i32 to index
    %c0_10 = arith.constant 0 : index
    %32 = vector.load %arg2[%31, %c0_10] : memref<28x256xf32, #tpu.memory_space<vmem>>, vector<1x256xf32>
    %33 = arith.index_cast %c3_i32 : i32 to index
    %c0_11 = arith.constant 0 : index
    %34 = vector.load %arg13[%33, %c0_11] : memref<8x256xf32, #tpu.memory_space<vmem>>, vector<1x256xf32>
    tpu.vector_store %arg13[%33, %c0_11], %32 {strides = array<i32>} : memref<8x256xf32, #tpu.memory_space<vmem>>, vector<1x256xf32>,
    %c4_i32 = arith.constant 4 : i32
    %c8_i32_12 = arith.constant 8 : i32
    %35 = arith.muli %arg0, %c8_i32_12 : i32
    %36 = arith.addi %35, %c4_i32 : i32
    %37 = arith.index_cast %36 : i32 to index
    %38 = memref.load %arg1[%37] : memref<8xi32, #tpu.memory_space<smem>>
    %39 = arith.index_cast %38 : i32 to index
    %c0_13 = arith.constant 0 : index
    %40 = vector.load %arg2[%39, %c0_13] : memref<28x256xf32, #tpu.memory_space<vmem>>, vector<1x256xf32>
    %41 = arith.index_cast %c4_i32 : i32 to index
    %c0_14 = arith.constant 0 : index
    %42 = vector.load %arg13[%41, %c0_14] : memref<8x256xf32, #tpu.memory_space<vmem>>, vector<1x256xf32>
    tpu.vector_store %arg13[%41, %c0_14], %40 {strides = array<i32>} : memref<8x256xf32, #tpu.memory_space<vmem>>, vector<1x256xf32>,
    %c5_i32 = arith.constant 5 : i32
    %c8_i32_15 = arith.constant 8 : i32
    %43 = arith.muli %arg0, %c8_i32_15 : i32
    %44 = arith.addi %43, %c5_i32 : i32
    %45 = arith.index_cast %44 : i32 to index
    %46 = memref.load %arg1[%45] : memref<8xi32, #tpu.memory_space<smem>>
    %47 = arith.index_cast %46 : i32 to index
    %c0_16 = arith.constant 0 : index
    %48 = vector.load %arg2[%47, %c0_16] : memref<28x256xf32, #tpu.memory_space<vmem>>, vector<1x256xf32>
    %49 = arith.index_cast %c5_i32 : i32 to index
    %c0_17 = arith.constant 0 : index
    %50 = vector.load %arg13[%49, %c0_17] : memref<8x256xf32, #tpu.memory_space<vmem>>, vector<1x256xf32>
    tpu.vector_store %arg13[%49, %c0_17], %48 {strides = array<i32>} : memref<8x256xf32, #tpu.memory_space<vmem>>, vector<1x256xf32>,
    %c6_i32 = arith.constant 6 : i32
    %c8_i32_18 = arith.constant 8 : i32
    %51 = arith.muli %arg0, %c8_i32_18 : i32
    %52 = arith.addi %51, %c6_i32 : i32
    %53 = arith.index_cast %52 : i32 to index
    %54 = memref.load %arg1[%53] : memref<8xi32, #tpu.memory_space<smem>>
    %55 = arith.index_cast %54 : i32 to index
    %c0_19 = arith.constant 0 : index
    %56 = vector.load %arg2[%55, %c0_19] : memref<28x256xf32, #tpu.memory_space<vmem>>, vector<1x256xf32>
    %57 = arith.index_cast %c6_i32 : i32 to index
    %c0_20 = arith.constant 0 : index
    %58 = vector.load %arg13[%57, %c0_20] : memref<8x256xf32, #tpu.memory_space<vmem>>, vector<1x256xf32>
    tpu.vector_store %arg13[%57, %c0_20], %56 {strides = array<i32>} : memref<8x256xf32, #tpu.memory_space<vmem>>, vector<1x256xf32>,
    %c7_i32 = arith.constant 7 : i32
    %c8_i32_21 = arith.constant 8 : i32
    %59 = arith.muli %arg0, %c8_i32_21 : i32
    %60 = arith.addi %59, %c7_i32 : i32
    %61 = arith.index_cast %60 : i32 to index
    %62 = memref.load %arg1[%61] : memref<8xi32, #tpu.memory_space<smem>>
    %63 = arith.index_cast %62 : i32 to index
    %c0_22 = arith.constant 0 : index
    %64 = vector.load %arg2[%63, %c0_22] : memref<28x256xf32, #tpu.memory_space<vmem>>, vector<1x256xf32>
    %65 = arith.index_cast %c7_i32 : i32 to index
    %c0_23 = arith.constant 0 : index
    %66 = vector.load %arg13[%65, %c0_23] : memref<8x256xf32, #tpu.memory_space<vmem>>, vector<1x256xf32>
    tpu.vector_store %arg13[%65, %c0_23], %64 {strides = array<i32>} : memref<8x256xf32, #tpu.memory_space<vmem>>, vector<1x256xf32>,
    %c8_i32_24 = arith.constant 8 : i32
    %c0_25 = arith.constant 0 : index
    %c0_26 = arith.constant 0 : index
    %67 = vector.load %arg13[%c0_25, %c0_26] : memref<8x256xf32, #tpu.memory_space<vmem>>, vector<8x256xf32>
    %68 = arith.truncf %67 : vector<8x256xf32> to vector<8x256xbf16>
    %c0_27 = arith.constant 0 : index
    %c0_28 = arith.constant 0 : index
    %69 = vector.load %arg5[%c0_27, %c0_28] : memref<256x1024xbf16, #tpu.memory_space<vmem>>, vector<256x1024xbf16>
    %cst = arith.constant dense<0.000000e+00> : vector<8x1024xf32>
    %70 = tpu.matmul %68, %69, %cst {dimension_numbers = #tpu.dot_dimension_numbers<[1], [0], [0], [1], [0, 0, 1, 1], [], []>} : vector<8x256xbf16>, vector<256x1024xbf16>, vector<8x1024xf32> -> vector<8x1024xf32>
    %c0_29 = arith.constant 0 : index
    %c0_30 = arith.constant 0 : index
    %71 = vector.load %arg7[%c0_29, %c0_30] : memref<1x1024xf32, #tpu.memory_space<vmem>>, vector<1x1024xf32>
    %72 = vector.broadcast %71 : vector<1x1024xf32> to vector<8x1024xf32>
    %73 = arith.addf %70, %72 : vector<8x1024xf32>
    %c0_31 = arith.constant 0 : index
    %c0_32 = arith.constant 0 : index
    %74 = vector.load %arg14[%c0_31, %c0_32] : memref<8x1024xf32, #tpu.memory_space<vmem>>, vector<8x1024xf32>
    tpu.vector_store %arg14[%c0_31, %c0_32], %73 {strides = array<i32>} : memref<8x1024xf32, #tpu.memory_space<vmem>>, vector<8x1024xf32>,
    %c0_33 = arith.constant 0 : index
    %c0_34 = arith.constant 0 : index
    %75 = vector.load %arg16[%c0_33, %c0_34] : memref<1x256xf32, #tpu.memory_space<vmem>>, vector<1x256xf32>
    %c0_35 = arith.constant 0 : index
    %c0_36 = arith.constant 0 : index
    %76 = vector.load %arg17[%c0_35, %c0_36] : memref<1x256xf32, #tpu.memory_space<vmem>>, vector<1x256xf32>
    %c0_i32_37 = arith.constant 0 : i32
    %77 = arith.index_cast %c0_i32_37 : i32 to index
    %c0_38 = arith.constant 0 : index
    %78 = vector.load %arg14[%77, %c0_38] : memref<8x1024xf32, #tpu.memory_space<vmem>>, vector<1x1024xf32>
    %c0_39 = arith.constant 0 : index
    %c0_40 = arith.constant 0 : index
    %79 = vector.load %arg6[%c0_39, %c0_40] : memref<256x1024xf32, #tpu.memory_space<vmem>>, vector<256x1024xf32>
    %cst_41 = arith.constant dense<0.000000e+00> : vector<1x1024xf32>
    %80 = tpu.matmul %75, %79, %cst_41 {dimension_numbers = #tpu.dot_dimension_numbers<[1], [0], [0], [1], [0, 0, 1, 1], [], []>} : vector<1x256xf32>, vector<256x1024xf32>, vector<1x1024xf32> -> vector<1x1024xf32>
    %81 = arith.addf %78, %80 : vector<1x1024xf32>
    %82 = vector.extract_strided_slice %81 {offsets = [0, 0], sizes = [1, 256], strides = [1, 1]} : vector<1x1024xf32> to vector<1x256xf32>
    %83 = arith.negf %82 : vector<1x256xf32>
    %84 = math.exp %83 : vector<1x256xf32>
    %cst_42 = arith.constant 1.000000e+00 : f32
    %85 = vector.broadcast %cst_42 : f32 to vector<1x256xf32>
    %86 = arith.addf %85, %84 : vector<1x256xf32>
    %87 = arith.divf %85, %86 : vector<1x256xf32>
    %88 = vector.extract_strided_slice %81 {offsets = [0, 256], sizes = [1, 256], strides = [1, 1]} : vector<1x1024xf32> to vector<1x256xf32>
    %89 = arith.negf %88 : vector<1x256xf32>
    %90 = math.exp %89 : vector<1x256xf32>
    %cst_43 = arith.constant 1.000000e+00 : f32
    %91 = vector.broadcast %cst_43 : f32 to vector<1x256xf32>
    %92 = arith.addf %91, %90 : vector<1x256xf32>
    %93 = arith.divf %91, %92 : vector<1x256xf32>
    %94 = vector.extract_strided_slice %81 {offsets = [0, 512], sizes = [1, 256], strides = [1, 1]} : vector<1x1024xf32> to vector<1x256xf32>
    %95 = math.tanh %94 : vector<1x256xf32>
    %96 = vector.extract_strided_slice %81 {offsets = [0, 768], sizes = [1, 256], strides = [1, 1]} : vector<1x1024xf32> to vector<1x256xf32>
    %97 = arith.negf %96 : vector<1x256xf32>
    %98 = math.exp %97 : vector<1x256xf32>
    %cst_44 = arith.constant 1.000000e+00 : f32
    %99 = vector.broadcast %cst_44 : f32 to vector<1x256xf32>
    %100 = arith.addf %99, %98 : vector<1x256xf32>
    %101 = arith.divf %99, %100 : vector<1x256xf32>
    %102 = arith.mulf %93, %76 : vector<1x256xf32>
    %103 = arith.mulf %87, %95 : vector<1x256xf32>
    %104 = arith.addf %102, %103 : vector<1x256xf32>
    %105 = math.tanh %104 : vector<1x256xf32>
    %106 = arith.mulf %101, %105 : vector<1x256xf32>
    %c8_i32_45 = arith.constant 8 : i32
    %107 = arith.muli %arg0, %c8_i32_45 : i32
    %108 = arith.addi %107, %c0_i32_37 : i32
    %c8_i32_46 = arith.constant 8 : i32
    %109 = arith.cmpi slt, %108, %c8_i32_46 : i32
    %110 = arith.extui %109 : i1 to i32
    %111 = arith.sitofp %110 : i32 to f32
    %112 = vector.broadcast %111 : f32 to vector<1x256xf32>
    %113 = arith.mulf %112, %106 : vector<1x256xf32>
    %cst_47 = arith.constant 1.000000e+00 : f32
    %114 = arith.subf %cst_47, %111 : f32
    %115 = vector.broadcast %114 : f32 to vector<1x256xf32>
    %116 = arith.mulf %115, %75 : vector<1x256xf32>
    %117 = arith.addf %113, %116 : vector<1x256xf32>
    %118 = vector.broadcast %111 : f32 to vector<1x256xf32>
    %119 = arith.mulf %118, %104 : vector<1x256xf32>
    %cst_48 = arith.constant 1.000000e+00 : f32
    %120 = arith.subf %cst_48, %111 : f32
    %121 = vector.broadcast %120 : f32 to vector<1x256xf32>
    %122 = arith.mulf %121, %76 : vector<1x256xf32>
    %123 = arith.addf %119, %122 : vector<1x256xf32>
    %124 = arith.index_cast %c0_i32_37 : i32 to index
    %c0_49 = arith.constant 0 : index
    %125 = vector.load %arg15[%124, %c0_49] : memref<8x256xf32, #tpu.memory_space<vmem>>, vector<1x256xf32>
    tpu.vector_store %arg15[%124, %c0_49], %117 {strides = array<i32>} : memref<8x256xf32, #tpu.memory_space<vmem>>, vector<1x256xf32>,
    %c1_i32_50 = arith.constant 1 : i32
    %126 = arith.index_cast %c1_i32_50 : i32 to index
    %c0_51 = arith.constant 0 : index
    %127 = vector.load %arg14[%126, %c0_51] : memref<8x1024xf32, #tpu.memory_space<vmem>>, vector<1x1024xf32>
    %c0_52 = arith.constant 0 : index
    %c0_53 = arith.constant 0 : index
    %128 = vector.load %arg6[%c0_52, %c0_53] : memref<256x1024xf32, #tpu.memory_space<vmem>>, vector<256x1024xf32>
    %cst_54 = arith.constant dense<0.000000e+00> : vector<1x1024xf32>
    %129 = tpu.matmul %117, %128, %cst_54 {dimension_numbers = #tpu.dot_dimension_numbers<[1], [0], [0], [1], [0, 0, 1, 1], [], []>} : vector<1x256xf32>, vector<256x1024xf32>, vector<1x1024xf32> -> vector<1x1024xf32>
    %130 = arith.addf %127, %129 : vector<1x1024xf32>
    %131 = vector.extract_strided_slice %130 {offsets = [0, 0], sizes = [1, 256], strides = [1, 1]} : vector<1x1024xf32> to vector<1x256xf32>
    %132 = arith.negf %131 : vector<1x256xf32>
    %133 = math.exp %132 : vector<1x256xf32>
    %cst_55 = arith.constant 1.000000e+00 : f32
    %134 = vector.broadcast %cst_55 : f32 to vector<1x256xf32>
    %135 = arith.addf %134, %133 : vector<1x256xf32>
    %136 = arith.divf %134, %135 : vector<1x256xf32>
    %137 = vector.extract_strided_slice %130 {offsets = [0, 256], sizes = [1, 256], strides = [1, 1]} : vector<1x1024xf32> to vector<1x256xf32>
    %138 = arith.negf %137 : vector<1x256xf32>
    %139 = math.exp %138 : vector<1x256xf32>
    %cst_56 = arith.constant 1.000000e+00 : f32
    %140 = vector.broadcast %cst_56 : f32 to vector<1x256xf32>
    %141 = arith.addf %140, %139 : vector<1x256xf32>
    %142 = arith.divf %140, %141 : vector<1x256xf32>
    %143 = vector.extract_strided_slice %130 {offsets = [0, 512], sizes = [1, 256], strides = [1, 1]} : vector<1x1024xf32> to vector<1x256xf32>
    %144 = math.tanh %143 : vector<1x256xf32>
    %145 = vector.extract_strided_slice %130 {offsets = [0, 768], sizes = [1, 256], strides = [1, 1]} : vector<1x1024xf32> to vector<1x256xf32>
    %146 = arith.negf %145 : vector<1x256xf32>
    %147 = math.exp %146 : vector<1x256xf32>
    %cst_57 = arith.constant 1.000000e+00 : f32
    %148 = vector.broadcast %cst_57 : f32 to vector<1x256xf32>
    %149 = arith.addf %148, %147 : vector<1x256xf32>
    %150 = arith.divf %148, %149 : vector<1x256xf32>
    %151 = arith.mulf %142, %123 : vector<1x256xf32>
    %152 = arith.mulf %136, %144 : vector<1x256xf32>
    %153 = arith.addf %151, %152 : vector<1x256xf32>
    %154 = math.tanh %153 : vector<1x256xf32>
    %155 = arith.mulf %150, %154 : vector<1x256xf32>
    %c8_i32_58 = arith.constant 8 : i32
    %156 = arith.muli %arg0, %c8_i32_58 : i32
    %157 = arith.addi %156, %c1_i32_50 : i32
    %c8_i32_59 = arith.constant 8 : i32
    %158 = arith.cmpi slt, %157, %c8_i32_59 : i32
    %159 = arith.extui %158 : i1 to i32
    %160 = arith.sitofp %159 : i32 to f32
    %161 = vector.broadcast %160 : f32 to vector<1x256xf32>
    %162 = arith.mulf %161, %155 : vector<1x256xf32>
    %cst_60 = arith.constant 1.000000e+00 : f32
    %163 = arith.subf %cst_60, %160 : f32
    %164 = vector.broadcast %163 : f32 to vector<1x256xf32>
    %165 = arith.mulf %164, %117 : vector<1x256xf32>
    %166 = arith.addf %162, %165 : vector<1x256xf32>
    %167 = vector.broadcast %160 : f32 to vector<1x256xf32>
    %168 = arith.mulf %167, %153 : vector<1x256xf32>
    %cst_61 = arith.constant 1.000000e+00 : f32
    %169 = arith.subf %cst_61, %160 : f32
    %170 = vector.broadcast %169 : f32 to vector<1x256xf32>
    %171 = arith.mulf %170, %123 : vector<1x256xf32>
    %172 = arith.addf %168, %171 : vector<1x256xf32>
    %173 = arith.index_cast %c1_i32_50 : i32 to index
    %c0_62 = arith.constant 0 : index
    %174 = vector.load %arg15[%173, %c0_62] : memref<8x256xf32, #tpu.memory_space<vmem>>, vector<1x256xf32>
    tpu.vector_store %arg15[%173, %c0_62], %166 {strides = array<i32>} : memref<8x256xf32, #tpu.memory_space<vmem>>, vector<1x256xf32>,
    %c2_i32_63 = arith.constant 2 : i32
    %175 = arith.index_cast %c2_i32_63 : i32 to index
    %c0_64 = arith.constant 0 : index
    %176 = vector.load %arg14[%175, %c0_64] : memref<8x1024xf32, #tpu.memory_space<vmem>>, vector<1x1024xf32>
    %c0_65 = arith.constant 0 : index
    %c0_66 = arith.constant 0 : index
    %177 = vector.load %arg6[%c0_65, %c0_66] : memref<256x1024xf32, #tpu.memory_space<vmem>>, vector<256x1024xf32>
    %cst_67 = arith.constant dense<0.000000e+00> : vector<1x1024xf32>
    %178 = tpu.matmul %166, %177, %cst_67 {dimension_numbers = #tpu.dot_dimension_numbers<[1], [0], [0], [1], [0, 0, 1, 1], [], []>} : vector<1x256xf32>, vector<256x1024xf32>, vector<1x1024xf32> -> vector<1x1024xf32>
    %179 = arith.addf %176, %178 : vector<1x1024xf32>
    %180 = vector.extract_strided_slice %179 {offsets = [0, 0], sizes = [1, 256], strides = [1, 1]} : vector<1x1024xf32> to vector<1x256xf32>
    %181 = arith.negf %180 : vector<1x256xf32>
    %182 = math.exp %181 : vector<1x256xf32>
    %cst_68 = arith.constant 1.000000e+00 : f32
    %183 = vector.broadcast %cst_68 : f32 to vector<1x256xf32>
    %184 = arith.addf %183, %182 : vector<1x256xf32>
    %185 = arith.divf %183, %184 : vector<1x256xf32>
    %186 = vector.extract_strided_slice %179 {offsets = [0, 256], sizes = [1, 256], strides = [1, 1]} : vector<1x1024xf32> to vector<1x256xf32>
    %187 = arith.negf %186 : vector<1x256xf32>
    %188 = math.exp %187 : vector<1x256xf32>
    %cst_69 = arith.constant 1.000000e+00 : f32
    %189 = vector.broadcast %cst_69 : f32 to vector<1x256xf32>
    %190 = arith.addf %189, %188 : vector<1x256xf32>
    %191 = arith.divf %189, %190 : vector<1x256xf32>
    %192 = vector.extract_strided_slice %179 {offsets = [0, 512], sizes = [1, 256], strides = [1, 1]} : vector<1x1024xf32> to vector<1x256xf32>
    %193 = math.tanh %192 : vector<1x256xf32>
    %194 = vector.extract_strided_slice %179 {offsets = [0, 768], sizes = [1, 256], strides = [1, 1]} : vector<1x1024xf32> to vector<1x256xf32>
    %195 = arith.negf %194 : vector<1x256xf32>
    %196 = math.exp %195 : vector<1x256xf32>
    %cst_70 = arith.constant 1.000000e+00 : f32
    %197 = vector.broadcast %cst_70 : f32 to vector<1x256xf32>
    %198 = arith.addf %197, %196 : vector<1x256xf32>
    %199 = arith.divf %197, %198 : vector<1x256xf32>
    %200 = arith.mulf %191, %172 : vector<1x256xf32>
    %201 = arith.mulf %185, %193 : vector<1x256xf32>
    %202 = arith.addf %200, %201 : vector<1x256xf32>
    %203 = math.tanh %202 : vector<1x256xf32>
    %204 = arith.mulf %199, %203 : vector<1x256xf32>
    %c8_i32_71 = arith.constant 8 : i32
    %205 = arith.muli %arg0, %c8_i32_71 : i32
    %206 = arith.addi %205, %c2_i32_63 : i32
    %c8_i32_72 = arith.constant 8 : i32
    %207 = arith.cmpi slt, %206, %c8_i32_72 : i32
    %208 = arith.extui %207 : i1 to i32
    %209 = arith.sitofp %208 : i32 to f32
    %210 = vector.broadcast %209 : f32 to vector<1x256xf32>
    %211 = arith.mulf %210, %204 : vector<1x256xf32>
    %cst_73 = arith.constant 1.000000e+00 : f32
    %212 = arith.subf %cst_73, %209 : f32
    %213 = vector.broadcast %212 : f32 to vector<1x256xf32>
    %214 = arith.mulf %213, %166 : vector<1x256xf32>
    %215 = arith.addf %211, %214 : vector<1x256xf32>
    %216 = vector.broadcast %209 : f32 to vector<1x256xf32>
    %217 = arith.mulf %216, %202 : vector<1x256xf32>
    %cst_74 = arith.constant 1.000000e+00 : f32
    %218 = arith.subf %cst_74, %209 : f32
    %219 = vector.broadcast %218 : f32 to vector<1x256xf32>
    %220 = arith.mulf %219, %172 : vector<1x256xf32>
    %221 = arith.addf %217, %220 : vector<1x256xf32>
    %222 = arith.index_cast %c2_i32_63 : i32 to index
    %c0_75 = arith.constant 0 : index
    %223 = vector.load %arg15[%222, %c0_75] : memref<8x256xf32, #tpu.memory_space<vmem>>, vector<1x256xf32>
    tpu.vector_store %arg15[%222, %c0_75], %215 {strides = array<i32>} : memref<8x256xf32, #tpu.memory_space<vmem>>, vector<1x256xf32>,
    %c3_i32_76 = arith.constant 3 : i32
    %224 = arith.index_cast %c3_i32_76 : i32 to index
    %c0_77 = arith.constant 0 : index
    %225 = vector.load %arg14[%224, %c0_77] : memref<8x1024xf32, #tpu.memory_space<vmem>>, vector<1x1024xf32>
    %c0_78 = arith.constant 0 : index
    %c0_79 = arith.constant 0 : index
    %226 = vector.load %arg6[%c0_78, %c0_79] : memref<256x1024xf32, #tpu.memory_space<vmem>>, vector<256x1024xf32>
    %cst_80 = arith.constant dense<0.000000e+00> : vector<1x1024xf32>
    %227 = tpu.matmul %215, %226, %cst_80 {dimension_numbers = #tpu.dot_dimension_numbers<[1], [0], [0], [1], [0, 0, 1, 1], [], []>} : vector<1x256xf32>, vector<256x1024xf32>, vector<1x1024xf32> -> vector<1x1024xf32>
    %228 = arith.addf %225, %227 : vector<1x1024xf32>
    %229 = vector.extract_strided_slice %228 {offsets = [0, 0], sizes = [1, 256], strides = [1, 1]} : vector<1x1024xf32> to vector<1x256xf32>
    %230 = arith.negf %229 : vector<1x256xf32>
    %231 = math.exp %230 : vector<1x256xf32>
    %cst_81 = arith.constant 1.000000e+00 : f32
    %232 = vector.broadcast %cst_81 : f32 to vector<1x256xf32>
    %233 = arith.addf %232, %231 : vector<1x256xf32>
    %234 = arith.divf %232, %233 : vector<1x256xf32>
    %235 = vector.extract_strided_slice %228 {offsets = [0, 256], sizes = [1, 256], strides = [1, 1]} : vector<1x1024xf32> to vector<1x256xf32>
    %236 = arith.negf %235 : vector<1x256xf32>
    %237 = math.exp %236 : vector<1x256xf32>
    %cst_82 = arith.constant 1.000000e+00 : f32
    %238 = vector.broadcast %cst_82 : f32 to vector<1x256xf32>
    %239 = arith.addf %238, %237 : vector<1x256xf32>
    %240 = arith.divf %238, %239 : vector<1x256xf32>
    %241 = vector.extract_strided_slice %228 {offsets = [0, 512], sizes = [1, 256], strides = [1, 1]} : vector<1x1024xf32> to vector<1x256xf32>
    %242 = math.tanh %241 : vector<1x256xf32>
    %243 = vector.extract_strided_slice %228 {offsets = [0, 768], sizes = [1, 256], strides = [1, 1]} : vector<1x1024xf32> to vector<1x256xf32>
    %244 = arith.negf %243 : vector<1x256xf32>
    %245 = math.exp %244 : vector<1x256xf32>
    %cst_83 = arith.constant 1.000000e+00 : f32
    %246 = vector.broadcast %cst_83 : f32 to vector<1x256xf32>
    %247 = arith.addf %246, %245 : vector<1x256xf32>
    %248 = arith.divf %246, %247 : vector<1x256xf32>
    %249 = arith.mulf %240, %221 : vector<1x256xf32>
    %250 = arith.mulf %234, %242 : vector<1x256xf32>
    %251 = arith.addf %249, %250 : vector<1x256xf32>
    %252 = math.tanh %251 : vector<1x256xf32>
    %253 = arith.mulf %248, %252 : vector<1x256xf32>
    %c8_i32_84 = arith.constant 8 : i32
    %254 = arith.muli %arg0, %c8_i32_84 : i32
    %255 = arith.addi %254, %c3_i32_76 : i32
    %c8_i32_85 = arith.constant 8 : i32
    %256 = arith.cmpi slt, %255, %c8_i32_85 : i32
    %257 = arith.extui %256 : i1 to i32
    %258 = arith.sitofp %257 : i32 to f32
    %259 = vector.broadcast %258 : f32 to vector<1x256xf32>
    %260 = arith.mulf %259, %253 : vector<1x256xf32>
    %cst_86 = arith.constant 1.000000e+00 : f32
    %261 = arith.subf %cst_86, %258 : f32
    %262 = vector.broadcast %261 : f32 to vector<1x256xf32>
    %263 = arith.mulf %262, %215 : vector<1x256xf32>
    %264 = arith.addf %260, %263 : vector<1x256xf32>
    %265 = vector.broadcast %258 : f32 to vector<1x256xf32>
    %266 = arith.mulf %265, %251 : vector<1x256xf32>
    %cst_87 = arith.constant 1.000000e+00 : f32
    %267 = arith.subf %cst_87, %258 : f32
    %268 = vector.broadcast %267 : f32 to vector<1x256xf32>
    %269 = arith.mulf %268, %221 : vector<1x256xf32>
    %270 = arith.addf %266, %269 : vector<1x256xf32>
    %271 = arith.index_cast %c3_i32_76 : i32 to index
    %c0_88 = arith.constant 0 : index
    %272 = vector.load %arg15[%271, %c0_88] : memref<8x256xf32, #tpu.memory_space<vmem>>, vector<1x256xf32>
    tpu.vector_store %arg15[%271, %c0_88], %264 {strides = array<i32>} : memref<8x256xf32, #tpu.memory_space<vmem>>, vector<1x256xf32>,
    %c4_i32_89 = arith.constant 4 : i32
    %273 = arith.index_cast %c4_i32_89 : i32 to index
    %c0_90 = arith.constant 0 : index
    %274 = vector.load %arg14[%273, %c0_90] : memref<8x1024xf32, #tpu.memory_space<vmem>>, vector<1x1024xf32>
    %c0_91 = arith.constant 0 : index
    %c0_92 = arith.constant 0 : index
    %275 = vector.load %arg6[%c0_91, %c0_92] : memref<256x1024xf32, #tpu.memory_space<vmem>>, vector<256x1024xf32>
    %cst_93 = arith.constant dense<0.000000e+00> : vector<1x1024xf32>
    %276 = tpu.matmul %264, %275, %cst_93 {dimension_numbers = #tpu.dot_dimension_numbers<[1], [0], [0], [1], [0, 0, 1, 1], [], []>} : vector<1x256xf32>, vector<256x1024xf32>, vector<1x1024xf32> -> vector<1x1024xf32>
    %277 = arith.addf %274, %276 : vector<1x1024xf32>
    %278 = vector.extract_strided_slice %277 {offsets = [0, 0], sizes = [1, 256], strides = [1, 1]} : vector<1x1024xf32> to vector<1x256xf32>
    %279 = arith.negf %278 : vector<1x256xf32>
    %280 = math.exp %279 : vector<1x256xf32>
    %cst_94 = arith.constant 1.000000e+00 : f32
    %281 = vector.broadcast %cst_94 : f32 to vector<1x256xf32>
    %282 = arith.addf %281, %280 : vector<1x256xf32>
    %283 = arith.divf %281, %282 : vector<1x256xf32>
    %284 = vector.extract_strided_slice %277 {offsets = [0, 256], sizes = [1, 256], strides = [1, 1]} : vector<1x1024xf32> to vector<1x256xf32>
    %285 = arith.negf %284 : vector<1x256xf32>
    %286 = math.exp %285 : vector<1x256xf32>
    %cst_95 = arith.constant 1.000000e+00 : f32
    %287 = vector.broadcast %cst_95 : f32 to vector<1x256xf32>
    %288 = arith.addf %287, %286 : vector<1x256xf32>
    %289 = arith.divf %287, %288 : vector<1x256xf32>
    %290 = vector.extract_strided_slice %277 {offsets = [0, 512], sizes = [1, 256], strides = [1, 1]} : vector<1x1024xf32> to vector<1x256xf32>
    %291 = math.tanh %290 : vector<1x256xf32>
    %292 = vector.extract_strided_slice %277 {offsets = [0, 768], sizes = [1, 256], strides = [1, 1]} : vector<1x1024xf32> to vector<1x256xf32>
    %293 = arith.negf %292 : vector<1x256xf32>
    %294 = math.exp %293 : vector<1x256xf32>
    %cst_96 = arith.constant 1.000000e+00 : f32
    %295 = vector.broadcast %cst_96 : f32 to vector<1x256xf32>
    %296 = arith.addf %295, %294 : vector<1x256xf32>
    %297 = arith.divf %295, %296 : vector<1x256xf32>
    %298 = arith.mulf %289, %270 : vector<1x256xf32>
    %299 = arith.mulf %283, %291 : vector<1x256xf32>
    %300 = arith.addf %298, %299 : vector<1x256xf32>
    %301 = math.tanh %300 : vector<1x256xf32>
    %302 = arith.mulf %297, %301 : vector<1x256xf32>
    %c8_i32_97 = arith.constant 8 : i32
    %303 = arith.muli %arg0, %c8_i32_97 : i32
    %304 = arith.addi %303, %c4_i32_89 : i32
    %c8_i32_98 = arith.constant 8 : i32
    %305 = arith.cmpi slt, %304, %c8_i32_98 : i32
    %306 = arith.extui %305 : i1 to i32
    %307 = arith.sitofp %306 : i32 to f32
    %308 = vector.broadcast %307 : f32 to vector<1x256xf32>
    %309 = arith.mulf %308, %302 : vector<1x256xf32>
    %cst_99 = arith.constant 1.000000e+00 : f32
    %310 = arith.subf %cst_99, %307 : f32
    %311 = vector.broadcast %310 : f32 to vector<1x256xf32>
    %312 = arith.mulf %311, %264 : vector<1x256xf32>
    %313 = arith.addf %309, %312 : vector<1x256xf32>
    %314 = vector.broadcast %307 : f32 to vector<1x256xf32>
    %315 = arith.mulf %314, %300 : vector<1x256xf32>
    %cst_100 = arith.constant 1.000000e+00 : f32
    %316 = arith.subf %cst_100, %307 : f32
    %317 = vector.broadcast %316 : f32 to vector<1x256xf32>
    %318 = arith.mulf %317, %270 : vector<1x256xf32>
    %319 = arith.addf %315, %318 : vector<1x256xf32>
    %320 = arith.index_cast %c4_i32_89 : i32 to index
    %c0_101 = arith.constant 0 : index
    %321 = vector.load %arg15[%320, %c0_101] : memref<8x256xf32, #tpu.memory_space<vmem>>, vector<1x256xf32>
    tpu.vector_store %arg15[%320, %c0_101], %313 {strides = array<i32>} : memref<8x256xf32, #tpu.memory_space<vmem>>, vector<1x256xf32>,
    %c5_i32_102 = arith.constant 5 : i32
    %322 = arith.index_cast %c5_i32_102 : i32 to index
    %c0_103 = arith.constant 0 : index
    %323 = vector.load %arg14[%322, %c0_103] : memref<8x1024xf32, #tpu.memory_space<vmem>>, vector<1x1024xf32>
    %c0_104 = arith.constant 0 : index
    %c0_105 = arith.constant 0 : index
    %324 = vector.load %arg6[%c0_104, %c0_105] : memref<256x1024xf32, #tpu.memory_space<vmem>>, vector<256x1024xf32>
    %cst_106 = arith.constant dense<0.000000e+00> : vector<1x1024xf32>
    %325 = tpu.matmul %313, %324, %cst_106 {dimension_numbers = #tpu.dot_dimension_numbers<[1], [0], [0], [1], [0, 0, 1, 1], [], []>} : vector<1x256xf32>, vector<256x1024xf32>, vector<1x1024xf32> -> vector<1x1024xf32>
    %326 = arith.addf %323, %325 : vector<1x1024xf32>
    %327 = vector.extract_strided_slice %326 {offsets = [0, 0], sizes = [1, 256], strides = [1, 1]} : vector<1x1024xf32> to vector<1x256xf32>
    %328 = arith.negf %327 : vector<1x256xf32>
    %329 = math.exp %328 : vector<1x256xf32>
    %cst_107 = arith.constant 1.000000e+00 : f32
    %330 = vector.broadcast %cst_107 : f32 to vector<1x256xf32>
    %331 = arith.addf %330, %329 : vector<1x256xf32>
    %332 = arith.divf %330, %331 : vector<1x256xf32>
    %333 = vector.extract_strided_slice %326 {offsets = [0, 256], sizes = [1, 256], strides = [1, 1]} : vector<1x1024xf32> to vector<1x256xf32>
    %334 = arith.negf %333 : vector<1x256xf32>
    %335 = math.exp %334 : vector<1x256xf32>
    %cst_108 = arith.constant 1.000000e+00 : f32
    %336 = vector.broadcast %cst_108 : f32 to vector<1x256xf32>
    %337 = arith.addf %336, %335 : vector<1x256xf32>
    %338 = arith.divf %336, %337 : vector<1x256xf32>
    %339 = vector.extract_strided_slice %326 {offsets = [0, 512], sizes = [1, 256], strides = [1, 1]} : vector<1x1024xf32> to vector<1x256xf32>
    %340 = math.tanh %339 : vector<1x256xf32>
    %341 = vector.extract_strided_slice %326 {offsets = [0, 768], sizes = [1, 256], strides = [1, 1]} : vector<1x1024xf32> to vector<1x256xf32>
    %342 = arith.negf %341 : vector<1x256xf32>
    %343 = math.exp %342 : vector<1x256xf32>
    %cst_109 = arith.constant 1.000000e+00 : f32
    %344 = vector.broadcast %cst_109 : f32 to vector<1x256xf32>
    %345 = arith.addf %344, %343 : vector<1x256xf32>
    %346 = arith.divf %344, %345 : vector<1x256xf32>
    %347 = arith.mulf %338, %319 : vector<1x256xf32>
    %348 = arith.mulf %332, %340 : vector<1x256xf32>
    %349 = arith.addf %347, %348 : vector<1x256xf32>
    %350 = math.tanh %349 : vector<1x256xf32>
    %351 = arith.mulf %346, %350 : vector<1x256xf32>
    %c8_i32_110 = arith.constant 8 : i32
    %352 = arith.muli %arg0, %c8_i32_110 : i32
    %353 = arith.addi %352, %c5_i32_102 : i32
    %c8_i32_111 = arith.constant 8 : i32
    %354 = arith.cmpi slt, %353, %c8_i32_111 : i32
    %355 = arith.extui %354 : i1 to i32
    %356 = arith.sitofp %355 : i32 to f32
    %357 = vector.broadcast %356 : f32 to vector<1x256xf32>
    %358 = arith.mulf %357, %351 : vector<1x256xf32>
    %cst_112 = arith.constant 1.000000e+00 : f32
    %359 = arith.subf %cst_112, %356 : f32
    %360 = vector.broadcast %359 : f32 to vector<1x256xf32>
    %361 = arith.mulf %360, %313 : vector<1x256xf32>
    %362 = arith.addf %358, %361 : vector<1x256xf32>
    %363 = vector.broadcast %356 : f32 to vector<1x256xf32>
    %364 = arith.mulf %363, %349 : vector<1x256xf32>
    %cst_113 = arith.constant 1.000000e+00 : f32
    %365 = arith.subf %cst_113, %356 : f32
    %366 = vector.broadcast %365 : f32 to vector<1x256xf32>
    %367 = arith.mulf %366, %319 : vector<1x256xf32>
    %368 = arith.addf %364, %367 : vector<1x256xf32>
    %369 = arith.index_cast %c5_i32_102 : i32 to index
    %c0_114 = arith.constant 0 : index
    %370 = vector.load %arg15[%369, %c0_114] : memref<8x256xf32, #tpu.memory_space<vmem>>, vector<1x256xf32>
    tpu.vector_store %arg15[%369, %c0_114], %362 {strides = array<i32>} : memref<8x256xf32, #tpu.memory_space<vmem>>, vector<1x256xf32>,
    %c6_i32_115 = arith.constant 6 : i32
    %371 = arith.index_cast %c6_i32_115 : i32 to index
    %c0_116 = arith.constant 0 : index
    %372 = vector.load %arg14[%371, %c0_116] : memref<8x1024xf32, #tpu.memory_space<vmem>>, vector<1x1024xf32>
    %c0_117 = arith.constant 0 : index
    %c0_118 = arith.constant 0 : index
    %373 = vector.load %arg6[%c0_117, %c0_118] : memref<256x1024xf32, #tpu.memory_space<vmem>>, vector<256x1024xf32>
    %cst_119 = arith.constant dense<0.000000e+00> : vector<1x1024xf32>
    %374 = tpu.matmul %362, %373, %cst_119 {dimension_numbers = #tpu.dot_dimension_numbers<[1], [0], [0], [1], [0, 0, 1, 1], [], []>} : vector<1x256xf32>, vector<256x1024xf32>, vector<1x1024xf32> -> vector<1x1024xf32>
    %375 = arith.addf %372, %374 : vector<1x1024xf32>
    %376 = vector.extract_strided_slice %375 {offsets = [0, 0], sizes = [1, 256], strides = [1, 1]} : vector<1x1024xf32> to vector<1x256xf32>
    %377 = arith.negf %376 : vector<1x256xf32>
    %378 = math.exp %377 : vector<1x256xf32>
    %cst_120 = arith.constant 1.000000e+00 : f32
    %379 = vector.broadcast %cst_120 : f32 to vector<1x256xf32>
    %380 = arith.addf %379, %378 : vector<1x256xf32>
    %381 = arith.divf %379, %380 : vector<1x256xf32>
    %382 = vector.extract_strided_slice %375 {offsets = [0, 256], sizes = [1, 256], strides = [1, 1]} : vector<1x1024xf32> to vector<1x256xf32>
    %383 = arith.negf %382 : vector<1x256xf32>
    %384 = math.exp %383 : vector<1x256xf32>
    %cst_121 = arith.constant 1.000000e+00 : f32
    %385 = vector.broadcast %cst_121 : f32 to vector<1x256xf32>
    %386 = arith.addf %385, %384 : vector<1x256xf32>
    %387 = arith.divf %385, %386 : vector<1x256xf32>
    %388 = vector.extract_strided_slice %375 {offsets = [0, 512], sizes = [1, 256], strides = [1, 1]} : vector<1x1024xf32> to vector<1x256xf32>
    %389 = math.tanh %388 : vector<1x256xf32>
    %390 = vector.extract_strided_slice %375 {offsets = [0, 768], sizes = [1, 256], strides = [1, 1]} : vector<1x1024xf32> to vector<1x256xf32>
    %391 = arith.negf %390 : vector<1x256xf32>
    %392 = math.exp %391 : vector<1x256xf32>
    %cst_122 = arith.constant 1.000000e+00 : f32
    %393 = vector.broadcast %cst_122 : f32 to vector<1x256xf32>
    %394 = arith.addf %393, %392 : vector<1x256xf32>
    %395 = arith.divf %393, %394 : vector<1x256xf32>
    %396 = arith.mulf %387, %368 : vector<1x256xf32>
    %397 = arith.mulf %381, %389 : vector<1x256xf32>
    %398 = arith.addf %396, %397 : vector<1x256xf32>
    %399 = math.tanh %398 : vector<1x256xf32>
    %400 = arith.mulf %395, %399 : vector<1x256xf32>
    %c8_i32_123 = arith.constant 8 : i32
    %401 = arith.muli %arg0, %c8_i32_123 : i32
    %402 = arith.addi %401, %c6_i32_115 : i32
    %c8_i32_124 = arith.constant 8 : i32
    %403 = arith.cmpi slt, %402, %c8_i32_124 : i32
    %404 = arith.extui %403 : i1 to i32
    %405 = arith.sitofp %404 : i32 to f32
    %406 = vector.broadcast %405 : f32 to vector<1x256xf32>
    %407 = arith.mulf %406, %400 : vector<1x256xf32>
    %cst_125 = arith.constant 1.000000e+00 : f32
    %408 = arith.subf %cst_125, %405 : f32
    %409 = vector.broadcast %408 : f32 to vector<1x256xf32>
    %410 = arith.mulf %409, %362 : vector<1x256xf32>
    %411 = arith.addf %407, %410 : vector<1x256xf32>
    %412 = vector.broadcast %405 : f32 to vector<1x256xf32>
    %413 = arith.mulf %412, %398 : vector<1x256xf32>
    %cst_126 = arith.constant 1.000000e+00 : f32
    %414 = arith.subf %cst_126, %405 : f32
    %415 = vector.broadcast %414 : f32 to vector<1x256xf32>
    %416 = arith.mulf %415, %368 : vector<1x256xf32>
    %417 = arith.addf %413, %416 : vector<1x256xf32>
    %418 = arith.index_cast %c6_i32_115 : i32 to index
    %c0_127 = arith.constant 0 : index
    %419 = vector.load %arg15[%418, %c0_127] : memref<8x256xf32, #tpu.memory_space<vmem>>, vector<1x256xf32>
    tpu.vector_store %arg15[%418, %c0_127], %411 {strides = array<i32>} : memref<8x256xf32, #tpu.memory_space<vmem>>, vector<1x256xf32>,
    %c7_i32_128 = arith.constant 7 : i32
    %420 = arith.index_cast %c7_i32_128 : i32 to index
    %c0_129 = arith.constant 0 : index
    %421 = vector.load %arg14[%420, %c0_129] : memref<8x1024xf32, #tpu.memory_space<vmem>>, vector<1x1024xf32>
    %c0_130 = arith.constant 0 : index
    %c0_131 = arith.constant 0 : index
    %422 = vector.load %arg6[%c0_130, %c0_131] : memref<256x1024xf32, #tpu.memory_space<vmem>>, vector<256x1024xf32>
    %cst_132 = arith.constant dense<0.000000e+00> : vector<1x1024xf32>
    %423 = tpu.matmul %411, %422, %cst_132 {dimension_numbers = #tpu.dot_dimension_numbers<[1], [0], [0], [1], [0, 0, 1, 1], [], []>} : vector<1x256xf32>, vector<256x1024xf32>, vector<1x1024xf32> -> vector<1x1024xf32>
    %424 = arith.addf %421, %423 : vector<1x1024xf32>
    %425 = vector.extract_strided_slice %424 {offsets = [0, 0], sizes = [1, 256], strides = [1, 1]} : vector<1x1024xf32> to vector<1x256xf32>
    %426 = arith.negf %425 : vector<1x256xf32>
    %427 = math.exp %426 : vector<1x256xf32>
    %cst_133 = arith.constant 1.000000e+00 : f32
    %428 = vector.broadcast %cst_133 : f32 to vector<1x256xf32>
    %429 = arith.addf %428, %427 : vector<1x256xf32>
    %430 = arith.divf %428, %429 : vector<1x256xf32>
    %431 = vector.extract_strided_slice %424 {offsets = [0, 256], sizes = [1, 256], strides = [1, 1]} : vector<1x1024xf32> to vector<1x256xf32>
    %432 = arith.negf %431 : vector<1x256xf32>
    %433 = math.exp %432 : vector<1x256xf32>
    %cst_134 = arith.constant 1.000000e+00 : f32
    %434 = vector.broadcast %cst_134 : f32 to vector<1x256xf32>
    %435 = arith.addf %434, %433 : vector<1x256xf32>
    %436 = arith.divf %434, %435 : vector<1x256xf32>
    %437 = vector.extract_strided_slice %424 {offsets = [0, 512], sizes = [1, 256], strides = [1, 1]} : vector<1x1024xf32> to vector<1x256xf32>
    %438 = math.tanh %437 : vector<1x256xf32>
    %439 = vector.extract_strided_slice %424 {offsets = [0, 768], sizes = [1, 256], strides = [1, 1]} : vector<1x1024xf32> to vector<1x256xf32>
    %440 = arith.negf %439 : vector<1x256xf32>
    %441 = math.exp %440 : vector<1x256xf32>
    %cst_135 = arith.constant 1.000000e+00 : f32
    %442 = vector.broadcast %cst_135 : f32 to vector<1x256xf32>
    %443 = arith.addf %442, %441 : vector<1x256xf32>
    %444 = arith.divf %442, %443 : vector<1x256xf32>
    %445 = arith.mulf %436, %417 : vector<1x256xf32>
    %446 = arith.mulf %430, %438 : vector<1x256xf32>
    %447 = arith.addf %445, %446 : vector<1x256xf32>
    %448 = math.tanh %447 : vector<1x256xf32>
    %449 = arith.mulf %444, %448 : vector<1x256xf32>
    %c8_i32_136 = arith.constant 8 : i32
    %450 = arith.muli %arg0, %c8_i32_136 : i32
    %451 = arith.addi %450, %c7_i32_128 : i32
    %c8_i32_137 = arith.constant 8 : i32
    %452 = arith.cmpi slt, %451, %c8_i32_137 : i32
    %453 = arith.extui %452 : i1 to i32
    %454 = arith.sitofp %453 : i32 to f32
    %455 = vector.broadcast %454 : f32 to vector<1x256xf32>
    %456 = arith.mulf %455, %449 : vector<1x256xf32>
    %cst_138 = arith.constant 1.000000e+00 : f32
    %457 = arith.subf %cst_138, %454 : f32
    %458 = vector.broadcast %457 : f32 to vector<1x256xf32>
    %459 = arith.mulf %458, %411 : vector<1x256xf32>
    %460 = arith.addf %456, %459 : vector<1x256xf32>
    %461 = vector.broadcast %454 : f32 to vector<1x256xf32>
    %462 = arith.mulf %461, %447 : vector<1x256xf32>
    %cst_139 = arith.constant 1.000000e+00 : f32
    %463 = arith.subf %cst_139, %454 : f32
    %464 = vector.broadcast %463 : f32 to vector<1x256xf32>
    %465 = arith.mulf %464, %417 : vector<1x256xf32>
    %466 = arith.addf %462, %465 : vector<1x256xf32>
    %467 = arith.index_cast %c7_i32_128 : i32 to index
    %c0_140 = arith.constant 0 : index
    %468 = vector.load %arg15[%467, %c0_140] : memref<8x256xf32, #tpu.memory_space<vmem>>, vector<1x256xf32>
    tpu.vector_store %arg15[%467, %c0_140], %460 {strides = array<i32>} : memref<8x256xf32, #tpu.memory_space<vmem>>, vector<1x256xf32>,
    %c8_i32_141 = arith.constant 8 : i32
    %c0_142 = arith.constant 0 : index
    %c0_143 = arith.constant 0 : index
    %469 = vector.load %arg16[%c0_142, %c0_143] : memref<1x256xf32, #tpu.memory_space<vmem>>, vector<1x256xf32>
    tpu.vector_store %arg16[%c0_142, %c0_143], %460 {strides = array<i32>} : memref<1x256xf32, #tpu.memory_space<vmem>>, vector<1x256xf32>,
    %c0_144 = arith.constant 0 : index
    %c0_145 = arith.constant 0 : index
    %470 = vector.load %arg17[%c0_144, %c0_145] : memref<1x256xf32, #tpu.memory_space<vmem>>, vector<1x256xf32>
    tpu.vector_store %arg17[%c0_144, %c0_145], %466 {strides = array<i32>} : memref<1x256xf32, #tpu.memory_space<vmem>>, vector<1x256xf32>,
    %c0_146 = arith.constant 0 : index
    %c0_147 = arith.constant 0 : index
    %471 = vector.load %arg15[%c0_146, %c0_147] : memref<8x256xf32, #tpu.memory_space<vmem>>, vector<8x256xf32>
    %472 = arith.truncf %471 : vector<8x256xf32> to vector<8x256xbf16>
    %c0_148 = arith.constant 0 : index
    %c0_149 = arith.constant 0 : index
    %473 = vector.load %arg8[%c0_148, %c0_149] : memref<256x128xbf16, #tpu.memory_space<vmem>>, vector<256x128xbf16>
    %cst_150 = arith.constant dense<0.000000e+00> : vector<8x128xf32>
    %474 = tpu.matmul %472, %473, %cst_150 {dimension_numbers = #tpu.dot_dimension_numbers<[1], [0], [0], [1], [0, 0, 1, 1], [], []>} : vector<8x256xbf16>, vector<256x128xbf16>, vector<8x128xf32> -> vector<8x128xf32>
    %c0_151 = arith.constant 0 : index
    %c0_152 = arith.constant 0 : index
    %475 = vector.load %arg9[%c0_151, %c0_152] : memref<1x128xf32, #tpu.memory_space<vmem>>, vector<1x128xf32>
    %476 = vector.broadcast %475 : vector<1x128xf32> to vector<8x128xf32>
    %477 = arith.addf %474, %476 : vector<8x128xf32>
    %c0_153 = arith.constant 0 : index
    %c0_154 = arith.constant 0 : index
    %478 = vector.load %arg10[%c0_153, %c0_154] : memref<8x128xf32, #tpu.memory_space<vmem>>, vector<8x128xf32>
    tpu.vector_store %arg10[%c0_153, %c0_154], %477 {strides = array<i32>} : memref<8x128xf32, #tpu.memory_space<vmem>>, vector<8x128xf32>,
    %c0_155 = arith.constant 0 : index
    %c0_156 = arith.constant 0 : index
    %479 = vector.load %arg11[%c0_155, %c0_156] : memref<1x256xf32, #tpu.memory_space<vmem>>, vector<1x256xf32>
    tpu.vector_store %arg11[%c0_155, %c0_156], %460 {strides = array<i32>} : memref<1x256xf32, #tpu.memory_space<vmem>>, vector<1x256xf32>,
    %c0_157 = arith.constant 0 : index
    %c0_158 = arith.constant 0 : index
    %480 = vector.load %arg12[%c0_157, %c0_158] : memref<1x256xf32, #tpu.memory_space<vmem>>, vector<1x256xf32>
    tpu.vector_store %arg12[%c0_157, %c0_158], %466 {strides = array<i32>} : memref<1x256xf32, #tpu.memory_space<vmem>>, vector<1x256xf32>,
    return
  }
  func.func @transform_0(%arg0: i32, %arg1: memref<8xi32, #tpu.memory_space<smem>>) -> (i32, i32) {
    %c0_i32 = arith.constant 0 : i32
    %c0_i32_0 = arith.constant 0 : i32
    %c0_i32_1 = arith.constant 0 : i32
    return %c0_i32, %c0_i32_0 : i32, i32
  }
  func.func @transform_1(%arg0: i32, %arg1: memref<8xi32, #tpu.memory_space<smem>>) -> (i32, i32) {
    %c0_i32 = arith.constant 0 : i32
    %c0_i32_0 = arith.constant 0 : i32
    %c0_i32_1 = arith.constant 0 : i32
    return %c0_i32, %c0_i32_0 : i32, i32
  }
  func.func @transform_2(%arg0: i32, %arg1: memref<8xi32, #tpu.memory_space<smem>>) -> (i32, i32) {
    %c0_i32 = arith.constant 0 : i32
    %c0_i32_0 = arith.constant 0 : i32
    %c0_i32_1 = arith.constant 0 : i32
    return %c0_i32, %c0_i32_0 : i32, i32
  }
  func.func @transform_3(%arg0: i32, %arg1: memref<8xi32, #tpu.memory_space<smem>>) -> (i32, i32) {
    %c0_i32 = arith.constant 0 : i32
    %c0_i32_0 = arith.constant 0 : i32
    %c0_i32_1 = arith.constant 0 : i32
    return %c0_i32, %c0_i32_0 : i32, i32
  }
  func.func @transform_4(%arg0: i32, %arg1: memref<8xi32, #tpu.memory_space<smem>>) -> (i32, i32) {
    %c0_i32 = arith.constant 0 : i32
    %c0_i32_0 = arith.constant 0 : i32
    %c0_i32_1 = arith.constant 0 : i32
    return %c0_i32, %c0_i32_0 : i32, i32
  }
  func.func @transform_5(%arg0: i32, %arg1: memref<8xi32, #tpu.memory_space<smem>>) -> (i32, i32) {
    %c0_i32 = arith.constant 0 : i32
    %c0_i32_0 = arith.constant 0 : i32
    %c0_i32_1 = arith.constant 0 : i32
    return %c0_i32, %c0_i32_0 : i32, i32
  }
  func.func @transform_6(%arg0: i32, %arg1: memref<8xi32, #tpu.memory_space<smem>>) -> (i32, i32) {
    %c0_i32 = arith.constant 0 : i32
    %c0_i32_0 = arith.constant 0 : i32
    %c0_i32_1 = arith.constant 0 : i32
    return %c0_i32, %c0_i32_0 : i32, i32
  }
  func.func @transform_7(%arg0: i32, %arg1: memref<8xi32, #tpu.memory_space<smem>>) -> (i32, i32) {
    %c0_i32 = arith.constant 0 : i32
    %c0_i32_0 = arith.constant 0 : i32
    %c0_i32_1 = arith.constant 0 : i32
    return %c0_i32, %c0_i32_0 : i32, i32
  }
  func.func @transform_8(%arg0: i32, %arg1: memref<8xi32, #tpu.memory_space<smem>>) -> (i32, i32) {
    %c0_i32 = arith.constant 0 : i32
    %c0_i32_0 = arith.constant 0 : i32
    return %arg0, %c0_i32 : i32, i32
  }
  func.func @transform_9(%arg0: i32, %arg1: memref<8xi32, #tpu.memory_space<smem>>) -> (i32, i32) {
    %c0_i32 = arith.constant 0 : i32
    %c0_i32_0 = arith.constant 0 : i32
    %c0_i32_1 = arith.constant 0 : i32
    return %c0_i32, %c0_i32_0 : i32, i32
  }
  func.func @transform_10(%arg0: i32, %arg1: memref<8xi32, #tpu.memory_space<smem>>) -> (i32, i32) {
    %c0_i32 = arith.constant 0 : i32
    %c0_i32_0 = arith.constant 0 : i32
    %c0_i32_1 = arith.constant 0 : i32
    return %c0_i32, %c0_i32_0 : i32, i32
  }
}

</mosaic_0001>

<bundles_post_ra>
// kernel: tpu_custom_call.1
= control target key start
LH: loop header
LB: loop body
LE: loop exit
PB: predicated region body
PF: predicated region fallthrough
CT: control target
= control target key end

     0   :  { %s9885_s0 = inlined_call_operand.hbm [shape: s32[8], index: 0, kind: input, shape index: {}]   ;;  %s9886_s1 = inlined_call_operand.hbm [shape: f32[28,256], index: 1, kind: input, shape index: {}]   ;;  %s9887_s2 = inlined_call_operand.vmem [shape: f32[1,256], index: 2, kind: input, shape index: {}]   ;;  %s9888_s3 = inlined_call_operand.vmem [shape: f32[1,256], index: 3, kind: input, shape index: {}]   ;;  %s9889_s4 = inlined_call_operand.hbm [shape: bf16[256,1024], index: 4, kind: input, shape index: {}]   ;;  %s9890_s5 = inlined_call_operand.hbm [shape: f32[256,1024], index: 5, kind: input, shape index: {}]   ;;  %s9891_s6 = inlined_call_operand.vmem [shape: f32[1,1024], index: 6, kind: input, shape index: {}]   ;;  %s9892_s7 = inlined_call_operand.hbm [shape: bf16[256,128], index: 7, kind: input, shape index: {}]   ;;  %s9893_s8 = inlined_call_operand.vmem [shape: f32[1,128], index: 8, kind: input, shape index: {}]   ;;  %s9894_s9 = inlined_call_operand.hbm [shape: f32[8,128], index: 9, kind: output, shape index: {0}]   ;;  %s9895_s10 = inlined_call_operand.hbm [shape: f32[1,256], index: 10, kind: output, shape index: {1}]   ;;  %s9896_s11 = inlined_call_operand.hbm [shape: f32[1,256], index: 11, kind: output, shape index: {2}]  }
   0x1   :  { %s9172_s19 = scalar_lea.hbm %s9885_s0, 16 }
   0x2   :  { %p9173_p0 = scmp.ne.s32.totalorder %s9885_s0, %s9172_s19  ;;  %p9176_p1 = scmp.lt.u32.totalorder %s9172_s19, %s9885_s0 }
   0x4   :  { %p9178_p2 = pnand %p9176_p1, %p9173_p0 }
   0x6   :  { %9181 = shalt.err (!%p9178_p2)  }
   0x7   :  { %s9348_s24 = smov [#allocation8]  }
   0x8   :  { %18 = dma.hbm_to_smem %s9885_s0, 16, %s9348_s24, [#allocation7] }
   0x9   :  { %9336 = dma.done.wait [#allocation7], 16 }
   0xa   :  { %9337 = vsyncadd [#allocation7], 4294967280 }
   0xb   :  { %20 = sfence }
   0xc   :  { %21 = vsyncpa [#allocation10], 0 }
   0xd   :  { %22 = vsyncpa [#allocation13], 0 }
   0xe   :  { %23 = vsyncpa [#allocation16], 0 }
   0xf   :  { %24 = vsyncpa [#allocation11], 0 }
  0x10   :  { %25 = vsyncpa [#allocation19], 0  ;;  %s9349_s27 = smov [#allocation12]   ;;  %s9182_s12 = scalar_lea.hbm %s9889_s4, 16384 }
  0x11   :  { %s47_s28 = sshll.u32 %s9349_s27, 4  ;;  %p9183_p3 = scmp.ne.s32.totalorder %s9889_s4, %s9182_s12  ;;  %s48_s28 = int_to_ptr.vmem [resolvable:$true] %s47_s28 }
  0x12   :  { %p9186_p4 = scmp.lt.u32.totalorder %s9182_s12, %s9889_s4 }
  0x14   :  { %p9188_p5 = pnand %p9186_p4, %p9183_p3 }
  0x16   :  { %9191 = shalt.err (!%p9188_p5)
}
  0x17   :  { %s9192_s16 = scalar_lea.vmem %s48_s28, 16384  ;;  %p9197_p7 = scmp.lt.s32.totalorder %s48_s28, %s48_s28 }
  0x18   :  { %p9193_p6 = scmp.ne.s32.totalorder %s48_s28, %s9192_s16  ;;  %p9198_p8 = scmp.lt.s32.totalorder %s9192_s16, %s9192_s16 }
  0x1a   :  { %p9199_p9 = por %p9198_p8, %p9197_p7 }
  0x1c   :  { %p9200_p10 = pnand %p9199_p9, %p9193_p6 }
  0x1e   :  { %9203 = shalt.err (!%p9200_p10)
}
  0x1f   :  { %s9350_s17 = smov 512   ;;  %s9351_s18 = smov 32  }
  0x20   :  { %53 = dma.hbm_to_vmem [thread:$0]  %s9889_s4, 16384, %s48_s28, [#allocation13], %s9350_s17, %s9350_s17, %s9351_s18  }
  0x21   :  { %s9352_s21 = smov [#allocation9]   ;;  %s9204_s25 = scalar_lea.hbm %s9886_s1, 1024 }
  0x22   :  { %s31_s22 = sshll.u32 %s9352_s21, 4  ;;  %p9205_p11 = scmp.ne.s32.totalorder %s9886_s1, %s9204_s25  ;;  %s32_s22 = int_to_ptr.vmem [resolvable:$true] %s31_s22 }
  0x23   :  { %p9208_p12 = scmp.lt.u32.totalorder %s9204_s25, %s9886_s1 }
  0x25   :  { %p9210_p13 = pnand %p9208_p12, %p9205_p11 }
  0x27   :  { %9213 = shalt.err (!%p9210_p13)
}
  0x28   :  { %s9214_s12 = scalar_lea.vmem %s32_s22, 1024  ;;  %p9219_p1 = scmp.lt.s32.totalorder %s32_s22, %s32_s22 }
  0x29   :  { %p9215_p0 = scmp.ne.s32.totalorder %s32_s22, %s9214_s12  ;;  %p9220_p2 = scmp.lt.s32.totalorder %s9214_s12, %s9214_s12 }
  0x2b   :  { %p9221_p3 = por %p9220_p2, %p9219_p1 }
  0x2d   :  { %p9222_p4 = pnand %p9221_p3, %p9215_p0 }
  0x2f   :  { %9225 = shalt.err (!%p9222_p4)
}
  0x30   :  { %s9353_s4 = smov 256   ;;  %s9354_s28 = smov 16  }
  0x31   :  { %37 = dma.hbm_to_vmem [thread:$0]  %s9886_s1, 1024, %s32_s22, [#allocation10], %s9353_s4, %s9353_s4, %s9354_s28  }
  0x32   :  { %s9355_s0 = smov [#allocation14]   ;;  %s9226_s18 = scalar_lea.hbm %s9890_s5, 32768 }
  0x33   :  { %s59_s15 = sshll.u32 %s9355_s0, 4  ;;  %p9227_p5 = scmp.ne.s32.totalorder %s9890_s5, %s9226_s18  ;;  %s60_s15 = int_to_ptr.vmem [resolvable:$true] %s59_s15 }
  0x34   :  { %p9230_p6 = scmp.lt.u32.totalorder %s9226_s18, %s9890_s5 }
  0x36   :  { %p9232_p7 = pnand %p9230_p6, %p9227_p5 }
  0x38   :  { %9235 = shalt.err (!%p9232_p7)
}
  0x39   :  { %s9236_s24 = scalar_lea.vmem %s60_s15, 32768  ;;  %p9241_p9 = scmp.lt.s32.totalorder %s60_s15, %s60_s15 }
  0x3a   :  { %p9237_p8 = scmp.ne.s32.totalorder %s60_s15, %s9236_s24  ;;  %p9242_p10 = scmp.lt.s32.totalorder %s9236_s24, %s9236_s24 }
  0x3c   :  { %p9243_p11 = por %p9242_p10, %p9241_p9 }
  0x3e   :  { %p9244_p12 = pnand %p9243_p11, %p9237_p8 }
  0x40   :  { %9247 = shalt.err (!%p9244_p12)
}
  0x41   :  { %s9356_s1 = smov 1024   ;;  %s9357_s22 = smov 64  }
  0x42   :  { %65 = dma.hbm_to_vmem [thread:$0]  %s9890_s5, 32768, %s60_s15, [#allocation13], %s9356_s1, %s9356_s1, %s9357_s22  }
  0x43   :  { %s9358_s27 = smov [#allocation15]   ;;  %s9248_s4 = scalar_lea.hbm %s9892_s7, 2048 }
  0x44   :  { %s73_s29 = sshll.u32 %s9358_s27, 4  ;;  %p9249_p13 = scmp.ne.s32.totalorder %s9892_s7, %s9248_s4  ;;  %s74_s29 = int_to_ptr.vmem [resolvable:$true] %s73_s29 }
  0x45   :  { %p9252_p0 = scmp.lt.u32.totalorder %s9248_s4, %s9892_s7 }
  0x47   :  { %p9254_p1 = pnand %p9252_p0, %p9249_p13 }
  0x49   :  { %9257 = shalt.err (!%p9254_p1)
}
  0x4a   :  { %s9258_s16 = scalar_lea.vmem %s74_s29, 2048  ;;  %p9263_p3 = scmp.lt.s32.totalorder %s74_s29, %s74_s29 }
  0x4b   :  { %p9259_p2 = scmp.ne.s32.totalorder %s74_s29, %s9258_s16  ;;  %p9264_p4 = scmp.lt.s32.totalorder %s9258_s16, %s9258_s16 }
  0x4d   :  { %p9265_p5 = por %p9264_p4, %p9263_p3 }
  0x4f   :  { %p9266_p6 = pnand %p9265_p5, %p9259_p2 }
  0x51   :  { %9269 = shalt.err (!%p9266_p6)
}
  0x52   :  { %s9359_s5 = smov 4  }
  0x53   :  { %79 = dma.hbm_to_vmem [thread:$0]  %s9892_s7, 2048, %s74_s29, [#allocation16], %s9357_s22, %s9357_s22, %s9359_s5  }
  0x54   :  { %9338 = dma.done.wait [#allocation10], 1024  }
  0x55   :  { %9339 = vsyncadd [#allocation10], 4294966272 }
  0x56   :  { %9340 = dma.done.wait [#allocation13], 49152  }
  0x57   :  { %9341 = vsyncadd [#allocation13], 4294918144 }
  0x58   :  { %9342 = dma.done.wait [#allocation16], 2048  }
  0x59   :  { %9343 = vsyncadd [#allocation16], 4294965248  ;;  %s9484_s18 = sld [smem:[#allocation8]]  ;;  %s9486_s19 = sld [smem:[#allocation8 + $0x1]]  ;;  %v226_v0 = vld [vmem:[#allocation12] sm:$0xff]  ;;  %v227_v2 = vld [vmem:[#allocation12 + $0x8] sm:$0xff]  ;;  %v100_v42 = vlaneseq }
  0x5a   :  { %s9488_s20 = sld [smem:[#allocation8 + $0x2]]  ;;  %s9490_s21 = sld [smem:[#allocation8 + $0x3]]  ;;  %v230_v1 = vld [vmem:[#allocation12 + $0x20] sm:$0xff]  ;;  %v231_v4 = vld [vmem:[#allocation12 + $0x28] sm:$0xff] }
  0x5b   :  { %s9493_s23 = sld [smem:[#allocation8 + $0x4]]  ;;  %v6764_v3 = vcombine.high %v226_v0, %v230_v1  ;;  %v6763_v5 = vcombine.low %v226_v0, %v230_v1  ;;  %v234_v6 = vld [vmem:[#allocation12 + $0x40] sm:$0xff]  ;;  %s9496_s1 = sld [smem:[#allocation8 + $0x5]]  ;;  %v6766_v8 = vcombine.high %v227_v2, %v231_v4  ;;  %v6765_v9 = vcombine.low %v227_v2, %v231_v4  ;;  %v235_v11 = vld [vmem:[#allocation12 + $0x48] sm:$0xff] }
  0x5c   :  { %v238_v7 = vld [vmem:[#allocation12 + $0x60] sm:$0xff]  ;;  %v239_v12 = vld [vmem:[#allocation12 + $0x68] sm:$0xff]  ;;  %s9501_s30 = sld [smem:[#allocation8 + $0x6]]  ;;  %s9509_s0 = sld [smem:[#allocation8 + $0x7]]  ;;  %vm9531_vm0 = vcmp.lt.s32.totalorder %v100_v42, 256 }
  0x5d   :  { %v6772_v10 = vcombine.high %v234_v6, %v238_v7  ;;  %v242_v13 = vld [vmem:[#allocation12 + $0x80] sm:$0xff]  ;;  %1036 = vmatprep.subr.bf16.mxu0 %v6764_v3  ;;  %v6774_v14 = vcombine.high %v235_v11, %v239_v12  ;;  %v243_v16 = vld [vmem:[#allocation12 + $0x88] sm:$0xff]  ;;  %1077 = vmatprep.subr.bf16.mxu1 %v6766_v8  ;;  %v6771_v18 = vcombine.low %v234_v6, %v238_v7 }
  0x5e   :  { %v246_v15 = vld [vmem:[#allocation12 + $0xa0] sm:$0xff]  ;;  %v247_v17 = vld [vmem:[#allocation12 + $0xa8] sm:$0xff]  ;;  %1037 = vmatpush1.bf16.msra.mxu0 %v6763_v5  ;;  %1078 = vmatpush1.bf16.msra.mxu1 %v6765_v9  ;;  %v6773_v19 = vcombine.low %v235_v11, %v239_v12 }
  0x5f   :  { %s109_s7 = sshra.s32 %s9484_s18, 3  ;;  %s126_s24 = sshra.s32 %s9486_s19, 3  ;;  %1038 = vmatprep.subr.bf16.mxu0 %v6772_v10  ;;  %v6780_v20 = vcombine.high %v242_v13, %v246_v15  ;;  %1079 = vmatprep.subr.bf16.mxu1 %v6774_v14  ;;  %v6782_v21 = vcombine.high %v243_v16, %v247_v17  ;;  %v250_v22 = vld [vmem:[#allocation12 + $0xc0] sm:$0xff]  ;;  %v251_v24 = vld [vmem:[#allocation12 + $0xc8] sm:$0xff]  ;;  %v6779_v26 = vcombine.low %v242_v13, %v246_v15 }
  0x60   :  { %s112_s22 = sand.u32 7, %s9484_s18  ;;  %s6932_s25 = sshll.u32 %s109_s7, 4  ;;  %v254_v23 = vld [vmem:[#allocation12 + $0xe0] sm:$0xff]  ;;  %v255_v25 = vld [vmem:[#allocation12 + $0xe8] sm:$0xff]  ;;  %v6781_v27 = vcombine.low %v243_v16, %v247_v17 }
  0x61   :  { %s129_s26 = sand.u32 7, %s9486_s19  ;;  %s6933_s27 = sshll.u32 %s126_s24, 4  ;;  %v6788_v28 = vcombine.high %v250_v22, %v254_v23  ;;  %v6790_v29 = vcombine.high %v251_v24, %v255_v25  ;;  %v258_v30 = vld [vmem:[#allocation12 + $0x100] sm:$0xff]  ;;  %v259_v32 = vld [vmem:[#allocation12 + $0x108] sm:$0xff]  ;;  %v6787_v34 = vcombine.low %v250_v22, %v254_v23  ;;  %v6789_v35 = vcombine.low %v251_v24, %v255_v25 }
  0x62   :  { %s140_s29 = sshra.s32 %s9488_s20, 3  ;;  %s9503_s12 = sadd.s32 %s6932_s25, %s112_s22  ;;  %1039 = vmatpush1.bf16.msra.mxu0 %v6771_v18  ;;  %1080 = vmatpush1.bf16.msra.mxu1 %v6773_v19  ;;  %v262_v31 = vld [vmem:[#allocation12 + $0x120] sm:$0xff]  ;;  %v263_v33 = vld [vmem:[#allocation12 + $0x128] sm:$0xff] }
  0x63   :  { %s143_s4 = sand.u32 7, %s9488_s20  ;;  %s9506_s28 = sadd.s32 %s6933_s27, %s129_s26  ;;  %1040 = vmatprep.subr.bf16.mxu0 %v6780_v20  ;;  %1081 = vmatprep.subr.bf16.mxu1 %v6782_v21  ;;  %v6796_v36 = vcombine.high %v258_v30, %v262_v31  ;;  %v6798_v37 = vcombine.high %v259_v32, %v263_v33  ;;  %v266_v38 = vld [vmem:[#allocation12 + $0x140] sm:$0xff]  ;;  %v267_v40 = vld [vmem:[#allocation12 + $0x148] sm:$0xff]  ;;  %v6795_v43 = vcombine.low %v258_v30, %v262_v31 }
  0x64   :  { %s6934_s13 = sshll.u32 %s140_s29, 4  ;;  %s154_s14 = sshra.s32 %s9490_s21, 3  ;;  %v270_v39 = vld [vmem:[#allocation12 + $0x160] sm:$0xff]  ;;  %v271_v41 = vld [vmem:[#allocation12 + $0x168] sm:$0xff]  ;;  %v6797_v44 = vcombine.low %v259_v32, %v263_v33 }
  0x65   :  { %s9511_s16 = sadd.s32 %s6934_s13, %s143_s4  ;;  %s168_s5 = sshra.s32 %s9493_s23, 3  ;;  %v6804_v45 = vcombine.high %v266_v38, %v270_v39  ;;  %v6806_v46 = vcombine.high %v267_v40, %v271_v41  ;;  %v274_v47 = vld [vmem:[#allocation12 + $0x180] sm:$0xff]  ;;  %v275_v49 = vld [vmem:[#allocation12 + $0x188] sm:$0xff]  ;;  %v6803_v52 = vcombine.low %v266_v38, %v270_v39  ;;  %v6805_v55 = vcombine.low %v267_v40, %v271_v41 }
  0x66   :  { %s157_s15 = sand.u32 7, %s9490_s21  ;;  %s6935_s17 = sshll.u32 %s154_s14, 4  ;;  %1041 = vmatpush1.bf16.msra.mxu0 %v6779_v26  ;;  %1082 = vmatpush1.bf16.msra.mxu1 %v6781_v27  ;;  %v278_v48 = vld [vmem:[#allocation12 + $0x1a0] sm:$0xff]  ;;  %v279_v50 = vld [vmem:[#allocation12 + $0x1a8] sm:$0xff] }
  0x67   :  { %s182_s18 = sshra.s32 %s9496_s1, 3  ;;  %s171_s19 = sand.u32 7, %s9493_s23  ;;  %1042 = vmatprep.subr.bf16.mxu0 %v6788_v28  ;;  %1083 = vmatprep.subr.bf16.mxu1 %v6790_v29  ;;  %v282_v53 = vld [vmem:[#allocation12 + $0x1c0] sm:$0xff]  ;;  %v6812_v56 = vcombine.high %v274_v47, %v278_v48  ;;  %v283_v57 = vld [vmem:[#allocation12 + $0x1c8] sm:$0xff]  ;;  %v6814_v60 = vcombine.high %v275_v49, %v279_v50  ;;  %v6811_v1 = vcombine.low %v274_v47, %v278_v48 }
  0x68   :  { %s6936_s20 = sshll.u32 %s168_s5, 4  ;;  %s9517_s7 = sadd.s32 %s6935_s17, %s157_s15  ;;  %v286_v54 = vld [vmem:[#allocation12 + $0x1e0] sm:$0xff]  ;;  %v287_v58 = vld [vmem:[#allocation12 + $0x1e8] sm:$0xff]  ;;  %v6813_v4 = vcombine.low %v275_v49, %v279_v50 }
  0x69   :  { %s185_s24 = sand.u32 7, %s9496_s1  ;;  %s6937_s21 = sshll.u32 %s182_s18, 4  ;;  %v6820_v5 = vcombine.high %v282_v53, %v286_v54  ;;  %v6822_v7 = vcombine.high %v283_v57, %v287_v58  ;;  %v290_v8 = vld [vmem:[#allocation12 + $0x200] sm:$0xff]  ;;  %v291_v10 = vld [vmem:[#allocation12 + $0x208] sm:$0xff]  ;;  %v6819_v12 = vcombine.low %v282_v53, %v286_v54  ;;  %v6821_v13 = vcombine.low %v283_v57, %v287_v58 }
  0x6a   :  { %s196_s22 = sshra.s32 %s9501_s30, 3  ;;  %s9521_s23 = sadd.s32 %s6936_s20, %s171_s19  ;;  %1043 = vmatpush1.bf16.msra.mxu0 %v6787_v34  ;;  %1084 = vmatpush1.bf16.msra.mxu1 %v6789_v35  ;;  %v294_v9 = vld [vmem:[#allocation12 + $0x220] sm:$0xff]  ;;  %v295_v11 = vld [vmem:[#allocation12 + $0x228] sm:$0xff] }
  0x6b   :  { %s199_s25 = sand.u32 7, %s9501_s30  ;;  %s6938_s26 = sshll.u32 %s196_s22, 4  ;;  %1044 = vmatprep.subr.bf16.mxu0 %v6796_v36  ;;  %1085 = vmatprep.subr.bf16.mxu1 %v6798_v37  ;;  %v6828_v14 = vcombine.high %v290_v8, %v294_v9  ;;  %v6830_v15 = vcombine.high %v291_v10, %v295_v11  ;;  %v298_v16 = vld [vmem:[#allocation12 + $0x240] sm:$0xff]  ;;  %v299_v18 = vld [vmem:[#allocation12 + $0x248] sm:$0xff]  ;;  %v6827_v20 = vcombine.low %v290_v8, %v294_v9 }
  0x6c   :  { %s210_s27 = sshra.s32 %s9509_s0, 3  ;;  %s9525_s1 = sadd.s32 %s6937_s21, %s185_s24  ;;  %v302_v17 = vld [vmem:[#allocation12 + $0x260] sm:$0xff]  ;;  %v303_v19 = vld [vmem:[#allocation12 + $0x268] sm:$0xff]  ;;  %v6829_v21 = vcombine.low %v291_v10, %v295_v11 }
  0x6d   :  { %s213_s29 = sand.u32 7, %s9509_s0  ;;  %s9528_s4 = sadd.s32 %s6938_s26, %s199_s25  ;;  %v6836_v22 = vcombine.high %v298_v16, %v302_v17  ;;  %v6838_v24 = vcombine.high %v299_v18, %v303_v19  ;;  %v306_v25 = vld [vmem:[#allocation12 + $0x280] sm:$0xff]  ;;  %v307_v28 = vld [vmem:[#allocation12 + $0x288] sm:$0xff]  ;;  %v6835_v30 = vcombine.low %v298_v16, %v302_v17  ;;  %v6837_v31 = vcombine.low %v299_v18, %v303_v19 }
  0x6e   :  { %s6939_s13 = sshll.u32 %s210_s27, 4  ;;  %1045 = vmatpush1.bf16.msra.mxu0 %v6795_v43  ;;  %1086 = vmatpush1.bf16.msra.mxu1 %v6797_v44  ;;  %s116_s14 = scalar_lea.vmem [#allocation9], %s9503_s12  ;;  %v310_v26 = vld [vmem:[#allocation12 + $0x2a0] sm:$0xff]  ;;  %v311_v29 = vld [vmem:[#allocation12 + $0x2a8] sm:$0xff] }
  0x6f   :  { %s9535_s30 = sadd.s32 %s6939_s13, %s213_s29  ;;  %1046 = vmatprep.subr.bf16.mxu0 %v6804_v45  ;;  %v117_v59 = vld [vmem:[%s116_s14] ss:$8 sm:$0x3]  ;;  %1087 = vmatprep.subr.bf16.mxu1 %v6806_v46  ;;  %s133_s0 = scalar_lea.vmem [#allocation9], %s9506_s28  ;;  %v6844_v32 = vcombine.high %v306_v25, %v310_v26  ;;  %v6846_v33 = vcombine.high %v307_v28, %v311_v29  ;;  %v6843_v38 = vcombine.low %v306_v25, %v310_v26  ;;  %v241_v25 = vld [vmem:[#allocation12 + $0x78] sm:$0xff] }
  0x70   :  { %122 = vst.msk [vmem:[#allocation2] ss:$8 sm:$0x3] %vm9531_vm0, %v117_v59  ;;  %v134_v61 = vld [vmem:[%s133_s0] ss:$8 sm:$0x3]  ;;  %v6845_v39 = vcombine.low %v307_v28, %v311_v29 }
  0x71   :  { %s147_s5 = scalar_lea.vmem [#allocation9], %s9511_s16  ;;  %136 = vst.msk [vmem:[#allocation2 + $0x1] ss:$8 sm:$0x3] %vm9531_vm0, %v134_v61  ;;  %s161_s15 = scalar_lea.vmem [#allocation9], %s9517_s7  ;;  %v314_v34 = vld [vmem:[#allocation12 + $0x2c0] sm:$0xff] }
  0x72   :  { %v148_v62 = vld [vmem:[%s147_s5] ss:$8 sm:$0x3]  ;;  %s175_s12 = scalar_lea.vmem [#allocation9], %s9521_s23  ;;  %1047 = vmatpush1.bf16.msra.mxu0 %v6803_v52  ;;  %s189_s28 = scalar_lea.vmem [#allocation9], %s9525_s1  ;;  %1088 = vmatpush1.bf16.msra.mxu1 %v6805_v55 }
  0x73   :  { %150 = vst.msk [vmem:[#allocation2 + $0x2] ss:$8 sm:$0x3] %vm9531_vm0, %v148_v62  ;;  %v162_v63 = vld [vmem:[%s161_s15] ss:$8 sm:$0x3]  ;;  %1048 = vmatprep.subr.bf16.mxu0 %v6812_v56  ;;  %1089 = vmatprep.subr.bf16.mxu1 %v6814_v60 }
  0x74   :  { %v176_v0 = vld [vmem:[%s175_s12] ss:$8 sm:$0x3]  ;;  %164 = vst.msk [vmem:[#allocation2 + $0x3] ss:$8 sm:$0x3] %vm9531_vm0, %v162_v63 }
  0x75   :  { %178 = vst.msk [vmem:[#allocation2 + $0x4] ss:$8 sm:$0x3] %vm9531_vm0, %v176_v0  ;;  %v190_v2 = vld [vmem:[%s189_s28] ss:$8 sm:$0x3] }
  0x76   :  { %s203_s16 = scalar_lea.vmem [#allocation9], %s9528_s4  ;;  %192 = vst.msk [vmem:[#allocation2 + $0x5] ss:$8 sm:$0x3] %vm9531_vm0, %v190_v2  ;;  %s217_s17 = scalar_lea.vmem [#allocation9], %s9535_s30  ;;  %1049 = vmatpush1.bf16.msra.mxu0 %v6811_v1  ;;  %1090 = vmatpush1.bf16.msra.mxu1 %v6813_v4  ;;  %v318_v35 = vld [vmem:[#allocation12 + $0x2e0] sm:$0xff] }
  0x77   :  { %v204_v3 = vld [vmem:[%s203_s16] ss:$8 sm:$0x3]  ;;  %1050 = vmatprep.subr.bf16.mxu0 %v6820_v5  ;;  %1091 = vmatprep.subr.bf16.mxu1 %v6822_v7  ;;  %v6852_v40 = vcombine.high %v314_v34, %v318_v35  ;;  %v6851_v47 = vcombine.low %v314_v34, %v318_v35  ;;  %v249_v34 = vld [vmem:[#allocation12 + $0xb8] sm:$0xff] }
  0x78   :  { %206 = vst.msk [vmem:[#allocation2 + $0x6] ss:$8 sm:$0x3] %vm9531_vm0, %v204_v3  ;;  %v218_v6 = vld [vmem:[%s217_s17] ss:$8 sm:$0x3] }
  0x79   :  { %220 = vst.msk [vmem:[#allocation2 + $0x7] ss:$8 sm:$0x3] %vm9531_vm0, %v218_v6  ;;  %v315_v36 = vld [vmem:[#allocation12 + $0x2c8] sm:$0xff]  ;;  %v322_v43 = vld [vmem:[#allocation12 + $0x300] sm:$0xff] }
  0x7a   :  { %1051 = vmatpush1.bf16.msra.mxu0 %v6819_v12  ;;  %1092 = vmatpush1.bf16.msra.mxu1 %v6821_v13  ;;  %v319_v37 = vld [vmem:[#allocation12 + $0x2e8] sm:$0xff]  ;;  %v326_v44 = vld [vmem:[#allocation12 + $0x320] sm:$0xff]  ;;  %v228_v12 = vld [vmem:[#allocation12 + $0x10] sm:$0xff] }
  0x7b   :  { %1052 = vmatprep.subr.bf16.mxu0 %v6828_v14  ;;  %1093 = vmatprep.subr.bf16.mxu1 %v6830_v15  ;;  %v6854_v41 = vcombine.high %v315_v36, %v319_v37  ;;  %v323_v45 = vld [vmem:[#allocation12 + $0x308] sm:$0xff]  ;;  %v6853_v48 = vcombine.low %v315_v36, %v319_v37  ;;  %v6860_v49 = vcombine.high %v322_v43, %v326_v44  ;;  %v330_v52 = vld [vmem:[#allocation12 + $0x340] sm:$0xff]  ;;  %v232_v13 = vld [vmem:[#allocation12 + $0x30] sm:$0xff] }
  0x7c   :  { %v327_v46 = vld [vmem:[#allocation12 + $0x328] sm:$0xff]  ;;  %v334_v53 = vld [vmem:[#allocation12 + $0x360] sm:$0xff]  ;;  %v6859_v56 = vcombine.low %v322_v43, %v326_v44  ;;  %v229_v14 = vld [vmem:[#allocation12 + $0x18] sm:$0xff]  ;;  %v6768_v19 = vcombine.high %v228_v12, %v232_v13  ;;  %v6767_v26 = vcombine.low %v228_v12, %v232_v13 }
  0x7d   :  { %v6862_v50 = vcombine.high %v323_v45, %v327_v46  ;;  %v331_v54 = vld [vmem:[#allocation12 + $0x348] sm:$0xff]  ;;  %v6861_v57 = vcombine.low %v323_v45, %v327_v46  ;;  %v6868_v58 = vcombine.high %v330_v52, %v334_v53  ;;  %v338_v60 = vld [vmem:[#allocation12 + $0x380] sm:$0xff]  ;;  %v6867_v0 = vcombine.low %v330_v52, %v334_v53  ;;  %v233_v15 = vld [vmem:[#allocation12 + $0x38] sm:$0xff] }
  0x7e   :  { %1053 = vmatpush1.bf16.msra.mxu0 %v6827_v20  ;;  %1094 = vmatpush1.bf16.msra.mxu1 %v6829_v21  ;;  %v335_v55 = vld [vmem:[#allocation12 + $0x368] sm:$0xff]  ;;  %v342_v61 = vld [vmem:[#allocation12 + $0x3a0] sm:$0xff]  ;;  %v6770_v20 = vcombine.high %v229_v14, %v233_v15  ;;  %v236_v21 = vld [vmem:[#allocation12 + $0x50] sm:$0xff]  ;;  %v6769_v28 = vcombine.low %v229_v14, %v233_v15 }
  0x7f   :  { %1054 = vmatprep.subr.bf16.mxu0 %v6836_v22  ;;  %1095 = vmatprep.subr.bf16.mxu1 %v6838_v24  ;;  %v6870_v59 = vcombine.high %v331_v54, %v335_v55  ;;  %v339_v62 = vld [vmem:[#allocation12 + $0x388] sm:$0xff]  ;;  %v6869_v1 = vcombine.low %v331_v54, %v335_v55  ;;  %v6876_v2 = vcombine.high %v338_v60, %v342_v61  ;;  %v346_v4 = vld [vmem:[#allocation12 + $0x3c0] sm:$0xff]  ;;  %v240_v22 = vld [vmem:[#allocation12 + $0x70] sm:$0xff] }
  0x80   :  { %v223_v23 = vld [vmem:[#allocation2 + $0x8] sm:$0xff]  ;;  %v6875_v8 = vcombine.low %v338_v60, %v342_v61  ;;  %v222_v17 = vld [vmem:[#allocation2] sm:$0xff]  ;;  %v6776_v29 = vcombine.high %v236_v21, %v240_v22  ;;  %v6775_v35 = vcombine.low %v236_v21, %v240_v22 }
  0x81   :  { %v9561_v27 = vpack.c.bf16 %v223_v23, %v223_v23  ;;  %v343_v63 = vld [vmem:[#allocation12 + $0x3a8] sm:$0xff]  ;;  %v350_v5 = vld [vmem:[#allocation12 + $0x3e0] sm:$0xff]  ;;  %v9565_v23 = vpack.c.bf16 %v222_v17, %v222_v17  ;;  %v237_v24 = vld [vmem:[#allocation12 + $0x58] sm:$0xff] }
  0x82   :  { %1055 = vmatpush1.bf16.msra.mxu0 %v6835_v30  ;;  %1096 = vmatpush1.bf16.msra.mxu1 %v6837_v31  ;;  %v6878_v3 = vcombine.high %v339_v62, %v343_v63  ;;  %v347_v6 = vld [vmem:[#allocation12 + $0x3c8] sm:$0xff]  ;;  %v6877_v9 = vcombine.low %v339_v62, %v343_v63  ;;  %v6884_v10 = vcombine.high %v346_v4, %v350_v5  ;;  %v244_v31 = vld [vmem:[#allocation12 + $0x90] sm:$0xff]  ;;  %v257_v43 = vld [vmem:[#allocation12 + $0xf8] sm:$0xff] }
  0x83   :  { %1068 = vmatprep.mubr.bf16.mxu0 %v9561_v27  ;;  %1109 = vmatprep.mubr.bf16.mxu1 %v9561_v27  ;;  %v351_v7 = vld [vmem:[#allocation12 + $0x3e8] sm:$0xff]  ;;  %v6883_v16 = vcombine.low %v346_v4, %v350_v5  ;;  %v6778_v30 = vcombine.high %v237_v24, %v241_v25  ;;  %v6777_v36 = vcombine.low %v237_v24, %v241_v25  ;;  %v265_v52 = vld [vmem:[#allocation12 + $0x138] sm:$0xff]  ;;  %v99_v15 = vld [vmem:[%s9887_s2] sm:$0x3] }
  0x84   :  { %1056 = vmatprep.subr.bf16.mxu0 %v6844_v32  ;;  %1097 = vmatprep.subr.bf16.mxu1 %v6846_v33  ;;  %v6886_v11 = vcombine.high %v347_v6, %v351_v7  ;;  %v6885_v18 = vcombine.low %v347_v6, %v351_v7  ;;  %v248_v32 = vld [vmem:[#allocation12 + $0xb0] sm:$0xff]  ;;  %v245_v33 = vld [vmem:[#allocation12 + $0x98] sm:$0xff]  ;;  %104 = vst.msk [vmem:[#allocation5] sm:$0x3] %vm9531_vm0, %v99_v15 }
  0x85   :  { %v6784_v37 = vcombine.high %v244_v31, %v248_v32  ;;  %v6783_v44 = vcombine.low %v244_v31, %v248_v32  ;;  %v6785_v45 = vcombine.low %v245_v33, %v249_v34  ;;  %v292_v17 = vld [vmem:[#allocation12 + $0x210] sm:$0xff]  ;;  %v353_v15 = vld [vmem:[#allocation12 + $0x3f8] sm:$0xff] }
  0x86   :  { %1057 = vmatpush1.bf16.msra.mxu0 %v6843_v38  ;;  %1098 = vmatpush1.bf16.msra.mxu1 %v6845_v39  ;;  %v6786_v38 = vcombine.high %v245_v33, %v249_v34  ;;  %v252_v39 = vld [vmem:[#allocation12 + $0xd0] sm:$0xff] }
  0x87   :  { %1058 = vmatprep.subr.bf16.mxu0 %v6852_v40  ;;  %1099 = vmatprep.subr.bf16.mxu1 %v6854_v41  ;;  %v256_v40 = vld [vmem:[#allocation12 + $0xf0] sm:$0xff]  ;;  %v253_v41 = vld [vmem:[#allocation12 + $0xd8] sm:$0xff] }
  0x88   :  { %v6792_v46 = vcombine.high %v252_v39, %v256_v40  ;;  %v6791_v53 = vcombine.low %v252_v39, %v256_v40  ;;  %v6793_v54 = vcombine.low %v253_v41, %v257_v43 }
  0x8a   :  { %1059 = vmatpush1.bf16.msra.mxu0 %v6851_v47  ;;  %1100 = vmatpush1.bf16.msra.mxu1 %v6853_v48  ;;  %v6794_v47 = vcombine.high %v253_v41, %v257_v43  ;;  %v260_v48 = vld [vmem:[#allocation12 + $0x110] sm:$0xff] }
  0x8b   :  { %1060 = vmatprep.subr.bf16.mxu0 %v6860_v49  ;;  %1101 = vmatprep.subr.bf16.mxu1 %v6862_v50  ;;  %v264_v49 = vld [vmem:[#allocation12 + $0x130] sm:$0xff]  ;;  %v261_v50 = vld [vmem:[#allocation12 + $0x118] sm:$0xff] }
  0x8c   :  { %v6800_v55 = vcombine.high %v260_v48, %v264_v49  ;;  %v6799_v60 = vcombine.low %v260_v48, %v264_v49  ;;  %v6801_v61 = vcombine.low %v261_v50, %v265_v52 }
  0x8e   :  { %1061 = vmatpush1.bf16.msra.mxu0 %v6859_v56  ;;  %1102 = vmatpush1.bf16.msra.mxu1 %v6861_v57  ;;  %v268_v56 = vld [vmem:[#allocation12 + $0x150] sm:$0xff] }
  0x8f   :  { %1062 = vmatprep.subr.bf16.mxu0 %v6868_v58  ;;  %1103 = vmatprep.subr.bf16.mxu1 %v6870_v59  ;;  %v272_v57 = vld [vmem:[#allocation12 + $0x170] sm:$0xff]  ;;  %v269_v58 = vld [vmem:[#allocation12 + $0x158] sm:$0xff] }
  0x90   :  { %v273_v59 = vld [vmem:[#allocation12 + $0x178] sm:$0xff]  ;;  %v6808_v62 = vcombine.high %v268_v56, %v272_v57  ;;  %v6807_v4 = vcombine.low %v268_v56, %v272_v57 }
  0x91   :  { %v6810_v63 = vcombine.high %v269_v58, %v273_v59  ;;  %v6809_v5 = vcombine.low %v269_v58, %v273_v59 }
  0x92   :  { %1063 = vmatpush1.bf16.msra.mxu0 %v6867_v0  ;;  %1104 = vmatpush1.bf16.msra.mxu1 %v6869_v1  ;;  %v276_v0 = vld [vmem:[#allocation12 + $0x190] sm:$0xff] }
  0x93   :  { %1064 = vmatprep.subr.bf16.mxu0 %v6876_v2  ;;  %1105 = vmatprep.subr.bf16.mxu1 %v6878_v3  ;;  %v280_v1 = vld [vmem:[#allocation12 + $0x1b0] sm:$0xff]  ;;  %v277_v2 = vld [vmem:[#allocation12 + $0x198] sm:$0xff] }
  0x94   :  { %v281_v3 = vld [vmem:[#allocation12 + $0x1b8] sm:$0xff]  ;;  %v6816_v6 = vcombine.high %v276_v0, %v280_v1  ;;  %v6815_v12 = vcombine.low %v276_v0, %v280_v1 }
  0x95   :  { %v6818_v7 = vcombine.high %v277_v2, %v281_v3  ;;  %v6817_v13 = vcombine.low %v277_v2, %v281_v3 }
  0x96   :  { %1065 = vmatpush1.bf16.msra.mxu0 %v6875_v8  ;;  %1106 = vmatpush1.bf16.msra.mxu1 %v6877_v9  ;;  %v284_v8 = vld [vmem:[#allocation12 + $0x1d0] sm:$0xff] }
  0x97   :  { %1066 = vmatprep.subr.bf16.mxu0 %v6884_v10  ;;  %1107 = vmatprep.subr.bf16.mxu1 %v6886_v11  ;;  %v288_v9 = vld [vmem:[#allocation12 + $0x1f0] sm:$0xff]  ;;  %v285_v10 = vld [vmem:[#allocation12 + $0x1d8] sm:$0xff] }
  0x98   :  { %v289_v11 = vld [vmem:[#allocation12 + $0x1f8] sm:$0xff]  ;;  %v6824_v14 = vcombine.high %v284_v8, %v288_v9  ;;  %v6823_v21 = vcombine.low %v284_v8, %v288_v9 }
  0x99   :  { %v6825_v22 = vcombine.low %v285_v10, %v289_v11 }
  0x9a   :  { %1067 = vmatpush1.bf16.msra.mxu0 %v6883_v16  ;;  %1108 = vmatpush1.bf16.msra.mxu1 %v6885_v18  ;;  %v6826_v16 = vcombine.high %v285_v10, %v289_v11  ;;  %v296_v18 = vld [vmem:[#allocation12 + $0x230] sm:$0xff] }
  0x9b   :  { %1118 = vmatprep.subr.bf16.mxu0 %v6768_v19  ;;  %1159 = vmatprep.subr.bf16.mxu1 %v6770_v20  ;;  %v293_v19 = vld [vmem:[#allocation12 + $0x218] sm:$0xff]  ;;  %v6832_v24 = vcombine.high %v292_v17, %v296_v18  ;;  %v6831_v31 = vcombine.low %v292_v17, %v296_v18 }
  0x9c   :  { %v297_v20 = vld [vmem:[#allocation12 + $0x238] sm:$0xff] }
  0x9d   :  { %1069 = vmatmul.mubr.bf16.vlgmr.msra.gmra.mrb[0].mxu0 %v9565_v23  ;;  %1110 = vmatmul.mubr.bf16.vlgmr.msra.gmra.mrb[0].mxu1 %v9565_v23  ;;  %v6834_v25 = vcombine.high %v293_v19, %v297_v20  ;;  %v6833_v32 = vcombine.low %v293_v19, %v297_v20  ;;  %v1214_v20 = vld [vmem:[#allocation14 + $0x8] sm:$0xff] }
  0x9e   :  { %1119 = vmatpush1.bf16.msra.mxu0 %v6767_v26  ;;  %1160 = vmatpush1.bf16.msra.mxu1 %v6769_v28  ;;  %v300_v26 = vld [vmem:[#allocation12 + $0x250] sm:$0xff] }
  0x9f   :  { %1120 = vmatprep.subr.bf16.mxu0 %v6776_v29  ;;  %1161 = vmatprep.subr.bf16.mxu1 %v6778_v30  ;;  %v304_v28 = vld [vmem:[#allocation12 + $0x270] sm:$0xff]  ;;  %v301_v29 = vld [vmem:[#allocation12 + $0x258] sm:$0xff] }
  0xa0   :  { %1150 = vmatprep.mubr.bf16.mxu0 %v9561_v27  ;;  %1191 = vmatprep.mubr.bf16.mxu1 %v9561_v27  ;;  %v6802_v27 = vcombine.high %v261_v50, %v265_v52  ;;  %v305_v30 = vld [vmem:[#allocation12 + $0x278] sm:$0xff]  ;;  %v6840_v33 = vcombine.high %v300_v26, %v304_v28  ;;  %v6839_v39 = vcombine.low %v300_v26, %v304_v28 }
  0xa1   :  { %v6842_v34 = vcombine.high %v301_v29, %v305_v30  ;;  %v6841_v40 = vcombine.low %v301_v29, %v305_v30  ;;  %v1213_v30 = vld [vmem:[#allocation14] sm:$0xff] }
  0xa2   :  { %1121 = vmatpush1.bf16.msra.mxu0 %v6775_v35  ;;  %1162 = vmatpush1.bf16.msra.mxu1 %v6777_v36  ;;  %v308_v35 = vld [vmem:[#allocation12 + $0x290] sm:$0xff] }
  0xa3   :  { %1122 = vmatprep.subr.bf16.mxu0 %v6784_v37  ;;  %1163 = vmatprep.subr.bf16.mxu1 %v6786_v38  ;;  %v312_v36 = vld [vmem:[#allocation12 + $0x2b0] sm:$0xff]  ;;  %v309_v37 = vld [vmem:[#allocation12 + $0x298] sm:$0xff] }
  0xa4   :  { %v313_v38 = vld [vmem:[#allocation12 + $0x2b8] sm:$0xff]  ;;  %v6848_v41 = vcombine.high %v308_v35, %v312_v36  ;;  %v6847_v48 = vcombine.low %v308_v35, %v312_v36  ;;  %v1230_v35 = vld [vmem:[#allocation14 + $0x88] sm:$0xff] }
  0xa5   :  { %v6850_v43 = vcombine.high %v309_v37, %v313_v38  ;;  %v6849_v49 = vcombine.low %v309_v37, %v313_v38  ;;  %v1238_v36 = vld [vmem:[#allocation14 + $0xc8] sm:$0xff]  ;;  %v1240_v38 = vld [vmem:[#allocation14 + $0xd8] sm:$0xff] }
  0xa6   :  { %1123 = vmatpush1.bf16.msra.mxu0 %v6783_v44  ;;  %1164 = vmatpush1.bf16.msra.mxu1 %v6785_v45  ;;  %v316_v44 = vld [vmem:[#allocation12 + $0x2d0] sm:$0xff] }
  0xa7   :  { %1124 = vmatprep.subr.bf16.mxu0 %v6792_v46  ;;  %1165 = vmatprep.subr.bf16.mxu1 %v6794_v47  ;;  %v320_v45 = vld [vmem:[#allocation12 + $0x2f0] sm:$0xff]  ;;  %v317_v46 = vld [vmem:[#allocation12 + $0x2d8] sm:$0xff] }
  0xa8   :  { %v321_v47 = vld [vmem:[#allocation12 + $0x2f8] sm:$0xff]  ;;  %v6856_v50 = vcombine.high %v316_v44, %v320_v45  ;;  %v6855_v56 = vcombine.low %v316_v44, %v320_v45  ;;  %v6966_v44 = vpack.c.bf16 %v1238_v36, %v1230_v35  ;;  %v1237_v45 = vld [vmem:[#allocation14 + $0xc0] sm:$0xff]  ;;  %v1303_v35 = vld [vmem:[#allocation14 + $0x2d0] sm:$0xff] }
  0xa9   :  { %v6858_v52 = vcombine.high %v317_v46, %v321_v47  ;;  %v6857_v57 = vcombine.low %v317_v46, %v321_v47  ;;  %v1231_v46 = vld [vmem:[#allocation14 + $0x90] sm:$0xff]  ;;  %v1310_v36 = vld [vmem:[#allocation14 + $0x308] sm:$0xff] }
  0xaa   :  { %1125 = vmatpush1.bf16.msra.mxu0 %v6791_v53  ;;  %1166 = vmatpush1.bf16.msra.mxu1 %v6793_v54  ;;  %v324_v53 = vld [vmem:[#allocation12 + $0x310] sm:$0xff] }
  0xab   :  { %1126 = vmatprep.subr.bf16.mxu0 %v6800_v55  ;;  %1167 = vmatprep.subr.bf16.mxu1 %v6802_v27  ;;  %v328_v54 = vld [vmem:[#allocation12 + $0x330] sm:$0xff]  ;;  %v325_v55 = vld [vmem:[#allocation12 + $0x318] sm:$0xff] }
  0xac   :  { %v329_v27 = vld [vmem:[#allocation12 + $0x338] sm:$0xff]  ;;  %v6864_v58 = vcombine.high %v324_v53, %v328_v54  ;;  %v6863_v0 = vcombine.low %v324_v53, %v328_v54  ;;  %v1239_v47 = vld [vmem:[#allocation14 + $0xd0] sm:$0xff] }
  0xad   :  { %v6866_v59 = vcombine.high %v325_v55, %v329_v27  ;;  %v6865_v1 = vcombine.low %v325_v55, %v329_v27  ;;  %v1256_v54 = vld [vmem:[#allocation14 + $0x158] sm:$0xff]  ;;  %v1245_v55 = vld [vmem:[#allocation14 + $0x100] sm:$0xff] }
  0xae   :  { %1127 = vmatpush1.bf16.msra.mxu0 %v6799_v60  ;;  %1168 = vmatpush1.bf16.msra.mxu1 %v6801_v61  ;;  %v332_v60 = vld [vmem:[#allocation12 + $0x350] sm:$0xff]  ;;  %v1253_v27 = vld [vmem:[#allocation14 + $0x140] sm:$0xff] }
  0xaf   :  { %1128 = vmatprep.subr.bf16.mxu0 %v6808_v62  ;;  %1169 = vmatprep.subr.bf16.mxu1 %v6810_v63  ;;  %v336_v61 = vld [vmem:[#allocation12 + $0x370] sm:$0xff]  ;;  %v333_v62 = vld [vmem:[#allocation12 + $0x358] sm:$0xff] }
  0xb0   :  { %v337_v63 = vld [vmem:[#allocation12 + $0x378] sm:$0xff]  ;;  %v6872_v2 = vcombine.high %v332_v60, %v336_v61  ;;  %v6871_v8 = vcombine.low %v332_v60, %v336_v61  ;;  %v1270_v60 = vld [vmem:[#allocation14 + $0x1c8] sm:$0xff]  ;;  %v7032_v61 = vpack.c.bf16 %v1239_v47, %v1231_v46  ;;  %v1317_v46 = vld [vmem:[#allocation14 + $0x340] sm:$0xff] }
  0xb1   :  { %v6874_v3 = vcombine.high %v333_v62, %v337_v63  ;;  %v6873_v9 = vcombine.low %v333_v62, %v337_v63  ;;  %v1264_v63 = vld [vmem:[#allocation14 + $0x198] sm:$0xff]  ;;  %v1311_v47 = vld [vmem:[#allocation14 + $0x310] sm:$0xff] }
  0xb2   :  { %1129 = vmatpush1.bf16.msra.mxu0 %v6807_v4  ;;  %1170 = vmatpush1.bf16.msra.mxu1 %v6809_v5  ;;  %v340_v4 = vld [vmem:[#allocation12 + $0x390] sm:$0xff] }
  0xb3   :  { %1130 = vmatprep.subr.bf16.mxu0 %v6816_v6  ;;  %1171 = vmatprep.subr.bf16.mxu1 %v6818_v7  ;;  %v344_v5 = vld [vmem:[#allocation12 + $0x3b0] sm:$0xff]  ;;  %v341_v6 = vld [vmem:[#allocation12 + $0x398] sm:$0xff] }
  0xb4   :  { %v345_v7 = vld [vmem:[#allocation12 + $0x3b8] sm:$0xff]  ;;  %v6880_v10 = vcombine.high %v340_v4, %v344_v5 }
  0xb5   :  { %v6882_v11 = vcombine.high %v341_v6, %v345_v7  ;;  %v6881_v17 = vcombine.low %v341_v6, %v345_v7  ;;  %v1278_v6 = vld [vmem:[#allocation14 + $0x208] sm:$0xff] }
  0xb6   :  { %1131 = vmatpush1.bf16.msra.mxu0 %v6815_v12  ;;  %1172 = vmatpush1.bf16.msra.mxu1 %v6817_v13  ;;  %v348_v12 = vld [vmem:[#allocation12 + $0x3d0] sm:$0xff]  ;;  %v1286_v7 = vld [vmem:[#allocation14 + $0x248] sm:$0xff] }
  0xb7   :  { %1132 = vmatprep.subr.bf16.mxu0 %v6824_v14  ;;  %1173 = vmatprep.subr.bf16.mxu1 %v6826_v16  ;;  %v352_v13 = vld [vmem:[#allocation12 + $0x3f0] sm:$0xff]  ;;  %v349_v14 = vld [vmem:[#allocation12 + $0x3d8] sm:$0xff]  ;;  %v6879_v16 = vcombine.low %v340_v4, %v344_v5 }
  0xb8   :  { %v6888_v18 = vcombine.high %v348_v12, %v352_v13  ;;  %v6890_v19 = vcombine.high %v349_v14, %v353_v15  ;;  %v6887_v26 = vcombine.low %v348_v12, %v352_v13  ;;  %v6889_v28 = vcombine.low %v349_v14, %v353_v15  ;;  %v1263_v4 = vld [vmem:[#allocation14 + $0x190] sm:$0xff]  ;;  %v1277_v13 = vld [vmem:[#allocation14 + $0x200] sm:$0xff] }
  0xb9   :  { %v1271_v5 = vld [vmem:[#allocation14 + $0x1d0] sm:$0xff]  ;;  %v1285_v14 = vld [vmem:[#allocation14 + $0x240] sm:$0xff] }
  0xba   :  { %1133 = vmatpush1.bf16.msra.mxu0 %v6823_v21  ;;  %1174 = vmatpush1.bf16.msra.mxu1 %v6825_v22  ;;  %v1222_v21 = vld [vmem:[#allocation14 + $0x48] sm:$0xff]  ;;  %v9577_v22 = vshrl.u32 %v100_v42, 7  ;;  %v1232_v42 = vld [vmem:[#allocation14 + $0x98] sm:$0xff] }
  0xbb   :  { %1134 = vmatprep.subr.bf16.mxu0 %v6832_v24  ;;  %1175 = vmatprep.subr.bf16.mxu1 %v6834_v25  ;;  %v1216_v24 = vld [vmem:[#allocation14 + $0x18] sm:$0xff]  ;;  %v6962_v29 = vpack.c.bf16 %v1222_v21, %v1214_v20  ;;  %v7040_v20 = vpack.c.bf16 %v1271_v5, %v1263_v4  ;;  %v6978_v21 = vpack.c.bf16 %v1286_v7, %v1278_v6  ;;  %v1341_v5 = vld [vmem:[#allocation14 + $0x400] sm:$0xff]  ;;  %v1343_v7 = vld [vmem:[#allocation14 + $0x410] sm:$0xff] }
  0xbc   :  { %v1224_v25 = vld [vmem:[#allocation14 + $0x58] sm:$0xff]  ;;  %v9580_v37 = vsub.s32 1, %v9577_v22  ;;  %v1349_v6 = vld [vmem:[#allocation14 + $0x440] sm:$0xff] }
  0xbe   :  { %1135 = vmatpush1.bf16.msra.mxu0 %v6831_v31  ;;  %1176 = vmatpush1.bf16.msra.mxu1 %v6833_v32  ;;  %v1221_v31 = vld [vmem:[#allocation14 + $0x40] sm:$0xff]  ;;  %v1215_v32 = vld [vmem:[#allocation14 + $0x10] sm:$0xff] }
  0xbf   :  { %1136 = vmatprep.subr.bf16.mxu0 %v6840_v33  ;;  %1177 = vmatprep.subr.bf16.mxu1 %v6842_v34  ;;  %v7026_v33 = vpack.c.bf16 %v1224_v25, %v1216_v24  ;;  %v1223_v34 = vld [vmem:[#allocation14 + $0x50] sm:$0xff]  ;;  %v1296_v24 = vld [vmem:[#allocation14 + $0x298] sm:$0xff] }
  0xc0   :  { %v1304_v25 = vld [vmem:[#allocation14 + $0x2d8] sm:$0xff] }
  0xc2   :  { %1137 = vmatpush1.bf16.msra.mxu0 %v6839_v39  ;;  %1178 = vmatpush1.bf16.msra.mxu1 %v6841_v40  ;;  %v9582_v39 = vld [vmem:[#allocation5] sm:$0x3]  ;;  %v6964_v40 = vpack.c.bf16 %v1221_v31, %v1213_v30  ;;  %v1293_v31 = vld [vmem:[#allocation14 + $0x280] sm:$0xff] }
  0xc3   :  { %1138 = vmatprep.subr.bf16.mxu0 %v6848_v41  ;;  %1179 = vmatprep.subr.bf16.mxu1 %v6850_v43  ;;  %v1229_v41 = vld [vmem:[#allocation14 + $0x80] sm:$0xff]  ;;  %v7028_v43 = vpack.c.bf16 %v1223_v34, %v1215_v32  ;;  %v9586_v53 = vrot.slane %v9582_v39, %v9580_v37  ;;  %v7046_v34 = vpack.c.bf16 %v1304_v25, %v1296_v24  ;;  %v1374_v24 = vld [vmem:[#allocation14 + $0x508] sm:$0xff] }
  0xc4   :  { %v1301_v32 = vld [vmem:[#allocation14 + $0x2c0] sm:$0xff]  ;;  %v1382_v25 = vld [vmem:[#allocation14 + $0x548] sm:$0xff] }
  0xc6   :  { %1139 = vmatpush1.bf16.msra.mxu0 %v6847_v48  ;;  %1180 = vmatpush1.bf16.msra.mxu1 %v6849_v49  ;;  %v7030_v48 = vpack.c.bf16 %v1240_v38, %v1232_v42  ;;  %v1246_v49 = vld [vmem:[#allocation14 + $0x108] sm:$0xff]  ;;  %v1312_v38 = vld [vmem:[#allocation14 + $0x318] sm:$0xff] }
  0xc7   :  { %1140 = vmatprep.subr.bf16.mxu0 %v6856_v50  ;;  %1181 = vmatprep.subr.bf16.mxu1 %v6858_v52  ;;  %v1254_v50 = vld [vmem:[#allocation14 + $0x148] sm:$0xff]  ;;  %v1248_v52 = vld [vmem:[#allocation14 + $0x118] sm:$0xff] }
  0xc8   :  { %v6970_v62 = vpack.c.bf16 %v1254_v50, %v1246_v49  ;;  %v1318_v42 = vld [vmem:[#allocation14 + $0x348] sm:$0xff]  ;;  %v1319_v49 = vld [vmem:[#allocation14 + $0x350] sm:$0xff] }
  0xc9   :  { %v1326_v50 = vld [vmem:[#allocation14 + $0x388] sm:$0xff] }
  0xca   :  { %1141 = vmatpush1.bf16.msra.mxu0 %v6855_v56  ;;  %1182 = vmatpush1.bf16.msra.mxu1 %v6857_v57  ;;  %v6968_v56 = vpack.c.bf16 %v1237_v45, %v1229_v41  ;;  %v1247_v57 = vld [vmem:[#allocation14 + $0x110] sm:$0xff]  ;;  %v6984_v41 = vpack.c.bf16 %v1301_v32, %v1293_v31  ;;  %v1309_v45 = vld [vmem:[#allocation14 + $0x300] sm:$0xff]  ;;  %v7002_v31 = vpack.c.bf16 %v1382_v25, %v1374_v24  ;;  %v1454_v25 = vld [vmem:[#allocation14 + $0x788] sm:$0xff] }
  0xcb   :  { %1142 = vmatprep.subr.bf16.mxu0 %v6864_v58  ;;  %1183 = vmatprep.subr.bf16.mxu1 %v6866_v59  ;;  %v1255_v58 = vld [vmem:[#allocation14 + $0x150] sm:$0xff]  ;;  %v1262_v59 = vld [vmem:[#allocation14 + $0x188] sm:$0xff]  ;;  %v1373_v32 = vld [vmem:[#allocation14 + $0x500] sm:$0xff] }
  0xcc   :  { %v1447_v24 = vld [vmem:[#allocation14 + $0x750] sm:$0xff] }
  0xce   :  { %1143 = vmatpush1.bf16.msra.mxu0 %v6863_v0  ;;  %1184 = vmatpush1.bf16.msra.mxu1 %v6865_v1  ;;  %v1272_v0 = vld [vmem:[#allocation14 + $0x1d8] sm:$0xff]  ;;  %v7034_v1 = vpack.c.bf16 %v1256_v54, %v1248_v52  ;;  %v1334_v52 = vld [vmem:[#allocation14 + $0x3c8] sm:$0xff] }
  0xcf   :  { %1144 = vmatprep.subr.bf16.mxu0 %v6872_v2  ;;  %1185 = vmatprep.subr.bf16.mxu1 %v6874_v3  ;;  %v1261_v2 = vld [vmem:[#allocation14 + $0x180] sm:$0xff]  ;;  %v7038_v12 = vpack.c.bf16 %v1272_v0, %v1264_v63  ;;  %v1328_v54 = vld [vmem:[#allocation14 + $0x398] sm:$0xff]  ;;  %v1342_v63 = vld [vmem:[#allocation14 + $0x408] sm:$0xff] }
  0xd0   :  { %v1269_v3 = vld [vmem:[#allocation14 + $0x1c0] sm:$0xff]  ;;  %v1350_v0 = vld [vmem:[#allocation14 + $0x448] sm:$0xff] }
  0xd1   :  { %v6976_v15 = vpack.c.bf16 %v1269_v3, %v1261_v2  ;;  %v1352_v2 = vld [vmem:[#allocation14 + $0x458] sm:$0xff]  ;;  %v6994_v4 = vpack.c.bf16 %v1350_v0, %v1342_v63  ;;  %v1415_v63 = vld [vmem:[#allocation14 + $0x650] sm:$0xff]  ;;  %v1422_v0 = vld [vmem:[#allocation14 + $0x688] sm:$0xff] }
  0xd2   :  { %1145 = vmatpush1.bf16.msra.mxu0 %v6871_v8  ;;  %1186 = vmatpush1.bf16.msra.mxu1 %v6873_v9  ;;  %v7036_v8 = vpack.c.bf16 %v1255_v58, %v1247_v57  ;;  %v6974_v9 = vpack.c.bf16 %v1270_v60, %v1262_v59  ;;  %v6990_v57 = vpack.c.bf16 %v1334_v52, %v1326_v50  ;;  %v1325_v58 = vld [vmem:[#allocation14 + $0x380] sm:$0xff]  ;;  %v1327_v60 = vld [vmem:[#allocation14 + $0x390] sm:$0xff]  ;;  %v1406_v52 = vld [vmem:[#allocation14 + $0x608] sm:$0xff] }
  0xd3   :  { %1146 = vmatprep.subr.bf16.mxu0 %v6880_v10  ;;  %1187 = vmatprep.subr.bf16.mxu1 %v6882_v11  ;;  %v1280_v10 = vld [vmem:[#allocation14 + $0x218] sm:$0xff]  ;;  %v1333_v59 = vld [vmem:[#allocation14 + $0x3c0] sm:$0xff]  ;;  %v1399_v50 = vld [vmem:[#allocation14 + $0x5d0] sm:$0xff] }
  0xd4   :  { %v1288_v11 = vld [vmem:[#allocation14 + $0x258] sm:$0xff]  ;;  %v6992_v3 = vpack.c.bf16 %v1333_v59, %v1325_v58  ;;  %v1405_v59 = vld [vmem:[#allocation14 + $0x600] sm:$0xff] }
  0xd6   :  { %1147 = vmatpush1.bf16.msra.mxu0 %v6879_v16  ;;  %1188 = vmatpush1.bf16.msra.mxu1 %v6881_v17  ;;  %v1279_v16 = vld [vmem:[#allocation14 + $0x210] sm:$0xff] }
  0xd7   :  { %1148 = vmatprep.subr.bf16.mxu0 %v6888_v18  ;;  %1189 = vmatprep.subr.bf16.mxu1 %v6890_v19  ;;  %v1287_v17 = vld [vmem:[#allocation14 + $0x250] sm:$0xff]  ;;  %v1294_v18 = vld [vmem:[#allocation14 + $0x288] sm:$0xff] }
  0xd8   :  { %v1302_v19 = vld [vmem:[#allocation14 + $0x2c8] sm:$0xff] }
  0xd9   :  { %v6982_v30 = vpack.c.bf16 %v1302_v19, %v1294_v18  ;;  %v1365_v18 = vld [vmem:[#allocation14 + $0x4c0] sm:$0xff]  ;;  %v1359_v19 = vld [vmem:[#allocation14 + $0x490] sm:$0xff] }
  0xda   :  { %1149 = vmatpush1.bf16.msra.mxu0 %v6887_v26  ;;  %1190 = vmatpush1.bf16.msra.mxu1 %v6889_v28  ;;  %v7042_v26 = vpack.c.bf16 %v1288_v11, %v1280_v10  ;;  %v6980_v28 = vpack.c.bf16 %v1285_v14, %v1277_v13  ;;  %v1358_v10 = vld [vmem:[#allocation14 + $0x488] sm:$0xff]  ;;  %v1368_v13 = vld [vmem:[#allocation14 + $0x4d8] sm:$0xff]  ;;  %v6996_v14 = vpack.c.bf16 %v1349_v6, %v1341_v5  ;;  %v1421_v6 = vld [vmem:[#allocation14 + $0x680] sm:$0xff] }
  0xdb   :  { %6963 = vmatprep.subr.bf16.mxu0 %v6962_v29  ;;  %7027 = vmatprep.subr.bf16.mxu1 %v7026_v33  ;;  %v7044_v29 = vpack.c.bf16 %v1287_v17, %v1279_v16  ;;  %v1295_v33 = vld [vmem:[#allocation14 + $0x290] sm:$0xff]  ;;  %v1366_v11 = vld [vmem:[#allocation14 + $0x4c8] sm:$0xff]  ;;  %v1357_v17 = vld [vmem:[#allocation14 + $0x480] sm:$0xff] }
  0xdc   :  { %v6998_v16 = vpack.c.bf16 %v1366_v11, %v1358_v10  ;;  %v1431_v10 = vld [vmem:[#allocation14 + $0x6d0] sm:$0xff]  ;;  %v1438_v11 = vld [vmem:[#allocation14 + $0x708] sm:$0xff] }
  0xdd   :  { %1151 = vmatmul.mubr.bf16.vlgmr.msra.gmra.mrb[4].mxu0 %v9565_v23  ;;  %1192 = vmatmul.mubr.bf16.vlgmr.msra.gmra.mrb[4].mxu1 %v9565_v23  ;;  %v6972_v23 = vpack.c.bf16 %v1253_v27, %v1245_v55  ;;  %v1336_v55 = vld [vmem:[#allocation14 + $0x3d8] sm:$0xff]  ;;  %v6988_v27 = vpack.c.bf16 %v1317_v46, %v1309_v45  ;;  %v1389_v46 = vld [vmem:[#allocation14 + $0x580] sm:$0xff] }
  0xde   :  { %6965 = vmatpush1.bf16.msra.mxu0 %v6964_v40  ;;  %7029 = vmatpush1.bf16.msra.mxu1 %v7028_v43  ;;  %v1320_v40 = vld [vmem:[#allocation14 + $0x358] sm:$0xff]  ;;  %v7048_v43 = vpack.c.bf16 %v1303_v35, %v1295_v33  ;;  %v1381_v33 = vld [vmem:[#allocation14 + $0x540] sm:$0xff] }
  0xdf   :  { %6967 = vmatprep.subr.bf16.mxu0 %v6966_v44  ;;  %7031 = vmatprep.subr.bf16.mxu1 %v7030_v48  ;;  %v6986_v44 = vpack.c.bf16 %v1318_v42, %v1310_v36  ;;  %v7050_v48 = vpack.c.bf16 %v1320_v40, %v1312_v38  ;;  %v1383_v36 = vld [vmem:[#allocation14 + $0x550] sm:$0xff]  ;;  %v1390_v42 = vld [vmem:[#allocation14 + $0x588] sm:$0xff]  ;;  %v1392_v40 = vld [vmem:[#allocation14 + $0x598] sm:$0xff] }
  0xe0   :  { %1544 = vmatprep.mubr.f32.mxu0 %v9586_v53  ;;  %1615 = vmatprep.mubr.f32.mxu1 %v9586_v53  ;;  %v1398_v38 = vld [vmem:[#allocation14 + $0x5c8] sm:$0xff] }
  0xe1   :  { %v7006_v45 = vpack.c.bf16 %v1398_v38, %v1390_v42  ;;  %v1463_v42 = vld [vmem:[#allocation14 + $0x7d0] sm:$0xff]  ;;  %v1218_v38 = vld [vmem:[#allocation14 + $0x28] sm:$0xff] }
  0xe2   :  { %6969 = vmatpush1.bf16.msra.mxu0 %v6968_v56  ;;  %7033 = vmatpush1.bf16.msra.mxu1 %v7032_v61  ;;  %v7052_v56 = vpack.c.bf16 %v1319_v49, %v1311_v47  ;;  %v7054_v61 = vpack.c.bf16 %v1336_v55, %v1328_v54  ;;  %v1397_v47 = vld [vmem:[#allocation14 + $0x5c0] sm:$0xff]  ;;  %v1414_v54 = vld [vmem:[#allocation14 + $0x648] sm:$0xff]  ;;  %v1408_v55 = vld [vmem:[#allocation14 + $0x618] sm:$0xff] }
  0xe3   :  { %6971 = vmatprep.subr.bf16.mxu0 %v6970_v62  ;;  %7035 = vmatprep.subr.bf16.mxu1 %v7034_v1  ;;  %v1335_v62 = vld [vmem:[#allocation14 + $0x3d0] sm:$0xff]  ;;  %v1344_v1 = vld [vmem:[#allocation14 + $0x418] sm:$0xff]  ;;  %v7010_v58 = vpack.c.bf16 %v1414_v54, %v1406_v52 }
  0xe4   :  { %v1227_v54 = vld [vmem:[#allocation14 + $0x70] sm:$0xff] }
  0xe6   :  { %6973 = vmatpush1.bf16.msra.mxu0 %v6972_v23  ;;  %7037 = vmatpush1.bf16.msra.mxu1 %v7036_v8  ;;  %v7056_v23 = vpack.c.bf16 %v1335_v62, %v1327_v60  ;;  %v7058_v8 = vpack.c.bf16 %v1352_v2, %v1344_v1  ;;  %v1413_v60 = vld [vmem:[#allocation14 + $0x640] sm:$0xff]  ;;  %v1430_v1 = vld [vmem:[#allocation14 + $0x6c8] sm:$0xff]  ;;  %v1424_v2 = vld [vmem:[#allocation14 + $0x698] sm:$0xff] }
  0xe7   :  { %6975 = vmatprep.subr.bf16.mxu0 %v6974_v9  ;;  %7039 = vmatprep.subr.bf16.mxu1 %v7038_v12  ;;  %v1351_v9 = vld [vmem:[#allocation14 + $0x450] sm:$0xff]  ;;  %v1360_v12 = vld [vmem:[#allocation14 + $0x498] sm:$0xff]  ;;  %v7014_v5 = vpack.c.bf16 %v1430_v1, %v1422_v0 }
  0xe8   :  { %v1235_v0 = vld [vmem:[#allocation14 + $0xb0] sm:$0xff] }
  0xea   :  { %6977 = vmatpush1.bf16.msra.mxu0 %v6976_v15  ;;  %7041 = vmatpush1.bf16.msra.mxu1 %v7040_v20  ;;  %v7060_v15 = vpack.c.bf16 %v1351_v9, %v1343_v7  ;;  %v7062_v20 = vpack.c.bf16 %v1368_v13, %v1360_v12  ;;  %v1429_v7 = vld [vmem:[#allocation14 + $0x6c0] sm:$0xff]  ;;  %v1446_v12 = vld [vmem:[#allocation14 + $0x748] sm:$0xff]  ;;  %v1440_v13 = vld [vmem:[#allocation14 + $0x718] sm:$0xff] }
  0xeb   :  { %6979 = vmatprep.subr.bf16.mxu0 %v6978_v21  ;;  %7043 = vmatprep.subr.bf16.mxu1 %v7042_v26  ;;  %v1367_v21 = vld [vmem:[#allocation14 + $0x4d0] sm:$0xff]  ;;  %v1376_v26 = vld [vmem:[#allocation14 + $0x518] sm:$0xff] }
  0xee   :  { %6981 = vmatpush1.bf16.msra.mxu0 %v6980_v28  ;;  %7045 = vmatpush1.bf16.msra.mxu1 %v7044_v29  ;;  %v1384_v28 = vld [vmem:[#allocation14 + $0x558] sm:$0xff]  ;;  %v7000_v29 = vpack.c.bf16 %v1365_v18, %v1357_v17  ;;  %v7018_v17 = vpack.c.bf16 %v1446_v12, %v1438_v11  ;;  %v1437_v18 = vld [vmem:[#allocation14 + $0x700] sm:$0xff]  ;;  %v1259_v12 = vld [vmem:[#allocation14 + $0x170] sm:$0xff] }
  0xef   :  { %6983 = vmatprep.subr.bf16.mxu0 %v6982_v30  ;;  %7047 = vmatprep.subr.bf16.mxu1 %v7046_v34  ;;  %v7064_v30 = vpack.c.bf16 %v1367_v21, %v1359_v19  ;;  %v1375_v34 = vld [vmem:[#allocation14 + $0x510] sm:$0xff]  ;;  %v7066_v35 = vpack.c.bf16 %v1384_v28, %v1376_v26  ;;  %v1445_v19 = vld [vmem:[#allocation14 + $0x740] sm:$0xff]  ;;  %v1462_v26 = vld [vmem:[#allocation14 + $0x7c8] sm:$0xff] }
  0xf0   :  { %v1456_v28 = vld [vmem:[#allocation14 + $0x798] sm:$0xff] }
  0xf2   :  { %6985 = vmatpush1.bf16.msra.mxu0 %v6984_v41  ;;  %7049 = vmatpush1.bf16.msra.mxu1 %v7048_v43  ;;  %v1400_v41 = vld [vmem:[#allocation14 + $0x5d8] sm:$0xff]  ;;  %v7004_v43 = vpack.c.bf16 %v1381_v33, %v1373_v32  ;;  %v7022_v32 = vpack.c.bf16 %v1462_v26, %v1454_v25  ;;  %v1453_v33 = vld [vmem:[#allocation14 + $0x780] sm:$0xff]  ;;  %v1275_v26 = vld [vmem:[#allocation14 + $0x1f0] sm:$0xff] }
  0xf3   :  { %6987 = vmatprep.subr.bf16.mxu0 %v6986_v44  ;;  %7051 = vmatprep.subr.bf16.mxu1 %v7050_v48  ;;  %v7068_v44 = vpack.c.bf16 %v1383_v36, %v1375_v34  ;;  %v1391_v48 = vld [vmem:[#allocation14 + $0x590] sm:$0xff]  ;;  %v7070_v49 = vpack.c.bf16 %v1400_v41, %v1392_v40  ;;  %v1461_v34 = vld [vmem:[#allocation14 + $0x7c0] sm:$0xff]  ;;  %v1226_v40 = vld [vmem:[#allocation14 + $0x68] sm:$0xff]  ;;  %v9593_v41 = vsub.s32 0, %v9577_v22 }
  0xf6   :  { %6989 = vmatpush1.bf16.msra.mxu0 %v6988_v27  ;;  %7053 = vmatpush1.bf16.msra.mxu1 %v7052_v56  ;;  %v1416_v27 = vld [vmem:[#allocation14 + $0x658] sm:$0xff]  ;;  %v7008_v56 = vpack.c.bf16 %v1397_v47, %v1389_v46  ;;  %v7090_v47 = vpack.c.bf16 %v1226_v40, %v1218_v38  ;;  %v1291_v38 = vld [vmem:[#allocation14 + $0x270] sm:$0xff]  ;;  %v1298_v40 = vld [vmem:[#allocation14 + $0x2a8] sm:$0xff] }
  0xf7   :  { %6991 = vmatprep.subr.bf16.mxu0 %v6990_v57  ;;  %7055 = vmatprep.subr.bf16.mxu1 %v7054_v61  ;;  %v7072_v57 = vpack.c.bf16 %v1399_v50, %v1391_v48  ;;  %v1407_v61 = vld [vmem:[#allocation14 + $0x610] sm:$0xff]  ;;  %v7074_v62 = vpack.c.bf16 %v1416_v27, %v1408_v55  ;;  %v1217_v48 = vld [vmem:[#allocation14 + $0x20] sm:$0xff]  ;;  %v1234_v55 = vld [vmem:[#allocation14 + $0xa8] sm:$0xff] }
  0xf8   :  { %v1219_v50 = vld [vmem:[#allocation14 + $0x30] sm:$0xff]  ;;  %v1242_v27 = vld [vmem:[#allocation14 + $0xe8] sm:$0xff] }
  0xfa   :  { %6993 = vmatpush1.bf16.msra.mxu0 %v6992_v3  ;;  %7057 = vmatpush1.bf16.msra.mxu1 %v7056_v23  ;;  %v1432_v3 = vld [vmem:[#allocation14 + $0x6d8] sm:$0xff]  ;;  %v7012_v23 = vpack.c.bf16 %v1413_v60, %v1405_v59  ;;  %v7156_v60 = vpack.c.bf16 %v1227_v54, %v1219_v50  ;;  %v1305_v50 = vld [vmem:[#allocation14 + $0x2e0] sm:$0xff] }
  0xfb   :  { %6995 = vmatprep.subr.bf16.mxu0 %v6994_v4  ;;  %7059 = vmatprep.subr.bf16.mxu1 %v7058_v8  ;;  %v7076_v4 = vpack.c.bf16 %v1415_v63, %v1407_v61  ;;  %v1423_v8 = vld [vmem:[#allocation14 + $0x690] sm:$0xff]  ;;  %v7078_v9 = vpack.c.bf16 %v1432_v3, %v1424_v2  ;;  %v7094_v61 = vpack.c.bf16 %v1242_v27, %v1234_v55  ;;  %v1241_v63 = vld [vmem:[#allocation14 + $0xe0] sm:$0xff]  ;;  %v1250_v3 = vld [vmem:[#allocation14 + $0x128] sm:$0xff] }
  0xfc   :  { %v1243_v2 = vld [vmem:[#allocation14 + $0xf0] sm:$0xff]  ;;  %v1314_v27 = vld [vmem:[#allocation14 + $0x328] sm:$0xff] }
  0xfd   :  { %v1307_v55 = vld [vmem:[#allocation14 + $0x2f0] sm:$0xff] }
  0xfe   :  { %6997 = vmatpush1.bf16.msra.mxu0 %v6996_v14  ;;  %7061 = vmatpush1.bf16.msra.mxu1 %v7060_v15  ;;  %v1448_v14 = vld [vmem:[#allocation14 + $0x758] sm:$0xff]  ;;  %v7016_v15 = vpack.c.bf16 %v1429_v7, %v1421_v6  ;;  %v7160_v6 = vpack.c.bf16 %v1243_v2, %v1235_v0  ;;  %v1321_v0 = vld [vmem:[#allocation14 + $0x360] sm:$0xff] }
  0xff   :  { %6999 = vmatprep.subr.bf16.mxu0 %v6998_v16  ;;  %7063 = vmatprep.subr.bf16.mxu1 %v7062_v20  ;;  %v7080_v16 = vpack.c.bf16 %v1431_v10, %v1423_v8  ;;  %v1439_v20 = vld [vmem:[#allocation14 + $0x710] sm:$0xff]  ;;  %v7082_v21 = vpack.c.bf16 %v1448_v14, %v1440_v13  ;;  %v1249_v8 = vld [vmem:[#allocation14 + $0x120] sm:$0xff]  ;;  %v1266_v13 = vld [vmem:[#allocation14 + $0x1a8] sm:$0xff] }
 0x100   :  { %v1251_v10 = vld [vmem:[#allocation14 + $0x130] sm:$0xff]  ;;  %v1274_v14 = vld [vmem:[#allocation14 + $0x1e8] sm:$0xff] }
 0x102   :  { %7001 = vmatpush1.bf16.msra.mxu0 %v7000_v29  ;;  %7065 = vmatpush1.bf16.msra.mxu1 %v7064_v30  ;;  %v1464_v29 = vld [vmem:[#allocation14 + $0x7d8] sm:$0xff]  ;;  %v7020_v30 = vpack.c.bf16 %v1445_v19, %v1437_v18  ;;  %v7164_v18 = vpack.c.bf16 %v1259_v12, %v1251_v10  ;;  %v7102_v19 = vpack.c.bf16 %v1274_v14, %v1266_v13  ;;  %v1337_v10 = vld [vmem:[#allocation14 + $0x3e0] sm:$0xff]  ;;  %v1339_v13 = vld [vmem:[#allocation14 + $0x3f0] sm:$0xff] }
 0x103   :  { %7003 = vmatprep.subr.bf16.mxu0 %v7002_v31  ;;  %7067 = vmatprep.subr.bf16.mxu1 %v7066_v35  ;;  %v7084_v31 = vpack.c.bf16 %v1447_v24, %v1439_v20  ;;  %v1455_v35 = vld [vmem:[#allocation14 + $0x790] sm:$0xff]  ;;  %v7086_v36 = vpack.c.bf16 %v1464_v29, %v1456_v28  ;;  %v1265_v20 = vld [vmem:[#allocation14 + $0x1a0] sm:$0xff]  ;;  %v1282_v28 = vld [vmem:[#allocation14 + $0x228] sm:$0xff] }
 0x104   :  { %v7088_v46 = vpack.c.bf16 %v1463_v42, %v1455_v35  ;;  %v1267_v24 = vld [vmem:[#allocation14 + $0x1b0] sm:$0xff]  ;;  %v1290_v29 = vld [vmem:[#allocation14 + $0x268] sm:$0xff]  ;;  %v1289_v35 = vld [vmem:[#allocation14 + $0x260] sm:$0xff] }
 0x105   :  { %v1346_v14 = vld [vmem:[#allocation14 + $0x428] sm:$0xff] }
 0x106   :  { %7005 = vmatpush1.bf16.msra.mxu0 %v7004_v43  ;;  %7069 = vmatpush1.bf16.msra.mxu1 %v7068_v44  ;;  %v1220_v43 = vld [vmem:[#allocation14 + $0x38] sm:$0xff] }
 0x107   :  { %7007 = vmatprep.subr.bf16.mxu0 %v7006_v45  ;;  %7071 = vmatprep.subr.bf16.mxu1 %v7070_v49  ;;  %v1228_v44 = vld [vmem:[#allocation14 + $0x78] sm:$0xff]  ;;  %v7024_v45 = vpack.c.bf16 %v1461_v34, %v1453_v33  ;;  %v1225_v49 = vld [vmem:[#allocation14 + $0x60] sm:$0xff]  ;;  %v7106_v33 = vpack.c.bf16 %v1290_v29, %v1282_v28  ;;  %v1355_v28 = vld [vmem:[#allocation14 + $0x470] sm:$0xff] }
 0x108   :  { %v7154_v52 = vpack.c.bf16 %v1228_v44, %v1220_v43  ;;  %v7092_v59 = vpack.c.bf16 %v1225_v49, %v1217_v48  ;;  %v1281_v34 = vld [vmem:[#allocation14 + $0x220] sm:$0xff]  ;;  %v1306_v43 = vld [vmem:[#allocation14 + $0x2e8] sm:$0xff]  ;;  %v1300_v44 = vld [vmem:[#allocation14 + $0x2b8] sm:$0xff] }
 0x109   :  { %v7110_v48 = vpack.c.bf16 %v1306_v43, %v1298_v40  ;;  %v1297_v49 = vld [vmem:[#allocation14 + $0x2a0] sm:$0xff]  ;;  %v1362_v29 = vld [vmem:[#allocation14 + $0x4a8] sm:$0xff]  ;;  %v1371_v40 = vld [vmem:[#allocation14 + $0x4f0] sm:$0xff] }
 0x10a   :  { %7009 = vmatpush1.bf16.msra.mxu0 %v7008_v56  ;;  %7073 = vmatpush1.bf16.msra.mxu1 %v7072_v57  ;;  %v9597_v56 = vrot.slane %v9582_v39, %v9593_v41  ;;  %v1236_v57 = vld [vmem:[#allocation14 + $0xb8] sm:$0xff]  ;;  %v1378_v43 = vld [vmem:[#allocation14 + $0x528] sm:$0xff] }
 0x10b   :  { %7011 = vmatprep.subr.bf16.mxu0 %v7010_v58  ;;  %7075 = vmatprep.subr.bf16.mxu1 %v7074_v62  ;;  %v1244_v58 = vld [vmem:[#allocation14 + $0xf8] sm:$0xff]  ;;  %v1233_v62 = vld [vmem:[#allocation14 + $0xa0] sm:$0xff] }
 0x10c   :  { %v7158_v1 = vpack.c.bf16 %v1244_v58, %v1236_v57  ;;  %v1252_v39 = vld [vmem:[#allocation14 + $0x138] sm:$0xff]  ;;  %v1322_v57 = vld [vmem:[#allocation14 + $0x368] sm:$0xff] }
 0x10d   :  { %v1316_v58 = vld [vmem:[#allocation14 + $0x338] sm:$0xff] }
 0x10e   :  { %7013 = vmatpush1.bf16.msra.mxu0 %v7012_v23  ;;  %7077 = vmatpush1.bf16.msra.mxu1 %v7076_v4  ;;  %v1258_v23 = vld [vmem:[#allocation14 + $0x168] sm:$0xff]  ;;  %v1260_v4 = vld [vmem:[#allocation14 + $0x178] sm:$0xff] }
 0x10f   :  { %7015 = vmatprep.subr.bf16.mxu0 %v7014_v5  ;;  %7079 = vmatprep.subr.bf16.mxu1 %v7078_v9  ;;  %v7096_v5 = vpack.c.bf16 %v1241_v63, %v1233_v62  ;;  %v7098_v7 = vpack.c.bf16 %v1258_v23, %v1250_v3  ;;  %v1257_v9 = vld [vmem:[#allocation14 + $0x160] sm:$0xff]  ;;  %v7162_v11 = vpack.c.bf16 %v1260_v4, %v1252_v39  ;;  %v1323_v3 = vld [vmem:[#allocation14 + $0x370] sm:$0xff]  ;;  %v1330_v23 = vld [vmem:[#allocation14 + $0x3a8] sm:$0xff] }
 0x110   :  { %v7114_v62 = vpack.c.bf16 %v1322_v57, %v1314_v27  ;;  %v1313_v63 = vld [vmem:[#allocation14 + $0x320] sm:$0xff]  ;;  %v1338_v39 = vld [vmem:[#allocation14 + $0x3e8] sm:$0xff]  ;;  %v1332_v4 = vld [vmem:[#allocation14 + $0x3b8] sm:$0xff] }
 0x111   :  { %v1387_v27 = vld [vmem:[#allocation14 + $0x570] sm:$0xff]  ;;  %v1394_v57 = vld [vmem:[#allocation14 + $0x5a8] sm:$0xff] }
 0x112   :  { %7017 = vmatpush1.bf16.msra.mxu0 %v7016_v15  ;;  %7081 = vmatpush1.bf16.msra.mxu1 %v7080_v16  ;;  %v1268_v15 = vld [vmem:[#allocation14 + $0x1b8] sm:$0xff] }
 0x113   :  { %7019 = vmatprep.subr.bf16.mxu0 %v7018_v17  ;;  %7083 = vmatprep.subr.bf16.mxu1 %v7082_v21  ;;  %v1276_v16 = vld [vmem:[#allocation14 + $0x1f8] sm:$0xff]  ;;  %v7100_v17 = vpack.c.bf16 %v1257_v9, %v1249_v8  ;;  %v1273_v21 = vld [vmem:[#allocation14 + $0x1e0] sm:$0xff]  ;;  %v7118_v8 = vpack.c.bf16 %v1338_v39, %v1330_v23  ;;  %v1403_v23 = vld [vmem:[#allocation14 + $0x5f0] sm:$0xff] }
 0x114   :  { %v7166_v25 = vpack.c.bf16 %v1276_v16, %v1268_v15  ;;  %v1329_v9 = vld [vmem:[#allocation14 + $0x3a0] sm:$0xff]  ;;  %v1354_v15 = vld [vmem:[#allocation14 + $0x468] sm:$0xff]  ;;  %v1348_v16 = vld [vmem:[#allocation14 + $0x438] sm:$0xff] }
 0x115   :  { %v1410_v39 = vld [vmem:[#allocation14 + $0x628] sm:$0xff] }
 0x116   :  { %7021 = vmatpush1.bf16.msra.mxu0 %v7020_v30  ;;  %7085 = vmatpush1.bf16.msra.mxu1 %v7084_v31  ;;  %v1284_v30 = vld [vmem:[#allocation14 + $0x238] sm:$0xff] }
 0x117   :  { %7023 = vmatprep.subr.bf16.mxu0 %v7022_v32  ;;  %7087 = vmatprep.subr.bf16.mxu1 %v7086_v36  ;;  %v1292_v31 = vld [vmem:[#allocation14 + $0x278] sm:$0xff]  ;;  %v7104_v32 = vpack.c.bf16 %v1273_v21, %v1265_v20  ;;  %v1283_v36 = vld [vmem:[#allocation14 + $0x230] sm:$0xff]  ;;  %v7122_v20 = vpack.c.bf16 %v1354_v15, %v1346_v14  ;;  %v1345_v21 = vld [vmem:[#allocation14 + $0x420] sm:$0xff] }
 0x118   :  { %v7170_v42 = vpack.c.bf16 %v1292_v31, %v1284_v30  ;;  %v1370_v30 = vld [vmem:[#allocation14 + $0x4e8] sm:$0xff]  ;;  %v1364_v31 = vld [vmem:[#allocation14 + $0x4b8] sm:$0xff]  ;;  %v1419_v14 = vld [vmem:[#allocation14 + $0x670] sm:$0xff] }
 0x119   :  { %v1426_v15 = vld [vmem:[#allocation14 + $0x6a8] sm:$0xff] }
 0x11a   :  { %7025 = vmatpush1.bf16.msra.mxu0 %v7024_v45  ;;  %7089 = vmatpush1.bf16.msra.mxu1 %v7088_v46  ;;  %v1308_v45 = vld [vmem:[#allocation14 + $0x2f8] sm:$0xff]  ;;  %v7108_v46 = vpack.c.bf16 %v1289_v35, %v1281_v34  ;;  %v7126_v34 = vpack.c.bf16 %v1370_v30, %v1362_v29  ;;  %v1361_v35 = vld [vmem:[#allocation14 + $0x4a0] sm:$0xff]  ;;  %v1435_v29 = vld [vmem:[#allocation14 + $0x6f0] sm:$0xff] }
 0x11b   :  { %7091 = vmatprep.subr.bf16.mxu0 %v7090_v47  ;;  %7155 = vmatprep.subr.bf16.mxu1 %v7154_v52  ;;  %v7172_v47 = vpack.c.bf16 %v1291_v38, %v1283_v36  ;;  %v1299_v52 = vld [vmem:[#allocation14 + $0x2b0] sm:$0xff]  ;;  %v7174_v54 = vpack.c.bf16 %v1308_v45, %v1300_v44  ;;  %v1369_v36 = vld [vmem:[#allocation14 + $0x4e0] sm:$0xff]  ;;  %v1386_v44 = vld [vmem:[#allocation14 + $0x568] sm:$0xff] }
 0x11c   :  { %v1380_v45 = vld [vmem:[#allocation14 + $0x538] sm:$0xff]  ;;  %v1442_v30 = vld [vmem:[#allocation14 + $0x728] sm:$0xff] }
 0x11d   :  { %1545 = vmatmul.mubr.f32.vlgmr.msra.gmra.mrb[8].mxu0 %v9597_v56  ;;  %1616 = vmatmul.mubr.f32.vlgmr.msra.gmra.mrb[8].mxu1 %v9597_v56 }
 0x11e   :  { %7093 = vmatpush1.bf16.msra.mxu0 %v7092_v59  ;;  %7157 = vmatpush1.bf16.msra.mxu1 %v7156_v60  ;;  %v1324_v59 = vld [vmem:[#allocation14 + $0x378] sm:$0xff]  ;;  %v7112_v60 = vpack.c.bf16 %v1305_v50, %v1297_v49  ;;  %v7130_v49 = vpack.c.bf16 %v1386_v44, %v1378_v43  ;;  %v1377_v50 = vld [vmem:[#allocation14 + $0x520] sm:$0xff]  ;;  %v1451_v43 = vld [vmem:[#allocation14 + $0x770] sm:$0xff] }
 0x11f   :  { %7095 = vmatprep.subr.bf16.mxu0 %v7094_v61  ;;  %7159 = vmatprep.subr.bf16.mxu1 %v7158_v1  ;;  %v7176_v61 = vpack.c.bf16 %v1307_v55, %v1299_v52  ;;  %v1315_v1 = vld [vmem:[#allocation14 + $0x330] sm:$0xff]  ;;  %v7178_v2 = vpack.c.bf16 %v1324_v59, %v1316_v58  ;;  %v1385_v52 = vld [vmem:[#allocation14 + $0x560] sm:$0xff]  ;;  %v1402_v58 = vld [vmem:[#allocation14 + $0x5e8] sm:$0xff] }
 0x120   :  { %1686 = vmatprep.mubr.f32.mxu0 %v9586_v53  ;;  %1757 = vmatprep.mubr.f32.mxu1 %v9586_v53  ;;  %v7168_v53 = vpack.c.bf16 %v1275_v26, %v1267_v24  ;;  %v1353_v24 = vld [vmem:[#allocation14 + $0x460] sm:$0xff]  ;;  %v1396_v59 = vld [vmem:[#allocation14 + $0x5b8] sm:$0xff]  ;;  %v1458_v44 = vld [vmem:[#allocation14 + $0x7a8] sm:$0xff] }
 0x122   :  { %7097 = vmatpush1.bf16.msra.mxu0 %v7096_v5  ;;  %7161 = vmatpush1.bf16.msra.mxu1 %v7160_v6  ;;  %v1340_v5 = vld [vmem:[#allocation14 + $0x3f8] sm:$0xff]  ;;  %v7116_v6 = vpack.c.bf16 %v1321_v0, %v1313_v63  ;;  %v7134_v63 = vpack.c.bf16 %v1402_v58, %v1394_v57  ;;  %v1393_v0 = vld [vmem:[#allocation14 + $0x5a0] sm:$0xff]  ;;  %v1467_v57 = vld [vmem:[#allocation14 + $0x7f0] sm:$0xff] }
 0x123   :  { %7099 = vmatprep.subr.bf16.mxu0 %v7098_v7  ;;  %7163 = vmatprep.subr.bf16.mxu1 %v7162_v11  ;;  %v7180_v7 = vpack.c.bf16 %v1323_v3, %v1315_v1  ;;  %v1331_v11 = vld [vmem:[#allocation14 + $0x3b0] sm:$0xff]  ;;  %v7182_v12 = vpack.c.bf16 %v1340_v5, %v1332_v4  ;;  %v1401_v1 = vld [vmem:[#allocation14 + $0x5e0] sm:$0xff]  ;;  %v1418_v4 = vld [vmem:[#allocation14 + $0x668] sm:$0xff] }
 0x124   :  { %v1412_v5 = vld [vmem:[#allocation14 + $0x638] sm:$0xff] }
 0x126   :  { %7101 = vmatpush1.bf16.msra.mxu0 %v7100_v17  ;;  %7165 = vmatpush1.bf16.msra.mxu1 %v7164_v18  ;;  %v1356_v17 = vld [vmem:[#allocation14 + $0x478] sm:$0xff]  ;;  %v7120_v18 = vpack.c.bf16 %v1337_v10, %v1329_v9  ;;  %v7138_v9 = vpack.c.bf16 %v1418_v4, %v1410_v39  ;;  %v1409_v10 = vld [vmem:[#allocation14 + $0x620] sm:$0xff] }
 0x127   :  { %7103 = vmatprep.subr.bf16.mxu0 %v7102_v19  ;;  %7167 = vmatprep.subr.bf16.mxu1 %v7166_v25  ;;  %v7184_v19 = vpack.c.bf16 %v1339_v13, %v1331_v11  ;;  %v1347_v25 = vld [vmem:[#allocation14 + $0x430] sm:$0xff]  ;;  %v7186_v26 = vpack.c.bf16 %v1356_v17, %v1348_v16  ;;  %v1417_v11 = vld [vmem:[#allocation14 + $0x660] sm:$0xff]  ;;  %v1434_v16 = vld [vmem:[#allocation14 + $0x6e8] sm:$0xff] }
 0x128   :  { %v1428_v17 = vld [vmem:[#allocation14 + $0x6b8] sm:$0xff] }
 0x12a   :  { %7105 = vmatpush1.bf16.msra.mxu0 %v7104_v32  ;;  %7169 = vmatpush1.bf16.msra.mxu1 %v7168_v53  ;;  %v1372_v32 = vld [vmem:[#allocation14 + $0x4f8] sm:$0xff]  ;;  %v7124_v53 = vpack.c.bf16 %v1353_v24, %v1345_v21  ;;  %v7142_v21 = vpack.c.bf16 %v1434_v16, %v1426_v15  ;;  %v1425_v24 = vld [vmem:[#allocation14 + $0x6a0] sm:$0xff] }
 0x12b   :  { %7107 = vmatprep.subr.bf16.mxu0 %v7106_v33  ;;  %7171 = vmatprep.subr.bf16.mxu1 %v7170_v42  ;;  %v7188_v33 = vpack.c.bf16 %v1355_v28, %v1347_v25  ;;  %v1363_v42 = vld [vmem:[#allocation14 + $0x4b0] sm:$0xff]  ;;  %v7190_v38 = vpack.c.bf16 %v1372_v32, %v1364_v31  ;;  %v1433_v25 = vld [vmem:[#allocation14 + $0x6e0] sm:$0xff]  ;;  %v1450_v31 = vld [vmem:[#allocation14 + $0x768] sm:$0xff] }
 0x12c   :  { %v1444_v32 = vld [vmem:[#allocation14 + $0x738] sm:$0xff] }
 0x12d   :  { %v1883_v16 = vld [vmem:[#allocation14 + $0x58] sm:$0xff] }
 0x12e   :  { %7109 = vmatpush1.bf16.msra.mxu0 %v7108_v46  ;;  %7173 = vmatpush1.bf16.msra.mxu1 %v7172_v47  ;;  %v1388_v46 = vld [vmem:[#allocation14 + $0x578] sm:$0xff]  ;;  %v7128_v47 = vpack.c.bf16 %v1369_v36, %v1361_v35  ;;  %v7146_v35 = vpack.c.bf16 %v1450_v31, %v1442_v30  ;;  %v1441_v36 = vld [vmem:[#allocation14 + $0x720] sm:$0xff]  ;;  %v1874_v30 = vld [vmem:[#allocation14 + $0x10] sm:$0xff] }
 0x12f   :  { %7111 = vmatprep.subr.bf16.mxu0 %v7110_v48  ;;  %7175 = vmatprep.subr.bf16.mxu1 %v7174_v54  ;;  %v7192_v48 = vpack.c.bf16 %v1371_v40, %v1363_v42  ;;  %v1379_v54 = vld [vmem:[#allocation14 + $0x530] sm:$0xff]  ;;  %v7194_v55 = vpack.c.bf16 %v1388_v46, %v1380_v45  ;;  %v1449_v42 = vld [vmem:[#allocation14 + $0x760] sm:$0xff]  ;;  %v1466_v45 = vld [vmem:[#allocation14 + $0x7e8] sm:$0xff] }
 0x130   :  { %v1460_v46 = vld [vmem:[#allocation14 + $0x7b8] sm:$0xff] }
 0x132   :  { %7113 = vmatpush1.bf16.msra.mxu0 %v7112_v60  ;;  %7177 = vmatpush1.bf16.msra.mxu1 %v7176_v61  ;;  %v1404_v60 = vld [vmem:[#allocation14 + $0x5f8] sm:$0xff]  ;;  %v7132_v61 = vpack.c.bf16 %v1385_v52, %v1377_v50  ;;  %v7150_v50 = vpack.c.bf16 %v1466_v45, %v1458_v44  ;;  %v1457_v52 = vld [vmem:[#allocation14 + $0x7a0] sm:$0xff]  ;;  %v1889_v45 = vld [vmem:[#allocation14 + $0x88] sm:$0xff] }
 0x133   :  { %7115 = vmatprep.subr.bf16.mxu0 %v7114_v62  ;;  %7179 = vmatprep.subr.bf16.mxu1 %v7178_v2  ;;  %v7196_v62 = vpack.c.bf16 %v1387_v27, %v1379_v54  ;;  %v1395_v2 = vld [vmem:[#allocation14 + $0x5b0] sm:$0xff]  ;;  %v7198_v3 = vpack.c.bf16 %v1404_v60, %v1396_v59  ;;  %v1465_v54 = vld [vmem:[#allocation14 + $0x7e0] sm:$0xff] }
 0x134   :  { %v1459_v27 = vld [vmem:[#allocation14 + $0x7b0] sm:$0xff]  ;;  %v7152_v58 = vpack.c.bf16 %v1465_v54, %v1457_v52  ;;  %v354_v60 = vld [vmem:[%s9891_s6] sm:$0xff]  ;;  %v1899_v54 = vld [vmem:[#allocation14 + $0xd8] sm:$0xff] }
 0x135   :  { %v7216_v59 = vpack.c.bf16 %v1467_v57, %v1459_v27  ;;  %v1896_v27 = vld [vmem:[#allocation14 + $0xc0] sm:$0xff] }
 0x136   :  { %7117 = vmatpush1.bf16.msra.mxu0 %v7116_v6  ;;  %7181 = vmatpush1.bf16.msra.mxu1 %v7180_v7  ;;  %v1420_v6 = vld [vmem:[#allocation14 + $0x678] sm:$0xff]  ;;  %v7136_v7 = vpack.c.bf16 %v1401_v1, %v1393_v0  ;;  %v363_v1 = vrot.slane %v354_v60, %v9580_v37 }
 0x137   :  { %7119 = vmatprep.subr.bf16.mxu0 %v7118_v8  ;;  %7183 = vmatprep.subr.bf16.mxu1 %v7182_v12  ;;  %v7200_v8 = vpack.c.bf16 %v1403_v23, %v1395_v2  ;;  %v1411_v12 = vld [vmem:[#allocation14 + $0x630] sm:$0xff]  ;;  %v7202_v13 = vpack.c.bf16 %v1420_v6, %v1412_v5 }
 0x13a   :  { %7121 = vmatpush1.bf16.msra.mxu0 %v7120_v18  ;;  %7185 = vmatpush1.bf16.msra.mxu1 %v7184_v19  ;;  %v1436_v18 = vld [vmem:[#allocation14 + $0x6f8] sm:$0xff]  ;;  %v7140_v19 = vpack.c.bf16 %v1417_v11, %v1409_v10 }
 0x13b   :  { %7123 = vmatprep.subr.bf16.mxu0 %v7122_v20  ;;  %7187 = vmatprep.subr.bf16.mxu1 %v7186_v26  ;;  %v7204_v20 = vpack.c.bf16 %v1419_v14, %v1411_v12  ;;  %v1427_v26 = vld [vmem:[#allocation14 + $0x6b0] sm:$0xff]  ;;  %v7206_v28 = vpack.c.bf16 %v1436_v18, %v1428_v17  ;;  %v1873_v12 = vld [vmem:[#allocation14 + $0x8] sm:$0xff]  ;;  %v1875_v14 = vld [vmem:[#allocation14 + $0x18] sm:$0xff]  ;;  %v374_v18 = vsub.s32 4, %v9577_v22 }
 0x13c   :  { %v7282_v17 = vpack.c.bf16 %v1883_v16, %v1875_v14  ;;  %v1928_v14 = vld [vmem:[#allocation14 + $0x1c0] sm:$0xff] }
 0x13e   :  { %7125 = vmatpush1.bf16.msra.mxu0 %v7124_v53  ;;  %7189 = vmatpush1.bf16.msra.mxu1 %v7188_v33  ;;  %v1452_v53 = vld [vmem:[#allocation14 + $0x778] sm:$0xff]  ;;  %v7144_v33 = vpack.c.bf16 %v1433_v25, %v1425_v24  ;;  %v375_v24 = vrot.slane %v354_v60, %v374_v18  ;;  %v1930_v18 = vld [vmem:[#allocation14 + $0x1d0] sm:$0xff] }
 0x13f   :  { %7127 = vmatprep.subr.bf16.mxu0 %v7126_v34  ;;  %7191 = vmatprep.subr.bf16.mxu1 %v7190_v38  ;;  %v7208_v34 = vpack.c.bf16 %v1435_v29, %v1427_v26  ;;  %v1443_v38 = vld [vmem:[#allocation14 + $0x730] sm:$0xff]  ;;  %v7210_v40 = vpack.c.bf16 %v1452_v53, %v1444_v32  ;;  %v1880_v29 = vld [vmem:[#allocation14 + $0x40] sm:$0xff] }
 0x140   :  { %v1882_v53 = vld [vmem:[#allocation14 + $0x50] sm:$0xff] }
 0x142   :  { %7129 = vmatpush1.bf16.msra.mxu0 %v7128_v47  ;;  %7193 = vmatpush1.bf16.msra.mxu1 %v7192_v48  ;;  %v1468_v47 = vld [vmem:[#allocation14 + $0x7f8] sm:$0xff]  ;;  %v7148_v48 = vpack.c.bf16 %v1449_v42, %v1441_v36 }
 0x143   :  { %7131 = vmatprep.subr.bf16.mxu0 %v7130_v49  ;;  %7195 = vmatprep.subr.bf16.mxu1 %v7194_v55  ;;  %v7212_v49 = vpack.c.bf16 %v1451_v43, %v1443_v38  ;;  %v7214_v55 = vpack.c.bf16 %v1468_v47, %v1460_v46  ;;  %v1897_v46 = vld [vmem:[#allocation14 + $0xc8] sm:$0xff]  ;;  %v1891_v47 = vld [vmem:[#allocation14 + $0x98] sm:$0xff] }
 0x144   :  { %v7222_v52 = vpack.c.bf16 %v1897_v46, %v1889_v45  ;;  %v1954_v46 = vld [vmem:[#allocation14 + $0x290] sm:$0xff] }
 0x146   :  { %7133 = vmatpush1.bf16.msra.mxu0 %v7132_v61  ;;  %7197 = vmatpush1.bf16.msra.mxu1 %v7196_v62  ;;  %v366_v61 = vsub.s32 2, %v9577_v22  ;;  %v370_v62 = vsub.s32 3, %v9577_v22 }
 0x147   :  { %7135 = vmatprep.subr.bf16.mxu0 %v7134_v63  ;;  %7199 = vmatprep.subr.bf16.mxu1 %v7198_v3  ;;  %v359_v63 = vrot.slane %v354_v60, %v9593_v41 }
 0x148   :  { %v367_v0 = vrot.slane %v354_v60, %v366_v61  ;;  %v371_v2 = vrot.slane %v354_v60, %v370_v62  ;;  %v1898_v61 = vld [vmem:[#allocation14 + $0xd0] sm:$0xff] }
 0x14a   :  { %7137 = vmatpush1.bf16.msra.mxu0 %v7136_v7  ;;  %7201 = vmatpush1.bf16.msra.mxu1 %v7200_v8 }
 0x14b   :  { %7139 = vmatprep.subr.bf16.mxu0 %v7138_v9  ;;  %7203 = vmatprep.subr.bf16.mxu1 %v7202_v13  ;;  %v1881_v13 = vld [vmem:[#allocation14 + $0x48] sm:$0xff] }
 0x14c   :  { %v7218_v15 = vpack.c.bf16 %v1881_v13, %v1873_v12  ;;  %v1931_v12 = vld [vmem:[#allocation14 + $0x1d8] sm:$0xff]  ;;  %v1920_v13 = vld [vmem:[#allocation14 + $0x180] sm:$0xff] }
 0x14d   :  { %v7232_v16 = vpack.c.bf16 %v1928_v14, %v1920_v13  ;;  %v2000_v13 = vld [vmem:[#allocation14 + $0x400] sm:$0xff] }
 0x14e   :  { %7141 = vmatpush1.bf16.msra.mxu0 %v7140_v19  ;;  %7205 = vmatpush1.bf16.msra.mxu1 %v7204_v20  ;;  %v382_v19 = vsub.s32 6, %v9577_v22  ;;  %v378_v20 = vsub.s32 5, %v9577_v22  ;;  %v2008_v14 = vld [vmem:[#allocation14 + $0x440] sm:$0xff] }
 0x14f   :  { %7143 = vmatprep.subr.bf16.mxu0 %v7142_v21  ;;  %7207 = vmatprep.subr.bf16.mxu1 %v7206_v28  ;;  %v386_v21 = vsub.s32 7, %v9577_v22  ;;  %v1872_v28 = vld [vmem:[#allocation14] sm:$0xff] }
 0x150   :  { %v383_v25 = vrot.slane %v354_v60, %v382_v19  ;;  %v379_v26 = vrot.slane %v354_v60, %v378_v20  ;;  %v7220_v32 = vpack.c.bf16 %v1880_v29, %v1872_v28  ;;  %v1937_v20 = vld [vmem:[#allocation14 + $0x208] sm:$0xff]  ;;  %v1936_v28 = vld [vmem:[#allocation14 + $0x200] sm:$0xff] }
 0x151   :  { %v387_v31 = vrot.slane %v354_v60, %v386_v21  ;;  %v1890_v60 = vld [vmem:[#allocation14 + $0x90] sm:$0xff]  ;;  %v1945_v21 = vld [vmem:[#allocation14 + $0x248] sm:$0xff]  ;;  %v1944_v29 = vld [vmem:[#allocation14 + $0x240] sm:$0xff] }
 0x152   :  { %7145 = vmatpush1.bf16.msra.mxu0 %v7144_v33  ;;  %7209 = vmatpush1.bf16.msra.mxu1 %v7208_v34  ;;  %v7284_v34 = vpack.c.bf16 %v1882_v53, %v1874_v30  ;;  %v7288_v62 = vpack.c.bf16 %v1898_v61, %v1890_v60  ;;  %v1946_v53 = vld [vmem:[#allocation14 + $0x250] sm:$0xff] }
 0x153   :  { %7147 = vmatprep.subr.bf16.mxu0 %v7146_v35  ;;  %7211 = vmatprep.subr.bf16.mxu1 %v7210_v40  ;;  %v1970_v60 = vld [vmem:[#allocation14 + $0x310] sm:$0xff] }
 0x154   :  { %v1978_v61 = vld [vmem:[#allocation14 + $0x350] sm:$0xff] }
 0x156   :  { %7149 = vmatpush1.bf16.msra.mxu0 %v7148_v48  ;;  %7213 = vmatpush1.bf16.msra.mxu1 %v7212_v49 }
 0x157   :  { %7151 = vmatprep.subr.bf16.mxu0 %v7150_v50  ;;  %7215 = vmatprep.subr.bf16.mxu1 %v7214_v55  ;;  %v1888_v55 = vld [vmem:[#allocation14 + $0x80] sm:$0xff] }
 0x15a   :  { %7153 = vmatpush1.bf16.msra.mxu0 %v7152_v58  ;;  %7217 = vmatpush1.bf16.msra.mxu1 %v7216_v59  ;;  %v7286_v58 = vpack.c.bf16 %v1899_v54, %v1891_v47  ;;  %v7224_v59 = vpack.c.bf16 %v1896_v27, %v1888_v55  ;;  %v1962_v47 = vld [vmem:[#allocation14 + $0x2d0] sm:$0xff]  ;;  %v1979_v55 = vld [vmem:[#allocation14 + $0x358] sm:$0xff]  ;;  %v1968_v27 = vld [vmem:[#allocation14 + $0x300] sm:$0xff] }
 0x15b   :  { %7219 = vmatprep.subr.bf16.mxu0 %v7218_v15  ;;  %7283 = vmatprep.subr.bf16.mxu1 %v7282_v17  ;;  %v1922_v17 = vld [vmem:[#allocation14 + $0x190] sm:$0xff] }
 0x15c   :  { %v7296_v19 = vpack.c.bf16 %v1930_v18, %v1922_v17  ;;  %v2002_v17 = vld [vmem:[#allocation14 + $0x410] sm:$0xff] }
 0x15d   :  { %1687 = vmatmul.mubr.f32.vlgmr.msra.gmra.mrb[10].mxu0 %v9597_v56  ;;  %1758 = vmatmul.mubr.f32.vlgmr.msra.gmra.mrb[10].mxu1 %v9597_v56  ;;  %v2010_v18 = vld [vmem:[#allocation14 + $0x450] sm:$0xff] }
 0x15e   :  { %7221 = vmatpush1.bf16.msra.mxu0 %v7220_v32  ;;  %7285 = vmatpush1.bf16.msra.mxu1 %v7284_v34  ;;  %v1938_v32 = vld [vmem:[#allocation14 + $0x210] sm:$0xff]  ;;  %v1953_v34 = vld [vmem:[#allocation14 + $0x288] sm:$0xff] }
 0x15f   :  { %7223 = vmatprep.subr.bf16.mxu0 %v7222_v52  ;;  %7287 = vmatprep.subr.bf16.mxu1 %v7286_v58  ;;  %v1971_v52 = vld [vmem:[#allocation14 + $0x318] sm:$0xff] }
 0x160   :  { %v7306_v58 = vpack.c.bf16 %v1979_v55, %v1971_v52  ;;  %v2057_v52 = vld [vmem:[#allocation14 + $0x5c8] sm:$0xff] }
 0x162   :  { %7225 = vmatpush1.bf16.msra.mxu0 %v7224_v59  ;;  %7289 = vmatpush1.bf16.msra.mxu1 %v7288_v62  ;;  %v7308_v62 = vpack.c.bf16 %v1978_v61, %v1970_v60  ;;  %v2050_v61 = vld [vmem:[#allocation14 + $0x590] sm:$0xff] }
 0x170   :  { %v1070_v3 = vpop.f32.mrb[0].mxu0  ;;  %v1111_v39 = vpop.f32.mrb[0].mxu1 }
 0x171   :  { %v1071_v23 = vadd.f32 %v1070_v3, %v359_v63  ;;  %v1072_v4 = vpop.f32.mrb[1].mxu0  ;;  %v1112_v5 = vadd.f32 %v1111_v39, %v367_v0  ;;  %v1113_v6 = vpop.f32.mrb[1].mxu1  ;;  %v1905_v63 = vld [vmem:[#allocation14 + $0x108] sm:$0xff]  ;;  %v1915_v3 = vld [vmem:[#allocation14 + $0x158] sm:$0xff]  ;;  %v1912_v39 = vld [vmem:[#allocation14 + $0x140] sm:$0xff] }
 0x172   :  { %v1073_v56 = vadd.f32 %v1072_v4, %v363_v1  ;;  %v1074_v7 = vpop.f32.mrb[2].mxu0  ;;  %v1114_v8 = vadd.f32 %v1113_v6, %v371_v2  ;;  %v1115_v9 = vpop.f32.mrb[2].mxu1  ;;  %v1913_v0 = vld [vmem:[#allocation14 + $0x148] sm:$0xff]  ;;  %v1907_v1 = vld [vmem:[#allocation14 + $0x118] sm:$0xff]  ;;  %v1914_v6 = vld [vmem:[#allocation14 + $0x150] sm:$0xff] }
 0x173   :  { %1200 = vst [vmem:[#allocation3] sm:$0xff] %v1071_v23  ;;  %v1075_v10 = vpop.f32.mrb[3].mxu0  ;;  %1202 = vst [vmem:[#allocation3 + $0x10] sm:$0xff] %v1112_v5  ;;  %v1116_v11 = vpop.f32.mrb[3].mxu1  ;;  %v7226_v2 = vpack.c.bf16 %v1913_v0, %v1905_v63  ;;  %v1904_v23 = vld [vmem:[#allocation14 + $0x100] sm:$0xff]  ;;  %v7290_v4 = vpack.c.bf16 %v1915_v3, %v1907_v1  ;;  %v1929_v9 = vld [vmem:[#allocation14 + $0x1c8] sm:$0xff] }
 0x174   :  { %1201 = vst [vmem:[#allocation3 + $0x8] sm:$0xff] %v1073_v56  ;;  %1203 = vst [vmem:[#allocation3 + $0x18] sm:$0xff] %v1114_v8  ;;  %v7228_v5 = vpack.c.bf16 %v1912_v39, %v1904_v23  ;;  %v1906_v56 = vld [vmem:[#allocation14 + $0x110] sm:$0xff]  ;;  %v1921_v8 = vld [vmem:[#allocation14 + $0x188] sm:$0xff] }
 0x175   :  { %7227 = vmatprep.subr.bf16.mxu0 %v7226_v2  ;;  %v7292_v7 = vpack.c.bf16 %v1914_v6, %v1906_v56  ;;  %7291 = vmatprep.subr.bf16.mxu1 %v7290_v4  ;;  %v1923_v10 = vld [vmem:[#allocation14 + $0x198] sm:$0xff]  ;;  %v7230_v11 = vpack.c.bf16 %v1929_v9, %v1921_v8  ;;  %v1985_v63 = vld [vmem:[#allocation14 + $0x388] sm:$0xff]  ;;  %v1984_v23 = vld [vmem:[#allocation14 + $0x380] sm:$0xff] }
 0x176   :  { %7229 = vmatpush1.bf16.msra.mxu0 %v7228_v5  ;;  %v7294_v15 = vpack.c.bf16 %v1931_v12, %v1923_v10  ;;  %v1993_v0 = vld [vmem:[#allocation14 + $0x3c8] sm:$0xff]  ;;  %v1987_v1 = vld [vmem:[#allocation14 + $0x398] sm:$0xff]  ;;  %v1992_v39 = vld [vmem:[#allocation14 + $0x3c0] sm:$0xff] }
 0x177   :  { %7293 = vmatpush1.bf16.msra.mxu1 %v7292_v7  ;;  %7231 = vmatprep.subr.bf16.mxu0 %v7230_v11  ;;  %v7246_v2 = vpack.c.bf16 %v1993_v0, %v1985_v63  ;;  %v1995_v3 = vld [vmem:[#allocation14 + $0x3d8] sm:$0xff]  ;;  %v7248_v5 = vpack.c.bf16 %v1992_v39, %v1984_v23  ;;  %v1986_v56 = vld [vmem:[#allocation14 + $0x390] sm:$0xff]  ;;  %v2001_v8 = vld [vmem:[#allocation14 + $0x408] sm:$0xff] }
 0x178   :  { %7295 = vmatprep.subr.bf16.mxu1 %v7294_v15  ;;  %v7310_v4 = vpack.c.bf16 %v1995_v3, %v1987_v1  ;;  %v1994_v6 = vld [vmem:[#allocation14 + $0x3d0] sm:$0xff]  ;;  %v2009_v9 = vld [vmem:[#allocation14 + $0x448] sm:$0xff]  ;;  %v2003_v10 = vld [vmem:[#allocation14 + $0x418] sm:$0xff] }
 0x179   :  { %v7312_v7 = vpack.c.bf16 %v1994_v6, %v1986_v56  ;;  %v7250_v11 = vpack.c.bf16 %v2009_v9, %v2001_v8  ;;  %v2011_v12 = vld [vmem:[#allocation14 + $0x458] sm:$0xff]  ;;  %v2065_v63 = vld [vmem:[#allocation14 + $0x608] sm:$0xff]  ;;  %v2066_v56 = vld [vmem:[#allocation14 + $0x610] sm:$0xff] }
 0x17a   :  { %7233 = vmatpush1.bf16.msra.mxu0 %v7232_v16  ;;  %v7314_v15 = vpack.c.bf16 %v2011_v12, %v2003_v10  ;;  %v7252_v16 = vpack.c.bf16 %v2008_v14, %v2000_v13  ;;  %v2073_v1 = vld [vmem:[#allocation14 + $0x648] sm:$0xff]  ;;  %v2075_v3 = vld [vmem:[#allocation14 + $0x658] sm:$0xff]  ;;  %v2080_v14 = vld [vmem:[#allocation14 + $0x680] sm:$0xff] }
 0x17b   :  { %7297 = vmatpush1.bf16.msra.mxu1 %v7296_v19  ;;  %v7316_v19 = vpack.c.bf16 %v2010_v18, %v2002_v17  ;;  %v7266_v23 = vpack.c.bf16 %v2073_v1, %v2065_v63  ;;  %v2081_v8 = vld [vmem:[#allocation14 + $0x688] sm:$0xff]  ;;  %v2083_v12 = vld [vmem:[#allocation14 + $0x698] sm:$0xff]  ;;  %v2082_v17 = vld [vmem:[#allocation14 + $0x690] sm:$0xff] }
 0x17c   :  { %v2089_v9 = vld [vmem:[#allocation14 + $0x6c8] sm:$0xff]  ;;  %v2091_v13 = vld [vmem:[#allocation14 + $0x6d8] sm:$0xff]  ;;  %v2090_v18 = vld [vmem:[#allocation14 + $0x6d0] sm:$0xff] }
 0x1b0   :  { %v1152_v33 = vpop.f32.mrb[4].mxu0  ;;  %v1193_v36 = vpop.f32.mrb[4].mxu1 }
 0x1b1   :  { %v1153_v35 = vadd.f32 %v1152_v33, %v375_v24  ;;  %v1154_v42 = vpop.f32.mrb[5].mxu0  ;;  %v1194_v38 = vadd.f32 %v1193_v36, %v383_v25  ;;  %v1195_v43 = vpop.f32.mrb[5].mxu1  ;;  %v1939_v24 = vld [vmem:[#allocation14 + $0x218] sm:$0xff]  ;;  %v7234_v25 = vpack.c.bf16 %v1945_v21, %v1937_v20  ;;  %v7300_v33 = vpack.c.bf16 %v1946_v53, %v1938_v32  ;;  %v2017_v20 = vld [vmem:[#allocation14 + $0x488] sm:$0xff]  ;;  %v2018_v32 = vld [vmem:[#allocation14 + $0x490] sm:$0xff] }
 0x1b2   :  { %v1155_v40 = vadd.f32 %v1154_v42, %v379_v26  ;;  %v1156_v44 = vpop.f32.mrb[6].mxu0  ;;  %v1196_v48 = vadd.f32 %v1195_v43, %v387_v31  ;;  %v1197_v49 = vpop.f32.mrb[6].mxu1  ;;  %v1947_v26 = vld [vmem:[#allocation14 + $0x258] sm:$0xff]  ;;  %v7236_v31 = vpack.c.bf16 %v1944_v29, %v1936_v28  ;;  %v1960_v43 = vld [vmem:[#allocation14 + $0x2c0] sm:$0xff]  ;;  %v2025_v21 = vld [vmem:[#allocation14 + $0x4c8] sm:$0xff] }
 0x1b3   :  { %1204 = vst [vmem:[#allocation3 + $0x20] sm:$0xff] %v1153_v35  ;;  %v1157_v50 = vpop.f32.mrb[7].mxu0  ;;  %1206 = vst [vmem:[#allocation3 + $0x30] sm:$0xff] %v1194_v38  ;;  %v1198_v57 = vpop.f32.mrb[7].mxu1  ;;  %v7298_v30 = vpack.c.bf16 %v1947_v26, %v1939_v24  ;;  %7235 = vmatprep.subr.bf16.mxu0 %v7234_v25  ;;  %v1961_v35 = vld [vmem:[#allocation14 + $0x2c8] sm:$0xff]  ;;  %v1955_v36 = vld [vmem:[#allocation14 + $0x298] sm:$0xff]  ;;  %v7254_v25 = vpack.c.bf16 %v2025_v21, %v2017_v20 }
 0x1b4   :  { %1205 = vst [vmem:[#allocation3 + $0x28] sm:$0xff] %v1155_v40  ;;  %1207 = vst [vmem:[#allocation3 + $0x38] sm:$0xff] %v1196_v48  ;;  %7237 = vmatpush1.bf16.msra.mxu0 %v7236_v31  ;;  %v7238_v42 = vpack.c.bf16 %v1961_v35, %v1953_v34  ;;  %v1963_v38 = vld [vmem:[#allocation14 + $0x2d8] sm:$0xff]  ;;  %v1952_v40 = vld [vmem:[#allocation14 + $0x280] sm:$0xff]  ;;  %v7304_v48 = vpack.c.bf16 %v1962_v47, %v1954_v46 }
 0x1b5   :  { %7299 = vmatprep.subr.bf16.mxu1 %v7298_v30  ;;  %v7302_v44 = vpack.c.bf16 %v1963_v38, %v1955_v36  ;;  %v7240_v45 = vpack.c.bf16 %v1960_v43, %v1952_v40  ;;  %v1969_v49 = vld [vmem:[#allocation14 + $0x308] sm:$0xff]  ;;  %v1976_v57 = vld [vmem:[#allocation14 + $0x340] sm:$0xff]  ;;  %v2019_v24 = vld [vmem:[#allocation14 + $0x498] sm:$0xff] }
 0x1b6   :  { %7301 = vmatpush1.bf16.msra.mxu1 %v7300_v33  ;;  %7239 = vmatprep.subr.bf16.mxu0 %v7238_v42  ;;  %v1977_v50 = vld [vmem:[#allocation14 + $0x348] sm:$0xff]  ;;  %v7244_v59 = vpack.c.bf16 %v1976_v57, %v1968_v27  ;;  %v2027_v26 = vld [vmem:[#allocation14 + $0x4d8] sm:$0xff]  ;;  %v2016_v28 = vld [vmem:[#allocation14 + $0x480] sm:$0xff] }
 0x1b7   :  { %7303 = vmatprep.subr.bf16.mxu1 %v7302_v44  ;;  %v7242_v54 = vpack.c.bf16 %v1977_v50, %v1969_v49  ;;  %v2024_v29 = vld [vmem:[#allocation14 + $0x4c0] sm:$0xff]  ;;  %v7318_v30 = vpack.c.bf16 %v2027_v26, %v2019_v24  ;;  %v2026_v53 = vld [vmem:[#allocation14 + $0x4d0] sm:$0xff]  ;;  %v2033_v35 = vld [vmem:[#allocation14 + $0x508] sm:$0xff]  ;;  %v7336_v26 = vpack.c.bf16 %v2090_v18, %v2082_v17 }
 0x1b8   :  { %7241 = vmatpush1.bf16.msra.mxu0 %v7240_v45  ;;  %v7256_v31 = vpack.c.bf16 %v2024_v29, %v2016_v28  ;;  %v105_v33 = vld [vmem:[%s9888_s3] sm:$0x3]  ;;  %v7320_v34 = vpack.c.bf16 %v2026_v53, %v2018_v32  ;;  %v2041_v36 = vld [vmem:[#allocation14 + $0x548] sm:$0xff]  ;;  %v2035_v42 = vld [vmem:[#allocation14 + $0x518] sm:$0xff]  ;;  %s9361_s3 = smov [#allocation18]  }
 0x1b9   :  { %7243 = vmatprep.subr.bf16.mxu0 %v7242_v54  ;;  %106 = vst.msk [vmem:[#allocation6] sm:$0x3] %vm9531_vm0, %v105_v33  ;;  %v7258_v38 = vpack.c.bf16 %v2041_v36, %v2033_v35  ;;  %v2043_v40 = vld [vmem:[#allocation14 + $0x558] sm:$0xff]  ;;  %v2032_v43 = vld [vmem:[#allocation14 + $0x500] sm:$0xff]  ;;  %v2034_v47 = vld [vmem:[#allocation14 + $0x510] sm:$0xff]  ;;  %s6688_s24 = sshll.u32 %s9361_s3, 4  ;;  %s6689_s24 = int_to_ptr.vmem [resolvable:$true] %s6688_s24 }
 0x1ba   :  { %7305 = vmatpush1.bf16.msra.mxu1 %v7304_v48  ;;  %v2040_v44 = vld [vmem:[#allocation14 + $0x540] sm:$0xff]  ;;  %v7322_v45 = vpack.c.bf16 %v2043_v40, %v2035_v42  ;;  %v2042_v48 = vld [vmem:[#allocation14 + $0x550] sm:$0xff]  ;;  %v2049_v50 = vld [vmem:[#allocation14 + $0x588] sm:$0xff]  ;;  %s9270_s21 = scalar_lea.vmem %s6689_s24, 32  ;;  %p9275_p8 = scmp.lt.s32.totalorder %s6689_s24, %s6689_s24 }
 0x1bb   :  { %7307 = vmatprep.subr.bf16.mxu1 %v7306_v58  ;;  %v7260_v46 = vpack.c.bf16 %v2040_v44, %v2032_v43  ;;  %v7324_v49 = vpack.c.bf16 %v2042_v48, %v2034_v47  ;;  %v2051_v54 = vld [vmem:[#allocation14 + $0x598] sm:$0xff]  ;;  %v7262_v55 = vpack.c.bf16 %v2057_v52, %v2049_v50  ;;  %v2048_v57 = vld [vmem:[#allocation14 + $0x580] sm:$0xff]  ;;  %v2105_v20 = vld [vmem:[#allocation14 + $0x748] sm:$0xff]  ;;  %p9271_p7 = scmp.ne.s32.totalorder %s6689_s24, %s9270_s21  ;;  %p9276_p9 = scmp.lt.s32.totalorder %s9270_s21, %s9270_s21 }
 0x1bc   :  { %7245 = vmatpush1.bf16.msra.mxu0 %v7244_v59  ;;  %v2059_v27 = vld [vmem:[#allocation14 + $0x5d8] sm:$0xff]  ;;  %v2056_v58 = vld [vmem:[#allocation14 + $0x5c0] sm:$0xff]  ;;  %v2106_v53 = vld [vmem:[#allocation14 + $0x750] sm:$0xff] }
 0x1bd   :  { %7247 = vmatprep.subr.bf16.mxu0 %v7246_v2  ;;  %v7326_v59 = vpack.c.bf16 %v2059_v27, %v2051_v54  ;;  %v7264_v60 = vpack.c.bf16 %v2056_v58, %v2048_v57  ;;  %v2067_v2 = vld [vmem:[#allocation14 + $0x618] sm:$0xff]  ;;  %v2096_v29 = vld [vmem:[#allocation14 + $0x700] sm:$0xff]  ;;  %v2113_v33 = vld [vmem:[#allocation14 + $0x788] sm:$0xff]  ;;  %p9277_p10 = por %p9276_p9, %p9275_p8 }
 0x1be   :  { %7309 = vmatpush1.bf16.msra.mxu1 %v7308_v62  ;;  %v2058_v62 = vld [vmem:[#allocation14 + $0x5d0] sm:$0xff]  ;;  %v7330_v39 = vpack.c.bf16 %v2075_v3, %v2067_v2  ;;  %v2099_v21 = vld [vmem:[#allocation14 + $0x718] sm:$0xff]  ;;  %v2112_v43 = vld [vmem:[#allocation14 + $0x780] sm:$0xff] }
 0x1bf   :  { %7311 = vmatprep.subr.bf16.mxu1 %v7310_v4  ;;  %v7328_v0 = vpack.c.bf16 %v2058_v62, %v2050_v61  ;;  %v2064_v4 = vld [vmem:[#allocation14 + $0x600] sm:$0xff]  ;;  %v2115_v35 = vld [vmem:[#allocation14 + $0x798] sm:$0xff]  ;;  %v2114_v48 = vld [vmem:[#allocation14 + $0x790] sm:$0xff]  ;;  %p9278_p11 = pnand %p9277_p10, %p9271_p7 }
 0x1c0   :  { %7249 = vmatpush1.bf16.msra.mxu0 %v7248_v5  ;;  %v2072_v5 = vld [vmem:[#allocation14 + $0x640] sm:$0xff]  ;;  %v2123_v36 = vld [vmem:[#allocation14 + $0x7d8] sm:$0xff]  ;;  %v1885_v27 = vld [vmem:[#allocation14 + $0x68] sm:$0xff] }
 0x1c1   :  { %7251 = vmatprep.subr.bf16.mxu0 %v7250_v11  ;;  %v7268_v6 = vpack.c.bf16 %v2072_v5, %v2064_v4  ;;  %v7270_v11 = vpack.c.bf16 %v2089_v9, %v2081_v8  ;;  %v2120_v44 = vld [vmem:[#allocation14 + $0x7c0] sm:$0xff]  ;;  %v7342_v47 = vpack.c.bf16 %v2123_v36, %v2115_v35  ;;  %v1879_v57 = vld [vmem:[#allocation14 + $0x38] sm:$0xff] }
 0x1c2   :  { %7313 = vmatpush1.bf16.msra.mxu1 %v7312_v7  ;;  %v2074_v7 = vld [vmem:[#allocation14 + $0x650] sm:$0xff]  ;;  %v7280_v50 = vpack.c.bf16 %v2120_v44, %v2112_v43  ;;  %v9170_v44 = vld [vmem:[#allocation5] sm:$0x3] }
 0x1c3   :  { %7315 = vmatprep.subr.bf16.mxu1 %v7314_v15  ;;  %v7332_v10 = vpack.c.bf16 %v2074_v7, %v2066_v56  ;;  %v7334_v15 = vpack.c.bf16 %v2091_v13, %v2083_v12  ;;  %v1211_v12 = vld [vmem:[#allocation3] ss:$8 sm:$0xf0] }
 0x1c4   :  { %7253 = vmatpush1.bf16.msra.mxu0 %v7252_v16  ;;  %v2088_v16 = vld [vmem:[#allocation14 + $0x6c0] sm:$0xff] }
 0x1c5   :  { %7255 = vmatprep.subr.bf16.mxu0 %v7254_v25  ;;  %v7272_v24 = vpack.c.bf16 %v2088_v16, %v2080_v14  ;;  %v2107_v25 = vld [vmem:[#allocation14 + $0x758] sm:$0xff] }
 0x1c6   :  { %7317 = vmatpush1.bf16.msra.mxu1 %v7316_v19  ;;  %v2097_v19 = vld [vmem:[#allocation14 + $0x708] sm:$0xff]  ;;  %v7338_v32 = vpack.c.bf16 %v2107_v25, %v2099_v21 }
 0x1c7   :  { %7319 = vmatprep.subr.bf16.mxu1 %v7318_v30  ;;  %v7274_v28 = vpack.c.bf16 %v2105_v20, %v2097_v19  ;;  %v2104_v30 = vld [vmem:[#allocation14 + $0x740] sm:$0xff] }
 0x1c8   :  { %7257 = vmatpush1.bf16.msra.mxu0 %v7256_v31  ;;  %v2098_v31 = vld [vmem:[#allocation14 + $0x710] sm:$0xff]  ;;  %v7276_v42 = vpack.c.bf16 %v2104_v30, %v2096_v29 }
 0x1c9   :  { %7259 = vmatprep.subr.bf16.mxu0 %v7258_v38  ;;  %v7340_v38 = vpack.c.bf16 %v2106_v53, %v2098_v31 }
 0x1ca   :  { %7321 = vmatpush1.bf16.msra.mxu1 %v7320_v34  ;;  %v2121_v34 = vld [vmem:[#allocation14 + $0x7c8] sm:$0xff] }
 0x1cb   :  { %7323 = vmatprep.subr.bf16.mxu1 %v7322_v45  ;;  %v7278_v40 = vpack.c.bf16 %v2121_v34, %v2113_v33  ;;  %v9360_v45 = vmov 1966171168   ;;  %v1209_v33 = vld [vmem:[#allocation6] sm:$0x3] }
 0x1cc   :  { %7261 = vmatpush1.bf16.msra.mxu0 %v7260_v46  ;;  %v1777_v46 = vunpack.c.l.s4 %v9360_v45  ;;  %v1861_v45 = vmul.f32 0.0, %v9170_v44  ;;  %v1957_v44 = vld [vmem:[#allocation14 + $0x2a8] sm:$0xff] }
 0x1cd   :  { %7263 = vmatprep.subr.bf16.mxu0 %v7262_v55  ;;  %v1877_v55 = vld [vmem:[#allocation14 + $0x28] sm:$0xff] }
 0x1ce   :  { %7325 = vmatpush1.bf16.msra.mxu1 %v7324_v49  ;;  %v2122_v49 = vld [vmem:[#allocation14 + $0x7d0] sm:$0xff]  ;;  %v1778_v54 = vunpack.c.0.s8 %v1777_v46  ;;  %v7346_v58 = vpack.c.bf16 %v1885_v27, %v1877_v55  ;;  %v1893_v55 = vld [vmem:[#allocation14 + $0xa8] sm:$0xff] }
 0x1cf   :  { %7327 = vmatprep.subr.bf16.mxu1 %v7326_v59  ;;  %v7344_v52 = vpack.c.bf16 %v2122_v49, %v2114_v48  ;;  %v1887_v59 = vld [vmem:[#allocation14 + $0x78] sm:$0xff]  ;;  %v1876_v48 = vld [vmem:[#allocation14 + $0x20] sm:$0xff]  ;;  %v1901_v27 = vld [vmem:[#allocation14 + $0xe8] sm:$0xff] }
 0x1d0   :  { %7265 = vmatpush1.bf16.msra.mxu0 %v7264_v60  ;;  %v9622_v60 = vsub.s32 %v1778_v54, %v9577_v22  ;;  %v7410_v62 = vpack.c.bf16 %v1887_v59, %v1879_v57  ;;  %v1884_v49 = vld [vmem:[#allocation14 + $0x60] sm:$0xff]  ;;  %v1895_v57 = vld [vmem:[#allocation14 + $0xb8] sm:$0xff] }
 0x1d1   :  { %7267 = vmatprep.subr.bf16.mxu0 %v7266_v23 }
 0x1d2   :  { %7329 = vmatpush1.bf16.msra.mxu1 %v7328_v0 }
 0x1d3   :  { %7331 = vmatprep.subr.bf16.mxu1 %v7330_v39 }
 0x1d4   :  { %7269 = vmatpush1.bf16.msra.mxu0 %v7268_v6 }
 0x1d5   :  { %7271 = vmatprep.subr.bf16.mxu0 %v7270_v11 }
 0x1d6   :  { %7333 = vmatpush1.bf16.msra.mxu1 %v7332_v10 }
 0x1d7   :  { %7335 = vmatprep.subr.bf16.mxu1 %v7334_v15  ;;  %v1210_v15 = vld [vmem:[#allocation3] ss:$8 sm:$0xf] }
 0x1d8   :  { %7273 = vmatpush1.bf16.msra.mxu0 %v7272_v24  ;;  %v1212_v16 = vor.u32 %v1211_v12, %v1210_v15  ;;  %v1910_v12 = vld [vmem:[#allocation14 + $0x130] sm:$0xff]  ;;  %v1933_v15 = vld [vmem:[#allocation14 + $0x1e8] sm:$0xff] }
 0x1d9   :  { %7275 = vmatprep.subr.bf16.mxu0 %v7274_v28 }
 0x1da   :  { %7337 = vmatpush1.bf16.msra.mxu1 %v7336_v26 }
 0x1db   :  { %7339 = vmatprep.subr.bf16.mxu1 %v7338_v32 }
 0x1dc   :  { %7277 = vmatpush1.bf16.msra.mxu0 %v7276_v42 }
 0x1dd   :  { %7279 = vmatprep.subr.bf16.mxu0 %v7278_v40 }
 0x1de   :  { %7341 = vmatpush1.bf16.msra.mxu1 %v7340_v38 }
 0x1df   :  { %7343 = vmatprep.subr.bf16.mxu1 %v7342_v47 }
 0x1e0   :  { %7281 = vmatpush1.bf16.msra.mxu0 %v7280_v50  ;;  %v1878_v50 = vld [vmem:[#allocation14 + $0x30] sm:$0xff] }
 0x1e1   :  { %7347 = vmatprep.subr.bf16.mxu0 %v7346_v58  ;;  %v1903_v58 = vld [vmem:[#allocation14 + $0xf8] sm:$0xff] }
 0x1e2   :  { %7345 = vmatpush1.bf16.msra.mxu1 %v7344_v52  ;;  %v1886_v52 = vld [vmem:[#allocation14 + $0x70] sm:$0xff] }
 0x1e3   :  { %7411 = vmatprep.subr.bf16.mxu1 %v7410_v62  ;;  %v7348_v62 = vpack.c.bf16 %v1884_v49, %v1876_v48 }
 0x1f0   :  { %v1546_v61 = vpop.f32.mrb[8].mxu0  ;;  %v1617_v63 = vpop.f32.mrb[8].mxu1 }
 0x1f1   :  { %v1548_v0 = vpop.f32.mrb[9].mxu0  ;;  %v1619_v2 = vpop.f32.mrb[9].mxu1 }
 0x1f2   :  { %v1772_v1 = vcombine.low %v1546_v61, %v1548_v0  ;;  %v1773_v3 = vcombine.low %v1617_v63, %v1619_v2  ;;  %v7412_v63 = vpack.c.bf16 %v1886_v52, %v1878_v50  ;;  %v1892_v0 = vld [vmem:[#allocation14 + $0xa0] sm:$0xff]  ;;  %v1894_v2 = vld [vmem:[#allocation14 + $0xb0] sm:$0xff] }
 0x1f3   :  { %v1956_v50 = vld [vmem:[#allocation14 + $0x2a0] sm:$0xff] }
 0x1f4   :  { %v1782_v23 = vrot.slane %v1772_v1, %v9622_v60  ;;  %v1789_v39 = vrot.slane %v1773_v3, %v9622_v60  ;;  %v1900_v1 = vld [vmem:[#allocation14 + $0xe0] sm:$0xff]  ;;  %v1902_v3 = vld [vmem:[#allocation14 + $0xf0] sm:$0xff] }
 0x1f5   :  { %v1964_v52 = vld [vmem:[#allocation14 + $0x2e0] sm:$0xff] }
 0x1f6   :  { %v1804_v4 = vcombine.low %v1782_v23, %v1789_v39  ;;  %v1909_v23 = vld [vmem:[#allocation14 + $0x128] sm:$0xff]  ;;  %v7350_v39 = vpack.c.bf16 %v1901_v27, %v1893_v55 }
 0x1f8   :  { %v1812_v13 = vrot.slane %v1804_v4, %v9622_v60  ;;  %v7414_v4 = vpack.c.bf16 %v1903_v58, %v1895_v57  ;;  %v1958_v57 = vld [vmem:[#allocation14 + $0x2b0] sm:$0xff] }
 0x1f9   :  { %v1966_v58 = vld [vmem:[#allocation14 + $0x2f0] sm:$0xff] }
 0x230   :  { %v1688_v5 = vpop.f32.mrb[10].mxu0  ;;  %v1759_v56 = vpop.f32.mrb[10].mxu1 }
 0x231   :  { %v1690_v6 = vpop.f32.mrb[11].mxu0  ;;  %v1761_v22 = vpop.f32.mrb[11].mxu1 }
 0x232   :  { %v1774_v7 = vcombine.low %v1688_v5, %v1690_v6  ;;  %v1775_v8 = vcombine.low %v1759_v56, %v1761_v22  ;;  %v1917_v5 = vld [vmem:[#allocation14 + $0x168] sm:$0xff]  ;;  %v1911_v56 = vld [vmem:[#allocation14 + $0x138] sm:$0xff]  ;;  %v7416_v22 = vpack.c.bf16 %v1902_v3, %v1894_v2  ;;  %v7432_v2 = vpack.c.bf16 %v1966_v58, %v1958_v57  ;;  %v1972_v3 = vld [vmem:[#allocation14 + $0x320] sm:$0xff] }
 0x233   :  { %v1919_v6 = vld [vmem:[#allocation14 + $0x178] sm:$0xff]  ;;  %v2044_v57 = vld [vmem:[#allocation14 + $0x560] sm:$0xff] }
 0x234   :  { %v1796_v9 = vrot.slane %v1774_v7, %v9622_v60  ;;  %v1803_v10 = vrot.slane %v1775_v8, %v9622_v60  ;;  %v7352_v7 = vpack.c.bf16 %v1900_v1, %v1892_v0  ;;  %v1908_v8 = vld [vmem:[#allocation14 + $0x120] sm:$0xff]  ;;  %v1983_v0 = vld [vmem:[#allocation14 + $0x378] sm:$0xff]  ;;  %v7368_v1 = vpack.c.bf16 %v1964_v52, %v1956_v50 }
 0x235   :  { %v2047_v50 = vld [vmem:[#allocation14 + $0x578] sm:$0xff] }
 0x236   :  { %v1805_v11 = vcombine.low %v1796_v9, %v1803_v10  ;;  %v1916_v9 = vld [vmem:[#allocation14 + $0x160] sm:$0xff]  ;;  %v7354_v10 = vpack.c.bf16 %v1917_v5, %v1909_v23  ;;  %v1974_v5 = vld [vmem:[#allocation14 + $0x330] sm:$0xff] }
 0x237   :  { %v1980_v23 = vld [vmem:[#allocation14 + $0x360] sm:$0xff] }
 0x238   :  { %v1819_v14 = vrot.slane %v1805_v11, %v9622_v60  ;;  %v7418_v11 = vpack.c.bf16 %v1919_v6, %v1911_v56  ;;  %v1982_v56 = vld [vmem:[#allocation14 + $0x370] sm:$0xff]  ;;  %v1989_v6 = vld [vmem:[#allocation14 + $0x3a8] sm:$0xff] }
 0x23a   :  { %v1820_v17 = vcombine.low %v1812_v13, %v1819_v14  ;;  %v1918_v13 = vld [vmem:[#allocation14 + $0x170] sm:$0xff]  ;;  %v1925_v14 = vld [vmem:[#allocation14 + $0x1a8] sm:$0xff] }
 0x23c   :  { %v1822_v18 = vadd.f32 %v1820_v17, %v1212_v16  ;;  %v1927_v16 = vld [vmem:[#allocation14 + $0x1b8] sm:$0xff] }
 0x23d   :  { %v1935_v17 = vld [vmem:[#allocation14 + $0x1f8] sm:$0xff] }
 0x23e   :  { %v6891_v19 = vmul.f32 -1.442695, %v1822_v18  ;;  %v1830_v20 = vrot.slane %v1822_v18, 2  ;;  %v1841_v24 = vrot.slane %v1822_v18, 6  ;;  %v1838_v28 = vrot.slane %v1822_v18, 4 }
 0x23f   :  { %v7356_v18 = vpack.c.bf16 %v1916_v9, %v1908_v8  ;;  %v1999_v8 = vld [vmem:[#allocation14 + $0x3f8] sm:$0xff]  ;;  %v7372_v9 = vpack.c.bf16 %v1980_v23, %v1972_v3 }
 0x240   :  { %9042 = vpow2.f32 %v6891_v19  ;;  %v6892_v21 = vmul.f32 -1.442695, %v1830_v20  ;;  %v6893_v25 = vmul.f32 -1.442695, %v1841_v24  ;;  %v7420_v19 = vpack.c.bf16 %v1918_v13, %v1910_v12  ;;  %v1924_v20 = vld [vmem:[#allocation14 + $0x1a0] sm:$0xff]  ;;  %v2063_v3 = vld [vmem:[#allocation14 + $0x5f8] sm:$0xff] }
 0x241   :  { %v7358_v24 = vpack.c.bf16 %v1933_v15, %v1925_v14  ;;  %v1996_v12 = vld [vmem:[#allocation14 + $0x3e0] sm:$0xff]  ;;  %v1990_v15 = vld [vmem:[#allocation14 + $0x3b0] sm:$0xff] }
 0x242   :  { %9044 = vpow2.f32 %v6892_v21  ;;  %v1932_v21 = vld [vmem:[#allocation14 + $0x1e0] sm:$0xff] }
 0x243   :  { %9046 = vpow2.f32 %v6893_v25  ;;  %v7422_v25 = vpack.c.bf16 %v1935_v17, %v1927_v16  ;;  %v1998_v16 = vld [vmem:[#allocation14 + $0x3f0] sm:$0xff]  ;;  %v2005_v17 = vld [vmem:[#allocation14 + $0x428] sm:$0xff] }
 0x24a   :  { %v9043_v26 = vpop.eup %9042 }
 0x24b   :  { %v1826_v29 = vadd.f32 1.0, %v9043_v26  ;;  %v1926_v26 = vld [vmem:[#allocation14 + $0x1b0] sm:$0xff] }
 0x24c   :  { %v9045_v30 = vpop.eup %9044 }
 0x24d   :  { %9048 = vrcp.f32 %v1826_v29  ;;  %v1835_v31 = vadd.f32 1.0, %v9045_v30  ;;  %v9047_v32 = vpop.eup %9046  ;;  %v1941_v29 = vld [vmem:[#allocation14 + $0x228] sm:$0xff] }
 0x24e   :  { %9050 = vtanh.f32 %v1838_v28  ;;  %v1846_v36 = vadd.f32 1.0, %v9047_v32  ;;  %v1934_v28 = vld [vmem:[#allocation14 + $0x1f0] sm:$0xff]  ;;  %v1949_v30 = vld [vmem:[#allocation14 + $0x268] sm:$0xff]  ;;  %v1951_v32 = vld [vmem:[#allocation14 + $0x278] sm:$0xff] }
 0x24f   :  { %9052 = vrcp.f32 %v1835_v31  ;;  %v1943_v31 = vld [vmem:[#allocation14 + $0x238] sm:$0xff] }
 0x250   :  { %9054 = vrcp.f32 %v1846_v36  ;;  %v7362_v36 = vpack.c.bf16 %v1949_v30, %v1941_v29  ;;  %v2006_v30 = vld [vmem:[#allocation14 + $0x430] sm:$0xff] }
 0x257   :  { %v9049_v53 = vpop.eup %9048 }
 0x258   :  { %v9051_v34 = vpop.eup %9050 }
 0x259   :  { %v9053_v35 = vpop.eup %9052  ;;  %v1850_v42 = vmul.f32 %v9051_v34, %v9049_v53  ;;  %v7360_v53 = vpack.c.bf16 %v1932_v21, %v1924_v20  ;;  %v1940_v34 = vld [vmem:[#allocation14 + $0x220] sm:$0xff]  ;;  %v2015_v20 = vld [vmem:[#allocation14 + $0x478] sm:$0xff] }
 0x25a   :  { %v1849_v38 = vmul.f32 %v9053_v35, %v1209_v33  ;;  %v9055_v43 = vpop.eup %9054  ;;  %v7424_v33 = vpack.c.bf16 %v1934_v28, %v1926_v26  ;;  %v1948_v35 = vld [vmem:[#allocation14 + $0x260] sm:$0xff] }
 0x25b   :  { %v7364_v48 = vpack.c.bf16 %v1948_v35, %v1940_v34  ;;  %v2012_v26 = vld [vmem:[#allocation14 + $0x460] sm:$0xff]  ;;  %v2031_v34 = vld [vmem:[#allocation14 + $0x4f8] sm:$0xff] }
 0x25c   :  { %v9630_v40 = vadd.f32 %v1850_v42, %v1849_v38  ;;  %v7426_v42 = vpack.c.bf16 %v1951_v32, %v1943_v31  ;;  %v1942_v38 = vld [vmem:[#allocation14 + $0x230] sm:$0xff]  ;;  %v2021_v32 = vld [vmem:[#allocation14 + $0x4a8] sm:$0xff] }
 0x25d   :  { %v2014_v31 = vld [vmem:[#allocation14 + $0x470] sm:$0xff] }
 0x25e   :  { %9056 = vtanh.f32 %v9630_v40 }
 0x268   :  { %v9057_v46 = vpop.eup %9056 }
 0x269   :  { %v1853_v47 = vmul.f32 %v9057_v46, %v9055_v43  ;;  %v1950_v43 = vld [vmem:[#allocation14 + $0x270] sm:$0xff]  ;;  %v1959_v46 = vld [vmem:[#allocation14 + $0x2b8] sm:$0xff] }
 0x26a   :  { %v7428_v49 = vpack.c.bf16 %v1950_v43, %v1942_v38  ;;  %v2028_v38 = vld [vmem:[#allocation14 + $0x4e0] sm:$0xff] }
 0x26b   :  { %v9633_v54 = vadd.f32 %v1861_v45, %v1853_v47  ;;  %v1965_v45 = vld [vmem:[#allocation14 + $0x2e8] sm:$0xff]  ;;  %v1967_v47 = vld [vmem:[#allocation14 + $0x2f8] sm:$0xff] }
 0x26c   :  { %v7366_v55 = vpack.c.bf16 %v1965_v45, %v1957_v44  ;;  %v7430_v27 = vpack.c.bf16 %v1967_v47, %v1959_v46  ;;  %v2022_v45 = vld [vmem:[#allocation14 + $0x4b0] sm:$0xff]  ;;  %v2037_v47 = vld [vmem:[#allocation14 + $0x528] sm:$0xff] }
 0x26d   :  { %1866 = vst.msk [vmem:[#allocation4] ss:$8 sm:$0x3] %vm9531_vm0, %v9633_v54  ;;  %v2136_v59 = vrot.slane %v9633_v54, %v9580_v37  ;;  %v9642_v61 = vrot.slane %v9633_v54, %v9593_v41  ;;  %v2030_v46 = vld [vmem:[#allocation14 + $0x4f0] sm:$0xff] }
 0x26f   :  { %2203 = vmatprep.mubr.f32.mxu0 %v2136_v59  ;;  %2274 = vmatprep.mubr.f32.mxu1 %v2136_v59 }
 0x270   :  { %2204 = vmatmul.mubr.f32.vlgmr.msra.gmra.mrb[12].mxu0 %v9642_v61  ;;  %2275 = vmatmul.mubr.f32.vlgmr.msra.gmra.mrb[12].mxu1 %v9642_v61 }
 0x271   :  { %7349 = vmatpush1.bf16.msra.mxu0 %v7348_v62  ;;  %7413 = vmatpush1.bf16.msra.mxu1 %v7412_v63  ;;  %v1981_v62 = vld [vmem:[#allocation14 + $0x368] sm:$0xff]  ;;  %v1975_v63 = vld [vmem:[#allocation14 + $0x338] sm:$0xff] }
 0x272   :  { %2345 = vmatprep.mubr.f32.mxu0 %v2136_v59  ;;  %2416 = vmatprep.mubr.f32.mxu1 %v2136_v59  ;;  %v1973_v59 = vld [vmem:[#allocation14 + $0x328] sm:$0xff] }
 0x273   :  { %7351 = vmatprep.subr.bf16.mxu0 %v7350_v39  ;;  %7415 = vmatprep.subr.bf16.mxu1 %v7414_v4  ;;  %v7370_v39 = vpack.c.bf16 %v1981_v62, %v1973_v59  ;;  %v7434_v4 = vpack.c.bf16 %v1983_v0, %v1975_v63  ;;  %v2038_v62 = vld [vmem:[#allocation14 + $0x530] sm:$0xff]  ;;  %v2053_v0 = vld [vmem:[#allocation14 + $0x5a8] sm:$0xff] }
 0x274   :  { %v2046_v63 = vld [vmem:[#allocation14 + $0x570] sm:$0xff] }
 0x275   :  { %7353 = vmatpush1.bf16.msra.mxu0 %v7352_v7  ;;  %7417 = vmatpush1.bf16.msra.mxu1 %v7416_v22  ;;  %v1997_v7 = vld [vmem:[#allocation14 + $0x3e8] sm:$0xff]  ;;  %v1991_v22 = vld [vmem:[#allocation14 + $0x3b8] sm:$0xff] }
 0x276   :  { %7355 = vmatprep.subr.bf16.mxu0 %v7354_v10  ;;  %7419 = vmatprep.subr.bf16.mxu1 %v7418_v11  ;;  %v7436_v10 = vpack.c.bf16 %v1982_v56, %v1974_v5  ;;  %v1988_v11 = vld [vmem:[#allocation14 + $0x3a0] sm:$0xff]  ;;  %v7374_v13 = vpack.c.bf16 %v1997_v7, %v1989_v6  ;;  %v7438_v14 = vpack.c.bf16 %v1999_v8, %v1991_v22  ;;  %v2054_v7 = vld [vmem:[#allocation14 + $0x5b0] sm:$0xff]  ;;  %v2069_v8 = vld [vmem:[#allocation14 + $0x628] sm:$0xff] }
 0x277   :  { %v7376_v21 = vpack.c.bf16 %v1996_v12, %v1988_v11  ;;  %v2060_v5 = vld [vmem:[#allocation14 + $0x5e0] sm:$0xff]  ;;  %v2062_v22 = vld [vmem:[#allocation14 + $0x5f0] sm:$0xff]  ;;  %v2079_v11 = vld [vmem:[#allocation14 + $0x678] sm:$0xff] }
 0x279   :  { %7357 = vmatpush1.bf16.msra.mxu0 %v7356_v18  ;;  %7421 = vmatpush1.bf16.msra.mxu1 %v7420_v19  ;;  %v2013_v18 = vld [vmem:[#allocation14 + $0x468] sm:$0xff]  ;;  %v2007_v19 = vld [vmem:[#allocation14 + $0x438] sm:$0xff] }
 0x27a   :  { %7359 = vmatprep.subr.bf16.mxu0 %v7358_v24  ;;  %7423 = vmatprep.subr.bf16.mxu1 %v7422_v25  ;;  %v7440_v24 = vpack.c.bf16 %v1998_v16, %v1990_v15  ;;  %v2004_v25 = vld [vmem:[#allocation14 + $0x420] sm:$0xff]  ;;  %v7378_v28 = vpack.c.bf16 %v2013_v18, %v2005_v17  ;;  %v7442_v29 = vpack.c.bf16 %v2015_v20, %v2007_v19  ;;  %v2070_v18 = vld [vmem:[#allocation14 + $0x630] sm:$0xff]  ;;  %v2085_v20 = vld [vmem:[#allocation14 + $0x6a8] sm:$0xff] }
 0x27b   :  { %v7380_v35 = vpack.c.bf16 %v2012_v26, %v2004_v25  ;;  %v2076_v15 = vld [vmem:[#allocation14 + $0x660] sm:$0xff]  ;;  %v2078_v19 = vld [vmem:[#allocation14 + $0x670] sm:$0xff]  ;;  %v2095_v25 = vld [vmem:[#allocation14 + $0x6f8] sm:$0xff] }
 0x27d   :  { %7361 = vmatpush1.bf16.msra.mxu0 %v7360_v53  ;;  %7425 = vmatpush1.bf16.msra.mxu1 %v7424_v33  ;;  %v2029_v53 = vld [vmem:[#allocation14 + $0x4e8] sm:$0xff]  ;;  %v2023_v33 = vld [vmem:[#allocation14 + $0x4b8] sm:$0xff] }
 0x27e   :  { %7363 = vmatprep.subr.bf16.mxu0 %v7362_v36  ;;  %7427 = vmatprep.subr.bf16.mxu1 %v7426_v42  ;;  %v7444_v36 = vpack.c.bf16 %v2014_v31, %v2006_v30  ;;  %v2020_v42 = vld [vmem:[#allocation14 + $0x4a0] sm:$0xff]  ;;  %v7382_v43 = vpack.c.bf16 %v2029_v53, %v2021_v32  ;;  %v7446_v44 = vpack.c.bf16 %v2031_v34, %v2023_v33  ;;  %v2086_v53 = vld [vmem:[#allocation14 + $0x6b0] sm:$0xff]  ;;  %v2101_v34 = vld [vmem:[#allocation14 + $0x728] sm:$0xff] }
 0x27f   :  { %v7384_v52 = vpack.c.bf16 %v2028_v38, %v2020_v42  ;;  %v2092_v30 = vld [vmem:[#allocation14 + $0x6e0] sm:$0xff]  ;;  %v2094_v33 = vld [vmem:[#allocation14 + $0x6f0] sm:$0xff]  ;;  %v2111_v42 = vld [vmem:[#allocation14 + $0x778] sm:$0xff] }
 0x281   :  { %7365 = vmatpush1.bf16.msra.mxu0 %v7364_v48  ;;  %7429 = vmatpush1.bf16.msra.mxu1 %v7428_v49  ;;  %v2045_v48 = vld [vmem:[#allocation14 + $0x568] sm:$0xff]  ;;  %v2039_v49 = vld [vmem:[#allocation14 + $0x538] sm:$0xff] }
 0x282   :  { %7367 = vmatprep.subr.bf16.mxu0 %v7366_v55  ;;  %7431 = vmatprep.subr.bf16.mxu1 %v7430_v27  ;;  %v7448_v55 = vpack.c.bf16 %v2030_v46, %v2022_v45  ;;  %v2036_v27 = vld [vmem:[#allocation14 + $0x520] sm:$0xff]  ;;  %v7386_v58 = vpack.c.bf16 %v2045_v48, %v2037_v47  ;;  %v7450_v59 = vpack.c.bf16 %v2047_v50, %v2039_v49  ;;  %v2102_v48 = vld [vmem:[#allocation14 + $0x730] sm:$0xff]  ;;  %v2117_v50 = vld [vmem:[#allocation14 + $0x7a8] sm:$0xff] }
 0x283   :  { %v7388_v23 = vpack.c.bf16 %v2044_v57, %v2036_v27  ;;  %v2108_v45 = vld [vmem:[#allocation14 + $0x760] sm:$0xff]  ;;  %v2110_v49 = vld [vmem:[#allocation14 + $0x770] sm:$0xff]  ;;  %v2127_v27 = vld [vmem:[#allocation14 + $0x7f8] sm:$0xff] }
 0x285   :  { %7369 = vmatpush1.bf16.msra.mxu0 %v7368_v1  ;;  %7433 = vmatpush1.bf16.msra.mxu1 %v7432_v2  ;;  %v2061_v1 = vld [vmem:[#allocation14 + $0x5e8] sm:$0xff]  ;;  %v2055_v2 = vld [vmem:[#allocation14 + $0x5b8] sm:$0xff] }
 0x286   :  { %7371 = vmatprep.subr.bf16.mxu0 %v7370_v39  ;;  %7435 = vmatprep.subr.bf16.mxu1 %v7434_v4  ;;  %v7452_v39 = vpack.c.bf16 %v2046_v63, %v2038_v62  ;;  %v2052_v4 = vld [vmem:[#allocation14 + $0x5a0] sm:$0xff]  ;;  %v7390_v56 = vpack.c.bf16 %v2061_v1, %v2053_v0  ;;  %v7454_v6 = vpack.c.bf16 %v2063_v3, %v2055_v2  ;;  %v2118_v1 = vld [vmem:[#allocation14 + $0x7b0] sm:$0xff] }
 0x287   :  { %v7392_v12 = vpack.c.bf16 %v2060_v5, %v2052_v4  ;;  %v2124_v0 = vld [vmem:[#allocation14 + $0x7e0] sm:$0xff]  ;;  %v2126_v2 = vld [vmem:[#allocation14 + $0x7f0] sm:$0xff]  ;;  %v2541_v4 = vld [vmem:[#allocation14 + $0x48] sm:$0xff] }
 0x288   :  { %v2535_v5 = vld [vmem:[#allocation14 + $0x18] sm:$0xff] }
 0x289   :  { %7373 = vmatpush1.bf16.msra.mxu0 %v7372_v9  ;;  %7437 = vmatpush1.bf16.msra.mxu1 %v7436_v10  ;;  %v2077_v9 = vld [vmem:[#allocation14 + $0x668] sm:$0xff]  ;;  %v2071_v10 = vld [vmem:[#allocation14 + $0x638] sm:$0xff] }
 0x28a   :  { %7375 = vmatprep.subr.bf16.mxu0 %v7374_v13  ;;  %7439 = vmatprep.subr.bf16.mxu1 %v7438_v14  ;;  %v7456_v13 = vpack.c.bf16 %v2062_v22, %v2054_v7  ;;  %v2068_v14 = vld [vmem:[#allocation14 + $0x620] sm:$0xff]  ;;  %v7394_v16 = vpack.c.bf16 %v2077_v9, %v2069_v8  ;;  %v7458_v17 = vpack.c.bf16 %v2079_v11, %v2071_v10  ;;  %v2534_v9 = vld [vmem:[#allocation14 + $0x10] sm:$0xff] }
 0x28b   :  { %v7396_v26 = vpack.c.bf16 %v2076_v15, %v2068_v14  ;;  %v2532_v22 = vld [vmem:[#allocation14] sm:$0xff]  ;;  %v2542_v11 = vld [vmem:[#allocation14 + $0x50] sm:$0xff]  ;;  %v2557_v14 = vld [vmem:[#allocation14 + $0xc8] sm:$0xff] }
 0x28c   :  { %v2540_v8 = vld [vmem:[#allocation14 + $0x40] sm:$0xff]  ;;  %v2551_v15 = vld [vmem:[#allocation14 + $0x98] sm:$0xff] }
 0x28d   :  { %7377 = vmatpush1.bf16.msra.mxu0 %v7376_v21  ;;  %7441 = vmatpush1.bf16.msra.mxu1 %v7440_v24  ;;  %v2093_v21 = vld [vmem:[#allocation14 + $0x6e8] sm:$0xff]  ;;  %v2087_v24 = vld [vmem:[#allocation14 + $0x6b8] sm:$0xff]  ;;  %v7476_v10 = vpack.c.bf16 %v2540_v8, %v2532_v22  ;;  %v2612_v8 = vld [vmem:[#allocation14 + $0x280] sm:$0xff] }
 0x28e   :  { %7379 = vmatprep.subr.bf16.mxu0 %v7378_v28  ;;  %7443 = vmatprep.subr.bf16.mxu1 %v7442_v29  ;;  %v7460_v28 = vpack.c.bf16 %v2078_v19, %v2070_v18  ;;  %v2084_v29 = vld [vmem:[#allocation14 + $0x6a0] sm:$0xff]  ;;  %v7398_v31 = vpack.c.bf16 %v2093_v21, %v2085_v20  ;;  %v7462_v32 = vpack.c.bf16 %v2095_v25, %v2087_v24  ;;  %v2550_v21 = vld [vmem:[#allocation14 + $0x90] sm:$0xff]  ;;  %v2623_v22 = vld [vmem:[#allocation14 + $0x2d8] sm:$0xff] }
 0x28f   :  { %v7400_v38 = vpack.c.bf16 %v2092_v30, %v2084_v29  ;;  %v2556_v18 = vld [vmem:[#allocation14 + $0xc0] sm:$0xff]  ;;  %v2558_v24 = vld [vmem:[#allocation14 + $0xd0] sm:$0xff]  ;;  %v2567_v29 = vld [vmem:[#allocation14 + $0x118] sm:$0xff] }
 0x290   :  { %v7544_v25 = vpack.c.bf16 %v2558_v24, %v2550_v21 }
 0x291   :  { %7381 = vmatpush1.bf16.msra.mxu0 %v7380_v35  ;;  %7445 = vmatpush1.bf16.msra.mxu1 %v7444_v36  ;;  %v2109_v35 = vld [vmem:[#allocation14 + $0x768] sm:$0xff]  ;;  %v2103_v36 = vld [vmem:[#allocation14 + $0x738] sm:$0xff] }
 0x292   :  { %7383 = vmatprep.subr.bf16.mxu0 %v7382_v43  ;;  %7447 = vmatprep.subr.bf16.mxu1 %v7446_v44  ;;  %v7464_v43 = vpack.c.bf16 %v2094_v33, %v2086_v53  ;;  %v2100_v44 = vld [vmem:[#allocation14 + $0x720] sm:$0xff]  ;;  %v7402_v46 = vpack.c.bf16 %v2109_v35, %v2101_v34  ;;  %v7466_v47 = vpack.c.bf16 %v2111_v42, %v2103_v36  ;;  %v2566_v35 = vld [vmem:[#allocation14 + $0x110] sm:$0xff] }
 0x293   :  { %v7404_v57 = vpack.c.bf16 %v2108_v45, %v2100_v44  ;;  %v2572_v53 = vld [vmem:[#allocation14 + $0x140] sm:$0xff]  ;;  %v2574_v36 = vld [vmem:[#allocation14 + $0x150] sm:$0xff]  ;;  %v2583_v44 = vld [vmem:[#allocation14 + $0x198] sm:$0xff] }
 0x294   :  { %v7548_v42 = vpack.c.bf16 %v2574_v36, %v2566_v35 }
 0x295   :  { %7385 = vmatpush1.bf16.msra.mxu0 %v7384_v52  ;;  %7449 = vmatpush1.bf16.msra.mxu1 %v7448_v55  ;;  %v2125_v52 = vld [vmem:[#allocation14 + $0x7e8] sm:$0xff]  ;;  %v2119_v55 = vld [vmem:[#allocation14 + $0x7b8] sm:$0xff] }
 0x296   :  { %7387 = vmatprep.subr.bf16.mxu0 %v7386_v58  ;;  %7451 = vmatprep.subr.bf16.mxu1 %v7450_v59  ;;  %v7468_v58 = vpack.c.bf16 %v2110_v49, %v2102_v48  ;;  %v2116_v59 = vld [vmem:[#allocation14 + $0x7a0] sm:$0xff]  ;;  %v7406_v62 = vpack.c.bf16 %v2125_v52, %v2117_v50  ;;  %v7470_v63 = vpack.c.bf16 %v2127_v27, %v2119_v55  ;;  %v2582_v52 = vld [vmem:[#allocation14 + $0x190] sm:$0xff] }
 0x297   :  { %v7408_v3 = vpack.c.bf16 %v2124_v0, %v2116_v59  ;;  %v2588_v48 = vld [vmem:[#allocation14 + $0x1c0] sm:$0xff]  ;;  %v2590_v55 = vld [vmem:[#allocation14 + $0x1d0] sm:$0xff]  ;;  %v2599_v59 = vld [vmem:[#allocation14 + $0x218] sm:$0xff] }
 0x298   :  { %v7552_v27 = vpack.c.bf16 %v2590_v55, %v2582_v52  ;;  %v2596_v0 = vld [vmem:[#allocation14 + $0x200] sm:$0xff] }
 0x299   :  { %7389 = vmatpush1.bf16.msra.mxu0 %v7388_v23  ;;  %7453 = vmatpush1.bf16.msra.mxu1 %v7452_v39  ;;  %v7472_v23 = vpack.c.bf16 %v2126_v2, %v2118_v1  ;;  %v2533_v39 = vld [vmem:[#allocation14 + $0x8] sm:$0xff]  ;;  %v2604_v1 = vld [vmem:[#allocation14 + $0x240] sm:$0xff] }
 0x29a   :  { %7391 = vmatprep.subr.bf16.mxu0 %v7390_v56  ;;  %7455 = vmatprep.subr.bf16.mxu1 %v7454_v6  ;;  %v7474_v56 = vpack.c.bf16 %v2541_v4, %v2533_v39  ;;  %v2543_v6 = vld [vmem:[#allocation14 + $0x58] sm:$0xff]  ;;  %v2606_v39 = vld [vmem:[#allocation14 + $0x250] sm:$0xff] }
 0x29b   :  { %v7538_v7 = vpack.c.bf16 %v2543_v6, %v2535_v5  ;;  %v2613_v5 = vld [vmem:[#allocation14 + $0x288] sm:$0xff]  ;;  %v2615_v6 = vld [vmem:[#allocation14 + $0x298] sm:$0xff] }
 0x29d   :  { %7393 = vmatpush1.bf16.msra.mxu0 %v7392_v12  ;;  %7457 = vmatpush1.bf16.msra.mxu1 %v7456_v13  ;;  %v7540_v12 = vpack.c.bf16 %v2542_v11, %v2534_v9  ;;  %v2549_v13 = vld [vmem:[#allocation14 + $0x88] sm:$0xff]  ;;  %v2620_v9 = vld [vmem:[#allocation14 + $0x2c0] sm:$0xff] }
 0x29e   :  { %7395 = vmatprep.subr.bf16.mxu0 %v7394_v16  ;;  %7459 = vmatprep.subr.bf16.mxu1 %v7458_v17  ;;  %v2559_v16 = vld [vmem:[#allocation14 + $0xd8] sm:$0xff]  ;;  %v2548_v17 = vld [vmem:[#allocation14 + $0x80] sm:$0xff]  ;;  %v7496_v11 = vpack.c.bf16 %v2620_v9, %v2612_v8 }
 0x29f   :  { %v7542_v19 = vpack.c.bf16 %v2559_v16, %v2551_v15  ;;  %v7480_v20 = vpack.c.bf16 %v2556_v18, %v2548_v17  ;;  %v2629_v15 = vld [vmem:[#allocation14 + $0x308] sm:$0xff]  ;;  %v2631_v16 = vld [vmem:[#allocation14 + $0x318] sm:$0xff] }
 0x2a0   :  { %v2639_v18 = vld [vmem:[#allocation14 + $0x358] sm:$0xff] }
 0x2a1   :  { %7397 = vmatpush1.bf16.msra.mxu0 %v7396_v26  ;;  %7461 = vmatpush1.bf16.msra.mxu1 %v7460_v28  ;;  %v2565_v26 = vld [vmem:[#allocation14 + $0x108] sm:$0xff]  ;;  %v7562_v21 = vpack.c.bf16 %v2639_v18, %v2631_v16  ;;  %v2703_v9 = vld [vmem:[#allocation14 + $0x558] sm:$0xff] }
 0x2a2   :  { %7399 = vmatprep.subr.bf16.mxu0 %v7398_v31  ;;  %7463 = vmatprep.subr.bf16.mxu1 %v7462_v32  ;;  %v2573_v28 = vld [vmem:[#allocation14 + $0x148] sm:$0xff]  ;;  %v2575_v31 = vld [vmem:[#allocation14 + $0x158] sm:$0xff]  ;;  %v2564_v32 = vld [vmem:[#allocation14 + $0x100] sm:$0xff] }
 0x2a3   :  { %v7482_v30 = vpack.c.bf16 %v2573_v28, %v2565_v26  ;;  %v7546_v33 = vpack.c.bf16 %v2575_v31, %v2567_v29  ;;  %v7484_v34 = vpack.c.bf16 %v2572_v53, %v2564_v32  ;;  %v2638_v26 = vld [vmem:[#allocation14 + $0x350] sm:$0xff]  ;;  %v2645_v29 = vld [vmem:[#allocation14 + $0x388] sm:$0xff]  ;;  %v2647_v31 = vld [vmem:[#allocation14 + $0x398] sm:$0xff] }
 0x2a4   :  { %v2655_v53 = vld [vmem:[#allocation14 + $0x3d8] sm:$0xff]  ;;  %v2709_v16 = vld [vmem:[#allocation14 + $0x588] sm:$0xff] }
 0x2a5   :  { %7401 = vmatpush1.bf16.msra.mxu0 %v7400_v38  ;;  %7465 = vmatpush1.bf16.msra.mxu1 %v7464_v43  ;;  %v2581_v38 = vld [vmem:[#allocation14 + $0x188] sm:$0xff]  ;;  %v7566_v35 = vpack.c.bf16 %v2655_v53, %v2647_v31  ;;  %v2711_v18 = vld [vmem:[#allocation14 + $0x598] sm:$0xff] }
 0x2a6   :  { %7403 = vmatprep.subr.bf16.mxu0 %v7402_v46  ;;  %7467 = vmatprep.subr.bf16.mxu1 %v7466_v47  ;;  %v2589_v43 = vld [vmem:[#allocation14 + $0x1c8] sm:$0xff]  ;;  %v2591_v46 = vld [vmem:[#allocation14 + $0x1d8] sm:$0xff]  ;;  %v2580_v47 = vld [vmem:[#allocation14 + $0x180] sm:$0xff] }
 0x2a7   :  { %v7486_v45 = vpack.c.bf16 %v2589_v43, %v2581_v38  ;;  %v7550_v49 = vpack.c.bf16 %v2591_v46, %v2583_v44  ;;  %v7488_v50 = vpack.c.bf16 %v2588_v48, %v2580_v47  ;;  %v2654_v38 = vld [vmem:[#allocation14 + $0x3d0] sm:$0xff]  ;;  %v2661_v44 = vld [vmem:[#allocation14 + $0x408] sm:$0xff]  ;;  %v2663_v46 = vld [vmem:[#allocation14 + $0x418] sm:$0xff] }
 0x2a8   :  { %v2671_v48 = vld [vmem:[#allocation14 + $0x458] sm:$0xff] }
 0x2a9   :  { %7405 = vmatpush1.bf16.msra.mxu0 %v7404_v57  ;;  %7469 = vmatpush1.bf16.msra.mxu1 %v7468_v58  ;;  %v2597_v57 = vld [vmem:[#allocation14 + $0x208] sm:$0xff]  ;;  %v7570_v52 = vpack.c.bf16 %v2671_v48, %v2663_v46  ;;  %v2727_v53 = vld [vmem:[#allocation14 + $0x618] sm:$0xff] }
 0x2aa   :  { %7407 = vmatprep.subr.bf16.mxu0 %v7406_v62  ;;  %7471 = vmatprep.subr.bf16.mxu1 %v7470_v63  ;;  %v2605_v58 = vld [vmem:[#allocation14 + $0x248] sm:$0xff]  ;;  %v2607_v63 = vld [vmem:[#allocation14 + $0x258] sm:$0xff] }
 0x2ab   :  { %v7490_v62 = vpack.c.bf16 %v2605_v58, %v2597_v57  ;;  %v7554_v2 = vpack.c.bf16 %v2607_v63, %v2599_v59  ;;  %v2670_v57 = vld [vmem:[#allocation14 + $0x450] sm:$0xff]  ;;  %v2677_v59 = vld [vmem:[#allocation14 + $0x488] sm:$0xff]  ;;  %v2679_v63 = vld [vmem:[#allocation14 + $0x498] sm:$0xff] }
 0x2ac   :  { %v2749_v46 = vld [vmem:[#allocation14 + $0x6c8] sm:$0xff] }
 0x2ad   :  { %7409 = vmatpush1.bf16.msra.mxu0 %v7408_v3  ;;  %7473 = vmatpush1.bf16.msra.mxu1 %v7472_v23  ;;  %v7492_v3 = vpack.c.bf16 %v2604_v1, %v2596_v0  ;;  %v2598_v23 = vld [vmem:[#allocation14 + $0x210] sm:$0xff]  ;;  %v2687_v1 = vld [vmem:[#allocation14 + $0x4d8] sm:$0xff] }
 0x2ae   :  { %7475 = vmatprep.subr.bf16.mxu0 %v7474_v56  ;;  %7539 = vmatprep.subr.bf16.mxu1 %v7538_v7  ;;  %v7556_v4 = vpack.c.bf16 %v2606_v39, %v2598_v23  ;;  %v2621_v56 = vld [vmem:[#allocation14 + $0x2c8] sm:$0xff]  ;;  %v7574_v23 = vpack.c.bf16 %v2687_v1, %v2679_v63  ;;  %v2759_v63 = vld [vmem:[#allocation14 + $0x718] sm:$0xff] }
 0x2af   :  { %v7494_v7 = vpack.c.bf16 %v2621_v56, %v2613_v5  ;;  %v2686_v5 = vld [vmem:[#allocation14 + $0x4d0] sm:$0xff]  ;;  %v2767_v1 = vld [vmem:[#allocation14 + $0x758] sm:$0xff] }
 0x2b0   :  { %2346 = vmatmul.mubr.f32.vlgmr.msra.gmra.mrb[14].mxu0 %v9642_v61  ;;  %2417 = vmatmul.mubr.f32.vlgmr.msra.gmra.mrb[14].mxu1 %v9642_v61  ;;  %v7478_v61 = vpack.c.bf16 %v2557_v14, %v2549_v13  ;;  %v2622_v13 = vld [vmem:[#allocation14 + $0x2d0] sm:$0xff] }
 0x2b1   :  { %7477 = vmatpush1.bf16.msra.mxu0 %v7476_v10  ;;  %7541 = vmatpush1.bf16.msra.mxu1 %v7540_v12  ;;  %v7558_v10 = vpack.c.bf16 %v2623_v22, %v2615_v6  ;;  %v2614_v12 = vld [vmem:[#allocation14 + $0x290] sm:$0xff]  ;;  %v2693_v6 = vld [vmem:[#allocation14 + $0x508] sm:$0xff]  ;;  %v2695_v22 = vld [vmem:[#allocation14 + $0x518] sm:$0xff] }
 0x2b2   :  { %7479 = vmatprep.subr.bf16.mxu0 %v7478_v61  ;;  %7543 = vmatprep.subr.bf16.mxu1 %v7542_v19  ;;  %v7560_v14 = vpack.c.bf16 %v2622_v13, %v2614_v12  ;;  %v2637_v61 = vld [vmem:[#allocation14 + $0x348] sm:$0xff]  ;;  %v2628_v19 = vld [vmem:[#allocation14 + $0x300] sm:$0xff]  ;;  %v7578_v12 = vpack.c.bf16 %v2703_v9, %v2695_v22  ;;  %v2775_v22 = vld [vmem:[#allocation14 + $0x798] sm:$0xff] }
 0x2b3   :  { %v7498_v17 = vpack.c.bf16 %v2637_v61, %v2629_v15  ;;  %v2702_v15 = vld [vmem:[#allocation14 + $0x550] sm:$0xff] }
 0x2b5   :  { %7481 = vmatpush1.bf16.msra.mxu0 %v7480_v20  ;;  %7545 = vmatpush1.bf16.msra.mxu1 %v7544_v25  ;;  %v2636_v20 = vld [vmem:[#allocation14 + $0x340] sm:$0xff]  ;;  %v2630_v25 = vld [vmem:[#allocation14 + $0x310] sm:$0xff] }
 0x2b6   :  { %7483 = vmatprep.subr.bf16.mxu0 %v7482_v30  ;;  %7547 = vmatprep.subr.bf16.mxu1 %v7546_v33  ;;  %v7500_v24 = vpack.c.bf16 %v2636_v20, %v2628_v19  ;;  %v7564_v28 = vpack.c.bf16 %v2638_v26, %v2630_v25  ;;  %v2653_v30 = vld [vmem:[#allocation14 + $0x3c8] sm:$0xff]  ;;  %v2644_v33 = vld [vmem:[#allocation14 + $0x380] sm:$0xff]  ;;  %v2719_v20 = vld [vmem:[#allocation14 + $0x5d8] sm:$0xff] }
 0x2b7   :  { %v7502_v32 = vpack.c.bf16 %v2653_v30, %v2645_v29  ;;  %v7582_v25 = vpack.c.bf16 %v2719_v20, %v2711_v18  ;;  %v2718_v29 = vld [vmem:[#allocation14 + $0x5d0] sm:$0xff]  ;;  %v2725_v30 = vld [vmem:[#allocation14 + $0x608] sm:$0xff]  ;;  %v2539_v20 = vld [vmem:[#allocation14 + $0x38] sm:$0xff] }
 0x2b8   :  { %v2537_v18 = vld [vmem:[#allocation14 + $0x28] sm:$0xff] }
 0x2b9   :  { %7485 = vmatpush1.bf16.msra.mxu0 %v7484_v34  ;;  %7549 = vmatpush1.bf16.msra.mxu1 %v7548_v42  ;;  %v2652_v34 = vld [vmem:[#allocation14 + $0x3c0] sm:$0xff]  ;;  %v2646_v42 = vld [vmem:[#allocation14 + $0x390] sm:$0xff] }
 0x2ba   :  { %7487 = vmatprep.subr.bf16.mxu0 %v7486_v45  ;;  %7551 = vmatprep.subr.bf16.mxu1 %v7550_v49  ;;  %v7504_v36 = vpack.c.bf16 %v2652_v34, %v2644_v33  ;;  %v7568_v43 = vpack.c.bf16 %v2654_v38, %v2646_v42  ;;  %v2669_v45 = vld [vmem:[#allocation14 + $0x448] sm:$0xff]  ;;  %v2660_v49 = vld [vmem:[#allocation14 + $0x400] sm:$0xff]  ;;  %v2735_v33 = vld [vmem:[#allocation14 + $0x658] sm:$0xff] }
 0x2bb   :  { %v7506_v47 = vpack.c.bf16 %v2669_v45, %v2661_v44  ;;  %v2732_v42 = vld [vmem:[#allocation14 + $0x640] sm:$0xff]  ;;  %v2726_v38 = vld [vmem:[#allocation14 + $0x610] sm:$0xff]  ;;  %v2741_v45 = vld [vmem:[#allocation14 + $0x688] sm:$0xff] }
 0x2bc   :  { %v2734_v44 = vld [vmem:[#allocation14 + $0x650] sm:$0xff]  ;;  %v7526_v48 = vpack.c.bf16 %v2749_v46, %v2741_v45 }
 0x2bd   :  { %7489 = vmatpush1.bf16.msra.mxu0 %v7488_v50  ;;  %7553 = vmatpush1.bf16.msra.mxu1 %v7552_v27  ;;  %v2668_v50 = vld [vmem:[#allocation14 + $0x440] sm:$0xff]  ;;  %v2662_v27 = vld [vmem:[#allocation14 + $0x410] sm:$0xff] }
 0x2be   :  { %7491 = vmatprep.subr.bf16.mxu0 %v7490_v62  ;;  %7555 = vmatprep.subr.bf16.mxu1 %v7554_v2  ;;  %v7508_v55 = vpack.c.bf16 %v2668_v50, %v2660_v49  ;;  %v7572_v58 = vpack.c.bf16 %v2670_v57, %v2662_v27  ;;  %v2685_v62 = vld [vmem:[#allocation14 + $0x4c8] sm:$0xff]  ;;  %v2676_v2 = vld [vmem:[#allocation14 + $0x480] sm:$0xff]  ;;  %v2743_v49 = vld [vmem:[#allocation14 + $0x698] sm:$0xff] }
 0x2bf   :  { %v7510_v0 = vpack.c.bf16 %v2685_v62, %v2677_v59  ;;  %v2751_v50 = vld [vmem:[#allocation14 + $0x6d8] sm:$0xff]  ;;  %v2748_v27 = vld [vmem:[#allocation14 + $0x6c0] sm:$0xff]  ;;  %v2742_v57 = vld [vmem:[#allocation14 + $0x690] sm:$0xff] }
 0x2c0   :  { %v2757_v59 = vld [vmem:[#allocation14 + $0x708] sm:$0xff] }
 0x2c1   :  { %7493 = vmatpush1.bf16.msra.mxu0 %v7492_v3  ;;  %7557 = vmatpush1.bf16.msra.mxu1 %v7556_v4  ;;  %v2684_v3 = vld [vmem:[#allocation14 + $0x4c0] sm:$0xff]  ;;  %v2678_v4 = vld [vmem:[#allocation14 + $0x490] sm:$0xff]  ;;  %v2765_v62 = vld [vmem:[#allocation14 + $0x748] sm:$0xff] }
 0x2c2   :  { %7495 = vmatprep.subr.bf16.mxu0 %v7494_v7  ;;  %7559 = vmatprep.subr.bf16.mxu1 %v7558_v10  ;;  %v7512_v39 = vpack.c.bf16 %v2684_v3, %v2676_v2  ;;  %v7576_v56 = vpack.c.bf16 %v2686_v5, %v2678_v4  ;;  %v2701_v7 = vld [vmem:[#allocation14 + $0x548] sm:$0xff]  ;;  %v2692_v10 = vld [vmem:[#allocation14 + $0x500] sm:$0xff]  ;;  %v7530_v3 = vpack.c.bf16 %v2765_v62, %v2757_v59  ;;  %v2758_v4 = vld [vmem:[#allocation14 + $0x710] sm:$0xff] }
 0x2c3   :  { %v7514_v8 = vpack.c.bf16 %v2701_v7, %v2693_v6  ;;  %v7594_v5 = vpack.c.bf16 %v2767_v1, %v2759_v63  ;;  %v2773_v6 = vld [vmem:[#allocation14 + $0x788] sm:$0xff] }
 0x2c4   :  { %v2781_v7 = vld [vmem:[#allocation14 + $0x7c8] sm:$0xff] }
 0x2c5   :  { %7497 = vmatpush1.bf16.msra.mxu0 %v7496_v11  ;;  %7561 = vmatpush1.bf16.msra.mxu1 %v7560_v14  ;;  %v2700_v11 = vld [vmem:[#allocation14 + $0x540] sm:$0xff]  ;;  %v2694_v14 = vld [vmem:[#allocation14 + $0x510] sm:$0xff] }
 0x2c6   :  { %7499 = vmatprep.subr.bf16.mxu0 %v7498_v17  ;;  %7563 = vmatprep.subr.bf16.mxu1 %v7562_v21  ;;  %v7516_v13 = vpack.c.bf16 %v2700_v11, %v2692_v10  ;;  %v7580_v61 = vpack.c.bf16 %v2702_v15, %v2694_v14  ;;  %v2717_v17 = vld [vmem:[#allocation14 + $0x5c8] sm:$0xff]  ;;  %v2708_v21 = vld [vmem:[#allocation14 + $0x580] sm:$0xff]  ;;  %v7534_v11 = vpack.c.bf16 %v2781_v7, %v2773_v6  ;;  %v2774_v15 = vld [vmem:[#allocation14 + $0x790] sm:$0xff] }
 0x2c7   :  { %v7518_v19 = vpack.c.bf16 %v2717_v17, %v2709_v16 }
 0x2c9   :  { %7501 = vmatpush1.bf16.msra.mxu0 %v7500_v24  ;;  %7565 = vmatpush1.bf16.msra.mxu1 %v7564_v28  ;;  %v2716_v24 = vld [vmem:[#allocation14 + $0x5c0] sm:$0xff]  ;;  %v2710_v28 = vld [vmem:[#allocation14 + $0x590] sm:$0xff] }
 0x2ca   :  { %7503 = vmatprep.subr.bf16.mxu0 %v7502_v32  ;;  %7567 = vmatprep.subr.bf16.mxu1 %v7566_v35  ;;  %v7520_v26 = vpack.c.bf16 %v2716_v24, %v2708_v21  ;;  %v7584_v31 = vpack.c.bf16 %v2718_v29, %v2710_v28  ;;  %v2733_v32 = vld [vmem:[#allocation14 + $0x648] sm:$0xff]  ;;  %v7586_v35 = vpack.c.bf16 %v2735_v33, %v2727_v53  ;;  %v2547_v24 = vld [vmem:[#allocation14 + $0x78] sm:$0xff] }
 0x2cb   :  { %v7522_v34 = vpack.c.bf16 %v2733_v32, %v2725_v30 }
 0x2cd   :  { %7505 = vmatpush1.bf16.msra.mxu0 %v7504_v36  ;;  %7569 = vmatpush1.bf16.msra.mxu1 %v7568_v43  ;;  %v2724_v36 = vld [vmem:[#allocation14 + $0x600] sm:$0xff] }
 0x2ce   :  { %7507 = vmatprep.subr.bf16.mxu0 %v7506_v47  ;;  %7571 = vmatprep.subr.bf16.mxu1 %v7570_v52  ;;  %v7524_v43 = vpack.c.bf16 %v2732_v42, %v2724_v36  ;;  %v7588_v47 = vpack.c.bf16 %v2734_v44, %v2726_v38  ;;  %v2740_v52 = vld [vmem:[#allocation14 + $0x680] sm:$0xff] }
 0x2d1   :  { %7509 = vmatpush1.bf16.msra.mxu0 %v7508_v55  ;;  %7573 = vmatpush1.bf16.msra.mxu1 %v7572_v58  ;;  %v7590_v55 = vpack.c.bf16 %v2751_v50, %v2743_v49  ;;  %v2750_v58 = vld [vmem:[#allocation14 + $0x6d0] sm:$0xff] }
 0x2d2   :  { %7511 = vmatprep.subr.bf16.mxu0 %v7510_v0  ;;  %7575 = vmatprep.subr.bf16.mxu1 %v7574_v23  ;;  %v7528_v0 = vpack.c.bf16 %v2748_v27, %v2740_v52  ;;  %v7592_v2 = vpack.c.bf16 %v2750_v58, %v2742_v57  ;;  %v2756_v23 = vld [vmem:[#allocation14 + $0x700] sm:$0xff] }
 0x2d3   :  { %v1869_v52 = vld [vmem:[#allocation3 + $0x1] ss:$8 sm:$0xf] }
 0x2d5   :  { %7513 = vmatpush1.bf16.msra.mxu0 %v7512_v39  ;;  %7577 = vmatpush1.bf16.msra.mxu1 %v7576_v56  ;;  %v2764_v39 = vld [vmem:[#allocation14 + $0x740] sm:$0xff]  ;;  %v2766_v56 = vld [vmem:[#allocation14 + $0x750] sm:$0xff] }
 0x2d6   :  { %7515 = vmatprep.subr.bf16.mxu0 %v7514_v8  ;;  %7579 = vmatprep.subr.bf16.mxu1 %v7578_v12  ;;  %v2783_v8 = vld [vmem:[#allocation14 + $0x7d8] sm:$0xff]  ;;  %v7532_v9 = vpack.c.bf16 %v2764_v39, %v2756_v23  ;;  %v7596_v10 = vpack.c.bf16 %v2766_v56, %v2758_v4  ;;  %v2772_v12 = vld [vmem:[#allocation14 + $0x780] sm:$0xff] }
 0x2d7   :  { %v7598_v14 = vpack.c.bf16 %v2783_v8, %v2775_v22  ;;  %v9171_v4 = vld [vmem:[#allocation6] sm:$0x3] }
 0x2d9   :  { %7517 = vmatpush1.bf16.msra.mxu0 %v7516_v13  ;;  %7581 = vmatpush1.bf16.msra.mxu1 %v7580_v61  ;;  %v2780_v13 = vld [vmem:[#allocation14 + $0x7c0] sm:$0xff]  ;;  %v2782_v61 = vld [vmem:[#allocation14 + $0x7d0] sm:$0xff] }
 0x2da   :  { %7519 = vmatprep.subr.bf16.mxu0 %v7518_v19  ;;  %7583 = vmatprep.subr.bf16.mxu1 %v7582_v25  ;;  %v7536_v16 = vpack.c.bf16 %v2780_v13, %v2772_v12  ;;  %v7600_v17 = vpack.c.bf16 %v2782_v61, %v2774_v15  ;;  %v2545_v19 = vld [vmem:[#allocation14 + $0x68] sm:$0xff]  ;;  %v7666_v25 = vpack.c.bf16 %v2547_v24, %v2539_v20  ;;  %v2520_v61 = vmul.f32 0.0, %v9633_v54  ;;  %v2555_v24 = vld [vmem:[#allocation14 + $0xb8] sm:$0xff] }
 0x2db   :  { %v7602_v21 = vpack.c.bf16 %v2545_v19, %v2537_v18  ;;  %v2538_v18 = vld [vmem:[#allocation14 + $0x30] sm:$0xff]  ;;  %v2553_v20 = vld [vmem:[#allocation14 + $0xa8] sm:$0xff] }
 0x2dd   :  { %7521 = vmatpush1.bf16.msra.mxu0 %v7520_v26  ;;  %7585 = vmatpush1.bf16.msra.mxu1 %v7584_v31 }
 0x2de   :  { %7523 = vmatprep.subr.bf16.mxu0 %v7522_v34  ;;  %7587 = vmatprep.subr.bf16.mxu1 %v7586_v35 }
 0x2e1   :  { %7525 = vmatpush1.bf16.msra.mxu0 %v7524_v43  ;;  %7589 = vmatpush1.bf16.msra.mxu1 %v7588_v47 }
 0x2e2   :  { %7527 = vmatprep.subr.bf16.mxu0 %v7526_v48  ;;  %7591 = vmatprep.subr.bf16.mxu1 %v7590_v55  ;;  %v1870_v48 = vld [vmem:[#allocation3 + $0x1] ss:$8 sm:$0xf0] }
 0x2e3   :  { %v1871_v55 = vor.u32 %v1870_v48, %v1869_v52  ;;  %v2585_v52 = vld [vmem:[#allocation14 + $0x1a8] sm:$0xff] }
 0x2e5   :  { %7529 = vmatpush1.bf16.msra.mxu0 %v7528_v0  ;;  %7593 = vmatpush1.bf16.msra.mxu1 %v7592_v2 }
 0x2e6   :  { %7531 = vmatprep.subr.bf16.mxu0 %v7530_v3  ;;  %7595 = vmatprep.subr.bf16.mxu1 %v7594_v5  ;;  %v1864_v5 = vmul.f32 0.0, %v9171_v4  ;;  %v2603_v4 = vld [vmem:[#allocation14 + $0x238] sm:$0xff] }
 0x2e8   :  { %v9655_v22 = vadd.f32 %v1864_v5, %v9630_v40  ;;  %v2546_v40 = vld [vmem:[#allocation14 + $0x70] sm:$0xff]  ;;  %v2611_v5 = vld [vmem:[#allocation14 + $0x278] sm:$0xff] }
 0x2e9   :  { %7533 = vmatpush1.bf16.msra.mxu0 %v7532_v9  ;;  %7597 = vmatpush1.bf16.msra.mxu1 %v7596_v10 }
 0x2ea   :  { %7535 = vmatprep.subr.bf16.mxu0 %v7534_v11  ;;  %7599 = vmatprep.subr.bf16.mxu1 %v7598_v14 }
 0x2ed   :  { %7537 = vmatpush1.bf16.msra.mxu0 %v7536_v16  ;;  %7601 = vmatpush1.bf16.msra.mxu1 %v7600_v17  ;;  %v2536_v16 = vld [vmem:[#allocation14 + $0x20] sm:$0xff] }
 0x2ee   :  { %7603 = vmatprep.subr.bf16.mxu0 %v7602_v21  ;;  %7667 = vmatprep.subr.bf16.mxu1 %v7666_v25  ;;  %v2544_v17 = vld [vmem:[#allocation14 + $0x60] sm:$0xff]  ;;  %v2561_v21 = vld [vmem:[#allocation14 + $0xe8] sm:$0xff]  ;;  %v2563_v25 = vld [vmem:[#allocation14 + $0xf8] sm:$0xff] }
 0x343   :  { %v2205_v26 = vpop.f32.mrb[12].mxu0  ;;  %v2276_v28 = vpop.f32.mrb[12].mxu1 }
 0x344   :  { %v2207_v29 = vpop.f32.mrb[13].mxu0  ;;  %v2278_v30 = vpop.f32.mrb[13].mxu1 }
 0x345   :  { %v2431_v31 = vcombine.low %v2205_v26, %v2207_v29  ;;  %v2432_v32 = vcombine.low %v2276_v28, %v2278_v30  ;;  %v7604_v28 = vpack.c.bf16 %v2544_v17, %v2536_v16  ;;  %v7668_v29 = vpack.c.bf16 %v2546_v40, %v2538_v18  ;;  %v2552_v30 = vld [vmem:[#allocation14 + $0xa0] sm:$0xff]  ;;  %v2627_v16 = vld [vmem:[#allocation14 + $0x2f8] sm:$0xff] }
 0x346   :  { %v2616_v40 = vld [vmem:[#allocation14 + $0x2a0] sm:$0xff] }
 0x347   :  { %v2441_v53 = vrot.slane %v2431_v31, %v9622_v60  ;;  %v2448_v33 = vrot.slane %v2432_v32, %v9622_v60  ;;  %v2560_v31 = vld [vmem:[#allocation14 + $0xe0] sm:$0xff]  ;;  %v2554_v32 = vld [vmem:[#allocation14 + $0xb0] sm:$0xff] }
 0x349   :  { %v2463_v34 = vcombine.low %v2441_v53, %v2448_v33  ;;  %v2562_v53 = vld [vmem:[#allocation14 + $0xf0] sm:$0xff]  ;;  %v2569_v33 = vld [vmem:[#allocation14 + $0x128] sm:$0xff] }
 0x34b   :  { %v2471_v49 = vrot.slane %v2463_v34, %v9622_v60  ;;  %v7606_v34 = vpack.c.bf16 %v2561_v21, %v2553_v20  ;;  %v2624_v20 = vld [vmem:[#allocation14 + $0x2e0] sm:$0xff] }
 0x383   :  { %v2347_v35 = vpop.f32.mrb[14].mxu0  ;;  %v2418_v36 = vpop.f32.mrb[14].mxu1 }
 0x384   :  { %v2349_v42 = vpop.f32.mrb[15].mxu0  ;;  %v2420_v38 = vpop.f32.mrb[15].mxu1 }
 0x385   :  { %v2433_v43 = vcombine.low %v2347_v35, %v2349_v42  ;;  %v2434_v44 = vcombine.low %v2418_v36, %v2420_v38  ;;  %v7670_v35 = vpack.c.bf16 %v2563_v25, %v2555_v24  ;;  %v2577_v36 = vld [vmem:[#allocation14 + $0x168] sm:$0xff]  ;;  %v2571_v42 = vld [vmem:[#allocation14 + $0x138] sm:$0xff]  ;;  %v2618_v25 = vld [vmem:[#allocation14 + $0x2b0] sm:$0xff] }
 0x386   :  { %v2579_v38 = vld [vmem:[#allocation14 + $0x178] sm:$0xff] }
 0x387   :  { %v2455_v45 = vrot.slane %v2433_v43, %v9622_v60  ;;  %v2462_v46 = vrot.slane %v2434_v44, %v9622_v60  ;;  %v7608_v43 = vpack.c.bf16 %v2560_v31, %v2552_v30  ;;  %v7672_v44 = vpack.c.bf16 %v2562_v53, %v2554_v32  ;;  %v2635_v30 = vld [vmem:[#allocation14 + $0x338] sm:$0xff] }
 0x388   :  { %v7674_v48 = vpack.c.bf16 %v2579_v38, %v2571_v42  ;;  %v2643_v31 = vld [vmem:[#allocation14 + $0x378] sm:$0xff]  ;;  %v7624_v32 = vpack.c.bf16 %v2624_v20, %v2616_v40  ;;  %v2634_v42 = vld [vmem:[#allocation14 + $0x330] sm:$0xff] }
 0x389   :  { %v2464_v47 = vcombine.low %v2455_v45, %v2462_v46  ;;  %v2568_v45 = vld [vmem:[#allocation14 + $0x120] sm:$0xff]  ;;  %v2642_v38 = vld [vmem:[#allocation14 + $0x370] sm:$0xff]  ;;  %v2699_v40 = vld [vmem:[#allocation14 + $0x538] sm:$0xff] }
 0x38a   :  { %v2576_v46 = vld [vmem:[#allocation14 + $0x160] sm:$0xff]  ;;  %v2707_v20 = vld [vmem:[#allocation14 + $0x578] sm:$0xff] }
 0x38b   :  { %v2478_v50 = vrot.slane %v2464_v47, %v9622_v60  ;;  %v7610_v47 = vpack.c.bf16 %v2577_v36, %v2569_v33  ;;  %v2632_v33 = vld [vmem:[#allocation14 + $0x320] sm:$0xff]  ;;  %v7690_v36 = vpack.c.bf16 %v2643_v31, %v2635_v30  ;;  %v2698_v30 = vld [vmem:[#allocation14 + $0x530] sm:$0xff] }
 0x38c   :  { %v2706_v31 = vld [vmem:[#allocation14 + $0x570] sm:$0xff] }
 0x38d   :  { %v2479_v27 = vcombine.low %v2471_v49, %v2478_v50  ;;  %v2570_v49 = vld [vmem:[#allocation14 + $0x130] sm:$0xff] }
 0x38e   :  { %v2578_v50 = vld [vmem:[#allocation14 + $0x170] sm:$0xff] }
 0x38f   :  { %v2481_v57 = vadd.f32 %v2479_v27, %v1871_v55  ;;  %v2593_v55 = vld [vmem:[#allocation14 + $0x1e8] sm:$0xff]  ;;  %v2587_v27 = vld [vmem:[#allocation14 + $0x1b8] sm:$0xff] }
 0x391   :  { %v6894_v58 = vmul.f32 -1.442695, %v2481_v57  ;;  %v2489_v59 = vrot.slane %v2481_v57, 2  ;;  %v2500_v63 = vrot.slane %v2481_v57, 6  ;;  %v2497_v2 = vrot.slane %v2481_v57, 4  ;;  %v2595_v57 = vld [vmem:[#allocation14 + $0x1f8] sm:$0xff] }
 0x393   :  { %9058 = vpow2.f32 %v6894_v58  ;;  %v6895_v62 = vmul.f32 -1.442695, %v2489_v59  ;;  %v6896_v0 = vmul.f32 -1.442695, %v2500_v63  ;;  %v7612_v58 = vpack.c.bf16 %v2576_v46, %v2568_v45  ;;  %v2592_v63 = vld [vmem:[#allocation14 + $0x1e0] sm:$0xff]  ;;  %v2651_v45 = vld [vmem:[#allocation14 + $0x3b8] sm:$0xff] }
 0x394   :  { %v7676_v59 = vpack.c.bf16 %v2578_v50, %v2570_v49  ;;  %v2659_v46 = vld [vmem:[#allocation14 + $0x3f8] sm:$0xff]  ;;  %v2648_v49 = vld [vmem:[#allocation14 + $0x3a0] sm:$0xff] }
 0x395   :  { %9060 = vpow2.f32 %v6895_v62  ;;  %v2584_v62 = vld [vmem:[#allocation14 + $0x1a0] sm:$0xff] }
 0x396   :  { %9062 = vpow2.f32 %v6896_v0  ;;  %v7614_v0 = vpack.c.bf16 %v2593_v55, %v2585_v52  ;;  %v2656_v50 = vld [vmem:[#allocation14 + $0x3e0] sm:$0xff]  ;;  %v7694_v55 = vpack.c.bf16 %v2659_v46, %v2651_v45  ;;  %v2714_v45 = vld [vmem:[#allocation14 + $0x5b0] sm:$0xff] }
 0x397   :  { %v2722_v46 = vld [vmem:[#allocation14 + $0x5f0] sm:$0xff] }
 0x39d   :  { %v9059_v1 = vpop.eup %9058 }
 0x39e   :  { %v2485_v3 = vadd.f32 1.0, %v9059_v1  ;;  %v7678_v1 = vpack.c.bf16 %v2595_v57, %v2587_v27  ;;  %v2650_v27 = vld [vmem:[#allocation14 + $0x3b0] sm:$0xff] }
 0x39f   :  { %v9061_v23 = vpop.eup %9060  ;;  %v2658_v57 = vld [vmem:[#allocation14 + $0x3f0] sm:$0xff] }
 0x3a0   :  { %9064 = vrcp.f32 %v2485_v3  ;;  %v2494_v39 = vadd.f32 1.0, %v9061_v23  ;;  %v9063_v56 = vpop.eup %9062  ;;  %v2594_v3 = vld [vmem:[#allocation14 + $0x1f0] sm:$0xff]  ;;  %v2601_v23 = vld [vmem:[#allocation14 + $0x228] sm:$0xff] }
 0x3a1   :  { %9066 = vtanh.f32 %v2497_v2  ;;  %v2505_v9 = vadd.f32 1.0, %v9063_v56  ;;  %v2586_v2 = vld [vmem:[#allocation14 + $0x1b0] sm:$0xff]  ;;  %v7616_v56 = vpack.c.bf16 %v2592_v63, %v2584_v62  ;;  %v2667_v62 = vld [vmem:[#allocation14 + $0x438] sm:$0xff] }
 0x3a2   :  { %9068 = vrcp.f32 %v2494_v39  ;;  %v2609_v39 = vld [vmem:[#allocation14 + $0x268] sm:$0xff]  ;;  %v2675_v63 = vld [vmem:[#allocation14 + $0x478] sm:$0xff] }
 0x3a3   :  { %9070 = vrcp.f32 %v2505_v9  ;;  %v7618_v9 = vpack.c.bf16 %v2609_v39, %v2601_v23  ;;  %v7698_v39 = vpack.c.bf16 %v2675_v63, %v2667_v62  ;;  %v2730_v62 = vld [vmem:[#allocation14 + $0x630] sm:$0xff] }
 0x3a4   :  { %v2738_v63 = vld [vmem:[#allocation14 + $0x670] sm:$0xff] }
 0x3aa   :  { %v9065_v6 = vpop.eup %9064 }
 0x3ab   :  { %v9067_v7 = vpop.eup %9066 }
 0x3ac   :  { %v9069_v8 = vpop.eup %9068  ;;  %v2509_v10 = vmul.f32 %v9067_v7, %v9065_v6  ;;  %v7680_v6 = vpack.c.bf16 %v2594_v3, %v2586_v2  ;;  %v2600_v7 = vld [vmem:[#allocation14 + $0x220] sm:$0xff] }
 0x3ad   :  { %v2508_v11 = vmul.f32 %v9069_v8, %v9655_v22  ;;  %v9071_v13 = vpop.eup %9070  ;;  %v2608_v8 = vld [vmem:[#allocation14 + $0x260] sm:$0xff] }
 0x3ae   :  { %v7620_v17 = vpack.c.bf16 %v2608_v8, %v2600_v7  ;;  %v2664_v2 = vld [vmem:[#allocation14 + $0x420] sm:$0xff]  ;;  %v2683_v7 = vld [vmem:[#allocation14 + $0x4b8] sm:$0xff] }
 0x3af   :  { %v9658_v12 = vadd.f32 %v2509_v10, %v2508_v11  ;;  %v7682_v10 = vpack.c.bf16 %v2611_v5, %v2603_v4  ;;  %v2602_v11 = vld [vmem:[#allocation14 + $0x230] sm:$0xff]  ;;  %v2672_v3 = vld [vmem:[#allocation14 + $0x460] sm:$0xff]  ;;  %v2691_v8 = vld [vmem:[#allocation14 + $0x4f8] sm:$0xff] }
 0x3b0   :  { %v2666_v4 = vld [vmem:[#allocation14 + $0x430] sm:$0xff] }
 0x3b1   :  { %9072 = vtanh.f32 %v9658_v12  ;;  %v2674_v5 = vld [vmem:[#allocation14 + $0x470] sm:$0xff] }
 0x3bb   :  { %v9073_v14 = vpop.eup %9072 }
 0x3bc   :  { %v2512_v15 = vmul.f32 %v9073_v14, %v9071_v13  ;;  %v2610_v13 = vld [vmem:[#allocation14 + $0x270] sm:$0xff]  ;;  %v2617_v14 = vld [vmem:[#allocation14 + $0x2a8] sm:$0xff] }
 0x3bd   :  { %v7684_v18 = vpack.c.bf16 %v2610_v13, %v2602_v11  ;;  %v2680_v11 = vld [vmem:[#allocation14 + $0x4a0] sm:$0xff] }
 0x3be   :  { %v9662_v19 = vadd.f32 %v2520_v61, %v2512_v15  ;;  %v2625_v15 = vld [vmem:[#allocation14 + $0x2e8] sm:$0xff]  ;;  %v2619_v61 = vld [vmem:[#allocation14 + $0x2b8] sm:$0xff]  ;;  %v2688_v13 = vld [vmem:[#allocation14 + $0x4e0] sm:$0xff] }
 0x3bf   :  { %v7622_v21 = vpack.c.bf16 %v2625_v15, %v2617_v14  ;;  %v7686_v24 = vpack.c.bf16 %v2627_v16, %v2619_v61  ;;  %v7702_v15 = vpack.c.bf16 %v2691_v8, %v2683_v7  ;;  %v2682_v61 = vld [vmem:[#allocation14 + $0x4b0] sm:$0xff] }
 0x3c0   :  { %2526 = vst.msk [vmem:[#allocation4 + $0x1] ss:$8 sm:$0x3] %vm9531_vm0, %v9662_v19  ;;  %v2796_v26 = vrot.slane %v9662_v19, %v9580_v37  ;;  %v9671_v54 = vrot.slane %v9662_v19, %v9593_v41  ;;  %v2690_v16 = vld [vmem:[#allocation14 + $0x4f0] sm:$0xff] }
 0x3c1   :  { %v2746_v7 = vld [vmem:[#allocation14 + $0x6b0] sm:$0xff] }
 0x3c2   :  { %2863 = vmatprep.mubr.f32.mxu0 %v2796_v26  ;;  %2934 = vmatprep.mubr.f32.mxu1 %v2796_v26  ;;  %v2754_v8 = vld [vmem:[#allocation14 + $0x6f0] sm:$0xff] }
 0x3c3   :  { %2864 = vmatmul.mubr.f32.vlgmr.msra.gmra.mrb[16].mxu0 %v9671_v54  ;;  %2935 = vmatmul.mubr.f32.vlgmr.msra.gmra.mrb[16].mxu1 %v9671_v54 }
 0x3c4   :  { %7605 = vmatpush1.bf16.msra.mxu0 %v7604_v28  ;;  %7669 = vmatpush1.bf16.msra.mxu1 %v7668_v29  ;;  %v2633_v28 = vld [vmem:[#allocation14 + $0x328] sm:$0xff] }
 0x3c5   :  { %3005 = vmatprep.mubr.f32.mxu0 %v2796_v26  ;;  %3076 = vmatprep.mubr.f32.mxu1 %v2796_v26  ;;  %v2626_v26 = vld [vmem:[#allocation14 + $0x2f0] sm:$0xff]  ;;  %v2641_v29 = vld [vmem:[#allocation14 + $0x368] sm:$0xff] }
 0x3c6   :  { %7607 = vmatprep.subr.bf16.mxu0 %v7606_v34  ;;  %7671 = vmatprep.subr.bf16.mxu1 %v7670_v35  ;;  %v7688_v53 = vpack.c.bf16 %v2626_v26, %v2618_v25  ;;  %v2640_v34 = vld [vmem:[#allocation14 + $0x360] sm:$0xff]  ;;  %v7626_v35 = vpack.c.bf16 %v2641_v29, %v2633_v28  ;;  %v7706_v29 = vpack.c.bf16 %v2707_v20, %v2699_v40  ;;  %v2762_v40 = vld [vmem:[#allocation14 + $0x730] sm:$0xff] }
 0x3c7   :  { %v2696_v25 = vld [vmem:[#allocation14 + $0x520] sm:$0xff]  ;;  %v2770_v20 = vld [vmem:[#allocation14 + $0x770] sm:$0xff] }
 0x3c8   :  { %7609 = vmatpush1.bf16.msra.mxu0 %v7608_v43  ;;  %7673 = vmatpush1.bf16.msra.mxu1 %v7672_v44  ;;  %v2649_v43 = vld [vmem:[#allocation14 + $0x3a8] sm:$0xff]  ;;  %v2704_v26 = vld [vmem:[#allocation14 + $0x560] sm:$0xff] }
 0x3c9   :  { %7611 = vmatprep.subr.bf16.mxu0 %v7610_v47  ;;  %7675 = vmatprep.subr.bf16.mxu1 %v7674_v48  ;;  %v2657_v44 = vld [vmem:[#allocation14 + $0x3e8] sm:$0xff]  ;;  %v7628_v47 = vpack.c.bf16 %v2640_v34, %v2632_v33  ;;  %v7692_v48 = vpack.c.bf16 %v2642_v38, %v2634_v42  ;;  %v2715_v33 = vld [vmem:[#allocation14 + $0x5b8] sm:$0xff]  ;;  %v2712_v42 = vld [vmem:[#allocation14 + $0x5a0] sm:$0xff] }
 0x3ca   :  { %v7630_v52 = vpack.c.bf16 %v2657_v44, %v2649_v43  ;;  %v2723_v34 = vld [vmem:[#allocation14 + $0x5f8] sm:$0xff]  ;;  %v2720_v38 = vld [vmem:[#allocation14 + $0x5e0] sm:$0xff] }
 0x3cb   :  { %v7710_v44 = vpack.c.bf16 %v2723_v34, %v2715_v33  ;;  %v2778_v33 = vld [vmem:[#allocation14 + $0x7b0] sm:$0xff] }
 0x3cc   :  { %7613 = vmatpush1.bf16.msra.mxu0 %v7612_v58  ;;  %7677 = vmatpush1.bf16.msra.mxu1 %v7676_v59  ;;  %v2665_v58 = vld [vmem:[#allocation14 + $0x428] sm:$0xff]  ;;  %v2786_v34 = vld [vmem:[#allocation14 + $0x7f0] sm:$0xff] }
 0x3cd   :  { %7615 = vmatprep.subr.bf16.mxu0 %v7614_v0  ;;  %7679 = vmatprep.subr.bf16.mxu1 %v7678_v1  ;;  %v2673_v59 = vld [vmem:[#allocation14 + $0x468] sm:$0xff]  ;;  %v7632_v0 = vpack.c.bf16 %v2656_v50, %v2648_v49  ;;  %v7696_v1 = vpack.c.bf16 %v2658_v57, %v2650_v27  ;;  %v2731_v49 = vld [vmem:[#allocation14 + $0x638] sm:$0xff]  ;;  %v2728_v27 = vld [vmem:[#allocation14 + $0x620] sm:$0xff] }
 0x3ce   :  { %v7634_v23 = vpack.c.bf16 %v2673_v59, %v2665_v58  ;;  %v2739_v50 = vld [vmem:[#allocation14 + $0x678] sm:$0xff]  ;;  %v2736_v57 = vld [vmem:[#allocation14 + $0x660] sm:$0xff] }
 0x3cf   :  { %v7714_v59 = vpack.c.bf16 %v2739_v50, %v2731_v49  ;;  %v3194_v49 = vld [vmem:[#allocation14 + $0x10] sm:$0xff] }
 0x3d0   :  { %7617 = vmatpush1.bf16.msra.mxu0 %v7616_v56  ;;  %7681 = vmatpush1.bf16.msra.mxu1 %v7680_v6  ;;  %v2681_v56 = vld [vmem:[#allocation14 + $0x4a8] sm:$0xff] }
 0x3d1   :  { %7619 = vmatprep.subr.bf16.mxu0 %v7618_v9  ;;  %7683 = vmatprep.subr.bf16.mxu1 %v7682_v10  ;;  %v2689_v6 = vld [vmem:[#allocation14 + $0x4e8] sm:$0xff]  ;;  %v7636_v9 = vpack.c.bf16 %v2672_v3, %v2664_v2  ;;  %v7700_v10 = vpack.c.bf16 %v2674_v5, %v2666_v4  ;;  %v2747_v2 = vld [vmem:[#allocation14 + $0x6b8] sm:$0xff]  ;;  %v2744_v4 = vld [vmem:[#allocation14 + $0x6a0] sm:$0xff] }
 0x3d2   :  { %v7638_v14 = vpack.c.bf16 %v2689_v6, %v2681_v56  ;;  %v2755_v3 = vld [vmem:[#allocation14 + $0x6f8] sm:$0xff]  ;;  %v2752_v5 = vld [vmem:[#allocation14 + $0x6e0] sm:$0xff] }
 0x3d3   :  { %v7718_v6 = vpack.c.bf16 %v2755_v3, %v2747_v2  ;;  %v3210_v2 = vld [vmem:[#allocation14 + $0x90] sm:$0xff] }
 0x3d4   :  { %7621 = vmatpush1.bf16.msra.mxu0 %v7620_v17  ;;  %7685 = vmatpush1.bf16.msra.mxu1 %v7684_v18  ;;  %v2697_v17 = vld [vmem:[#allocation14 + $0x528] sm:$0xff]  ;;  %v3218_v3 = vld [vmem:[#allocation14 + $0xd0] sm:$0xff] }
 0x3d5   :  { %7623 = vmatprep.subr.bf16.mxu0 %v7622_v21  ;;  %7687 = vmatprep.subr.bf16.mxu1 %v7686_v24  ;;  %v2705_v18 = vld [vmem:[#allocation14 + $0x568] sm:$0xff]  ;;  %v7640_v21 = vpack.c.bf16 %v2688_v13, %v2680_v11  ;;  %v7704_v24 = vpack.c.bf16 %v2690_v16, %v2682_v61  ;;  %v2763_v11 = vld [vmem:[#allocation14 + $0x738] sm:$0xff]  ;;  %v2760_v61 = vld [vmem:[#allocation14 + $0x720] sm:$0xff] }
 0x3d6   :  { %v7642_v28 = vpack.c.bf16 %v2705_v18, %v2697_v17  ;;  %v2771_v13 = vld [vmem:[#allocation14 + $0x778] sm:$0xff]  ;;  %v2768_v16 = vld [vmem:[#allocation14 + $0x760] sm:$0xff] }
 0x3d7   :  { %v7722_v18 = vpack.c.bf16 %v2771_v13, %v2763_v11  ;;  %v3226_v11 = vld [vmem:[#allocation14 + $0x110] sm:$0xff] }
 0x3d8   :  { %7625 = vmatpush1.bf16.msra.mxu0 %v7624_v32  ;;  %7689 = vmatpush1.bf16.msra.mxu1 %v7688_v53  ;;  %v2713_v32 = vld [vmem:[#allocation14 + $0x5a8] sm:$0xff]  ;;  %v3234_v13 = vld [vmem:[#allocation14 + $0x150] sm:$0xff] }
 0x3d9   :  { %7627 = vmatprep.subr.bf16.mxu0 %v7626_v35  ;;  %7691 = vmatprep.subr.bf16.mxu1 %v7690_v36  ;;  %v2721_v53 = vld [vmem:[#allocation14 + $0x5e8] sm:$0xff]  ;;  %v7644_v35 = vpack.c.bf16 %v2704_v26, %v2696_v25  ;;  %v7708_v36 = vpack.c.bf16 %v2706_v31, %v2698_v30  ;;  %v2779_v25 = vld [vmem:[#allocation14 + $0x7b8] sm:$0xff]  ;;  %v2776_v30 = vld [vmem:[#allocation14 + $0x7a0] sm:$0xff] }
 0x3da   :  { %v7646_v43 = vpack.c.bf16 %v2721_v53, %v2713_v32  ;;  %v2787_v26 = vld [vmem:[#allocation14 + $0x7f8] sm:$0xff]  ;;  %v2784_v53 = vld [vmem:[#allocation14 + $0x7e0] sm:$0xff] }
 0x3db   :  { %v7726_v32 = vpack.c.bf16 %v2787_v26, %v2779_v25  ;;  %v3242_v25 = vld [vmem:[#allocation14 + $0x190] sm:$0xff] }
 0x3dc   :  { %7629 = vmatpush1.bf16.msra.mxu0 %v7628_v47  ;;  %7693 = vmatpush1.bf16.msra.mxu1 %v7692_v48  ;;  %v2729_v47 = vld [vmem:[#allocation14 + $0x628] sm:$0xff]  ;;  %v3250_v26 = vld [vmem:[#allocation14 + $0x1d0] sm:$0xff] }
 0x3dd   :  { %7631 = vmatprep.subr.bf16.mxu0 %v7630_v52  ;;  %7695 = vmatprep.subr.bf16.mxu1 %v7694_v55  ;;  %v2737_v48 = vld [vmem:[#allocation14 + $0x668] sm:$0xff]  ;;  %v7648_v52 = vpack.c.bf16 %v2720_v38, %v2712_v42  ;;  %v7712_v55 = vpack.c.bf16 %v2722_v46, %v2714_v45  ;;  %v3203_v45 = vld [vmem:[#allocation14 + $0x58] sm:$0xff] }
 0x3de   :  { %v7650_v58 = vpack.c.bf16 %v2737_v48, %v2729_v47  ;;  %v3193_v42 = vld [vmem:[#allocation14 + $0x8] sm:$0xff]  ;;  %v3192_v47 = vld [vmem:[#allocation14] sm:$0xff] }
 0x3df   :  { %v3201_v38 = vld [vmem:[#allocation14 + $0x48] sm:$0xff]  ;;  %v3200_v48 = vld [vmem:[#allocation14 + $0x40] sm:$0xff] }
 0x3e0   :  { %7633 = vmatpush1.bf16.msra.mxu0 %v7632_v0  ;;  %7697 = vmatpush1.bf16.msra.mxu1 %v7696_v1  ;;  %v2745_v0 = vld [vmem:[#allocation14 + $0x6a8] sm:$0xff]  ;;  %v7732_v50 = vpack.c.bf16 %v3200_v48, %v3192_v47  ;;  %v3283_v48 = vld [vmem:[#allocation14 + $0x2d8] sm:$0xff] }
 0x3e1   :  { %7635 = vmatprep.subr.bf16.mxu0 %v7634_v23  ;;  %7699 = vmatprep.subr.bf16.mxu1 %v7698_v39  ;;  %v2753_v1 = vld [vmem:[#allocation14 + $0x6e8] sm:$0xff]  ;;  %v7652_v23 = vpack.c.bf16 %v2736_v57, %v2728_v27  ;;  %v7716_v39 = vpack.c.bf16 %v2738_v63, %v2730_v62  ;;  %v3208_v62 = vld [vmem:[#allocation14 + $0x80] sm:$0xff] }
 0x3e2   :  { %v7654_v56 = vpack.c.bf16 %v2753_v1, %v2745_v0  ;;  %v3209_v27 = vld [vmem:[#allocation14 + $0x88] sm:$0xff]  ;;  %v3216_v63 = vld [vmem:[#allocation14 + $0xc0] sm:$0xff] }
 0x3e3   :  { %v3217_v57 = vld [vmem:[#allocation14 + $0xc8] sm:$0xff]  ;;  %v7736_v1 = vpack.c.bf16 %v3216_v63, %v3208_v62  ;;  %v3291_v62 = vld [vmem:[#allocation14 + $0x318] sm:$0xff] }
 0x3e4   :  { %7637 = vmatpush1.bf16.msra.mxu0 %v7636_v9  ;;  %7701 = vmatpush1.bf16.msra.mxu1 %v7700_v10  ;;  %v2761_v9 = vld [vmem:[#allocation14 + $0x728] sm:$0xff] }
 0x3e5   :  { %7639 = vmatprep.subr.bf16.mxu0 %v7638_v14  ;;  %7703 = vmatprep.subr.bf16.mxu1 %v7702_v15  ;;  %v2769_v10 = vld [vmem:[#allocation14 + $0x768] sm:$0xff]  ;;  %v7656_v14 = vpack.c.bf16 %v2752_v5, %v2744_v4  ;;  %v7720_v15 = vpack.c.bf16 %v2754_v8, %v2746_v7  ;;  %v3227_v5 = vld [vmem:[#allocation14 + $0x118] sm:$0xff]  ;;  %v3224_v7 = vld [vmem:[#allocation14 + $0x100] sm:$0xff] }
 0x3e6   :  { %v7658_v17 = vpack.c.bf16 %v2769_v10, %v2761_v9  ;;  %v3233_v4 = vld [vmem:[#allocation14 + $0x148] sm:$0xff]  ;;  %v3232_v8 = vld [vmem:[#allocation14 + $0x140] sm:$0xff] }
 0x3e7   :  { %v7740_v10 = vpack.c.bf16 %v3232_v8, %v3224_v7  ;;  %v3307_v7 = vld [vmem:[#allocation14 + $0x398] sm:$0xff] }
 0x3e8   :  { %7641 = vmatpush1.bf16.msra.mxu0 %v7640_v21  ;;  %7705 = vmatpush1.bf16.msra.mxu1 %v7704_v24  ;;  %v2777_v21 = vld [vmem:[#allocation14 + $0x7a8] sm:$0xff] }
 0x3e9   :  { %7643 = vmatprep.subr.bf16.mxu0 %v7642_v28  ;;  %7707 = vmatprep.subr.bf16.mxu1 %v7706_v29  ;;  %v2785_v24 = vld [vmem:[#allocation14 + $0x7e8] sm:$0xff]  ;;  %v7660_v28 = vpack.c.bf16 %v2768_v16, %v2760_v61  ;;  %v7724_v29 = vpack.c.bf16 %v2770_v20, %v2762_v40  ;;  %v3243_v16 = vld [vmem:[#allocation14 + $0x198] sm:$0xff]  ;;  %v3240_v40 = vld [vmem:[#allocation14 + $0x180] sm:$0xff] }
 0x3ea   :  { %v7662_v31 = vpack.c.bf16 %v2785_v24, %v2777_v21  ;;  %v3249_v61 = vld [vmem:[#allocation14 + $0x1c8] sm:$0xff]  ;;  %v3248_v20 = vld [vmem:[#allocation14 + $0x1c0] sm:$0xff] }
 0x3eb   :  { %v7744_v24 = vpack.c.bf16 %v3248_v20, %v3240_v40  ;;  %v3323_v40 = vld [vmem:[#allocation14 + $0x418] sm:$0xff] }
 0x3ec   :  { %7645 = vmatpush1.bf16.msra.mxu0 %v7644_v35  ;;  %7709 = vmatpush1.bf16.msra.mxu1 %v7708_v36  ;;  %v7664_v35 = vpack.c.bf16 %v2784_v53, %v2776_v30  ;;  %v7728_v36 = vpack.c.bf16 %v2786_v34, %v2778_v33  ;;  %v3265_v30 = vld [vmem:[#allocation14 + $0x248] sm:$0xff]  ;;  %v3267_v53 = vld [vmem:[#allocation14 + $0x258] sm:$0xff]  ;;  %v3256_v33 = vld [vmem:[#allocation14 + $0x200] sm:$0xff] }
 0x3ed   :  { %7647 = vmatprep.subr.bf16.mxu0 %v7646_v43  ;;  %7711 = vmatprep.subr.bf16.mxu1 %v7710_v44  ;;  %v3195_v43 = vld [vmem:[#allocation14 + $0x18] sm:$0xff]  ;;  %v7730_v44 = vpack.c.bf16 %v3201_v38, %v3193_v42  ;;  %v3264_v34 = vld [vmem:[#allocation14 + $0x240] sm:$0xff]  ;;  %v3258_v42 = vld [vmem:[#allocation14 + $0x210] sm:$0xff] }
 0x3ee   :  { %v7794_v46 = vpack.c.bf16 %v3203_v45, %v3195_v43  ;;  %v3266_v38 = vld [vmem:[#allocation14 + $0x250] sm:$0xff]  ;;  %v3281_v45 = vld [vmem:[#allocation14 + $0x2c8] sm:$0xff] }
 0x3ef   :  { %v7812_v43 = vpack.c.bf16 %v3266_v38, %v3258_v42  ;;  %v3344_v42 = vld [vmem:[#allocation14 + $0x4c0] sm:$0xff] }
 0x3f0   :  { %7649 = vmatpush1.bf16.msra.mxu0 %v7648_v52  ;;  %7713 = vmatpush1.bf16.msra.mxu1 %v7712_v55  ;;  %v3202_v52 = vld [vmem:[#allocation14 + $0x50] sm:$0xff] }
 0x3f1   :  { %7651 = vmatprep.subr.bf16.mxu0 %v7650_v58  ;;  %7715 = vmatprep.subr.bf16.mxu1 %v7714_v59  ;;  %v7796_v55 = vpack.c.bf16 %v3202_v52, %v3194_v49  ;;  %v3211_v58 = vld [vmem:[#allocation14 + $0x98] sm:$0xff]  ;;  %v3272_v49 = vld [vmem:[#allocation14 + $0x280] sm:$0xff] }
 0x3f2   :  { %v3219_v59 = vld [vmem:[#allocation14 + $0xd8] sm:$0xff] }
 0x3f3   :  { %v7798_v0 = vpack.c.bf16 %v3219_v59, %v3211_v58  ;;  %v3297_v59 = vld [vmem:[#allocation14 + $0x348] sm:$0xff] }
 0x3f4   :  { %7653 = vmatpush1.bf16.msra.mxu0 %v7652_v23  ;;  %7717 = vmatpush1.bf16.msra.mxu1 %v7716_v39  ;;  %v7800_v23 = vpack.c.bf16 %v3218_v3, %v3210_v2  ;;  %v3225_v39 = vld [vmem:[#allocation14 + $0x108] sm:$0xff]  ;;  %v3296_v2 = vld [vmem:[#allocation14 + $0x340] sm:$0xff] }
 0x3f5   :  { %7655 = vmatprep.subr.bf16.mxu0 %v7654_v56  ;;  %7719 = vmatprep.subr.bf16.mxu1 %v7718_v6  ;;  %v7738_v56 = vpack.c.bf16 %v3233_v4, %v3225_v39  ;;  %v3235_v6 = vld [vmem:[#allocation14 + $0x158] sm:$0xff]  ;;  %v3290_v39 = vld [vmem:[#allocation14 + $0x310] sm:$0xff] }
 0x3f6   :  { %v7802_v9 = vpack.c.bf16 %v3235_v6, %v3227_v5  ;;  %v3298_v4 = vld [vmem:[#allocation14 + $0x350] sm:$0xff]  ;;  %v3313_v6 = vld [vmem:[#allocation14 + $0x3c8] sm:$0xff] }
 0x3f7   :  { %v7820_v5 = vpack.c.bf16 %v3298_v4, %v3290_v39  ;;  %v3376_v39 = vld [vmem:[#allocation14 + $0x5c0] sm:$0xff] }
 0x3f8   :  { %7657 = vmatpush1.bf16.msra.mxu0 %v7656_v14  ;;  %7721 = vmatpush1.bf16.msra.mxu1 %v7720_v15  ;;  %v7804_v14 = vpack.c.bf16 %v3234_v13, %v3226_v11  ;;  %v3241_v15 = vld [vmem:[#allocation14 + $0x188] sm:$0xff]  ;;  %v3312_v11 = vld [vmem:[#allocation14 + $0x3c0] sm:$0xff] }
 0x3f9   :  { %7659 = vmatprep.subr.bf16.mxu0 %v7658_v17  ;;  %7723 = vmatprep.subr.bf16.mxu1 %v7722_v18  ;;  %v7742_v17 = vpack.c.bf16 %v3249_v61, %v3241_v15  ;;  %v3251_v18 = vld [vmem:[#allocation14 + $0x1d8] sm:$0xff]  ;;  %v3306_v15 = vld [vmem:[#allocation14 + $0x390] sm:$0xff] }
 0x3fa   :  { %v7806_v21 = vpack.c.bf16 %v3251_v18, %v3243_v16  ;;  %v3314_v61 = vld [vmem:[#allocation14 + $0x3d0] sm:$0xff]  ;;  %v3329_v18 = vld [vmem:[#allocation14 + $0x448] sm:$0xff] }
 0x3fb   :  { %v7824_v16 = vpack.c.bf16 %v3314_v61, %v3306_v15  ;;  %v3384_v15 = vld [vmem:[#allocation14 + $0x600] sm:$0xff] }
 0x3fc   :  { %7661 = vmatpush1.bf16.msra.mxu0 %v7660_v28  ;;  %7725 = vmatpush1.bf16.msra.mxu1 %v7724_v29  ;;  %v7808_v28 = vpack.c.bf16 %v3250_v26, %v3242_v25  ;;  %v3257_v29 = vld [vmem:[#allocation14 + $0x208] sm:$0xff]  ;;  %v3328_v25 = vld [vmem:[#allocation14 + $0x440] sm:$0xff] }
 0x3fd   :  { %7663 = vmatprep.subr.bf16.mxu0 %v7662_v31  ;;  %7727 = vmatprep.subr.bf16.mxu1 %v7726_v32  ;;  %v3259_v31 = vld [vmem:[#allocation14 + $0x218] sm:$0xff]  ;;  %v7746_v32 = vpack.c.bf16 %v3265_v30, %v3257_v29  ;;  %v3322_v29 = vld [vmem:[#allocation14 + $0x410] sm:$0xff]  ;;  %v3392_v61 = vld [vmem:[#allocation14 + $0x640] sm:$0xff] }
 0x3fe   :  { %v3330_v30 = vld [vmem:[#allocation14 + $0x450] sm:$0xff] }
 0x400   :  { %7665 = vmatpush1.bf16.msra.mxu0 %v7664_v35  ;;  %7729 = vmatpush1.bf16.msra.mxu1 %v7728_v36  ;;  %v7810_v35 = vpack.c.bf16 %v3267_v53, %v3259_v31  ;;  %v7748_v36 = vpack.c.bf16 %v3264_v34, %v3256_v33  ;;  %v7828_v31 = vpack.c.bf16 %v3330_v30, %v3322_v29  ;;  %v3345_v53 = vld [vmem:[#allocation14 + $0x4c8] sm:$0xff]  ;;  %v3339_v33 = vld [vmem:[#allocation14 + $0x498] sm:$0xff]  ;;  %v3408_v30 = vld [vmem:[#allocation14 + $0x6c0] sm:$0xff] }
 0x401   :  { %7731 = vmatprep.subr.bf16.mxu0 %v7730_v44  ;;  %7795 = vmatprep.subr.bf16.mxu1 %v7794_v46  ;;  %v3273_v44 = vld [vmem:[#allocation14 + $0x288] sm:$0xff]  ;;  %v3275_v46 = vld [vmem:[#allocation14 + $0x298] sm:$0xff] }
 0x402   :  { %v7750_v47 = vpack.c.bf16 %v3281_v45, %v3273_v44  ;;  %v7814_v52 = vpack.c.bf16 %v3283_v48, %v3275_v46  ;;  %v3338_v44 = vld [vmem:[#allocation14 + $0x490] sm:$0xff]  ;;  %v3361_v48 = vld [vmem:[#allocation14 + $0x548] sm:$0xff] }
 0x403   :  { %3006 = vmatmul.mubr.f32.vlgmr.msra.gmra.mrb[18].mxu0 %v9671_v54  ;;  %3077 = vmatmul.mubr.f32.vlgmr.msra.gmra.mrb[18].mxu1 %v9671_v54  ;;  %v7734_v54 = vpack.c.bf16 %v3217_v57, %v3209_v27  ;;  %v3274_v27 = vld [vmem:[#allocation14 + $0x290] sm:$0xff] }
 0x404   :  { %7733 = vmatpush1.bf16.msra.mxu0 %v7732_v50  ;;  %7797 = vmatpush1.bf16.msra.mxu1 %v7796_v55  ;;  %v3280_v50 = vld [vmem:[#allocation14 + $0x2c0] sm:$0xff]  ;;  %v3282_v57 = vld [vmem:[#allocation14 + $0x2d0] sm:$0xff] }
 0x405   :  { %7735 = vmatprep.subr.bf16.mxu0 %v7734_v54  ;;  %7799 = vmatprep.subr.bf16.mxu1 %v7798_v0  ;;  %v7752_v55 = vpack.c.bf16 %v3280_v50, %v3272_v49  ;;  %v7816_v58 = vpack.c.bf16 %v3282_v57, %v3274_v27  ;;  %v3289_v54 = vld [vmem:[#allocation14 + $0x308] sm:$0xff]  ;;  %v3299_v0 = vld [vmem:[#allocation14 + $0x358] sm:$0xff]  ;;  %v3346_v45 = vld [vmem:[#allocation14 + $0x4d0] sm:$0xff] }
 0x406   :  { %v7754_v63 = vpack.c.bf16 %v3297_v59, %v3289_v54  ;;  %v7818_v3 = vpack.c.bf16 %v3299_v0, %v3291_v62  ;;  %v7832_v46 = vpack.c.bf16 %v3346_v45, %v3338_v44  ;;  %v3355_v49 = vld [vmem:[#allocation14 + $0x518] sm:$0xff]  ;;  %v3360_v27 = vld [vmem:[#allocation14 + $0x540] sm:$0xff]  ;;  %v3354_v54 = vld [vmem:[#allocation14 + $0x510] sm:$0xff] }
 0x407   :  { %v3362_v59 = vld [vmem:[#allocation14 + $0x550] sm:$0xff]  ;;  %v3377_v0 = vld [vmem:[#allocation14 + $0x5c8] sm:$0xff]  ;;  %v3424_v44 = vld [vmem:[#allocation14 + $0x740] sm:$0xff] }
 0x408   :  { %7737 = vmatpush1.bf16.msra.mxu0 %v7736_v1  ;;  %7801 = vmatpush1.bf16.msra.mxu1 %v7800_v23  ;;  %v3288_v1 = vld [vmem:[#allocation14 + $0x300] sm:$0xff]  ;;  %v7836_v62 = vpack.c.bf16 %v3362_v59, %v3354_v54  ;;  %v3418_v45 = vld [vmem:[#allocation14 + $0x710] sm:$0xff] }
 0x409   :  { %7739 = vmatprep.subr.bf16.mxu0 %v7738_v56  ;;  %7803 = vmatprep.subr.bf16.mxu1 %v7802_v9  ;;  %v7756_v23 = vpack.c.bf16 %v3296_v2, %v3288_v1  ;;  %v3305_v56 = vld [vmem:[#allocation14 + $0x388] sm:$0xff]  ;;  %v3315_v9 = vld [vmem:[#allocation14 + $0x3d8] sm:$0xff]  ;;  %v3440_v54 = vld [vmem:[#allocation14 + $0x7c0] sm:$0xff] }
 0x40a   :  { %v7758_v8 = vpack.c.bf16 %v3313_v6, %v3305_v56  ;;  %v7822_v13 = vpack.c.bf16 %v3315_v9, %v3307_v7  ;;  %v3371_v1 = vld [vmem:[#allocation14 + $0x598] sm:$0xff]  ;;  %v3370_v56 = vld [vmem:[#allocation14 + $0x590] sm:$0xff]  ;;  %v3385_v7 = vld [vmem:[#allocation14 + $0x608] sm:$0xff] }
 0x40b   :  { %v3378_v6 = vld [vmem:[#allocation14 + $0x5d0] sm:$0xff]  ;;  %v3393_v9 = vld [vmem:[#allocation14 + $0x648] sm:$0xff] }
 0x40c   :  { %7741 = vmatpush1.bf16.msra.mxu0 %v7740_v10  ;;  %7805 = vmatpush1.bf16.msra.mxu1 %v7804_v14  ;;  %v3304_v10 = vld [vmem:[#allocation14 + $0x380] sm:$0xff] }
 0x40d   :  { %7743 = vmatprep.subr.bf16.mxu0 %v7742_v17  ;;  %7807 = vmatprep.subr.bf16.mxu1 %v7806_v21  ;;  %v7760_v14 = vpack.c.bf16 %v3312_v11, %v3304_v10  ;;  %v3321_v17 = vld [vmem:[#allocation14 + $0x408] sm:$0xff]  ;;  %v3331_v21 = vld [vmem:[#allocation14 + $0x458] sm:$0xff] }
 0x40e   :  { %v7762_v20 = vpack.c.bf16 %v3329_v18, %v3321_v17  ;;  %v7826_v26 = vpack.c.bf16 %v3331_v21, %v3323_v40  ;;  %v3387_v10 = vld [vmem:[#allocation14 + $0x618] sm:$0xff]  ;;  %v7780_v17 = vpack.c.bf16 %v3392_v61, %v3384_v15  ;;  %v3394_v18 = vld [vmem:[#allocation14 + $0x650] sm:$0xff]  ;;  %v3401_v40 = vld [vmem:[#allocation14 + $0x688] sm:$0xff] }
 0x40f   :  { %v3395_v11 = vld [vmem:[#allocation14 + $0x658] sm:$0xff] }
 0x410   :  { %7745 = vmatpush1.bf16.msra.mxu0 %v7744_v24  ;;  %7809 = vmatpush1.bf16.msra.mxu1 %v7808_v28  ;;  %v3320_v24 = vld [vmem:[#allocation14 + $0x400] sm:$0xff] }
 0x411   :  { %7747 = vmatprep.subr.bf16.mxu0 %v7746_v32  ;;  %7811 = vmatprep.subr.bf16.mxu1 %v7810_v35  ;;  %v7764_v28 = vpack.c.bf16 %v3328_v25, %v3320_v24  ;;  %v3337_v32 = vld [vmem:[#allocation14 + $0x488] sm:$0xff]  ;;  %v3347_v35 = vld [vmem:[#allocation14 + $0x4d8] sm:$0xff] }
 0x412   :  { %v7766_v34 = vpack.c.bf16 %v3345_v53, %v3337_v32  ;;  %v7830_v38 = vpack.c.bf16 %v3347_v35, %v3339_v33  ;;  %v3403_v25 = vld [vmem:[#allocation14 + $0x698] sm:$0xff]  ;;  %v3410_v32 = vld [vmem:[#allocation14 + $0x6d0] sm:$0xff]  ;;  %v3417_v53 = vld [vmem:[#allocation14 + $0x708] sm:$0xff] }
 0x413   :  { %v3425_v33 = vld [vmem:[#allocation14 + $0x748] sm:$0xff] }
 0x414   :  { %7749 = vmatpush1.bf16.msra.mxu0 %v7748_v36  ;;  %7813 = vmatpush1.bf16.msra.mxu1 %v7812_v43  ;;  %v3336_v36 = vld [vmem:[#allocation14 + $0x480] sm:$0xff] }
 0x415   :  { %7751 = vmatprep.subr.bf16.mxu0 %v7750_v47  ;;  %7815 = vmatprep.subr.bf16.mxu1 %v7814_v52  ;;  %v7768_v43 = vpack.c.bf16 %v3344_v42, %v3336_v36  ;;  %v3353_v47 = vld [vmem:[#allocation14 + $0x508] sm:$0xff]  ;;  %v3363_v52 = vld [vmem:[#allocation14 + $0x558] sm:$0xff] }
 0x416   :  { %v7770_v50 = vpack.c.bf16 %v3361_v48, %v3353_v47  ;;  %v7834_v57 = vpack.c.bf16 %v3363_v52, %v3355_v49  ;;  %v3427_v36 = vld [vmem:[#allocation14 + $0x758] sm:$0xff]  ;;  %v3426_v47 = vld [vmem:[#allocation14 + $0x750] sm:$0xff]  ;;  %v3433_v48 = vld [vmem:[#allocation14 + $0x788] sm:$0xff] }
 0x417   :  { %v3441_v49 = vld [vmem:[#allocation14 + $0x7c8] sm:$0xff]  ;;  %v3443_v52 = vld [vmem:[#allocation14 + $0x7d8] sm:$0xff] }
 0x418   :  { %7753 = vmatpush1.bf16.msra.mxu0 %v7752_v55  ;;  %7817 = vmatpush1.bf16.msra.mxu1 %v7816_v58  ;;  %v3352_v55 = vld [vmem:[#allocation14 + $0x500] sm:$0xff] }
 0x419   :  { %7755 = vmatprep.subr.bf16.mxu0 %v7754_v63  ;;  %7819 = vmatprep.subr.bf16.mxu1 %v7818_v3  ;;  %v7772_v58 = vpack.c.bf16 %v3360_v27, %v3352_v55  ;;  %v3369_v63 = vld [vmem:[#allocation14 + $0x588] sm:$0xff]  ;;  %v3379_v3 = vld [vmem:[#allocation14 + $0x5d8] sm:$0xff]  ;;  %v7852_v27 = vpack.c.bf16 %v3426_v47, %v3418_v45  ;;  %v2523_v47 = vmul.f32 0.0, %v9655_v22  ;;  %v3180_v22 = vmul.f32 0.0, %v9662_v19 }
 0x41a   :  { %v7774_v2 = vpack.c.bf16 %v3377_v0, %v3369_v63  ;;  %v7838_v4 = vpack.c.bf16 %v3379_v3, %v3371_v1  ;;  %v3442_v63 = vld [vmem:[#allocation14 + $0x7d0] sm:$0xff]  ;;  %v3205_v3 = vld [vmem:[#allocation14 + $0x68] sm:$0xff] }
 0x41c   :  { %7757 = vmatpush1.bf16.msra.mxu0 %v7756_v23  ;;  %7821 = vmatpush1.bf16.msra.mxu1 %v7820_v5  ;;  %v3368_v23 = vld [vmem:[#allocation14 + $0x580] sm:$0xff] }
 0x41d   :  { %7759 = vmatprep.subr.bf16.mxu0 %v7758_v8  ;;  %7823 = vmatprep.subr.bf16.mxu1 %v7822_v13  ;;  %v7776_v5 = vpack.c.bf16 %v3376_v39, %v3368_v23  ;;  %v7840_v8 = vpack.c.bf16 %v3378_v6, %v3370_v56  ;;  %v7778_v13 = vpack.c.bf16 %v3393_v9, %v3385_v7  ;;  %v3199_v23 = vld [vmem:[#allocation14 + $0x38] sm:$0xff] }
 0x420   :  { %7761 = vmatpush1.bf16.msra.mxu0 %v7760_v14  ;;  %7825 = vmatpush1.bf16.msra.mxu1 %v7824_v16  ;;  %v7842_v14 = vpack.c.bf16 %v3395_v11, %v3387_v10  ;;  %v3386_v16 = vld [vmem:[#allocation14 + $0x610] sm:$0xff] }
 0x421   :  { %7763 = vmatprep.subr.bf16.mxu0 %v7762_v20  ;;  %7827 = vmatprep.subr.bf16.mxu1 %v7826_v26  ;;  %v3409_v20 = vld [vmem:[#allocation14 + $0x6c8] sm:$0xff]  ;;  %v7844_v21 = vpack.c.bf16 %v3394_v18, %v3386_v16  ;;  %v3411_v26 = vld [vmem:[#allocation14 + $0x6d8] sm:$0xff] }
 0x422   :  { %v7782_v24 = vpack.c.bf16 %v3409_v20, %v3401_v40  ;;  %v7846_v29 = vpack.c.bf16 %v3411_v26, %v3403_v25  ;;  %v2530_v25 = vld [vmem:[#allocation3 + $0x2] ss:$8 sm:$0xf0] }
 0x424   :  { %7765 = vmatpush1.bf16.msra.mxu0 %v7764_v28  ;;  %7829 = vmatpush1.bf16.msra.mxu1 %v7828_v31  ;;  %v3400_v28 = vld [vmem:[#allocation14 + $0x680] sm:$0xff]  ;;  %v3402_v31 = vld [vmem:[#allocation14 + $0x690] sm:$0xff] }
 0x425   :  { %7767 = vmatprep.subr.bf16.mxu0 %v7766_v34  ;;  %7831 = vmatprep.subr.bf16.mxu1 %v7830_v38  ;;  %v3419_v34 = vld [vmem:[#allocation14 + $0x718] sm:$0xff]  ;;  %v7784_v35 = vpack.c.bf16 %v3408_v30, %v3400_v28  ;;  %v7848_v42 = vpack.c.bf16 %v3410_v32, %v3402_v31  ;;  %v7786_v38 = vpack.c.bf16 %v3425_v33, %v3417_v53 }
 0x428   :  { %7769 = vmatpush1.bf16.msra.mxu0 %v7768_v43  ;;  %7833 = vmatpush1.bf16.msra.mxu1 %v7832_v46  ;;  %v3416_v43 = vld [vmem:[#allocation14 + $0x700] sm:$0xff]  ;;  %v7850_v46 = vpack.c.bf16 %v3427_v36, %v3419_v34 }
 0x429   :  { %7771 = vmatprep.subr.bf16.mxu0 %v7770_v50  ;;  %7835 = vmatprep.subr.bf16.mxu1 %v7834_v57  ;;  %v3435_v50 = vld [vmem:[#allocation14 + $0x798] sm:$0xff]  ;;  %v7788_v55 = vpack.c.bf16 %v3424_v44, %v3416_v43  ;;  %v7790_v57 = vpack.c.bf16 %v3441_v49, %v3433_v48 }
 0x42a   :  { %v7854_v59 = vpack.c.bf16 %v3443_v52, %v3435_v50  ;;  %v9685_v50 = vadd.f32 %v2523_v47, %v9658_v12  ;;  %v3206_v12 = vld [vmem:[#allocation14 + $0x70] sm:$0xff] }
 0x42c   :  { %7773 = vmatpush1.bf16.msra.mxu0 %v7772_v58  ;;  %7837 = vmatpush1.bf16.msra.mxu1 %v7836_v62  ;;  %v3432_v58 = vld [vmem:[#allocation14 + $0x780] sm:$0xff]  ;;  %v3434_v62 = vld [vmem:[#allocation14 + $0x790] sm:$0xff] }
 0x42d   :  { %7775 = vmatprep.subr.bf16.mxu0 %v7774_v2  ;;  %7839 = vmatprep.subr.bf16.mxu1 %v7838_v4  ;;  %v7792_v0 = vpack.c.bf16 %v3440_v54, %v3432_v58  ;;  %v7856_v1 = vpack.c.bf16 %v3442_v63, %v3434_v62  ;;  %v3197_v2 = vld [vmem:[#allocation14 + $0x28] sm:$0xff]  ;;  %v3207_v4 = vld [vmem:[#allocation14 + $0x78] sm:$0xff]  ;;  %v3196_v63 = vld [vmem:[#allocation14 + $0x20] sm:$0xff] }
 0x42e   :  { %v7858_v39 = vpack.c.bf16 %v3205_v3, %v3197_v2  ;;  %v3213_v3 = vld [vmem:[#allocation14 + $0xa8] sm:$0xff] }
 0x430   :  { %7777 = vmatpush1.bf16.msra.mxu0 %v7776_v5  ;;  %7841 = vmatpush1.bf16.msra.mxu1 %v7840_v8  ;;  %v7922_v5 = vpack.c.bf16 %v3207_v4, %v3199_v23  ;;  %v3221_v23 = vld [vmem:[#allocation14 + $0xe8] sm:$0xff]  ;;  %v3223_v4 = vld [vmem:[#allocation14 + $0xf8] sm:$0xff] }
 0x431   :  { %7779 = vmatprep.subr.bf16.mxu0 %v7778_v13  ;;  %7843 = vmatprep.subr.bf16.mxu1 %v7842_v14 }
 0x434   :  { %7781 = vmatpush1.bf16.msra.mxu0 %v7780_v17  ;;  %7845 = vmatpush1.bf16.msra.mxu1 %v7844_v21 }
 0x435   :  { %7783 = vmatprep.subr.bf16.mxu0 %v7782_v24  ;;  %7847 = vmatprep.subr.bf16.mxu1 %v7846_v29  ;;  %v2529_v29 = vld [vmem:[#allocation3 + $0x2] ss:$8 sm:$0xf] }
 0x436   :  { %v2531_v30 = vor.u32 %v2530_v25, %v2529_v29  ;;  %v3230_v25 = vld [vmem:[#allocation14 + $0x130] sm:$0xff]  ;;  %v3253_v29 = vld [vmem:[#allocation14 + $0x1e8] sm:$0xff] }
 0x438   :  { %7785 = vmatpush1.bf16.msra.mxu0 %v7784_v35  ;;  %7849 = vmatpush1.bf16.msra.mxu1 %v7848_v42 }
 0x439   :  { %7787 = vmatprep.subr.bf16.mxu0 %v7786_v38  ;;  %7851 = vmatprep.subr.bf16.mxu1 %v7850_v46 }
 0x43c   :  { %7789 = vmatpush1.bf16.msra.mxu0 %v7788_v55  ;;  %7853 = vmatpush1.bf16.msra.mxu1 %v7852_v27 }
 0x43d   :  { %7791 = vmatprep.subr.bf16.mxu0 %v7790_v57  ;;  %7855 = vmatprep.subr.bf16.mxu1 %v7854_v59 }
 0x440   :  { %7793 = vmatpush1.bf16.msra.mxu0 %v7792_v0  ;;  %7857 = vmatpush1.bf16.msra.mxu1 %v7856_v1  ;;  %v3204_v0 = vld [vmem:[#allocation14 + $0x60] sm:$0xff]  ;;  %v3198_v1 = vld [vmem:[#allocation14 + $0x30] sm:$0xff] }
 0x441   :  { %7859 = vmatprep.subr.bf16.mxu0 %v7858_v39  ;;  %7923 = vmatprep.subr.bf16.mxu1 %v7922_v5  ;;  %v3215_v39 = vld [vmem:[#allocation14 + $0xb8] sm:$0xff] }
 0x496   :  { %v2865_v56 = vpop.f32.mrb[16].mxu0  ;;  %v2936_v6 = vpop.f32.mrb[16].mxu1 }
 0x497   :  { %v2867_v7 = vpop.f32.mrb[17].mxu0  ;;  %v2938_v8 = vpop.f32.mrb[17].mxu1 }
 0x498   :  { %v3091_v9 = vcombine.low %v2865_v56, %v2867_v7  ;;  %v3092_v10 = vcombine.low %v2936_v6, %v2938_v8  ;;  %v7860_v56 = vpack.c.bf16 %v3204_v0, %v3196_v63  ;;  %v7924_v6 = vpack.c.bf16 %v3206_v12, %v3198_v1  ;;  %v3212_v7 = vld [vmem:[#allocation14 + $0xa0] sm:$0xff]  ;;  %v3287_v63 = vld [vmem:[#allocation14 + $0x2f8] sm:$0xff] }
 0x499   :  { %v3220_v8 = vld [vmem:[#allocation14 + $0xe0] sm:$0xff] }
 0x49a   :  { %v3101_v11 = vrot.slane %v3091_v9, %v9622_v60  ;;  %v3108_v13 = vrot.slane %v3092_v10, %v9622_v60  ;;  %v3214_v9 = vld [vmem:[#allocation14 + $0xb0] sm:$0xff]  ;;  %v3276_v12 = vld [vmem:[#allocation14 + $0x2a0] sm:$0xff] }
 0x49b   :  { %v3222_v10 = vld [vmem:[#allocation14 + $0xf0] sm:$0xff] }
 0x49c   :  { %v3123_v14 = vcombine.low %v3101_v11, %v3108_v13  ;;  %v3229_v11 = vld [vmem:[#allocation14 + $0x128] sm:$0xff]  ;;  %v7862_v13 = vpack.c.bf16 %v3221_v23, %v3213_v3  ;;  %v3284_v3 = vld [vmem:[#allocation14 + $0x2e0] sm:$0xff] }
 0x49e   :  { %v3131_v26 = vrot.slane %v3123_v14, %v9622_v60  ;;  %v7926_v14 = vpack.c.bf16 %v3223_v4, %v3215_v39  ;;  %v3278_v4 = vld [vmem:[#allocation14 + $0x2b0] sm:$0xff] }
 0x4d6   :  { %v3007_v15 = vpop.f32.mrb[18].mxu0  ;;  %v3078_v61 = vpop.f32.mrb[18].mxu1 }
 0x4d7   :  { %v3009_v16 = vpop.f32.mrb[19].mxu0  ;;  %v3080_v17 = vpop.f32.mrb[19].mxu1 }
 0x4d8   :  { %v3093_v18 = vcombine.low %v3007_v15, %v3009_v16  ;;  %v3094_v40 = vcombine.low %v3078_v61, %v3080_v17  ;;  %v3237_v15 = vld [vmem:[#allocation14 + $0x168] sm:$0xff]  ;;  %v3231_v61 = vld [vmem:[#allocation14 + $0x138] sm:$0xff]  ;;  %v7864_v17 = vpack.c.bf16 %v3220_v8, %v3212_v7 }
 0x4d9   :  { %v3239_v16 = vld [vmem:[#allocation14 + $0x178] sm:$0xff] }
 0x4da   :  { %v3115_v20 = vrot.slane %v3093_v18, %v9622_v60  ;;  %v3122_v21 = vrot.slane %v3094_v40, %v9622_v60  ;;  %v7928_v18 = vpack.c.bf16 %v3222_v10, %v3214_v9  ;;  %v3228_v40 = vld [vmem:[#allocation14 + $0x120] sm:$0xff]  ;;  %v3295_v7 = vld [vmem:[#allocation14 + $0x338] sm:$0xff]  ;;  %v7880_v9 = vpack.c.bf16 %v3284_v3, %v3276_v12 }
 0x4db   :  { %v3303_v8 = vld [vmem:[#allocation14 + $0x378] sm:$0xff] }
 0x4dc   :  { %v3124_v24 = vcombine.low %v3115_v20, %v3122_v21  ;;  %v3236_v20 = vld [vmem:[#allocation14 + $0x160] sm:$0xff]  ;;  %v7866_v21 = vpack.c.bf16 %v3237_v15, %v3229_v11  ;;  %v7946_v15 = vpack.c.bf16 %v3303_v8, %v3295_v7  ;;  %v3359_v12 = vld [vmem:[#allocation14 + $0x538] sm:$0xff]  ;;  %v3358_v7 = vld [vmem:[#allocation14 + $0x530] sm:$0xff] }
 0x4dd   :  { %v3292_v11 = vld [vmem:[#allocation14 + $0x320] sm:$0xff]  ;;  %v3367_v3 = vld [vmem:[#allocation14 + $0x578] sm:$0xff]  ;;  %v3366_v8 = vld [vmem:[#allocation14 + $0x570] sm:$0xff] }
 0x4de   :  { %v3138_v28 = vrot.slane %v3124_v24, %v9622_v60  ;;  %v7930_v24 = vpack.c.bf16 %v3239_v16, %v3231_v61  ;;  %v3294_v61 = vld [vmem:[#allocation14 + $0x330] sm:$0xff] }
 0x4df   :  { %v3302_v16 = vld [vmem:[#allocation14 + $0x370] sm:$0xff] }
 0x4e0   :  { %v3139_v31 = vcombine.low %v3131_v26, %v3138_v28  ;;  %v3238_v26 = vld [vmem:[#allocation14 + $0x170] sm:$0xff]  ;;  %v3245_v28 = vld [vmem:[#allocation14 + $0x1a8] sm:$0xff] }
 0x4e2   :  { %v3141_v32 = vadd.f32 %v3139_v31, %v2531_v30  ;;  %v3247_v30 = vld [vmem:[#allocation14 + $0x1b8] sm:$0xff] }
 0x4e3   :  { %v3255_v31 = vld [vmem:[#allocation14 + $0x1f8] sm:$0xff] }
 0x4e4   :  { %v6897_v53 = vmul.f32 -1.442695, %v3141_v32  ;;  %v3149_v33 = vrot.slane %v3141_v32, 2  ;;  %v3160_v35 = vrot.slane %v3141_v32, 6  ;;  %v3157_v38 = vrot.slane %v3141_v32, 4 }
 0x4e5   :  { %v7868_v32 = vpack.c.bf16 %v3236_v20, %v3228_v40  ;;  %v3311_v40 = vld [vmem:[#allocation14 + $0x3b8] sm:$0xff] }
 0x4e6   :  { %9074 = vpow2.f32 %v6897_v53  ;;  %v6898_v34 = vmul.f32 -1.442695, %v3149_v33  ;;  %v6899_v36 = vmul.f32 -1.442695, %v3160_v35  ;;  %v7932_v53 = vpack.c.bf16 %v3238_v26, %v3230_v25  ;;  %v3244_v33 = vld [vmem:[#allocation14 + $0x1a0] sm:$0xff]  ;;  %v3319_v20 = vld [vmem:[#allocation14 + $0x3f8] sm:$0xff] }
 0x4e7   :  { %v7870_v35 = vpack.c.bf16 %v3253_v29, %v3245_v28  ;;  %v3308_v25 = vld [vmem:[#allocation14 + $0x3a0] sm:$0xff]  ;;  %v7950_v29 = vpack.c.bf16 %v3319_v20, %v3311_v40  ;;  %v3374_v40 = vld [vmem:[#allocation14 + $0x5b0] sm:$0xff] }
 0x4e8   :  { %9076 = vpow2.f32 %v6898_v34  ;;  %v3252_v34 = vld [vmem:[#allocation14 + $0x1e0] sm:$0xff]  ;;  %v3382_v20 = vld [vmem:[#allocation14 + $0x5f0] sm:$0xff] }
 0x4e9   :  { %9078 = vpow2.f32 %v6899_v36  ;;  %v7934_v36 = vpack.c.bf16 %v3255_v31, %v3247_v30  ;;  %v7872_v47 = vpack.c.bf16 %v3252_v34, %v3244_v33  ;;  %v3316_v26 = vld [vmem:[#allocation14 + $0x3e0] sm:$0xff]  ;;  %v3310_v30 = vld [vmem:[#allocation14 + $0x3b0] sm:$0xff]  ;;  %v3327_v33 = vld [vmem:[#allocation14 + $0x438] sm:$0xff] }
 0x4ea   :  { %v3318_v31 = vld [vmem:[#allocation14 + $0x3f0] sm:$0xff]  ;;  %v3335_v34 = vld [vmem:[#allocation14 + $0x478] sm:$0xff] }
 0x4f0   :  { %v9075_v42 = vpop.eup %9074 }
 0x4f1   :  { %v3145_v43 = vadd.f32 1.0, %v9075_v42  ;;  %v3246_v42 = vld [vmem:[#allocation14 + $0x1b0] sm:$0xff] }
 0x4f2   :  { %v9077_v44 = vpop.eup %9076 }
 0x4f3   :  { %9080 = vrcp.f32 %v3145_v43  ;;  %v3154_v45 = vadd.f32 1.0, %v9077_v44  ;;  %v9079_v46 = vpop.eup %9078  ;;  %v3261_v43 = vld [vmem:[#allocation14 + $0x228] sm:$0xff] }
 0x4f4   :  { %9082 = vtanh.f32 %v3157_v38  ;;  %v3165_v55 = vadd.f32 1.0, %v9079_v46  ;;  %v3254_v38 = vld [vmem:[#allocation14 + $0x1f0] sm:$0xff]  ;;  %v3269_v44 = vld [vmem:[#allocation14 + $0x268] sm:$0xff]  ;;  %v3271_v46 = vld [vmem:[#allocation14 + $0x278] sm:$0xff] }
 0x4f5   :  { %9084 = vrcp.f32 %v3154_v45  ;;  %v3263_v45 = vld [vmem:[#allocation14 + $0x238] sm:$0xff] }
 0x4f6   :  { %9086 = vrcp.f32 %v3165_v55  ;;  %v7874_v55 = vpack.c.bf16 %v3269_v44, %v3261_v43  ;;  %v7954_v44 = vpack.c.bf16 %v3335_v34, %v3327_v33  ;;  %v3390_v33 = vld [vmem:[#allocation14 + $0x630] sm:$0xff] }
 0x4f7   :  { %v3398_v34 = vld [vmem:[#allocation14 + $0x670] sm:$0xff] }
 0x4fd   :  { %v9081_v48 = vpop.eup %9080 }
 0x4fe   :  { %v9083_v49 = vpop.eup %9082 }
 0x4ff   :  { %v9085_v52 = vpop.eup %9084  ;;  %v3169_v27 = vmul.f32 %v9083_v49, %v9081_v48  ;;  %v7936_v48 = vpack.c.bf16 %v3254_v38, %v3246_v42  ;;  %v3260_v49 = vld [vmem:[#allocation14 + $0x220] sm:$0xff] }
 0x500   :  { %v3168_v57 = vmul.f32 %v9085_v52, %v9685_v50  ;;  %v9087_v54 = vpop.eup %9086  ;;  %v3268_v52 = vld [vmem:[#allocation14 + $0x260] sm:$0xff] }
 0x501   :  { %v7876_v0 = vpack.c.bf16 %v3268_v52, %v3260_v49  ;;  %v3324_v42 = vld [vmem:[#allocation14 + $0x420] sm:$0xff]  ;;  %v3343_v49 = vld [vmem:[#allocation14 + $0x4b8] sm:$0xff] }
 0x502   :  { %v9688_v58 = vadd.f32 %v3169_v27, %v3168_v57  ;;  %v7938_v27 = vpack.c.bf16 %v3271_v46, %v3263_v45  ;;  %v3262_v57 = vld [vmem:[#allocation14 + $0x230] sm:$0xff]  ;;  %v3332_v38 = vld [vmem:[#allocation14 + $0x460] sm:$0xff]  ;;  %v3351_v52 = vld [vmem:[#allocation14 + $0x4f8] sm:$0xff] }
 0x503   :  { %v3326_v45 = vld [vmem:[#allocation14 + $0x430] sm:$0xff] }
 0x504   :  { %9088 = vtanh.f32 %v9688_v58  ;;  %v3334_v46 = vld [vmem:[#allocation14 + $0x470] sm:$0xff] }
 0x50e   :  { %v9089_v59 = vpop.eup %9088 }
 0x50f   :  { %v3172_v62 = vmul.f32 %v9089_v59, %v9087_v54  ;;  %v3270_v54 = vld [vmem:[#allocation14 + $0x270] sm:$0xff]  ;;  %v3277_v59 = vld [vmem:[#allocation14 + $0x2a8] sm:$0xff] }
 0x510   :  { %v7940_v1 = vpack.c.bf16 %v3270_v54, %v3262_v57  ;;  %v3340_v57 = vld [vmem:[#allocation14 + $0x4a0] sm:$0xff] }
 0x511   :  { %v9692_v2 = vadd.f32 %v3180_v22, %v3172_v62  ;;  %v3285_v62 = vld [vmem:[#allocation14 + $0x2e8] sm:$0xff]  ;;  %v3279_v22 = vld [vmem:[#allocation14 + $0x2b8] sm:$0xff]  ;;  %v3348_v54 = vld [vmem:[#allocation14 + $0x4e0] sm:$0xff] }
 0x512   :  { %v7878_v23 = vpack.c.bf16 %v3285_v62, %v3277_v59  ;;  %v7942_v39 = vpack.c.bf16 %v3287_v63, %v3279_v22  ;;  %v7958_v62 = vpack.c.bf16 %v3351_v52, %v3343_v49  ;;  %v3342_v22 = vld [vmem:[#allocation14 + $0x4b0] sm:$0xff] }
 0x513   :  { %3186 = vst.msk [vmem:[#allocation4 + $0x2] ss:$8 sm:$0x3] %vm9531_vm0, %v9692_v2  ;;  %v3456_v5 = vrot.slane %v9692_v2, %v9580_v37  ;;  %v9701_v19 = vrot.slane %v9692_v2, %v9593_v41  ;;  %v3350_v63 = vld [vmem:[#allocation14 + $0x4f0] sm:$0xff] }
 0x514   :  { %v3406_v49 = vld [vmem:[#allocation14 + $0x6b0] sm:$0xff] }
 0x515   :  { %3523 = vmatprep.mubr.f32.mxu0 %v3456_v5  ;;  %3594 = vmatprep.mubr.f32.mxu1 %v3456_v5  ;;  %v3414_v52 = vld [vmem:[#allocation14 + $0x6f0] sm:$0xff] }
 0x516   :  { %3524 = vmatmul.mubr.f32.vlgmr.msra.gmra.mrb[20].mxu0 %v9701_v19  ;;  %3595 = vmatmul.mubr.f32.vlgmr.msra.gmra.mrb[20].mxu1 %v9701_v19 }
 0x517   :  { %7861 = vmatpush1.bf16.msra.mxu0 %v7860_v56  ;;  %7925 = vmatpush1.bf16.msra.mxu1 %v7924_v6  ;;  %v3293_v56 = vld [vmem:[#allocation14 + $0x328] sm:$0xff] }
 0x518   :  { %3665 = vmatprep.mubr.f32.mxu0 %v3456_v5  ;;  %3736 = vmatprep.mubr.f32.mxu1 %v3456_v5  ;;  %v3286_v5 = vld [vmem:[#allocation14 + $0x2f0] sm:$0xff]  ;;  %v3301_v6 = vld [vmem:[#allocation14 + $0x368] sm:$0xff] }
 0x519   :  { %7863 = vmatprep.subr.bf16.mxu0 %v7862_v13  ;;  %7927 = vmatprep.subr.bf16.mxu1 %v7926_v14  ;;  %v7944_v10 = vpack.c.bf16 %v3286_v5, %v3278_v4  ;;  %v3300_v13 = vld [vmem:[#allocation14 + $0x360] sm:$0xff]  ;;  %v7882_v14 = vpack.c.bf16 %v3301_v6, %v3293_v56  ;;  %v7962_v6 = vpack.c.bf16 %v3367_v3, %v3359_v12  ;;  %v3422_v12 = vld [vmem:[#allocation14 + $0x730] sm:$0xff] }
 0x51a   :  { %v3356_v4 = vld [vmem:[#allocation14 + $0x520] sm:$0xff]  ;;  %v3430_v3 = vld [vmem:[#allocation14 + $0x770] sm:$0xff] }
 0x51b   :  { %7865 = vmatpush1.bf16.msra.mxu0 %v7864_v17  ;;  %7929 = vmatpush1.bf16.msra.mxu1 %v7928_v18  ;;  %v3309_v17 = vld [vmem:[#allocation14 + $0x3a8] sm:$0xff]  ;;  %v3364_v5 = vld [vmem:[#allocation14 + $0x560] sm:$0xff] }
 0x51c   :  { %7867 = vmatprep.subr.bf16.mxu0 %v7866_v21  ;;  %7931 = vmatprep.subr.bf16.mxu1 %v7930_v24  ;;  %v3317_v18 = vld [vmem:[#allocation14 + $0x3e8] sm:$0xff]  ;;  %v7884_v21 = vpack.c.bf16 %v3300_v13, %v3292_v11  ;;  %v7948_v24 = vpack.c.bf16 %v3302_v16, %v3294_v61  ;;  %v3375_v11 = vld [vmem:[#allocation14 + $0x5b8] sm:$0xff]  ;;  %v3372_v61 = vld [vmem:[#allocation14 + $0x5a0] sm:$0xff] }
 0x51d   :  { %v7886_v28 = vpack.c.bf16 %v3317_v18, %v3309_v17  ;;  %v3383_v13 = vld [vmem:[#allocation14 + $0x5f8] sm:$0xff]  ;;  %v3380_v16 = vld [vmem:[#allocation14 + $0x5e0] sm:$0xff] }
 0x51e   :  { %v7966_v18 = vpack.c.bf16 %v3383_v13, %v3375_v11  ;;  %v3438_v11 = vld [vmem:[#allocation14 + $0x7b0] sm:$0xff] }
 0x51f   :  { %7869 = vmatpush1.bf16.msra.mxu0 %v7868_v32  ;;  %7933 = vmatpush1.bf16.msra.mxu1 %v7932_v53  ;;  %v3325_v32 = vld [vmem:[#allocation14 + $0x428] sm:$0xff]  ;;  %v3446_v13 = vld [vmem:[#allocation14 + $0x7f0] sm:$0xff] }
 0x520   :  { %7871 = vmatprep.subr.bf16.mxu0 %v7870_v35  ;;  %7935 = vmatprep.subr.bf16.mxu1 %v7934_v36  ;;  %v3333_v53 = vld [vmem:[#allocation14 + $0x468] sm:$0xff]  ;;  %v7888_v35 = vpack.c.bf16 %v3316_v26, %v3308_v25  ;;  %v7952_v36 = vpack.c.bf16 %v3318_v31, %v3310_v30  ;;  %v3391_v25 = vld [vmem:[#allocation14 + $0x638] sm:$0xff]  ;;  %v3388_v30 = vld [vmem:[#allocation14 + $0x620] sm:$0xff] }
 0x521   :  { %v7890_v43 = vpack.c.bf16 %v3333_v53, %v3325_v32  ;;  %v3399_v26 = vld [vmem:[#allocation14 + $0x678] sm:$0xff]  ;;  %v3396_v31 = vld [vmem:[#allocation14 + $0x660] sm:$0xff] }
 0x522   :  { %v7970_v53 = vpack.c.bf16 %v3399_v26, %v3391_v25  ;;  %v3854_v25 = vld [vmem:[#allocation14 + $0x10] sm:$0xff] }
 0x523   :  { %7873 = vmatpush1.bf16.msra.mxu0 %v7872_v47  ;;  %7937 = vmatpush1.bf16.msra.mxu1 %v7936_v48  ;;  %v3341_v47 = vld [vmem:[#allocation14 + $0x4a8] sm:$0xff] }
 0x524   :  { %7875 = vmatprep.subr.bf16.mxu0 %v7874_v55  ;;  %7939 = vmatprep.subr.bf16.mxu1 %v7938_v27  ;;  %v3349_v48 = vld [vmem:[#allocation14 + $0x4e8] sm:$0xff]  ;;  %v7892_v55 = vpack.c.bf16 %v3332_v38, %v3324_v42  ;;  %v7956_v27 = vpack.c.bf16 %v3334_v46, %v3326_v45  ;;  %v3407_v42 = vld [vmem:[#allocation14 + $0x6b8] sm:$0xff]  ;;  %v3404_v45 = vld [vmem:[#allocation14 + $0x6a0] sm:$0xff] }
 0x525   :  { %v7894_v59 = vpack.c.bf16 %v3349_v48, %v3341_v47  ;;  %v3415_v38 = vld [vmem:[#allocation14 + $0x6f8] sm:$0xff]  ;;  %v3412_v46 = vld [vmem:[#allocation14 + $0x6e0] sm:$0xff] }
 0x526   :  { %v7974_v48 = vpack.c.bf16 %v3415_v38, %v3407_v42  ;;  %v3870_v42 = vld [vmem:[#allocation14 + $0x90] sm:$0xff] }
 0x527   :  { %7877 = vmatpush1.bf16.msra.mxu0 %v7876_v0  ;;  %7941 = vmatpush1.bf16.msra.mxu1 %v7940_v1  ;;  %v3357_v0 = vld [vmem:[#allocation14 + $0x528] sm:$0xff]  ;;  %v3878_v38 = vld [vmem:[#allocation14 + $0xd0] sm:$0xff] }
 0x528   :  { %7879 = vmatprep.subr.bf16.mxu0 %v7878_v23  ;;  %7943 = vmatprep.subr.bf16.mxu1 %v7942_v39  ;;  %v3365_v1 = vld [vmem:[#allocation14 + $0x568] sm:$0xff]  ;;  %v7896_v23 = vpack.c.bf16 %v3348_v54, %v3340_v57  ;;  %v7960_v39 = vpack.c.bf16 %v3350_v63, %v3342_v22  ;;  %v3423_v57 = vld [vmem:[#allocation14 + $0x738] sm:$0xff]  ;;  %v3420_v22 = vld [vmem:[#allocation14 + $0x720] sm:$0xff] }
 0x529   :  { %v7898_v56 = vpack.c.bf16 %v3365_v1, %v3357_v0  ;;  %v3431_v54 = vld [vmem:[#allocation14 + $0x778] sm:$0xff]  ;;  %v3428_v63 = vld [vmem:[#allocation14 + $0x760] sm:$0xff] }
 0x52a   :  { %v7978_v1 = vpack.c.bf16 %v3431_v54, %v3423_v57  ;;  %v3886_v57 = vld [vmem:[#allocation14 + $0x110] sm:$0xff] }
 0x52b   :  { %7881 = vmatpush1.bf16.msra.mxu0 %v7880_v9  ;;  %7945 = vmatpush1.bf16.msra.mxu1 %v7944_v10  ;;  %v3373_v9 = vld [vmem:[#allocation14 + $0x5a8] sm:$0xff]  ;;  %v3894_v54 = vld [vmem:[#allocation14 + $0x150] sm:$0xff] }
 0x52c   :  { %7883 = vmatprep.subr.bf16.mxu0 %v7882_v14  ;;  %7947 = vmatprep.subr.bf16.mxu1 %v7946_v15  ;;  %v3381_v10 = vld [vmem:[#allocation14 + $0x5e8] sm:$0xff]  ;;  %v7900_v14 = vpack.c.bf16 %v3364_v5, %v3356_v4  ;;  %v7964_v15 = vpack.c.bf16 %v3366_v8, %v3358_v7  ;;  %v3439_v4 = vld [vmem:[#allocation14 + $0x7b8] sm:$0xff]  ;;  %v3436_v7 = vld [vmem:[#allocation14 + $0x7a0] sm:$0xff] }
 0x52d   :  { %v7902_v17 = vpack.c.bf16 %v3381_v10, %v3373_v9  ;;  %v3447_v5 = vld [vmem:[#allocation14 + $0x7f8] sm:$0xff]  ;;  %v3444_v10 = vld [vmem:[#allocation14 + $0x7e0] sm:$0xff] }
 0x52e   :  { %v7982_v9 = vpack.c.bf16 %v3447_v5, %v3439_v4  ;;  %v3902_v4 = vld [vmem:[#allocation14 + $0x190] sm:$0xff] }
 0x52f   :  { %7885 = vmatpush1.bf16.msra.mxu0 %v7884_v21  ;;  %7949 = vmatpush1.bf16.msra.mxu1 %v7948_v24  ;;  %v3389_v21 = vld [vmem:[#allocation14 + $0x628] sm:$0xff]  ;;  %v3910_v5 = vld [vmem:[#allocation14 + $0x1d0] sm:$0xff] }
 0x530   :  { %7887 = vmatprep.subr.bf16.mxu0 %v7886_v28  ;;  %7951 = vmatprep.subr.bf16.mxu1 %v7950_v29  ;;  %v3397_v24 = vld [vmem:[#allocation14 + $0x668] sm:$0xff]  ;;  %v7904_v28 = vpack.c.bf16 %v3380_v16, %v3372_v61  ;;  %v7968_v29 = vpack.c.bf16 %v3382_v20, %v3374_v40  ;;  %v3863_v40 = vld [vmem:[#allocation14 + $0x58] sm:$0xff] }
 0x531   :  { %v7906_v32 = vpack.c.bf16 %v3397_v24, %v3389_v21  ;;  %v3853_v61 = vld [vmem:[#allocation14 + $0x8] sm:$0xff]  ;;  %v3852_v21 = vld [vmem:[#allocation14] sm:$0xff] }
 0x532   :  { %v3861_v16 = vld [vmem:[#allocation14 + $0x48] sm:$0xff]  ;;  %v3860_v24 = vld [vmem:[#allocation14 + $0x40] sm:$0xff] }
 0x533   :  { %7889 = vmatpush1.bf16.msra.mxu0 %v7888_v35  ;;  %7953 = vmatpush1.bf16.msra.mxu1 %v7952_v36  ;;  %v3405_v35 = vld [vmem:[#allocation14 + $0x6a8] sm:$0xff]  ;;  %v7988_v26 = vpack.c.bf16 %v3860_v24, %v3852_v21  ;;  %v3943_v24 = vld [vmem:[#allocation14 + $0x2d8] sm:$0xff] }
 0x534   :  { %7891 = vmatprep.subr.bf16.mxu0 %v7890_v43  ;;  %7955 = vmatprep.subr.bf16.mxu1 %v7954_v44  ;;  %v3413_v36 = vld [vmem:[#allocation14 + $0x6e8] sm:$0xff]  ;;  %v7908_v43 = vpack.c.bf16 %v3396_v31, %v3388_v30  ;;  %v7972_v44 = vpack.c.bf16 %v3398_v34, %v3390_v33  ;;  %v3868_v33 = vld [vmem:[#allocation14 + $0x80] sm:$0xff] }
 0x535   :  { %v7910_v47 = vpack.c.bf16 %v3413_v36, %v3405_v35  ;;  %v3869_v30 = vld [vmem:[#allocation14 + $0x88] sm:$0xff]  ;;  %v3876_v34 = vld [vmem:[#allocation14 + $0xc0] sm:$0xff] }
 0x536   :  { %v3877_v31 = vld [vmem:[#allocation14 + $0xc8] sm:$0xff]  ;;  %v7992_v36 = vpack.c.bf16 %v3876_v34, %v3868_v33  ;;  %v3951_v33 = vld [vmem:[#allocation14 + $0x318] sm:$0xff] }
 0x537   :  { %7893 = vmatpush1.bf16.msra.mxu0 %v7892_v55  ;;  %7957 = vmatpush1.bf16.msra.mxu1 %v7956_v27  ;;  %v3421_v55 = vld [vmem:[#allocation14 + $0x728] sm:$0xff] }
 0x538   :  { %7895 = vmatprep.subr.bf16.mxu0 %v7894_v59  ;;  %7959 = vmatprep.subr.bf16.mxu1 %v7958_v62  ;;  %v3429_v27 = vld [vmem:[#allocation14 + $0x768] sm:$0xff]  ;;  %v7912_v59 = vpack.c.bf16 %v3412_v46, %v3404_v45  ;;  %v7976_v62 = vpack.c.bf16 %v3414_v52, %v3406_v49  ;;  %v3887_v46 = vld [vmem:[#allocation14 + $0x118] sm:$0xff]  ;;  %v3884_v49 = vld [vmem:[#allocation14 + $0x100] sm:$0xff] }
 0x539   :  { %v7914_v0 = vpack.c.bf16 %v3429_v27, %v3421_v55  ;;  %v3893_v45 = vld [vmem:[#allocation14 + $0x148] sm:$0xff]  ;;  %v3892_v52 = vld [vmem:[#allocation14 + $0x140] sm:$0xff] }
 0x53a   :  { %v7996_v27 = vpack.c.bf16 %v3892_v52, %v3884_v49  ;;  %v3967_v49 = vld [vmem:[#allocation14 + $0x398] sm:$0xff] }
 0x53b   :  { %7897 = vmatpush1.bf16.msra.mxu0 %v7896_v23  ;;  %7961 = vmatpush1.bf16.msra.mxu1 %v7960_v39  ;;  %v3437_v23 = vld [vmem:[#allocation14 + $0x7a8] sm:$0xff] }
 0x53c   :  { %7899 = vmatprep.subr.bf16.mxu0 %v7898_v56  ;;  %7963 = vmatprep.subr.bf16.mxu1 %v7962_v6  ;;  %v3445_v39 = vld [vmem:[#allocation14 + $0x7e8] sm:$0xff]  ;;  %v7916_v56 = vpack.c.bf16 %v3428_v63, %v3420_v22  ;;  %v7980_v6 = vpack.c.bf16 %v3430_v3, %v3422_v12  ;;  %v3903_v63 = vld [vmem:[#allocation14 + $0x198] sm:$0xff]  ;;  %v3900_v12 = vld [vmem:[#allocation14 + $0x180] sm:$0xff] }
 0x53d   :  { %v7918_v8 = vpack.c.bf16 %v3445_v39, %v3437_v23  ;;  %v3909_v22 = vld [vmem:[#allocation14 + $0x1c8] sm:$0xff]  ;;  %v3908_v3 = vld [vmem:[#allocation14 + $0x1c0] sm:$0xff] }
 0x53e   :  { %v8000_v39 = vpack.c.bf16 %v3908_v3, %v3900_v12  ;;  %v3983_v12 = vld [vmem:[#allocation14 + $0x418] sm:$0xff] }
 0x53f   :  { %7901 = vmatpush1.bf16.msra.mxu0 %v7900_v14  ;;  %7965 = vmatpush1.bf16.msra.mxu1 %v7964_v15  ;;  %v7920_v14 = vpack.c.bf16 %v3444_v10, %v3436_v7  ;;  %v7984_v15 = vpack.c.bf16 %v3446_v13, %v3438_v11  ;;  %v3925_v7 = vld [vmem:[#allocation14 + $0x248] sm:$0xff]  ;;  %v3927_v10 = vld [vmem:[#allocation14 + $0x258] sm:$0xff]  ;;  %v3916_v11 = vld [vmem:[#allocation14 + $0x200] sm:$0xff] }
 0x540   :  { %7903 = vmatprep.subr.bf16.mxu0 %v7902_v17  ;;  %7967 = vmatprep.subr.bf16.mxu1 %v7966_v18  ;;  %v3855_v17 = vld [vmem:[#allocation14 + $0x18] sm:$0xff]  ;;  %v7986_v18 = vpack.c.bf16 %v3861_v16, %v3853_v61  ;;  %v3924_v13 = vld [vmem:[#allocation14 + $0x240] sm:$0xff]  ;;  %v3918_v61 = vld [vmem:[#allocation14 + $0x210] sm:$0xff] }
 0x541   :  { %v8050_v20 = vpack.c.bf16 %v3863_v40, %v3855_v17  ;;  %v3926_v16 = vld [vmem:[#allocation14 + $0x250] sm:$0xff]  ;;  %v3941_v40 = vld [vmem:[#allocation14 + $0x2c8] sm:$0xff] }
 0x542   :  { %v8068_v17 = vpack.c.bf16 %v3926_v16, %v3918_v61  ;;  %v4004_v61 = vld [vmem:[#allocation14 + $0x4c0] sm:$0xff] }
 0x543   :  { %7905 = vmatpush1.bf16.msra.mxu0 %v7904_v28  ;;  %7969 = vmatpush1.bf16.msra.mxu1 %v7968_v29  ;;  %v3862_v28 = vld [vmem:[#allocation14 + $0x50] sm:$0xff] }
 0x544   :  { %7907 = vmatprep.subr.bf16.mxu0 %v7906_v32  ;;  %7971 = vmatprep.subr.bf16.mxu1 %v7970_v53  ;;  %v8052_v29 = vpack.c.bf16 %v3862_v28, %v3854_v25  ;;  %v3871_v32 = vld [vmem:[#allocation14 + $0x98] sm:$0xff]  ;;  %v3932_v25 = vld [vmem:[#allocation14 + $0x280] sm:$0xff] }
 0x545   :  { %v3879_v53 = vld [vmem:[#allocation14 + $0xd8] sm:$0xff] }
 0x546   :  { %v8054_v35 = vpack.c.bf16 %v3879_v53, %v3871_v32  ;;  %v3957_v53 = vld [vmem:[#allocation14 + $0x348] sm:$0xff] }
 0x547   :  { %7909 = vmatpush1.bf16.msra.mxu0 %v7908_v43  ;;  %7973 = vmatpush1.bf16.msra.mxu1 %v7972_v44  ;;  %v8056_v43 = vpack.c.bf16 %v3878_v38, %v3870_v42  ;;  %v3885_v44 = vld [vmem:[#allocation14 + $0x108] sm:$0xff]  ;;  %v3956_v42 = vld [vmem:[#allocation14 + $0x340] sm:$0xff] }
 0x548   :  { %7911 = vmatprep.subr.bf16.mxu0 %v7910_v47  ;;  %7975 = vmatprep.subr.bf16.mxu1 %v7974_v48  ;;  %v7994_v47 = vpack.c.bf16 %v3893_v45, %v3885_v44  ;;  %v3895_v48 = vld [vmem:[#allocation14 + $0x158] sm:$0xff]  ;;  %v3950_v44 = vld [vmem:[#allocation14 + $0x310] sm:$0xff] }
 0x549   :  { %v8058_v55 = vpack.c.bf16 %v3895_v48, %v3887_v46  ;;  %v3958_v45 = vld [vmem:[#allocation14 + $0x350] sm:$0xff]  ;;  %v3973_v48 = vld [vmem:[#allocation14 + $0x3c8] sm:$0xff] }
 0x54a   :  { %v8076_v46 = vpack.c.bf16 %v3958_v45, %v3950_v44  ;;  %v4036_v44 = vld [vmem:[#allocation14 + $0x5c0] sm:$0xff] }
 0x54b   :  { %7913 = vmatpush1.bf16.msra.mxu0 %v7912_v59  ;;  %7977 = vmatpush1.bf16.msra.mxu1 %v7976_v62  ;;  %v8060_v59 = vpack.c.bf16 %v3894_v54, %v3886_v57  ;;  %v3901_v62 = vld [vmem:[#allocation14 + $0x188] sm:$0xff]  ;;  %v3972_v57 = vld [vmem:[#allocation14 + $0x3c0] sm:$0xff] }
 0x54c   :  { %7915 = vmatprep.subr.bf16.mxu0 %v7914_v0  ;;  %7979 = vmatprep.subr.bf16.mxu1 %v7978_v1  ;;  %v7998_v0 = vpack.c.bf16 %v3909_v22, %v3901_v62  ;;  %v3911_v1 = vld [vmem:[#allocation14 + $0x1d8] sm:$0xff]  ;;  %v3966_v62 = vld [vmem:[#allocation14 + $0x390] sm:$0xff] }
 0x54d   :  { %v8062_v23 = vpack.c.bf16 %v3911_v1, %v3903_v63  ;;  %v3974_v22 = vld [vmem:[#allocation14 + $0x3d0] sm:$0xff]  ;;  %v3989_v1 = vld [vmem:[#allocation14 + $0x448] sm:$0xff] }
 0x54e   :  { %v8080_v63 = vpack.c.bf16 %v3974_v22, %v3966_v62  ;;  %v4044_v62 = vld [vmem:[#allocation14 + $0x600] sm:$0xff] }
 0x54f   :  { %7917 = vmatpush1.bf16.msra.mxu0 %v7916_v56  ;;  %7981 = vmatpush1.bf16.msra.mxu1 %v7980_v6  ;;  %v8064_v56 = vpack.c.bf16 %v3910_v5, %v3902_v4  ;;  %v3917_v6 = vld [vmem:[#allocation14 + $0x208] sm:$0xff]  ;;  %v3988_v4 = vld [vmem:[#allocation14 + $0x440] sm:$0xff] }
 0x550   :  { %7919 = vmatprep.subr.bf16.mxu0 %v7918_v8  ;;  %7983 = vmatprep.subr.bf16.mxu1 %v7982_v9  ;;  %v3919_v8 = vld [vmem:[#allocation14 + $0x218] sm:$0xff]  ;;  %v8002_v9 = vpack.c.bf16 %v3925_v7, %v3917_v6  ;;  %v3982_v6 = vld [vmem:[#allocation14 + $0x410] sm:$0xff]  ;;  %v4052_v22 = vld [vmem:[#allocation14 + $0x640] sm:$0xff] }
 0x551   :  { %v3990_v7 = vld [vmem:[#allocation14 + $0x450] sm:$0xff] }
 0x553   :  { %7921 = vmatpush1.bf16.msra.mxu0 %v7920_v14  ;;  %7985 = vmatpush1.bf16.msra.mxu1 %v7984_v15  ;;  %v8066_v14 = vpack.c.bf16 %v3927_v10, %v3919_v8  ;;  %v8004_v15 = vpack.c.bf16 %v3924_v13, %v3916_v11  ;;  %v8084_v8 = vpack.c.bf16 %v3990_v7, %v3982_v6  ;;  %v4005_v10 = vld [vmem:[#allocation14 + $0x4c8] sm:$0xff]  ;;  %v3999_v11 = vld [vmem:[#allocation14 + $0x498] sm:$0xff]  ;;  %v4068_v7 = vld [vmem:[#allocation14 + $0x6c0] sm:$0xff] }
 0x554   :  { %7987 = vmatprep.subr.bf16.mxu0 %v7986_v18  ;;  %8051 = vmatprep.subr.bf16.mxu1 %v8050_v20  ;;  %v3933_v18 = vld [vmem:[#allocation14 + $0x288] sm:$0xff]  ;;  %v3935_v20 = vld [vmem:[#allocation14 + $0x298] sm:$0xff] }
 0x555   :  { %v8006_v21 = vpack.c.bf16 %v3941_v40, %v3933_v18  ;;  %v8070_v28 = vpack.c.bf16 %v3943_v24, %v3935_v20  ;;  %v3998_v18 = vld [vmem:[#allocation14 + $0x490] sm:$0xff]  ;;  %v4021_v24 = vld [vmem:[#allocation14 + $0x548] sm:$0xff] }
 0x556   :  { %3666 = vmatmul.mubr.f32.vlgmr.msra.gmra.mrb[22].mxu0 %v9701_v19  ;;  %3737 = vmatmul.mubr.f32.vlgmr.msra.gmra.mrb[22].mxu1 %v9701_v19  ;;  %v7990_v19 = vpack.c.bf16 %v3877_v31, %v3869_v30  ;;  %v3934_v30 = vld [vmem:[#allocation14 + $0x290] sm:$0xff] }
 0x557   :  { %7989 = vmatpush1.bf16.msra.mxu0 %v7988_v26  ;;  %8053 = vmatpush1.bf16.msra.mxu1 %v8052_v29  ;;  %v3940_v26 = vld [vmem:[#allocation14 + $0x2c0] sm:$0xff]  ;;  %v3942_v31 = vld [vmem:[#allocation14 + $0x2d0] sm:$0xff] }
 0x558   :  { %7991 = vmatprep.subr.bf16.mxu0 %v7990_v19  ;;  %8055 = vmatprep.subr.bf16.mxu1 %v8054_v35  ;;  %v8008_v29 = vpack.c.bf16 %v3940_v26, %v3932_v25  ;;  %v8072_v32 = vpack.c.bf16 %v3942_v31, %v3934_v30  ;;  %v3949_v19 = vld [vmem:[#allocation14 + $0x308] sm:$0xff]  ;;  %v3959_v35 = vld [vmem:[#allocation14 + $0x358] sm:$0xff]  ;;  %v4006_v40 = vld [vmem:[#allocation14 + $0x4d0] sm:$0xff] }
 0x559   :  { %v8010_v34 = vpack.c.bf16 %v3957_v53, %v3949_v19  ;;  %v8074_v38 = vpack.c.bf16 %v3959_v35, %v3951_v33  ;;  %v8088_v20 = vpack.c.bf16 %v4006_v40, %v3998_v18  ;;  %v4015_v25 = vld [vmem:[#allocation14 + $0x518] sm:$0xff]  ;;  %v4020_v30 = vld [vmem:[#allocation14 + $0x540] sm:$0xff]  ;;  %v4014_v19 = vld [vmem:[#allocation14 + $0x510] sm:$0xff] }
 0x55a   :  { %v4022_v53 = vld [vmem:[#allocation14 + $0x550] sm:$0xff]  ;;  %v4037_v35 = vld [vmem:[#allocation14 + $0x5c8] sm:$0xff]  ;;  %v4084_v18 = vld [vmem:[#allocation14 + $0x740] sm:$0xff] }
 0x55b   :  { %7993 = vmatpush1.bf16.msra.mxu0 %v7992_v36  ;;  %8057 = vmatpush1.bf16.msra.mxu1 %v8056_v43  ;;  %v3948_v36 = vld [vmem:[#allocation14 + $0x300] sm:$0xff]  ;;  %v8092_v33 = vpack.c.bf16 %v4022_v53, %v4014_v19  ;;  %v4078_v40 = vld [vmem:[#allocation14 + $0x710] sm:$0xff] }
 0x55c   :  { %7995 = vmatprep.subr.bf16.mxu0 %v7994_v47  ;;  %8059 = vmatprep.subr.bf16.mxu1 %v8058_v55  ;;  %v8012_v43 = vpack.c.bf16 %v3956_v42, %v3948_v36  ;;  %v3965_v47 = vld [vmem:[#allocation14 + $0x388] sm:$0xff]  ;;  %v3975_v55 = vld [vmem:[#allocation14 + $0x3d8] sm:$0xff]  ;;  %v4100_v19 = vld [vmem:[#allocation14 + $0x7c0] sm:$0xff] }
 0x55d   :  { %v8014_v52 = vpack.c.bf16 %v3973_v48, %v3965_v47  ;;  %v8078_v54 = vpack.c.bf16 %v3975_v55, %v3967_v49  ;;  %v4031_v36 = vld [vmem:[#allocation14 + $0x598] sm:$0xff]  ;;  %v4030_v47 = vld [vmem:[#allocation14 + $0x590] sm:$0xff]  ;;  %v4045_v49 = vld [vmem:[#allocation14 + $0x608] sm:$0xff] }
 0x55e   :  { %v4038_v48 = vld [vmem:[#allocation14 + $0x5d0] sm:$0xff]  ;;  %v4053_v55 = vld [vmem:[#allocation14 + $0x648] sm:$0xff] }
 0x55f   :  { %7997 = vmatpush1.bf16.msra.mxu0 %v7996_v27  ;;  %8061 = vmatpush1.bf16.msra.mxu1 %v8060_v59  ;;  %v3964_v27 = vld [vmem:[#allocation14 + $0x380] sm:$0xff] }
 0x560   :  { %7999 = vmatprep.subr.bf16.mxu0 %v7998_v0  ;;  %8063 = vmatprep.subr.bf16.mxu1 %v8062_v23  ;;  %v8016_v59 = vpack.c.bf16 %v3972_v57, %v3964_v27  ;;  %v3981_v0 = vld [vmem:[#allocation14 + $0x408] sm:$0xff]  ;;  %v3991_v23 = vld [vmem:[#allocation14 + $0x458] sm:$0xff] }
 0x561   :  { %v8018_v3 = vpack.c.bf16 %v3989_v1, %v3981_v0  ;;  %v8082_v5 = vpack.c.bf16 %v3991_v23, %v3983_v12  ;;  %v4047_v27 = vld [vmem:[#allocation14 + $0x618] sm:$0xff]  ;;  %v8036_v0 = vpack.c.bf16 %v4052_v22, %v4044_v62  ;;  %v4054_v1 = vld [vmem:[#allocation14 + $0x650] sm:$0xff]  ;;  %v4061_v12 = vld [vmem:[#allocation14 + $0x688] sm:$0xff] }
 0x562   :  { %v4055_v57 = vld [vmem:[#allocation14 + $0x658] sm:$0xff] }
 0x563   :  { %8001 = vmatpush1.bf16.msra.mxu0 %v8000_v39  ;;  %8065 = vmatpush1.bf16.msra.mxu1 %v8064_v56  ;;  %v3980_v39 = vld [vmem:[#allocation14 + $0x400] sm:$0xff] }
 0x564   :  { %8003 = vmatprep.subr.bf16.mxu0 %v8002_v9  ;;  %8067 = vmatprep.subr.bf16.mxu1 %v8066_v14  ;;  %v8020_v56 = vpack.c.bf16 %v3988_v4, %v3980_v39  ;;  %v3997_v9 = vld [vmem:[#allocation14 + $0x488] sm:$0xff]  ;;  %v4007_v14 = vld [vmem:[#allocation14 + $0x4d8] sm:$0xff] }
 0x565   :  { %v8022_v13 = vpack.c.bf16 %v4005_v10, %v3997_v9  ;;  %v8086_v16 = vpack.c.bf16 %v4007_v14, %v3999_v11  ;;  %v4063_v4 = vld [vmem:[#allocation14 + $0x698] sm:$0xff]  ;;  %v4070_v9 = vld [vmem:[#allocation14 + $0x6d0] sm:$0xff]  ;;  %v4077_v10 = vld [vmem:[#allocation14 + $0x708] sm:$0xff] }
 0x566   :  { %v4085_v11 = vld [vmem:[#allocation14 + $0x748] sm:$0xff] }
 0x567   :  { %8005 = vmatpush1.bf16.msra.mxu0 %v8004_v15  ;;  %8069 = vmatpush1.bf16.msra.mxu1 %v8068_v17  ;;  %v3996_v15 = vld [vmem:[#allocation14 + $0x480] sm:$0xff] }
 0x568   :  { %8007 = vmatprep.subr.bf16.mxu0 %v8006_v21  ;;  %8071 = vmatprep.subr.bf16.mxu1 %v8070_v28  ;;  %v8024_v17 = vpack.c.bf16 %v4004_v61, %v3996_v15  ;;  %v4013_v21 = vld [vmem:[#allocation14 + $0x508] sm:$0xff]  ;;  %v4023_v28 = vld [vmem:[#allocation14 + $0x558] sm:$0xff] }
 0x569   :  { %v8026_v26 = vpack.c.bf16 %v4021_v24, %v4013_v21  ;;  %v8090_v31 = vpack.c.bf16 %v4023_v28, %v4015_v25  ;;  %v4087_v15 = vld [vmem:[#allocation14 + $0x758] sm:$0xff]  ;;  %v4086_v21 = vld [vmem:[#allocation14 + $0x750] sm:$0xff]  ;;  %v4093_v24 = vld [vmem:[#allocation14 + $0x788] sm:$0xff] }
 0x56a   :  { %v4101_v25 = vld [vmem:[#allocation14 + $0x7c8] sm:$0xff]  ;;  %v4103_v28 = vld [vmem:[#allocation14 + $0x7d8] sm:$0xff] }
 0x56b   :  { %8009 = vmatpush1.bf16.msra.mxu0 %v8008_v29  ;;  %8073 = vmatpush1.bf16.msra.mxu1 %v8072_v32  ;;  %v4012_v29 = vld [vmem:[#allocation14 + $0x500] sm:$0xff] }
 0x56c   :  { %8011 = vmatprep.subr.bf16.mxu0 %v8010_v34  ;;  %8075 = vmatprep.subr.bf16.mxu1 %v8074_v38  ;;  %v8028_v32 = vpack.c.bf16 %v4020_v30, %v4012_v29  ;;  %v4029_v34 = vld [vmem:[#allocation14 + $0x588] sm:$0xff]  ;;  %v4039_v38 = vld [vmem:[#allocation14 + $0x5d8] sm:$0xff]  ;;  %v8108_v30 = vpack.c.bf16 %v4086_v21, %v4078_v40  ;;  %v3183_v21 = vmul.f32 0.0, %v9685_v50  ;;  %v3840_v50 = vmul.f32 0.0, %v9692_v2 }
 0x56d   :  { %v8030_v42 = vpack.c.bf16 %v4037_v35, %v4029_v34  ;;  %v8094_v45 = vpack.c.bf16 %v4039_v38, %v4031_v36  ;;  %v4102_v34 = vld [vmem:[#allocation14 + $0x7d0] sm:$0xff]  ;;  %v3865_v38 = vld [vmem:[#allocation14 + $0x68] sm:$0xff] }
 0x56f   :  { %8013 = vmatpush1.bf16.msra.mxu0 %v8012_v43  ;;  %8077 = vmatpush1.bf16.msra.mxu1 %v8076_v46  ;;  %v4028_v43 = vld [vmem:[#allocation14 + $0x580] sm:$0xff] }
 0x570   :  { %8015 = vmatprep.subr.bf16.mxu0 %v8014_v52  ;;  %8079 = vmatprep.subr.bf16.mxu1 %v8078_v54  ;;  %v8032_v46 = vpack.c.bf16 %v4036_v44, %v4028_v43  ;;  %v8096_v52 = vpack.c.bf16 %v4038_v48, %v4030_v47  ;;  %v8034_v54 = vpack.c.bf16 %v4053_v55, %v4045_v49  ;;  %v3859_v43 = vld [vmem:[#allocation14 + $0x38] sm:$0xff] }
 0x573   :  { %8017 = vmatpush1.bf16.msra.mxu0 %v8016_v59  ;;  %8081 = vmatpush1.bf16.msra.mxu1 %v8080_v63  ;;  %v8098_v59 = vpack.c.bf16 %v4055_v57, %v4047_v27  ;;  %v4046_v63 = vld [vmem:[#allocation14 + $0x610] sm:$0xff] }
 0x574   :  { %8019 = vmatprep.subr.bf16.mxu0 %v8018_v3  ;;  %8083 = vmatprep.subr.bf16.mxu1 %v8082_v5  ;;  %v4069_v3 = vld [vmem:[#allocation14 + $0x6c8] sm:$0xff]  ;;  %v8100_v23 = vpack.c.bf16 %v4054_v1, %v4046_v63  ;;  %v4071_v5 = vld [vmem:[#allocation14 + $0x6d8] sm:$0xff] }
 0x575   :  { %v8038_v39 = vpack.c.bf16 %v4069_v3, %v4061_v12  ;;  %v8102_v6 = vpack.c.bf16 %v4071_v5, %v4063_v4  ;;  %v3190_v4 = vld [vmem:[#allocation3 + $0x3] ss:$8 sm:$0xf0] }
 0x577   :  { %8021 = vmatpush1.bf16.msra.mxu0 %v8020_v56  ;;  %8085 = vmatpush1.bf16.msra.mxu1 %v8084_v8  ;;  %v4060_v56 = vld [vmem:[#allocation14 + $0x680] sm:$0xff]  ;;  %v4062_v8 = vld [vmem:[#allocation14 + $0x690] sm:$0xff] }
 0x578   :  { %8023 = vmatprep.subr.bf16.mxu0 %v8022_v13  ;;  %8087 = vmatprep.subr.bf16.mxu1 %v8086_v16  ;;  %v4079_v13 = vld [vmem:[#allocation14 + $0x718] sm:$0xff]  ;;  %v8040_v14 = vpack.c.bf16 %v4068_v7, %v4060_v56  ;;  %v8104_v61 = vpack.c.bf16 %v4070_v9, %v4062_v8  ;;  %v8042_v16 = vpack.c.bf16 %v4085_v11, %v4077_v10 }
 0x57b   :  { %8025 = vmatpush1.bf16.msra.mxu0 %v8024_v17  ;;  %8089 = vmatpush1.bf16.msra.mxu1 %v8088_v20  ;;  %v4076_v17 = vld [vmem:[#allocation14 + $0x700] sm:$0xff]  ;;  %v8106_v20 = vpack.c.bf16 %v4087_v15, %v4079_v13 }
 0x57c   :  { %8027 = vmatprep.subr.bf16.mxu0 %v8026_v26  ;;  %8091 = vmatprep.subr.bf16.mxu1 %v8090_v31  ;;  %v4095_v26 = vld [vmem:[#allocation14 + $0x798] sm:$0xff]  ;;  %v8044_v29 = vpack.c.bf16 %v4084_v18, %v4076_v17  ;;  %v8046_v31 = vpack.c.bf16 %v4101_v25, %v4093_v24 }
 0x57d   :  { %v8110_v53 = vpack.c.bf16 %v4103_v28, %v4095_v26  ;;  %v9715_v26 = vadd.f32 %v3183_v21, %v9688_v58  ;;  %v3866_v58 = vld [vmem:[#allocation14 + $0x70] sm:$0xff] }
 0x57f   :  { %8029 = vmatpush1.bf16.msra.mxu0 %v8028_v32  ;;  %8093 = vmatpush1.bf16.msra.mxu1 %v8092_v33  ;;  %v4092_v32 = vld [vmem:[#allocation14 + $0x780] sm:$0xff]  ;;  %v4094_v33 = vld [vmem:[#allocation14 + $0x790] sm:$0xff] }
 0x580   :  { %8031 = vmatprep.subr.bf16.mxu0 %v8030_v42  ;;  %8095 = vmatprep.subr.bf16.mxu1 %v8094_v45  ;;  %v8048_v35 = vpack.c.bf16 %v4100_v19, %v4092_v32  ;;  %v8112_v36 = vpack.c.bf16 %v4102_v34, %v4094_v33  ;;  %v3857_v42 = vld [vmem:[#allocation14 + $0x28] sm:$0xff]  ;;  %v3867_v45 = vld [vmem:[#allocation14 + $0x78] sm:$0xff]  ;;  %v3856_v34 = vld [vmem:[#allocation14 + $0x20] sm:$0xff] }
 0x581   :  { %v8114_v44 = vpack.c.bf16 %v3865_v38, %v3857_v42  ;;  %v3873_v38 = vld [vmem:[#allocation14 + $0xa8] sm:$0xff] }
 0x583   :  { %8033 = vmatpush1.bf16.msra.mxu0 %v8032_v46  ;;  %8097 = vmatpush1.bf16.msra.mxu1 %v8096_v52  ;;  %v8178_v46 = vpack.c.bf16 %v3867_v45, %v3859_v43  ;;  %v3881_v43 = vld [vmem:[#allocation14 + $0xe8] sm:$0xff]  ;;  %v3883_v45 = vld [vmem:[#allocation14 + $0xf8] sm:$0xff] }
 0x584   :  { %8035 = vmatprep.subr.bf16.mxu0 %v8034_v54  ;;  %8099 = vmatprep.subr.bf16.mxu1 %v8098_v59 }
 0x587   :  { %8037 = vmatpush1.bf16.msra.mxu0 %v8036_v0  ;;  %8101 = vmatpush1.bf16.msra.mxu1 %v8100_v23 }
 0x588   :  { %8039 = vmatprep.subr.bf16.mxu0 %v8038_v39  ;;  %8103 = vmatprep.subr.bf16.mxu1 %v8102_v6  ;;  %v3189_v6 = vld [vmem:[#allocation3 + $0x3] ss:$8 sm:$0xf] }
 0x589   :  { %v3191_v7 = vor.u32 %v3190_v4, %v3189_v6  ;;  %v3890_v4 = vld [vmem:[#allocation14 + $0x130] sm:$0xff]  ;;  %v3913_v6 = vld [vmem:[#allocation14 + $0x1e8] sm:$0xff] }
 0x58b   :  { %8041 = vmatpush1.bf16.msra.mxu0 %v8040_v14  ;;  %8105 = vmatpush1.bf16.msra.mxu1 %v8104_v61 }
 0x58c   :  { %8043 = vmatprep.subr.bf16.mxu0 %v8042_v16  ;;  %8107 = vmatprep.subr.bf16.mxu1 %v8106_v20 }
 0x58f   :  { %8045 = vmatpush1.bf16.msra.mxu0 %v8044_v29  ;;  %8109 = vmatpush1.bf16.msra.mxu1 %v8108_v30 }
 0x590   :  { %8047 = vmatprep.subr.bf16.mxu0 %v8046_v31  ;;  %8111 = vmatprep.subr.bf16.mxu1 %v8110_v53 }
 0x593   :  { %8049 = vmatpush1.bf16.msra.mxu0 %v8048_v35  ;;  %8113 = vmatpush1.bf16.msra.mxu1 %v8112_v36  ;;  %v3864_v35 = vld [vmem:[#allocation14 + $0x60] sm:$0xff]  ;;  %v3858_v36 = vld [vmem:[#allocation14 + $0x30] sm:$0xff] }
 0x594   :  { %8115 = vmatprep.subr.bf16.mxu0 %v8114_v44  ;;  %8179 = vmatprep.subr.bf16.mxu1 %v8178_v46  ;;  %v3875_v44 = vld [vmem:[#allocation14 + $0xb8] sm:$0xff] }
 0x5e9   :  { %v3525_v47 = vpop.f32.mrb[20].mxu0  ;;  %v3596_v48 = vpop.f32.mrb[20].mxu1 }
 0x5ea   :  { %v3527_v49 = vpop.f32.mrb[21].mxu0  ;;  %v3598_v52 = vpop.f32.mrb[21].mxu1 }
 0x5eb   :  { %v3751_v55 = vcombine.low %v3525_v47, %v3527_v49  ;;  %v3752_v27 = vcombine.low %v3596_v48, %v3598_v52  ;;  %v8116_v47 = vpack.c.bf16 %v3864_v35, %v3856_v34  ;;  %v8180_v48 = vpack.c.bf16 %v3866_v58, %v3858_v36  ;;  %v3872_v49 = vld [vmem:[#allocation14 + $0xa0] sm:$0xff]  ;;  %v3947_v34 = vld [vmem:[#allocation14 + $0x2f8] sm:$0xff] }
 0x5ec   :  { %v3880_v52 = vld [vmem:[#allocation14 + $0xe0] sm:$0xff] }
 0x5ed   :  { %v3761_v57 = vrot.slane %v3751_v55, %v9622_v60  ;;  %v3768_v54 = vrot.slane %v3752_v27, %v9622_v60  ;;  %v3874_v55 = vld [vmem:[#allocation14 + $0xb0] sm:$0xff]  ;;  %v3936_v58 = vld [vmem:[#allocation14 + $0x2a0] sm:$0xff] }
 0x5ee   :  { %v3882_v27 = vld [vmem:[#allocation14 + $0xf0] sm:$0xff] }
 0x5ef   :  { %v3783_v59 = vcombine.low %v3761_v57, %v3768_v54  ;;  %v3889_v57 = vld [vmem:[#allocation14 + $0x128] sm:$0xff]  ;;  %v8118_v54 = vpack.c.bf16 %v3881_v43, %v3873_v38  ;;  %v3944_v38 = vld [vmem:[#allocation14 + $0x2e0] sm:$0xff] }
 0x5f1   :  { %v3791_v5 = vrot.slane %v3783_v59, %v9622_v60  ;;  %v8182_v59 = vpack.c.bf16 %v3883_v45, %v3875_v44  ;;  %v3938_v45 = vld [vmem:[#allocation14 + $0x2b0] sm:$0xff] }
 0x629   :  { %v3667_v62 = vpop.f32.mrb[22].mxu0  ;;  %v3738_v22 = vpop.f32.mrb[22].mxu1 }
 0x62a   :  { %v3669_v63 = vpop.f32.mrb[23].mxu0  ;;  %v3740_v0 = vpop.f32.mrb[23].mxu1 }
 0x62b   :  { %v3753_v1 = vcombine.low %v3667_v62, %v3669_v63  ;;  %v3754_v12 = vcombine.low %v3738_v22, %v3740_v0  ;;  %v3897_v62 = vld [vmem:[#allocation14 + $0x168] sm:$0xff]  ;;  %v3891_v22 = vld [vmem:[#allocation14 + $0x138] sm:$0xff]  ;;  %v8120_v0 = vpack.c.bf16 %v3880_v52, %v3872_v49 }
 0x62c   :  { %v3899_v63 = vld [vmem:[#allocation14 + $0x178] sm:$0xff] }
 0x62d   :  { %v3775_v3 = vrot.slane %v3753_v1, %v9622_v60  ;;  %v3782_v23 = vrot.slane %v3754_v12, %v9622_v60  ;;  %v8184_v1 = vpack.c.bf16 %v3882_v27, %v3874_v55  ;;  %v3888_v12 = vld [vmem:[#allocation14 + $0x120] sm:$0xff]  ;;  %v3955_v49 = vld [vmem:[#allocation14 + $0x338] sm:$0xff]  ;;  %v8136_v55 = vpack.c.bf16 %v3944_v38, %v3936_v58 }
 0x62e   :  { %v3963_v52 = vld [vmem:[#allocation14 + $0x378] sm:$0xff] }
 0x62f   :  { %v3784_v39 = vcombine.low %v3775_v3, %v3782_v23  ;;  %v3896_v3 = vld [vmem:[#allocation14 + $0x160] sm:$0xff]  ;;  %v8122_v23 = vpack.c.bf16 %v3897_v62, %v3889_v57  ;;  %v8202_v62 = vpack.c.bf16 %v3963_v52, %v3955_v49  ;;  %v4019_v58 = vld [vmem:[#allocation14 + $0x538] sm:$0xff]  ;;  %v4018_v49 = vld [vmem:[#allocation14 + $0x530] sm:$0xff] }
 0x630   :  { %v3952_v57 = vld [vmem:[#allocation14 + $0x320] sm:$0xff]  ;;  %v4027_v38 = vld [vmem:[#allocation14 + $0x578] sm:$0xff]  ;;  %v4026_v52 = vld [vmem:[#allocation14 + $0x570] sm:$0xff] }
 0x631   :  { %v3798_v56 = vrot.slane %v3784_v39, %v9622_v60  ;;  %v8186_v39 = vpack.c.bf16 %v3899_v63, %v3891_v22  ;;  %v3954_v22 = vld [vmem:[#allocation14 + $0x330] sm:$0xff] }
 0x632   :  { %v3962_v63 = vld [vmem:[#allocation14 + $0x370] sm:$0xff] }
 0x633   :  { %v3799_v8 = vcombine.low %v3791_v5, %v3798_v56  ;;  %v3898_v5 = vld [vmem:[#allocation14 + $0x170] sm:$0xff]  ;;  %v3905_v56 = vld [vmem:[#allocation14 + $0x1a8] sm:$0xff] }
 0x635   :  { %v3801_v9 = vadd.f32 %v3799_v8, %v3191_v7  ;;  %v3907_v7 = vld [vmem:[#allocation14 + $0x1b8] sm:$0xff] }
 0x636   :  { %v3915_v8 = vld [vmem:[#allocation14 + $0x1f8] sm:$0xff] }
 0x637   :  { %v6900_v10 = vmul.f32 -1.442695, %v3801_v9  ;;  %v3809_v11 = vrot.slane %v3801_v9, 2  ;;  %v3820_v14 = vrot.slane %v3801_v9, 6  ;;  %v3817_v16 = vrot.slane %v3801_v9, 4 }
 0x638   :  { %v8124_v9 = vpack.c.bf16 %v3896_v3, %v3888_v12  ;;  %v3971_v12 = vld [vmem:[#allocation14 + $0x3b8] sm:$0xff] }
 0x639   :  { %9090 = vpow2.f32 %v6900_v10  ;;  %v6901_v13 = vmul.f32 -1.442695, %v3809_v11  ;;  %v6902_v15 = vmul.f32 -1.442695, %v3820_v14  ;;  %v8188_v10 = vpack.c.bf16 %v3898_v5, %v3890_v4  ;;  %v3904_v11 = vld [vmem:[#allocation14 + $0x1a0] sm:$0xff]  ;;  %v3979_v3 = vld [vmem:[#allocation14 + $0x3f8] sm:$0xff] }
 0x63a   :  { %v8126_v14 = vpack.c.bf16 %v3913_v6, %v3905_v56  ;;  %v3968_v4 = vld [vmem:[#allocation14 + $0x3a0] sm:$0xff]  ;;  %v8206_v6 = vpack.c.bf16 %v3979_v3, %v3971_v12  ;;  %v4034_v12 = vld [vmem:[#allocation14 + $0x5b0] sm:$0xff] }
 0x63b   :  { %9092 = vpow2.f32 %v6901_v13  ;;  %v3912_v13 = vld [vmem:[#allocation14 + $0x1e0] sm:$0xff]  ;;  %v4042_v3 = vld [vmem:[#allocation14 + $0x5f0] sm:$0xff] }
 0x63c   :  { %9094 = vpow2.f32 %v6902_v15  ;;  %v8190_v15 = vpack.c.bf16 %v3915_v8, %v3907_v7  ;;  %v8128_v21 = vpack.c.bf16 %v3912_v13, %v3904_v11  ;;  %v3976_v5 = vld [vmem:[#allocation14 + $0x3e0] sm:$0xff]  ;;  %v3970_v7 = vld [vmem:[#allocation14 + $0x3b0] sm:$0xff]  ;;  %v3987_v11 = vld [vmem:[#allocation14 + $0x438] sm:$0xff] }
 0x63d   :  { %v3978_v8 = vld [vmem:[#allocation14 + $0x3f0] sm:$0xff]  ;;  %v3995_v13 = vld [vmem:[#allocation14 + $0x478] sm:$0xff] }
 0x643   :  { %v9091_v61 = vpop.eup %9090 }
 0x644   :  { %v3805_v17 = vadd.f32 1.0, %v9091_v61  ;;  %v3906_v61 = vld [vmem:[#allocation14 + $0x1b0] sm:$0xff] }
 0x645   :  { %v9093_v18 = vpop.eup %9092 }
 0x646   :  { %9096 = vrcp.f32 %v3805_v17  ;;  %v3814_v40 = vadd.f32 1.0, %v9093_v18  ;;  %v9095_v20 = vpop.eup %9094  ;;  %v3921_v17 = vld [vmem:[#allocation14 + $0x228] sm:$0xff] }
 0x647   :  { %9098 = vtanh.f32 %v3817_v16  ;;  %v3825_v29 = vadd.f32 1.0, %v9095_v20  ;;  %v3914_v16 = vld [vmem:[#allocation14 + $0x1f0] sm:$0xff]  ;;  %v3929_v18 = vld [vmem:[#allocation14 + $0x268] sm:$0xff]  ;;  %v3931_v20 = vld [vmem:[#allocation14 + $0x278] sm:$0xff] }
 0x648   :  { %9100 = vrcp.f32 %v3814_v40  ;;  %v3923_v40 = vld [vmem:[#allocation14 + $0x238] sm:$0xff] }
 0x649   :  { %9102 = vrcp.f32 %v3825_v29  ;;  %v8130_v29 = vpack.c.bf16 %v3929_v18, %v3921_v17  ;;  %v8210_v18 = vpack.c.bf16 %v3995_v13, %v3987_v11  ;;  %v4050_v11 = vld [vmem:[#allocation14 + $0x630] sm:$0xff] }
 0x64a   :  { %v4058_v13 = vld [vmem:[#allocation14 + $0x670] sm:$0xff] }
 0x650   :  { %v9097_v24 = vpop.eup %9096 }
 0x651   :  { %v9099_v25 = vpop.eup %9098 }
 0x652   :  { %v9101_v28 = vpop.eup %9100  ;;  %v3829_v30 = vmul.f32 %v9099_v25, %v9097_v24  ;;  %v8192_v24 = vpack.c.bf16 %v3914_v16, %v3906_v61  ;;  %v3920_v25 = vld [vmem:[#allocation14 + $0x220] sm:$0xff] }
 0x653   :  { %v3828_v31 = vmul.f32 %v9101_v28, %v9715_v26  ;;  %v9103_v19 = vpop.eup %9102  ;;  %v3928_v28 = vld [vmem:[#allocation14 + $0x260] sm:$0xff] }
 0x654   :  { %v8132_v35 = vpack.c.bf16 %v3928_v28, %v3920_v25  ;;  %v3984_v61 = vld [vmem:[#allocation14 + $0x420] sm:$0xff]  ;;  %v4003_v25 = vld [vmem:[#allocation14 + $0x4b8] sm:$0xff] }
 0x655   :  { %v9718_v32 = vadd.f32 %v3829_v30, %v3828_v31  ;;  %v8194_v30 = vpack.c.bf16 %v3931_v20, %v3923_v40  ;;  %v3922_v31 = vld [vmem:[#allocation14 + $0x230] sm:$0xff]  ;;  %v3992_v16 = vld [vmem:[#allocation14 + $0x460] sm:$0xff]  ;;  %v4011_v28 = vld [vmem:[#allocation14 + $0x4f8] sm:$0xff] }
 0x656   :  { %v3986_v40 = vld [vmem:[#allocation14 + $0x430] sm:$0xff] }
 0x657   :  { %9104 = vtanh.f32 %v9718_v32  ;;  %v3994_v20 = vld [vmem:[#allocation14 + $0x470] sm:$0xff] }
 0x661   :  { %v9105_v53 = vpop.eup %9104 }
 0x662   :  { %v3832_v33 = vmul.f32 %v9105_v53, %v9103_v19  ;;  %v3930_v19 = vld [vmem:[#allocation14 + $0x270] sm:$0xff]  ;;  %v3937_v53 = vld [vmem:[#allocation14 + $0x2a8] sm:$0xff] }
 0x663   :  { %v8196_v36 = vpack.c.bf16 %v3930_v19, %v3922_v31  ;;  %v4000_v31 = vld [vmem:[#allocation14 + $0x4a0] sm:$0xff] }
 0x664   :  { %v9722_v42 = vadd.f32 %v3840_v50, %v3832_v33  ;;  %v3945_v33 = vld [vmem:[#allocation14 + $0x2e8] sm:$0xff]  ;;  %v3939_v50 = vld [vmem:[#allocation14 + $0x2b8] sm:$0xff]  ;;  %v4008_v19 = vld [vmem:[#allocation14 + $0x4e0] sm:$0xff] }
 0x665   :  { %v8134_v43 = vpack.c.bf16 %v3945_v33, %v3937_v53  ;;  %v8198_v44 = vpack.c.bf16 %v3947_v34, %v3939_v50  ;;  %v8214_v33 = vpack.c.bf16 %v4011_v28, %v4003_v25  ;;  %v4002_v50 = vld [vmem:[#allocation14 + $0x4b0] sm:$0xff] }
 0x666   :  { %3846 = vst.msk [vmem:[#allocation4 + $0x3] ss:$8 sm:$0x3] %vm9531_vm0, %v9722_v42  ;;  %v4116_v46 = vrot.slane %v9722_v42, %v9580_v37  ;;  %v9731_v2 = vrot.slane %v9722_v42, %v9593_v41  ;;  %v4010_v34 = vld [vmem:[#allocation14 + $0x4f0] sm:$0xff] }
 0x667   :  { %v4066_v25 = vld [vmem:[#allocation14 + $0x6b0] sm:$0xff] }
 0x668   :  { %4183 = vmatprep.mubr.f32.mxu0 %v4116_v46  ;;  %4254 = vmatprep.mubr.f32.mxu1 %v4116_v46  ;;  %v4074_v28 = vld [vmem:[#allocation14 + $0x6f0] sm:$0xff] }
 0x669   :  { %4184 = vmatmul.mubr.f32.vlgmr.msra.gmra.mrb[24].mxu0 %v9731_v2  ;;  %4255 = vmatmul.mubr.f32.vlgmr.msra.gmra.mrb[24].mxu1 %v9731_v2 }
 0x66a   :  { %8117 = vmatpush1.bf16.msra.mxu0 %v8116_v47  ;;  %8181 = vmatpush1.bf16.msra.mxu1 %v8180_v48  ;;  %v3953_v47 = vld [vmem:[#allocation14 + $0x328] sm:$0xff] }
 0x66b   :  { %4325 = vmatprep.mubr.f32.mxu0 %v4116_v46  ;;  %4396 = vmatprep.mubr.f32.mxu1 %v4116_v46  ;;  %v3946_v46 = vld [vmem:[#allocation14 + $0x2f0] sm:$0xff]  ;;  %v3961_v48 = vld [vmem:[#allocation14 + $0x368] sm:$0xff] }
 0x66c   :  { %8119 = vmatprep.subr.bf16.mxu0 %v8118_v54  ;;  %8183 = vmatprep.subr.bf16.mxu1 %v8182_v59  ;;  %v8200_v27 = vpack.c.bf16 %v3946_v46, %v3938_v45  ;;  %v3960_v54 = vld [vmem:[#allocation14 + $0x360] sm:$0xff]  ;;  %v8138_v59 = vpack.c.bf16 %v3961_v48, %v3953_v47  ;;  %v8218_v48 = vpack.c.bf16 %v4027_v38, %v4019_v58  ;;  %v4082_v58 = vld [vmem:[#allocation14 + $0x730] sm:$0xff] }
 0x66d   :  { %v4016_v45 = vld [vmem:[#allocation14 + $0x520] sm:$0xff]  ;;  %v4090_v38 = vld [vmem:[#allocation14 + $0x770] sm:$0xff] }
 0x66e   :  { %8121 = vmatpush1.bf16.msra.mxu0 %v8120_v0  ;;  %8185 = vmatpush1.bf16.msra.mxu1 %v8184_v1  ;;  %v3969_v0 = vld [vmem:[#allocation14 + $0x3a8] sm:$0xff]  ;;  %v4024_v46 = vld [vmem:[#allocation14 + $0x560] sm:$0xff] }
 0x66f   :  { %8123 = vmatprep.subr.bf16.mxu0 %v8122_v23  ;;  %8187 = vmatprep.subr.bf16.mxu1 %v8186_v39  ;;  %v3977_v1 = vld [vmem:[#allocation14 + $0x3e8] sm:$0xff]  ;;  %v8140_v23 = vpack.c.bf16 %v3960_v54, %v3952_v57  ;;  %v8204_v39 = vpack.c.bf16 %v3962_v63, %v3954_v22  ;;  %v4035_v57 = vld [vmem:[#allocation14 + $0x5b8] sm:$0xff]  ;;  %v4032_v22 = vld [vmem:[#allocation14 + $0x5a0] sm:$0xff] }
 0x670   :  { %v8142_v56 = vpack.c.bf16 %v3977_v1, %v3969_v0  ;;  %v4043_v54 = vld [vmem:[#allocation14 + $0x5f8] sm:$0xff]  ;;  %v4040_v63 = vld [vmem:[#allocation14 + $0x5e0] sm:$0xff] }
 0x671   :  { %v8222_v1 = vpack.c.bf16 %v4043_v54, %v4035_v57  ;;  %v4098_v57 = vld [vmem:[#allocation14 + $0x7b0] sm:$0xff] }
 0x672   :  { %8125 = vmatpush1.bf16.msra.mxu0 %v8124_v9  ;;  %8189 = vmatpush1.bf16.msra.mxu1 %v8188_v10  ;;  %v3985_v9 = vld [vmem:[#allocation14 + $0x428] sm:$0xff]  ;;  %v4106_v54 = vld [vmem:[#allocation14 + $0x7f0] sm:$0xff] }
 0x673   :  { %8127 = vmatprep.subr.bf16.mxu0 %v8126_v14  ;;  %8191 = vmatprep.subr.bf16.mxu1 %v8190_v15  ;;  %v3993_v10 = vld [vmem:[#allocation14 + $0x468] sm:$0xff]  ;;  %v8144_v14 = vpack.c.bf16 %v3976_v5, %v3968_v4  ;;  %v8208_v15 = vpack.c.bf16 %v3978_v8, %v3970_v7  ;;  %v4051_v4 = vld [vmem:[#allocation14 + $0x638] sm:$0xff]  ;;  %v4048_v7 = vld [vmem:[#allocation14 + $0x620] sm:$0xff] }
 0x674   :  { %v8146_v17 = vpack.c.bf16 %v3993_v10, %v3985_v9  ;;  %v4059_v5 = vld [vmem:[#allocation14 + $0x678] sm:$0xff]  ;;  %v4056_v8 = vld [vmem:[#allocation14 + $0x660] sm:$0xff] }
 0x675   :  { %v8226_v10 = vpack.c.bf16 %v4059_v5, %v4051_v4  ;;  %v4514_v4 = vld [vmem:[#allocation14 + $0x10] sm:$0xff] }
 0x676   :  { %8129 = vmatpush1.bf16.msra.mxu0 %v8128_v21  ;;  %8193 = vmatpush1.bf16.msra.mxu1 %v8192_v24  ;;  %v4001_v21 = vld [vmem:[#allocation14 + $0x4a8] sm:$0xff] }
 0x677   :  { %8131 = vmatprep.subr.bf16.mxu0 %v8130_v29  ;;  %8195 = vmatprep.subr.bf16.mxu1 %v8194_v30  ;;  %v4009_v24 = vld [vmem:[#allocation14 + $0x4e8] sm:$0xff]  ;;  %v8148_v29 = vpack.c.bf16 %v3992_v16, %v3984_v61  ;;  %v8212_v30 = vpack.c.bf16 %v3994_v20, %v3986_v40  ;;  %v4067_v61 = vld [vmem:[#allocation14 + $0x6b8] sm:$0xff]  ;;  %v4064_v40 = vld [vmem:[#allocation14 + $0x6a0] sm:$0xff] }
 0x678   :  { %v8150_v53 = vpack.c.bf16 %v4009_v24, %v4001_v21  ;;  %v4075_v16 = vld [vmem:[#allocation14 + $0x6f8] sm:$0xff]  ;;  %v4072_v20 = vld [vmem:[#allocation14 + $0x6e0] sm:$0xff] }
 0x679   :  { %v8230_v24 = vpack.c.bf16 %v4075_v16, %v4067_v61  ;;  %v4530_v61 = vld [vmem:[#allocation14 + $0x90] sm:$0xff] }
 0x67a   :  { %8133 = vmatpush1.bf16.msra.mxu0 %v8132_v35  ;;  %8197 = vmatpush1.bf16.msra.mxu1 %v8196_v36  ;;  %v4017_v35 = vld [vmem:[#allocation14 + $0x528] sm:$0xff]  ;;  %v4538_v16 = vld [vmem:[#allocation14 + $0xd0] sm:$0xff] }
 0x67b   :  { %8135 = vmatprep.subr.bf16.mxu0 %v8134_v43  ;;  %8199 = vmatprep.subr.bf16.mxu1 %v8198_v44  ;;  %v4025_v36 = vld [vmem:[#allocation14 + $0x568] sm:$0xff]  ;;  %v8152_v43 = vpack.c.bf16 %v4008_v19, %v4000_v31  ;;  %v8216_v44 = vpack.c.bf16 %v4010_v34, %v4002_v50  ;;  %v4083_v31 = vld [vmem:[#allocation14 + $0x738] sm:$0xff]  ;;  %v4080_v50 = vld [vmem:[#allocation14 + $0x720] sm:$0xff] }
 0x67c   :  { %v8154_v47 = vpack.c.bf16 %v4025_v36, %v4017_v35  ;;  %v4091_v19 = vld [vmem:[#allocation14 + $0x778] sm:$0xff]  ;;  %v4088_v34 = vld [vmem:[#allocation14 + $0x760] sm:$0xff] }
 0x67d   :  { %v8234_v36 = vpack.c.bf16 %v4091_v19, %v4083_v31  ;;  %v4546_v31 = vld [vmem:[#allocation14 + $0x110] sm:$0xff] }
 0x67e   :  { %8137 = vmatpush1.bf16.msra.mxu0 %v8136_v55  ;;  %8201 = vmatpush1.bf16.msra.mxu1 %v8200_v27  ;;  %v4033_v55 = vld [vmem:[#allocation14 + $0x5a8] sm:$0xff]  ;;  %v4554_v19 = vld [vmem:[#allocation14 + $0x150] sm:$0xff] }
 0x67f   :  { %8139 = vmatprep.subr.bf16.mxu0 %v8138_v59  ;;  %8203 = vmatprep.subr.bf16.mxu1 %v8202_v62  ;;  %v4041_v27 = vld [vmem:[#allocation14 + $0x5e8] sm:$0xff]  ;;  %v8156_v59 = vpack.c.bf16 %v4024_v46, %v4016_v45  ;;  %v8220_v62 = vpack.c.bf16 %v4026_v52, %v4018_v49  ;;  %v4099_v45 = vld [vmem:[#allocation14 + $0x7b8] sm:$0xff]  ;;  %v4096_v49 = vld [vmem:[#allocation14 + $0x7a0] sm:$0xff] }
 0x680   :  { %v8158_v0 = vpack.c.bf16 %v4041_v27, %v4033_v55  ;;  %v4107_v46 = vld [vmem:[#allocation14 + $0x7f8] sm:$0xff]  ;;  %v4104_v27 = vld [vmem:[#allocation14 + $0x7e0] sm:$0xff] }
 0x681   :  { %v8238_v55 = vpack.c.bf16 %v4107_v46, %v4099_v45  ;;  %v4562_v45 = vld [vmem:[#allocation14 + $0x190] sm:$0xff] }
 0x682   :  { %8141 = vmatpush1.bf16.msra.mxu0 %v8140_v23  ;;  %8205 = vmatpush1.bf16.msra.mxu1 %v8204_v39  ;;  %v4049_v23 = vld [vmem:[#allocation14 + $0x628] sm:$0xff]  ;;  %v4570_v46 = vld [vmem:[#allocation14 + $0x1d0] sm:$0xff] }
 0x683   :  { %8143 = vmatprep.subr.bf16.mxu0 %v8142_v56  ;;  %8207 = vmatprep.subr.bf16.mxu1 %v8206_v6  ;;  %v4057_v39 = vld [vmem:[#allocation14 + $0x668] sm:$0xff]  ;;  %v8160_v56 = vpack.c.bf16 %v4040_v63, %v4032_v22  ;;  %v8224_v6 = vpack.c.bf16 %v4042_v3, %v4034_v12  ;;  %v4523_v12 = vld [vmem:[#allocation14 + $0x58] sm:$0xff] }
 0x684   :  { %v8162_v9 = vpack.c.bf16 %v4057_v39, %v4049_v23  ;;  %v4513_v22 = vld [vmem:[#allocation14 + $0x8] sm:$0xff]  ;;  %v4512_v23 = vld [vmem:[#allocation14] sm:$0xff] }
 0x685   :  { %v4521_v63 = vld [vmem:[#allocation14 + $0x48] sm:$0xff]  ;;  %v4520_v39 = vld [vmem:[#allocation14 + $0x40] sm:$0xff] }
 0x686   :  { %8145 = vmatpush1.bf16.msra.mxu0 %v8144_v14  ;;  %8209 = vmatpush1.bf16.msra.mxu1 %v8208_v15  ;;  %v4065_v14 = vld [vmem:[#allocation14 + $0x6a8] sm:$0xff]  ;;  %v8244_v5 = vpack.c.bf16 %v4520_v39, %v4512_v23  ;;  %v4603_v39 = vld [vmem:[#allocation14 + $0x2d8] sm:$0xff] }
 0x687   :  { %8147 = vmatprep.subr.bf16.mxu0 %v8146_v17  ;;  %8211 = vmatprep.subr.bf16.mxu1 %v8210_v18  ;;  %v4073_v15 = vld [vmem:[#allocation14 + $0x6e8] sm:$0xff]  ;;  %v8164_v17 = vpack.c.bf16 %v4056_v8, %v4048_v7  ;;  %v8228_v18 = vpack.c.bf16 %v4058_v13, %v4050_v11  ;;  %v4528_v11 = vld [vmem:[#allocation14 + $0x80] sm:$0xff] }
 0x688   :  { %v8166_v21 = vpack.c.bf16 %v4073_v15, %v4065_v14  ;;  %v4529_v7 = vld [vmem:[#allocation14 + $0x88] sm:$0xff]  ;;  %v4536_v13 = vld [vmem:[#allocation14 + $0xc0] sm:$0xff] }
 0x689   :  { %v4537_v8 = vld [vmem:[#allocation14 + $0xc8] sm:$0xff]  ;;  %v8248_v15 = vpack.c.bf16 %v4536_v13, %v4528_v11  ;;  %v4611_v11 = vld [vmem:[#allocation14 + $0x318] sm:$0xff] }
 0x68a   :  { %8149 = vmatpush1.bf16.msra.mxu0 %v8148_v29  ;;  %8213 = vmatpush1.bf16.msra.mxu1 %v8212_v30  ;;  %v4081_v29 = vld [vmem:[#allocation14 + $0x728] sm:$0xff] }
 0x68b   :  { %8151 = vmatprep.subr.bf16.mxu0 %v8150_v53  ;;  %8215 = vmatprep.subr.bf16.mxu1 %v8214_v33  ;;  %v4089_v30 = vld [vmem:[#allocation14 + $0x768] sm:$0xff]  ;;  %v8168_v53 = vpack.c.bf16 %v4072_v20, %v4064_v40  ;;  %v8232_v33 = vpack.c.bf16 %v4074_v28, %v4066_v25  ;;  %v4547_v20 = vld [vmem:[#allocation14 + $0x118] sm:$0xff]  ;;  %v4544_v25 = vld [vmem:[#allocation14 + $0x100] sm:$0xff] }
 0x68c   :  { %v8170_v35 = vpack.c.bf16 %v4089_v30, %v4081_v29  ;;  %v4553_v40 = vld [vmem:[#allocation14 + $0x148] sm:$0xff]  ;;  %v4552_v28 = vld [vmem:[#allocation14 + $0x140] sm:$0xff] }
 0x68d   :  { %v8252_v30 = vpack.c.bf16 %v4552_v28, %v4544_v25  ;;  %v4627_v25 = vld [vmem:[#allocation14 + $0x398] sm:$0xff] }
 0x68e   :  { %8153 = vmatpush1.bf16.msra.mxu0 %v8152_v43  ;;  %8217 = vmatpush1.bf16.msra.mxu1 %v8216_v44  ;;  %v4097_v43 = vld [vmem:[#allocation14 + $0x7a8] sm:$0xff] }
 0x68f   :  { %8155 = vmatprep.subr.bf16.mxu0 %v8154_v47  ;;  %8219 = vmatprep.subr.bf16.mxu1 %v8218_v48  ;;  %v4105_v44 = vld [vmem:[#allocation14 + $0x7e8] sm:$0xff]  ;;  %v8172_v47 = vpack.c.bf16 %v4088_v34, %v4080_v50  ;;  %v8236_v48 = vpack.c.bf16 %v4090_v38, %v4082_v58  ;;  %v4563_v34 = vld [vmem:[#allocation14 + $0x198] sm:$0xff]  ;;  %v4560_v58 = vld [vmem:[#allocation14 + $0x180] sm:$0xff] }
 0x690   :  { %v8174_v52 = vpack.c.bf16 %v4105_v44, %v4097_v43  ;;  %v4569_v50 = vld [vmem:[#allocation14 + $0x1c8] sm:$0xff]  ;;  %v4568_v38 = vld [vmem:[#allocation14 + $0x1c0] sm:$0xff] }
 0x691   :  { %v8256_v44 = vpack.c.bf16 %v4568_v38, %v4560_v58  ;;  %v4643_v58 = vld [vmem:[#allocation14 + $0x418] sm:$0xff] }
 0x692   :  { %8157 = vmatpush1.bf16.msra.mxu0 %v8156_v59  ;;  %8221 = vmatpush1.bf16.msra.mxu1 %v8220_v62  ;;  %v8176_v59 = vpack.c.bf16 %v4104_v27, %v4096_v49  ;;  %v8240_v62 = vpack.c.bf16 %v4106_v54, %v4098_v57  ;;  %v4585_v49 = vld [vmem:[#allocation14 + $0x248] sm:$0xff]  ;;  %v4587_v27 = vld [vmem:[#allocation14 + $0x258] sm:$0xff]  ;;  %v4576_v57 = vld [vmem:[#allocation14 + $0x200] sm:$0xff] }
 0x693   :  { %8159 = vmatprep.subr.bf16.mxu0 %v8158_v0  ;;  %8223 = vmatprep.subr.bf16.mxu1 %v8222_v1  ;;  %v4515_v0 = vld [vmem:[#allocation14 + $0x18] sm:$0xff]  ;;  %v8242_v1 = vpack.c.bf16 %v4521_v63, %v4513_v22  ;;  %v4584_v54 = vld [vmem:[#allocation14 + $0x240] sm:$0xff]  ;;  %v4578_v22 = vld [vmem:[#allocation14 + $0x210] sm:$0xff] }
 0x694   :  { %v8306_v3 = vpack.c.bf16 %v4523_v12, %v4515_v0  ;;  %v4586_v63 = vld [vmem:[#allocation14 + $0x250] sm:$0xff]  ;;  %v4601_v12 = vld [vmem:[#allocation14 + $0x2c8] sm:$0xff] }
 0x695   :  { %v8324_v0 = vpack.c.bf16 %v4586_v63, %v4578_v22  ;;  %v4664_v22 = vld [vmem:[#allocation14 + $0x4c0] sm:$0xff] }
 0x696   :  { %8161 = vmatpush1.bf16.msra.mxu0 %v8160_v56  ;;  %8225 = vmatpush1.bf16.msra.mxu1 %v8224_v6  ;;  %v4522_v56 = vld [vmem:[#allocation14 + $0x50] sm:$0xff] }
 0x697   :  { %8163 = vmatprep.subr.bf16.mxu0 %v8162_v9  ;;  %8227 = vmatprep.subr.bf16.mxu1 %v8226_v10  ;;  %v8308_v6 = vpack.c.bf16 %v4522_v56, %v4514_v4  ;;  %v4531_v9 = vld [vmem:[#allocation14 + $0x98] sm:$0xff]  ;;  %v4592_v4 = vld [vmem:[#allocation14 + $0x280] sm:$0xff] }
 0x698   :  { %v4539_v10 = vld [vmem:[#allocation14 + $0xd8] sm:$0xff] }
 0x699   :  { %v8310_v14 = vpack.c.bf16 %v4539_v10, %v4531_v9  ;;  %v4617_v10 = vld [vmem:[#allocation14 + $0x348] sm:$0xff] }
 0x69a   :  { %8165 = vmatpush1.bf16.msra.mxu0 %v8164_v17  ;;  %8229 = vmatpush1.bf16.msra.mxu1 %v8228_v18  ;;  %v8312_v17 = vpack.c.bf16 %v4538_v16, %v4530_v61  ;;  %v4545_v18 = vld [vmem:[#allocation14 + $0x108] sm:$0xff]  ;;  %v4616_v61 = vld [vmem:[#allocation14 + $0x340] sm:$0xff] }
 0x69b   :  { %8167 = vmatprep.subr.bf16.mxu0 %v8166_v21  ;;  %8231 = vmatprep.subr.bf16.mxu1 %v8230_v24  ;;  %v8250_v21 = vpack.c.bf16 %v4553_v40, %v4545_v18  ;;  %v4555_v24 = vld [vmem:[#allocation14 + $0x158] sm:$0xff]  ;;  %v4610_v18 = vld [vmem:[#allocation14 + $0x310] sm:$0xff] }
 0x69c   :  { %v8314_v29 = vpack.c.bf16 %v4555_v24, %v4547_v20  ;;  %v4618_v40 = vld [vmem:[#allocation14 + $0x350] sm:$0xff]  ;;  %v4633_v24 = vld [vmem:[#allocation14 + $0x3c8] sm:$0xff] }
 0x69d   :  { %v8332_v20 = vpack.c.bf16 %v4618_v40, %v4610_v18  ;;  %v4696_v18 = vld [vmem:[#allocation14 + $0x5c0] sm:$0xff] }
 0x69e   :  { %8169 = vmatpush1.bf16.msra.mxu0 %v8168_v53  ;;  %8233 = vmatpush1.bf16.msra.mxu1 %v8232_v33  ;;  %v8316_v53 = vpack.c.bf16 %v4554_v19, %v4546_v31  ;;  %v4561_v33 = vld [vmem:[#allocation14 + $0x188] sm:$0xff]  ;;  %v4632_v31 = vld [vmem:[#allocation14 + $0x3c0] sm:$0xff] }
 0x69f   :  { %8171 = vmatprep.subr.bf16.mxu0 %v8170_v35  ;;  %8235 = vmatprep.subr.bf16.mxu1 %v8234_v36  ;;  %v8254_v35 = vpack.c.bf16 %v4569_v50, %v4561_v33  ;;  %v4571_v36 = vld [vmem:[#allocation14 + $0x1d8] sm:$0xff]  ;;  %v4626_v33 = vld [vmem:[#allocation14 + $0x390] sm:$0xff] }
 0x6a0   :  { %v8318_v43 = vpack.c.bf16 %v4571_v36, %v4563_v34  ;;  %v4634_v50 = vld [vmem:[#allocation14 + $0x3d0] sm:$0xff]  ;;  %v4649_v36 = vld [vmem:[#allocation14 + $0x448] sm:$0xff] }
 0x6a1   :  { %v8336_v34 = vpack.c.bf16 %v4634_v50, %v4626_v33  ;;  %v4704_v33 = vld [vmem:[#allocation14 + $0x600] sm:$0xff] }
 0x6a2   :  { %8173 = vmatpush1.bf16.msra.mxu0 %v8172_v47  ;;  %8237 = vmatpush1.bf16.msra.mxu1 %v8236_v48  ;;  %v8320_v47 = vpack.c.bf16 %v4570_v46, %v4562_v45  ;;  %v4577_v48 = vld [vmem:[#allocation14 + $0x208] sm:$0xff]  ;;  %v4648_v45 = vld [vmem:[#allocation14 + $0x440] sm:$0xff] }
 0x6a3   :  { %8175 = vmatprep.subr.bf16.mxu0 %v8174_v52  ;;  %8239 = vmatprep.subr.bf16.mxu1 %v8238_v55  ;;  %v4579_v52 = vld [vmem:[#allocation14 + $0x218] sm:$0xff]  ;;  %v8258_v55 = vpack.c.bf16 %v4585_v49, %v4577_v48  ;;  %v4642_v48 = vld [vmem:[#allocation14 + $0x410] sm:$0xff]  ;;  %v4712_v50 = vld [vmem:[#allocation14 + $0x640] sm:$0xff] }
 0x6a4   :  { %v4650_v49 = vld [vmem:[#allocation14 + $0x450] sm:$0xff] }
 0x6a6   :  { %8177 = vmatpush1.bf16.msra.mxu0 %v8176_v59  ;;  %8241 = vmatpush1.bf16.msra.mxu1 %v8240_v62  ;;  %v8322_v59 = vpack.c.bf16 %v4587_v27, %v4579_v52  ;;  %v8260_v62 = vpack.c.bf16 %v4584_v54, %v4576_v57  ;;  %v8340_v52 = vpack.c.bf16 %v4650_v49, %v4642_v48  ;;  %v4665_v27 = vld [vmem:[#allocation14 + $0x4c8] sm:$0xff]  ;;  %v4659_v57 = vld [vmem:[#allocation14 + $0x498] sm:$0xff]  ;;  %v4728_v49 = vld [vmem:[#allocation14 + $0x6c0] sm:$0xff] }
 0x6a7   :  { %8243 = vmatprep.subr.bf16.mxu0 %v8242_v1  ;;  %8307 = vmatprep.subr.bf16.mxu1 %v8306_v3  ;;  %v4593_v1 = vld [vmem:[#allocation14 + $0x288] sm:$0xff]  ;;  %v4595_v3 = vld [vmem:[#allocation14 + $0x298] sm:$0xff] }
 0x6a8   :  { %v8262_v23 = vpack.c.bf16 %v4601_v12, %v4593_v1  ;;  %v8326_v56 = vpack.c.bf16 %v4603_v39, %v4595_v3  ;;  %v4658_v1 = vld [vmem:[#allocation14 + $0x490] sm:$0xff]  ;;  %v4681_v39 = vld [vmem:[#allocation14 + $0x548] sm:$0xff] }
 0x6a9   :  { %4326 = vmatmul.mubr.f32.vlgmr.msra.gmra.mrb[26].mxu0 %v9731_v2  ;;  %4397 = vmatmul.mubr.f32.vlgmr.msra.gmra.mrb[26].mxu1 %v9731_v2  ;;  %v8246_v2 = vpack.c.bf16 %v4537_v8, %v4529_v7  ;;  %v4594_v7 = vld [vmem:[#allocation14 + $0x290] sm:$0xff] }
 0x6aa   :  { %8245 = vmatpush1.bf16.msra.mxu0 %v8244_v5  ;;  %8309 = vmatpush1.bf16.msra.mxu1 %v8308_v6  ;;  %v4600_v5 = vld [vmem:[#allocation14 + $0x2c0] sm:$0xff]  ;;  %v4602_v8 = vld [vmem:[#allocation14 + $0x2d0] sm:$0xff] }
 0x6ab   :  { %8247 = vmatprep.subr.bf16.mxu0 %v8246_v2  ;;  %8311 = vmatprep.subr.bf16.mxu1 %v8310_v14  ;;  %v8264_v6 = vpack.c.bf16 %v4600_v5, %v4592_v4  ;;  %v8328_v9 = vpack.c.bf16 %v4602_v8, %v4594_v7  ;;  %v4609_v2 = vld [vmem:[#allocation14 + $0x308] sm:$0xff]  ;;  %v4619_v14 = vld [vmem:[#allocation14 + $0x358] sm:$0xff]  ;;  %v4666_v12 = vld [vmem:[#allocation14 + $0x4d0] sm:$0xff] }
 0x6ac   :  { %v8266_v13 = vpack.c.bf16 %v4617_v10, %v4609_v2  ;;  %v8330_v16 = vpack.c.bf16 %v4619_v14, %v4611_v11  ;;  %v8344_v3 = vpack.c.bf16 %v4666_v12, %v4658_v1  ;;  %v4675_v4 = vld [vmem:[#allocation14 + $0x518] sm:$0xff]  ;;  %v4680_v7 = vld [vmem:[#allocation14 + $0x540] sm:$0xff]  ;;  %v4674_v2 = vld [vmem:[#allocation14 + $0x510] sm:$0xff] }
 0x6ad   :  { %v4682_v10 = vld [vmem:[#allocation14 + $0x550] sm:$0xff]  ;;  %v4697_v14 = vld [vmem:[#allocation14 + $0x5c8] sm:$0xff]  ;;  %v4744_v1 = vld [vmem:[#allocation14 + $0x740] sm:$0xff] }
 0x6ae   :  { %8249 = vmatpush1.bf16.msra.mxu0 %v8248_v15  ;;  %8313 = vmatpush1.bf16.msra.mxu1 %v8312_v17  ;;  %v4608_v15 = vld [vmem:[#allocation14 + $0x300] sm:$0xff]  ;;  %v8348_v11 = vpack.c.bf16 %v4682_v10, %v4674_v2  ;;  %v4738_v12 = vld [vmem:[#allocation14 + $0x710] sm:$0xff] }
 0x6af   :  { %8251 = vmatprep.subr.bf16.mxu0 %v8250_v21  ;;  %8315 = vmatprep.subr.bf16.mxu1 %v8314_v29  ;;  %v8268_v17 = vpack.c.bf16 %v4616_v61, %v4608_v15  ;;  %v4625_v21 = vld [vmem:[#allocation14 + $0x388] sm:$0xff]  ;;  %v4635_v29 = vld [vmem:[#allocation14 + $0x3d8] sm:$0xff]  ;;  %v4760_v2 = vld [vmem:[#allocation14 + $0x7c0] sm:$0xff] }
 0x6b0   :  { %v8270_v28 = vpack.c.bf16 %v4633_v24, %v4625_v21  ;;  %v8334_v19 = vpack.c.bf16 %v4635_v29, %v4627_v25  ;;  %v4691_v15 = vld [vmem:[#allocation14 + $0x598] sm:$0xff]  ;;  %v4690_v21 = vld [vmem:[#allocation14 + $0x590] sm:$0xff]  ;;  %v4705_v25 = vld [vmem:[#allocation14 + $0x608] sm:$0xff] }
 0x6b1   :  { %v4698_v24 = vld [vmem:[#allocation14 + $0x5d0] sm:$0xff]  ;;  %v4713_v29 = vld [vmem:[#allocation14 + $0x648] sm:$0xff] }
 0x6b2   :  { %8253 = vmatpush1.bf16.msra.mxu0 %v8252_v30  ;;  %8317 = vmatpush1.bf16.msra.mxu1 %v8316_v53  ;;  %v4624_v30 = vld [vmem:[#allocation14 + $0x380] sm:$0xff] }
 0x6b3   :  { %8255 = vmatprep.subr.bf16.mxu0 %v8254_v35  ;;  %8319 = vmatprep.subr.bf16.mxu1 %v8318_v43  ;;  %v8272_v53 = vpack.c.bf16 %v4632_v31, %v4624_v30  ;;  %v4641_v35 = vld [vmem:[#allocation14 + $0x408] sm:$0xff]  ;;  %v4651_v43 = vld [vmem:[#allocation14 + $0x458] sm:$0xff] }
 0x6b4   :  { %v8274_v38 = vpack.c.bf16 %v4649_v36, %v4641_v35  ;;  %v8338_v46 = vpack.c.bf16 %v4651_v43, %v4643_v58  ;;  %v4707_v30 = vld [vmem:[#allocation14 + $0x618] sm:$0xff]  ;;  %v8292_v35 = vpack.c.bf16 %v4712_v50, %v4704_v33  ;;  %v4714_v36 = vld [vmem:[#allocation14 + $0x650] sm:$0xff]  ;;  %v4721_v58 = vld [vmem:[#allocation14 + $0x688] sm:$0xff] }
 0x6b5   :  { %v4715_v31 = vld [vmem:[#allocation14 + $0x658] sm:$0xff] }
 0x6b6   :  { %8257 = vmatpush1.bf16.msra.mxu0 %v8256_v44  ;;  %8321 = vmatpush1.bf16.msra.mxu1 %v8320_v47  ;;  %v4640_v44 = vld [vmem:[#allocation14 + $0x400] sm:$0xff] }
 0x6b7   :  { %8259 = vmatprep.subr.bf16.mxu0 %v8258_v55  ;;  %8323 = vmatprep.subr.bf16.mxu1 %v8322_v59  ;;  %v8276_v47 = vpack.c.bf16 %v4648_v45, %v4640_v44  ;;  %v4657_v55 = vld [vmem:[#allocation14 + $0x488] sm:$0xff]  ;;  %v4667_v59 = vld [vmem:[#allocation14 + $0x4d8] sm:$0xff] }
 0x6b8   :  { %v8278_v54 = vpack.c.bf16 %v4665_v27, %v4657_v55  ;;  %v8342_v63 = vpack.c.bf16 %v4667_v59, %v4659_v57  ;;  %v4723_v45 = vld [vmem:[#allocation14 + $0x698] sm:$0xff]  ;;  %v4730_v55 = vld [vmem:[#allocation14 + $0x6d0] sm:$0xff]  ;;  %v4737_v27 = vld [vmem:[#allocation14 + $0x708] sm:$0xff] }
 0x6b9   :  { %v4745_v57 = vld [vmem:[#allocation14 + $0x748] sm:$0xff] }
 0x6ba   :  { %8261 = vmatpush1.bf16.msra.mxu0 %v8260_v62  ;;  %8325 = vmatpush1.bf16.msra.mxu1 %v8324_v0  ;;  %v4656_v62 = vld [vmem:[#allocation14 + $0x480] sm:$0xff] }
 0x6bb   :  { %8263 = vmatprep.subr.bf16.mxu0 %v8262_v23  ;;  %8327 = vmatprep.subr.bf16.mxu1 %v8326_v56  ;;  %v8280_v0 = vpack.c.bf16 %v4664_v22, %v4656_v62  ;;  %v4673_v23 = vld [vmem:[#allocation14 + $0x508] sm:$0xff]  ;;  %v4683_v56 = vld [vmem:[#allocation14 + $0x558] sm:$0xff] }
 0x6bc   :  { %v8282_v5 = vpack.c.bf16 %v4681_v39, %v4673_v23  ;;  %v8346_v8 = vpack.c.bf16 %v4683_v56, %v4675_v4  ;;  %v4747_v62 = vld [vmem:[#allocation14 + $0x758] sm:$0xff]  ;;  %v4746_v23 = vld [vmem:[#allocation14 + $0x750] sm:$0xff]  ;;  %v4753_v39 = vld [vmem:[#allocation14 + $0x788] sm:$0xff] }
 0x6bd   :  { %v4761_v4 = vld [vmem:[#allocation14 + $0x7c8] sm:$0xff]  ;;  %v4763_v56 = vld [vmem:[#allocation14 + $0x7d8] sm:$0xff] }
 0x6be   :  { %8265 = vmatpush1.bf16.msra.mxu0 %v8264_v6  ;;  %8329 = vmatpush1.bf16.msra.mxu1 %v8328_v9  ;;  %v4672_v6 = vld [vmem:[#allocation14 + $0x500] sm:$0xff] }
 0x6bf   :  { %8267 = vmatprep.subr.bf16.mxu0 %v8266_v13  ;;  %8331 = vmatprep.subr.bf16.mxu1 %v8330_v16  ;;  %v8284_v9 = vpack.c.bf16 %v4680_v7, %v4672_v6  ;;  %v4689_v13 = vld [vmem:[#allocation14 + $0x588] sm:$0xff]  ;;  %v4699_v16 = vld [vmem:[#allocation14 + $0x5d8] sm:$0xff]  ;;  %v8364_v7 = vpack.c.bf16 %v4746_v23, %v4738_v12  ;;  %v3843_v23 = vmul.f32 0.0, %v9715_v26  ;;  %v4500_v26 = vmul.f32 0.0, %v9722_v42 }
 0x6c0   :  { %v8286_v61 = vpack.c.bf16 %v4697_v14, %v4689_v13  ;;  %v8350_v40 = vpack.c.bf16 %v4699_v16, %v4691_v15  ;;  %v4762_v13 = vld [vmem:[#allocation14 + $0x7d0] sm:$0xff]  ;;  %v4525_v16 = vld [vmem:[#allocation14 + $0x68] sm:$0xff] }
 0x6c2   :  { %8269 = vmatpush1.bf16.msra.mxu0 %v8268_v17  ;;  %8333 = vmatpush1.bf16.msra.mxu1 %v8332_v20  ;;  %v4688_v17 = vld [vmem:[#allocation14 + $0x580] sm:$0xff] }
 0x6c3   :  { %8271 = vmatprep.subr.bf16.mxu0 %v8270_v28  ;;  %8335 = vmatprep.subr.bf16.mxu1 %v8334_v19  ;;  %v8288_v20 = vpack.c.bf16 %v4696_v18, %v4688_v17  ;;  %v8352_v28 = vpack.c.bf16 %v4698_v24, %v4690_v21  ;;  %v8290_v19 = vpack.c.bf16 %v4713_v29, %v4705_v25  ;;  %v4519_v17 = vld [vmem:[#allocation14 + $0x38] sm:$0xff] }
 0x6c6   :  { %8273 = vmatpush1.bf16.msra.mxu0 %v8272_v53  ;;  %8337 = vmatpush1.bf16.msra.mxu1 %v8336_v34  ;;  %v8354_v53 = vpack.c.bf16 %v4715_v31, %v4707_v30  ;;  %v4706_v34 = vld [vmem:[#allocation14 + $0x610] sm:$0xff] }
 0x6c7   :  { %8275 = vmatprep.subr.bf16.mxu0 %v8274_v38  ;;  %8339 = vmatprep.subr.bf16.mxu1 %v8338_v46  ;;  %v4729_v38 = vld [vmem:[#allocation14 + $0x6c8] sm:$0xff]  ;;  %v8356_v43 = vpack.c.bf16 %v4714_v36, %v4706_v34  ;;  %v4731_v46 = vld [vmem:[#allocation14 + $0x6d8] sm:$0xff] }
 0x6c8   :  { %v8294_v44 = vpack.c.bf16 %v4729_v38, %v4721_v58  ;;  %v8358_v48 = vpack.c.bf16 %v4731_v46, %v4723_v45  ;;  %v3850_v45 = vld [vmem:[#allocation3 + $0x4] ss:$8 sm:$0xf0] }
 0x6ca   :  { %8277 = vmatpush1.bf16.msra.mxu0 %v8276_v47  ;;  %8341 = vmatpush1.bf16.msra.mxu1 %v8340_v52  ;;  %v4720_v47 = vld [vmem:[#allocation14 + $0x680] sm:$0xff]  ;;  %v4722_v52 = vld [vmem:[#allocation14 + $0x690] sm:$0xff] }
 0x6cb   :  { %8279 = vmatprep.subr.bf16.mxu0 %v8278_v54  ;;  %8343 = vmatprep.subr.bf16.mxu1 %v8342_v63  ;;  %v4739_v54 = vld [vmem:[#allocation14 + $0x718] sm:$0xff]  ;;  %v8296_v59 = vpack.c.bf16 %v4728_v49, %v4720_v47  ;;  %v8360_v22 = vpack.c.bf16 %v4730_v55, %v4722_v52  ;;  %v8298_v63 = vpack.c.bf16 %v4745_v57, %v4737_v27 }
 0x6ce   :  { %8281 = vmatpush1.bf16.msra.mxu0 %v8280_v0  ;;  %8345 = vmatpush1.bf16.msra.mxu1 %v8344_v3  ;;  %v4736_v0 = vld [vmem:[#allocation14 + $0x700] sm:$0xff]  ;;  %v8362_v3 = vpack.c.bf16 %v4747_v62, %v4739_v54 }
 0x6cf   :  { %8283 = vmatprep.subr.bf16.mxu0 %v8282_v5  ;;  %8347 = vmatprep.subr.bf16.mxu1 %v8346_v8  ;;  %v4755_v5 = vld [vmem:[#allocation14 + $0x798] sm:$0xff]  ;;  %v8300_v6 = vpack.c.bf16 %v4744_v1, %v4736_v0  ;;  %v8302_v8 = vpack.c.bf16 %v4761_v4, %v4753_v39 }
 0x6d0   :  { %v8366_v10 = vpack.c.bf16 %v4763_v56, %v4755_v5  ;;  %v9745_v5 = vadd.f32 %v3843_v23, %v9718_v32  ;;  %v4526_v32 = vld [vmem:[#allocation14 + $0x70] sm:$0xff] }
 0x6d2   :  { %8285 = vmatpush1.bf16.msra.mxu0 %v8284_v9  ;;  %8349 = vmatpush1.bf16.msra.mxu1 %v8348_v11  ;;  %v4752_v9 = vld [vmem:[#allocation14 + $0x780] sm:$0xff]  ;;  %v4754_v11 = vld [vmem:[#allocation14 + $0x790] sm:$0xff] }
 0x6d3   :  { %8287 = vmatprep.subr.bf16.mxu0 %v8286_v61  ;;  %8351 = vmatprep.subr.bf16.mxu1 %v8350_v40  ;;  %v8304_v14 = vpack.c.bf16 %v4760_v2, %v4752_v9  ;;  %v8368_v15 = vpack.c.bf16 %v4762_v13, %v4754_v11  ;;  %v4517_v61 = vld [vmem:[#allocation14 + $0x28] sm:$0xff]  ;;  %v4527_v40 = vld [vmem:[#allocation14 + $0x78] sm:$0xff]  ;;  %v4516_v13 = vld [vmem:[#allocation14 + $0x20] sm:$0xff] }
 0x6d4   :  { %v8370_v18 = vpack.c.bf16 %v4525_v16, %v4517_v61  ;;  %v4533_v16 = vld [vmem:[#allocation14 + $0xa8] sm:$0xff] }
 0x6d6   :  { %8289 = vmatpush1.bf16.msra.mxu0 %v8288_v20  ;;  %8353 = vmatpush1.bf16.msra.mxu1 %v8352_v28  ;;  %v8434_v20 = vpack.c.bf16 %v4527_v40, %v4519_v17  ;;  %v4541_v17 = vld [vmem:[#allocation14 + $0xe8] sm:$0xff]  ;;  %v4543_v40 = vld [vmem:[#allocation14 + $0xf8] sm:$0xff] }
 0x6d7   :  { %8291 = vmatprep.subr.bf16.mxu0 %v8290_v19  ;;  %8355 = vmatprep.subr.bf16.mxu1 %v8354_v53 }
 0x6da   :  { %8293 = vmatpush1.bf16.msra.mxu0 %v8292_v35  ;;  %8357 = vmatpush1.bf16.msra.mxu1 %v8356_v43 }
 0x6db   :  { %8295 = vmatprep.subr.bf16.mxu0 %v8294_v44  ;;  %8359 = vmatprep.subr.bf16.mxu1 %v8358_v48  ;;  %v3849_v48 = vld [vmem:[#allocation3 + $0x4] ss:$8 sm:$0xf] }
 0x6dc   :  { %v3851_v49 = vor.u32 %v3850_v45, %v3849_v48  ;;  %v4550_v45 = vld [vmem:[#allocation14 + $0x130] sm:$0xff]  ;;  %v4573_v48 = vld [vmem:[#allocation14 + $0x1e8] sm:$0xff] }
 0x6de   :  { %8297 = vmatpush1.bf16.msra.mxu0 %v8296_v59  ;;  %8361 = vmatpush1.bf16.msra.mxu1 %v8360_v22 }
 0x6df   :  { %8299 = vmatprep.subr.bf16.mxu0 %v8298_v63  ;;  %8363 = vmatprep.subr.bf16.mxu1 %v8362_v3 }
 0x6e2   :  { %8301 = vmatpush1.bf16.msra.mxu0 %v8300_v6  ;;  %8365 = vmatpush1.bf16.msra.mxu1 %v8364_v7 }
 0x6e3   :  { %8303 = vmatprep.subr.bf16.mxu0 %v8302_v8  ;;  %8367 = vmatprep.subr.bf16.mxu1 %v8366_v10 }
 0x6e6   :  { %8305 = vmatpush1.bf16.msra.mxu0 %v8304_v14  ;;  %8369 = vmatpush1.bf16.msra.mxu1 %v8368_v15  ;;  %v4524_v14 = vld [vmem:[#allocation14 + $0x60] sm:$0xff]  ;;  %v4518_v15 = vld [vmem:[#allocation14 + $0x30] sm:$0xff] }
 0x6e7   :  { %8371 = vmatprep.subr.bf16.mxu0 %v8370_v18  ;;  %8435 = vmatprep.subr.bf16.mxu1 %v8434_v20  ;;  %v4535_v18 = vld [vmem:[#allocation14 + $0xb8] sm:$0xff] }
 0x73c   :  { %v4185_v21 = vpop.f32.mrb[24].mxu0  ;;  %v4256_v24 = vpop.f32.mrb[24].mxu1 }
 0x73d   :  { %v4187_v25 = vpop.f32.mrb[25].mxu0  ;;  %v4258_v28 = vpop.f32.mrb[25].mxu1 }
 0x73e   :  { %v4411_v29 = vcombine.low %v4185_v21, %v4187_v25  ;;  %v4412_v30 = vcombine.low %v4256_v24, %v4258_v28  ;;  %v8372_v21 = vpack.c.bf16 %v4524_v14, %v4516_v13  ;;  %v8436_v24 = vpack.c.bf16 %v4526_v32, %v4518_v15  ;;  %v4532_v25 = vld [vmem:[#allocation14 + $0xa0] sm:$0xff]  ;;  %v4607_v13 = vld [vmem:[#allocation14 + $0x2f8] sm:$0xff] }
 0x73f   :  { %v4540_v28 = vld [vmem:[#allocation14 + $0xe0] sm:$0xff] }
 0x740   :  { %v4421_v31 = vrot.slane %v4411_v29, %v9622_v60  ;;  %v4428_v19 = vrot.slane %v4412_v30, %v9622_v60  ;;  %v4534_v29 = vld [vmem:[#allocation14 + $0xb0] sm:$0xff]  ;;  %v4596_v32 = vld [vmem:[#allocation14 + $0x2a0] sm:$0xff] }
 0x741   :  { %v4542_v30 = vld [vmem:[#allocation14 + $0xf0] sm:$0xff] }
 0x742   :  { %v4443_v53 = vcombine.low %v4421_v31, %v4428_v19  ;;  %v4549_v31 = vld [vmem:[#allocation14 + $0x128] sm:$0xff]  ;;  %v8374_v19 = vpack.c.bf16 %v4541_v17, %v4533_v16  ;;  %v4604_v16 = vld [vmem:[#allocation14 + $0x2e0] sm:$0xff] }
 0x744   :  { %v4451_v46 = vrot.slane %v4443_v53, %v9622_v60  ;;  %v8438_v53 = vpack.c.bf16 %v4543_v40, %v4535_v18  ;;  %v4598_v40 = vld [vmem:[#allocation14 + $0x2b0] sm:$0xff] }
 0x77c   :  { %v4327_v33 = vpop.f32.mrb[26].mxu0  ;;  %v4398_v50 = vpop.f32.mrb[26].mxu1 }
 0x77d   :  { %v4329_v34 = vpop.f32.mrb[27].mxu0  ;;  %v4400_v35 = vpop.f32.mrb[27].mxu1 }
 0x77e   :  { %v4413_v36 = vcombine.low %v4327_v33, %v4329_v34  ;;  %v4414_v58 = vcombine.low %v4398_v50, %v4400_v35  ;;  %v4557_v33 = vld [vmem:[#allocation14 + $0x168] sm:$0xff]  ;;  %v4551_v50 = vld [vmem:[#allocation14 + $0x138] sm:$0xff]  ;;  %v8376_v35 = vpack.c.bf16 %v4540_v28, %v4532_v25 }
 0x77f   :  { %v4559_v34 = vld [vmem:[#allocation14 + $0x178] sm:$0xff] }
 0x780   :  { %v4435_v38 = vrot.slane %v4413_v36, %v9622_v60  ;;  %v4442_v43 = vrot.slane %v4414_v58, %v9622_v60  ;;  %v8440_v36 = vpack.c.bf16 %v4542_v30, %v4534_v29  ;;  %v4548_v58 = vld [vmem:[#allocation14 + $0x120] sm:$0xff]  ;;  %v4615_v25 = vld [vmem:[#allocation14 + $0x338] sm:$0xff]  ;;  %v8392_v29 = vpack.c.bf16 %v4604_v16, %v4596_v32 }
 0x781   :  { %v4623_v28 = vld [vmem:[#allocation14 + $0x378] sm:$0xff] }
 0x782   :  { %v4444_v44 = vcombine.low %v4435_v38, %v4442_v43  ;;  %v4556_v38 = vld [vmem:[#allocation14 + $0x160] sm:$0xff]  ;;  %v8378_v43 = vpack.c.bf16 %v4557_v33, %v4549_v31  ;;  %v8458_v33 = vpack.c.bf16 %v4623_v28, %v4615_v25  ;;  %v4679_v32 = vld [vmem:[#allocation14 + $0x538] sm:$0xff]  ;;  %v4678_v25 = vld [vmem:[#allocation14 + $0x530] sm:$0xff] }
 0x783   :  { %v4612_v31 = vld [vmem:[#allocation14 + $0x320] sm:$0xff]  ;;  %v4687_v16 = vld [vmem:[#allocation14 + $0x578] sm:$0xff]  ;;  %v4686_v28 = vld [vmem:[#allocation14 + $0x570] sm:$0xff] }
 0x784   :  { %v4458_v47 = vrot.slane %v4444_v44, %v9622_v60  ;;  %v8442_v44 = vpack.c.bf16 %v4559_v34, %v4551_v50  ;;  %v4614_v50 = vld [vmem:[#allocation14 + $0x330] sm:$0xff] }
 0x785   :  { %v4622_v34 = vld [vmem:[#allocation14 + $0x370] sm:$0xff] }
 0x786   :  { %v4459_v52 = vcombine.low %v4451_v46, %v4458_v47  ;;  %v4558_v46 = vld [vmem:[#allocation14 + $0x170] sm:$0xff]  ;;  %v4565_v47 = vld [vmem:[#allocation14 + $0x1a8] sm:$0xff] }
 0x788   :  { %v4461_v55 = vadd.f32 %v4459_v52, %v3851_v49  ;;  %v4567_v49 = vld [vmem:[#allocation14 + $0x1b8] sm:$0xff] }
 0x789   :  { %v4575_v52 = vld [vmem:[#allocation14 + $0x1f8] sm:$0xff] }
 0x78a   :  { %v6903_v27 = vmul.f32 -1.442695, %v4461_v55  ;;  %v4469_v57 = vrot.slane %v4461_v55, 2  ;;  %v4480_v59 = vrot.slane %v4461_v55, 6  ;;  %v4477_v63 = vrot.slane %v4461_v55, 4 }
 0x78b   :  { %v8380_v55 = vpack.c.bf16 %v4556_v38, %v4548_v58  ;;  %v4631_v58 = vld [vmem:[#allocation14 + $0x3b8] sm:$0xff] }
 0x78c   :  { %9106 = vpow2.f32 %v6903_v27  ;;  %v6904_v54 = vmul.f32 -1.442695, %v4469_v57  ;;  %v6905_v62 = vmul.f32 -1.442695, %v4480_v59  ;;  %v8444_v27 = vpack.c.bf16 %v4558_v46, %v4550_v45  ;;  %v4564_v57 = vld [vmem:[#allocation14 + $0x1a0] sm:$0xff]  ;;  %v4639_v38 = vld [vmem:[#allocation14 + $0x3f8] sm:$0xff] }
 0x78d   :  { %v8382_v59 = vpack.c.bf16 %v4573_v48, %v4565_v47  ;;  %v4628_v45 = vld [vmem:[#allocation14 + $0x3a0] sm:$0xff]  ;;  %v8462_v48 = vpack.c.bf16 %v4639_v38, %v4631_v58  ;;  %v4694_v58 = vld [vmem:[#allocation14 + $0x5b0] sm:$0xff] }
 0x78e   :  { %9108 = vpow2.f32 %v6904_v54  ;;  %v4572_v54 = vld [vmem:[#allocation14 + $0x1e0] sm:$0xff]  ;;  %v4702_v38 = vld [vmem:[#allocation14 + $0x5f0] sm:$0xff] }
 0x78f   :  { %9110 = vpow2.f32 %v6905_v62  ;;  %v8446_v62 = vpack.c.bf16 %v4575_v52, %v4567_v49  ;;  %v8384_v23 = vpack.c.bf16 %v4572_v54, %v4564_v57  ;;  %v4636_v46 = vld [vmem:[#allocation14 + $0x3e0] sm:$0xff]  ;;  %v4630_v49 = vld [vmem:[#allocation14 + $0x3b0] sm:$0xff]  ;;  %v4647_v57 = vld [vmem:[#allocation14 + $0x438] sm:$0xff] }
 0x790   :  { %v4638_v52 = vld [vmem:[#allocation14 + $0x3f0] sm:$0xff]  ;;  %v4655_v54 = vld [vmem:[#allocation14 + $0x478] sm:$0xff] }
 0x796   :  { %v9107_v22 = vpop.eup %9106 }
 0x797   :  { %v4465_v0 = vadd.f32 1.0, %v9107_v22  ;;  %v4566_v22 = vld [vmem:[#allocation14 + $0x1b0] sm:$0xff] }
 0x798   :  { %v9109_v1 = vpop.eup %9108 }
 0x799   :  { %9112 = vrcp.f32 %v4465_v0  ;;  %v4474_v12 = vadd.f32 1.0, %v9109_v1  ;;  %v9111_v3 = vpop.eup %9110  ;;  %v4581_v0 = vld [vmem:[#allocation14 + $0x228] sm:$0xff] }
 0x79a   :  { %9114 = vtanh.f32 %v4477_v63  ;;  %v4485_v6 = vadd.f32 1.0, %v9111_v3  ;;  %v4574_v63 = vld [vmem:[#allocation14 + $0x1f0] sm:$0xff]  ;;  %v4589_v1 = vld [vmem:[#allocation14 + $0x268] sm:$0xff]  ;;  %v4591_v3 = vld [vmem:[#allocation14 + $0x278] sm:$0xff] }
 0x79b   :  { %9116 = vrcp.f32 %v4474_v12  ;;  %v4583_v12 = vld [vmem:[#allocation14 + $0x238] sm:$0xff] }
 0x79c   :  { %9118 = vrcp.f32 %v4485_v6  ;;  %v8386_v6 = vpack.c.bf16 %v4589_v1, %v4581_v0  ;;  %v8466_v1 = vpack.c.bf16 %v4655_v54, %v4647_v57  ;;  %v4710_v57 = vld [vmem:[#allocation14 + $0x630] sm:$0xff] }
 0x79d   :  { %v4718_v54 = vld [vmem:[#allocation14 + $0x670] sm:$0xff] }
 0x7a3   :  { %v9113_v39 = vpop.eup %9112 }
 0x7a4   :  { %v9115_v4 = vpop.eup %9114 }
 0x7a5   :  { %v9117_v56 = vpop.eup %9116  ;;  %v4489_v7 = vmul.f32 %v9115_v4, %v9113_v39  ;;  %v8448_v39 = vpack.c.bf16 %v4574_v63, %v4566_v22  ;;  %v4580_v4 = vld [vmem:[#allocation14 + $0x220] sm:$0xff] }
 0x7a6   :  { %v4488_v8 = vmul.f32 %v9117_v56, %v9745_v5  ;;  %v9119_v2 = vpop.eup %9118  ;;  %v4588_v56 = vld [vmem:[#allocation14 + $0x260] sm:$0xff] }
 0x7a7   :  { %v8388_v14 = vpack.c.bf16 %v4588_v56, %v4580_v4  ;;  %v4644_v22 = vld [vmem:[#allocation14 + $0x420] sm:$0xff]  ;;  %v4663_v4 = vld [vmem:[#allocation14 + $0x4b8] sm:$0xff] }
 0x7a8   :  { %v9748_v9 = vadd.f32 %v4489_v7, %v4488_v8  ;;  %v8450_v7 = vpack.c.bf16 %v4591_v3, %v4583_v12  ;;  %v4582_v8 = vld [vmem:[#allocation14 + $0x230] sm:$0xff]  ;;  %v4652_v63 = vld [vmem:[#allocation14 + $0x460] sm:$0xff]  ;;  %v4671_v56 = vld [vmem:[#allocation14 + $0x4f8] sm:$0xff] }
 0x7a9   :  { %v4646_v12 = vld [vmem:[#allocation14 + $0x430] sm:$0xff] }
 0x7aa   :  { %9120 = vtanh.f32 %v9748_v9  ;;  %v4654_v3 = vld [vmem:[#allocation14 + $0x470] sm:$0xff] }
 0x7b4   :  { %v9121_v10 = vpop.eup %9120 }
 0x7b5   :  { %v4492_v11 = vmul.f32 %v9121_v10, %v9119_v2  ;;  %v4590_v2 = vld [vmem:[#allocation14 + $0x270] sm:$0xff]  ;;  %v4597_v10 = vld [vmem:[#allocation14 + $0x2a8] sm:$0xff] }
 0x7b6   :  { %v8452_v15 = vpack.c.bf16 %v4590_v2, %v4582_v8  ;;  %v4660_v8 = vld [vmem:[#allocation14 + $0x4a0] sm:$0xff] }
 0x7b7   :  { %v9752_v61 = vadd.f32 %v4500_v26, %v4492_v11  ;;  %v4605_v11 = vld [vmem:[#allocation14 + $0x2e8] sm:$0xff]  ;;  %v4599_v26 = vld [vmem:[#allocation14 + $0x2b8] sm:$0xff]  ;;  %v4668_v2 = vld [vmem:[#allocation14 + $0x4e0] sm:$0xff] }
 0x7b8   :  { %v8390_v17 = vpack.c.bf16 %v4605_v11, %v4597_v10  ;;  %v8454_v18 = vpack.c.bf16 %v4607_v13, %v4599_v26  ;;  %v8470_v11 = vpack.c.bf16 %v4671_v56, %v4663_v4  ;;  %v4662_v26 = vld [vmem:[#allocation14 + $0x4b0] sm:$0xff] }
 0x7b9   :  { %4506 = vst.msk [vmem:[#allocation4 + $0x4] ss:$8 sm:$0x3] %vm9531_vm0, %v9752_v61  ;;  %v4776_v20 = vrot.slane %v9752_v61, %v9580_v37  ;;  %v9761_v42 = vrot.slane %v9752_v61, %v9593_v41  ;;  %v4670_v13 = vld [vmem:[#allocation14 + $0x4f0] sm:$0xff] }
 0x7ba   :  { %v4726_v4 = vld [vmem:[#allocation14 + $0x6b0] sm:$0xff] }
 0x7bb   :  { %4843 = vmatprep.mubr.f32.mxu0 %v4776_v20  ;;  %4914 = vmatprep.mubr.f32.mxu1 %v4776_v20  ;;  %v4734_v56 = vld [vmem:[#allocation14 + $0x6f0] sm:$0xff] }
 0x7bc   :  { %4844 = vmatmul.mubr.f32.vlgmr.msra.gmra.mrb[28].mxu0 %v9761_v42  ;;  %4915 = vmatmul.mubr.f32.vlgmr.msra.gmra.mrb[28].mxu1 %v9761_v42 }
 0x7bd   :  { %8373 = vmatpush1.bf16.msra.mxu0 %v8372_v21  ;;  %8437 = vmatpush1.bf16.msra.mxu1 %v8436_v24  ;;  %v4613_v21 = vld [vmem:[#allocation14 + $0x328] sm:$0xff] }
 0x7be   :  { %4985 = vmatprep.mubr.f32.mxu0 %v4776_v20  ;;  %5056 = vmatprep.mubr.f32.mxu1 %v4776_v20  ;;  %v4606_v20 = vld [vmem:[#allocation14 + $0x2f0] sm:$0xff]  ;;  %v4621_v24 = vld [vmem:[#allocation14 + $0x368] sm:$0xff] }
 0x7bf   :  { %8375 = vmatprep.subr.bf16.mxu0 %v8374_v19  ;;  %8439 = vmatprep.subr.bf16.mxu1 %v8438_v53  ;;  %v8456_v30 = vpack.c.bf16 %v4606_v20, %v4598_v40  ;;  %v4620_v19 = vld [vmem:[#allocation14 + $0x360] sm:$0xff]  ;;  %v8394_v53 = vpack.c.bf16 %v4621_v24, %v4613_v21  ;;  %v8474_v24 = vpack.c.bf16 %v4687_v16, %v4679_v32  ;;  %v4742_v32 = vld [vmem:[#allocation14 + $0x730] sm:$0xff] }
 0x7c0   :  { %v4676_v40 = vld [vmem:[#allocation14 + $0x520] sm:$0xff]  ;;  %v4750_v16 = vld [vmem:[#allocation14 + $0x770] sm:$0xff] }
 0x7c1   :  { %8377 = vmatpush1.bf16.msra.mxu0 %v8376_v35  ;;  %8441 = vmatpush1.bf16.msra.mxu1 %v8440_v36  ;;  %v4629_v35 = vld [vmem:[#allocation14 + $0x3a8] sm:$0xff]  ;;  %v4684_v20 = vld [vmem:[#allocation14 + $0x560] sm:$0xff] }
 0x7c2   :  { %8379 = vmatprep.subr.bf16.mxu0 %v8378_v43  ;;  %8443 = vmatprep.subr.bf16.mxu1 %v8442_v44  ;;  %v4637_v36 = vld [vmem:[#allocation14 + $0x3e8] sm:$0xff]  ;;  %v8396_v43 = vpack.c.bf16 %v4620_v19, %v4612_v31  ;;  %v8460_v44 = vpack.c.bf16 %v4622_v34, %v4614_v50  ;;  %v4695_v31 = vld [vmem:[#allocation14 + $0x5b8] sm:$0xff]  ;;  %v4692_v50 = vld [vmem:[#allocation14 + $0x5a0] sm:$0xff] }
 0x7c3   :  { %v8398_v47 = vpack.c.bf16 %v4637_v36, %v4629_v35  ;;  %v4703_v19 = vld [vmem:[#allocation14 + $0x5f8] sm:$0xff]  ;;  %v4700_v34 = vld [vmem:[#allocation14 + $0x5e0] sm:$0xff] }
 0x7c4   :  { %v8478_v36 = vpack.c.bf16 %v4703_v19, %v4695_v31  ;;  %v4758_v31 = vld [vmem:[#allocation14 + $0x7b0] sm:$0xff] }
 0x7c5   :  { %8381 = vmatpush1.bf16.msra.mxu0 %v8380_v55  ;;  %8445 = vmatpush1.bf16.msra.mxu1 %v8444_v27  ;;  %v4645_v55 = vld [vmem:[#allocation14 + $0x428] sm:$0xff]  ;;  %v4766_v19 = vld [vmem:[#allocation14 + $0x7f0] sm:$0xff] }
 0x7c6   :  { %8383 = vmatprep.subr.bf16.mxu0 %v8382_v59  ;;  %8447 = vmatprep.subr.bf16.mxu1 %v8446_v62  ;;  %v4653_v27 = vld [vmem:[#allocation14 + $0x468] sm:$0xff]  ;;  %v8400_v59 = vpack.c.bf16 %v4636_v46, %v4628_v45  ;;  %v8464_v62 = vpack.c.bf16 %v4638_v52, %v4630_v49  ;;  %v4711_v45 = vld [vmem:[#allocation14 + $0x638] sm:$0xff]  ;;  %v4708_v49 = vld [vmem:[#allocation14 + $0x620] sm:$0xff] }
 0x7c7   :  { %v8402_v0 = vpack.c.bf16 %v4653_v27, %v4645_v55  ;;  %v4719_v46 = vld [vmem:[#allocation14 + $0x678] sm:$0xff]  ;;  %v4716_v52 = vld [vmem:[#allocation14 + $0x660] sm:$0xff] }
 0x7c8   :  { %v8482_v27 = vpack.c.bf16 %v4719_v46, %v4711_v45  ;;  %v5174_v45 = vld [vmem:[#allocation14 + $0x10] sm:$0xff] }
 0x7c9   :  { %8385 = vmatpush1.bf16.msra.mxu0 %v8384_v23  ;;  %8449 = vmatpush1.bf16.msra.mxu1 %v8448_v39  ;;  %v4661_v23 = vld [vmem:[#allocation14 + $0x4a8] sm:$0xff] }
 0x7ca   :  { %8387 = vmatprep.subr.bf16.mxu0 %v8386_v6  ;;  %8451 = vmatprep.subr.bf16.mxu1 %v8450_v7  ;;  %v4669_v39 = vld [vmem:[#allocation14 + $0x4e8] sm:$0xff]  ;;  %v8404_v6 = vpack.c.bf16 %v4652_v63, %v4644_v22  ;;  %v8468_v7 = vpack.c.bf16 %v4654_v3, %v4646_v12  ;;  %v4727_v22 = vld [vmem:[#allocation14 + $0x6b8] sm:$0xff]  ;;  %v4724_v12 = vld [vmem:[#allocation14 + $0x6a0] sm:$0xff] }
 0x7cb   :  { %v8406_v10 = vpack.c.bf16 %v4669_v39, %v4661_v23  ;;  %v4735_v63 = vld [vmem:[#allocation14 + $0x6f8] sm:$0xff]  ;;  %v4732_v3 = vld [vmem:[#allocation14 + $0x6e0] sm:$0xff] }
 0x7cc   :  { %v8486_v39 = vpack.c.bf16 %v4735_v63, %v4727_v22  ;;  %v5190_v22 = vld [vmem:[#allocation14 + $0x90] sm:$0xff] }
 0x7cd   :  { %8389 = vmatpush1.bf16.msra.mxu0 %v8388_v14  ;;  %8453 = vmatpush1.bf16.msra.mxu1 %v8452_v15  ;;  %v4677_v14 = vld [vmem:[#allocation14 + $0x528] sm:$0xff]  ;;  %v5198_v63 = vld [vmem:[#allocation14 + $0xd0] sm:$0xff] }
 0x7ce   :  { %8391 = vmatprep.subr.bf16.mxu0 %v8390_v17  ;;  %8455 = vmatprep.subr.bf16.mxu1 %v8454_v18  ;;  %v4685_v15 = vld [vmem:[#allocation14 + $0x568] sm:$0xff]  ;;  %v8408_v17 = vpack.c.bf16 %v4668_v2, %v4660_v8  ;;  %v8472_v18 = vpack.c.bf16 %v4670_v13, %v4662_v26  ;;  %v4743_v8 = vld [vmem:[#allocation14 + $0x738] sm:$0xff]  ;;  %v4740_v26 = vld [vmem:[#allocation14 + $0x720] sm:$0xff] }
 0x7cf   :  { %v8410_v21 = vpack.c.bf16 %v4685_v15, %v4677_v14  ;;  %v4751_v2 = vld [vmem:[#allocation14 + $0x778] sm:$0xff]  ;;  %v4748_v13 = vld [vmem:[#allocation14 + $0x760] sm:$0xff] }
 0x7d0   :  { %v8490_v15 = vpack.c.bf16 %v4751_v2, %v4743_v8  ;;  %v5206_v8 = vld [vmem:[#allocation14 + $0x110] sm:$0xff] }
 0x7d1   :  { %8393 = vmatpush1.bf16.msra.mxu0 %v8392_v29  ;;  %8457 = vmatpush1.bf16.msra.mxu1 %v8456_v30  ;;  %v4693_v29 = vld [vmem:[#allocation14 + $0x5a8] sm:$0xff]  ;;  %v5214_v2 = vld [vmem:[#allocation14 + $0x150] sm:$0xff] }
 0x7d2   :  { %8395 = vmatprep.subr.bf16.mxu0 %v8394_v53  ;;  %8459 = vmatprep.subr.bf16.mxu1 %v8458_v33  ;;  %v4701_v30 = vld [vmem:[#allocation14 + $0x5e8] sm:$0xff]  ;;  %v8412_v53 = vpack.c.bf16 %v4684_v20, %v4676_v40  ;;  %v8476_v33 = vpack.c.bf16 %v4686_v28, %v4678_v25  ;;  %v4759_v40 = vld [vmem:[#allocation14 + $0x7b8] sm:$0xff]  ;;  %v4756_v25 = vld [vmem:[#allocation14 + $0x7a0] sm:$0xff] }
 0x7d3   :  { %v8414_v35 = vpack.c.bf16 %v4701_v30, %v4693_v29  ;;  %v4767_v20 = vld [vmem:[#allocation14 + $0x7f8] sm:$0xff]  ;;  %v4764_v30 = vld [vmem:[#allocation14 + $0x7e0] sm:$0xff] }
 0x7d4   :  { %v8494_v29 = vpack.c.bf16 %v4767_v20, %v4759_v40  ;;  %v5222_v40 = vld [vmem:[#allocation14 + $0x190] sm:$0xff] }
 0x7d5   :  { %8397 = vmatpush1.bf16.msra.mxu0 %v8396_v43  ;;  %8461 = vmatpush1.bf16.msra.mxu1 %v8460_v44  ;;  %v4709_v43 = vld [vmem:[#allocation14 + $0x628] sm:$0xff]  ;;  %v5230_v20 = vld [vmem:[#allocation14 + $0x1d0] sm:$0xff] }
 0x7d6   :  { %8399 = vmatprep.subr.bf16.mxu0 %v8398_v47  ;;  %8463 = vmatprep.subr.bf16.mxu1 %v8462_v48  ;;  %v4717_v44 = vld [vmem:[#allocation14 + $0x668] sm:$0xff]  ;;  %v8416_v47 = vpack.c.bf16 %v4700_v34, %v4692_v50  ;;  %v8480_v48 = vpack.c.bf16 %v4702_v38, %v4694_v58  ;;  %v5183_v58 = vld [vmem:[#allocation14 + $0x58] sm:$0xff] }
 0x7d7   :  { %v8418_v55 = vpack.c.bf16 %v4717_v44, %v4709_v43  ;;  %v5173_v50 = vld [vmem:[#allocation14 + $0x8] sm:$0xff]  ;;  %v5172_v43 = vld [vmem:[#allocation14] sm:$0xff] }
 0x7d8   :  { %v5181_v34 = vld [vmem:[#allocation14 + $0x48] sm:$0xff]  ;;  %v5180_v44 = vld [vmem:[#allocation14 + $0x40] sm:$0xff] }
 0x7d9   :  { %8401 = vmatpush1.bf16.msra.mxu0 %v8400_v59  ;;  %8465 = vmatpush1.bf16.msra.mxu1 %v8464_v62  ;;  %v4725_v59 = vld [vmem:[#allocation14 + $0x6a8] sm:$0xff]  ;;  %v8500_v46 = vpack.c.bf16 %v5180_v44, %v5172_v43  ;;  %v5263_v44 = vld [vmem:[#allocation14 + $0x2d8] sm:$0xff] }
 0x7da   :  { %8403 = vmatprep.subr.bf16.mxu0 %v8402_v0  ;;  %8467 = vmatprep.subr.bf16.mxu1 %v8466_v1  ;;  %v4733_v62 = vld [vmem:[#allocation14 + $0x6e8] sm:$0xff]  ;;  %v8420_v0 = vpack.c.bf16 %v4716_v52, %v4708_v49  ;;  %v8484_v1 = vpack.c.bf16 %v4718_v54, %v4710_v57  ;;  %v5188_v57 = vld [vmem:[#allocation14 + $0x80] sm:$0xff] }
 0x7db   :  { %v8422_v23 = vpack.c.bf16 %v4733_v62, %v4725_v59  ;;  %v5189_v49 = vld [vmem:[#allocation14 + $0x88] sm:$0xff]  ;;  %v5196_v54 = vld [vmem:[#allocation14 + $0xc0] sm:$0xff] }
 0x7dc   :  { %v5197_v52 = vld [vmem:[#allocation14 + $0xc8] sm:$0xff]  ;;  %v8504_v62 = vpack.c.bf16 %v5196_v54, %v5188_v57  ;;  %v5271_v57 = vld [vmem:[#allocation14 + $0x318] sm:$0xff] }
 0x7dd   :  { %8405 = vmatpush1.bf16.msra.mxu0 %v8404_v6  ;;  %8469 = vmatpush1.bf16.msra.mxu1 %v8468_v7  ;;  %v4741_v6 = vld [vmem:[#allocation14 + $0x728] sm:$0xff] }
 0x7de   :  { %8407 = vmatprep.subr.bf16.mxu0 %v8406_v10  ;;  %8471 = vmatprep.subr.bf16.mxu1 %v8470_v11  ;;  %v4749_v7 = vld [vmem:[#allocation14 + $0x768] sm:$0xff]  ;;  %v8424_v10 = vpack.c.bf16 %v4732_v3, %v4724_v12  ;;  %v8488_v11 = vpack.c.bf16 %v4734_v56, %v4726_v4  ;;  %v5207_v3 = vld [vmem:[#allocation14 + $0x118] sm:$0xff]  ;;  %v5204_v4 = vld [vmem:[#allocation14 + $0x100] sm:$0xff] }
 0x7df   :  { %v8426_v14 = vpack.c.bf16 %v4749_v7, %v4741_v6  ;;  %v5213_v12 = vld [vmem:[#allocation14 + $0x148] sm:$0xff]  ;;  %v5212_v56 = vld [vmem:[#allocation14 + $0x140] sm:$0xff] }
 0x7e0   :  { %v8508_v7 = vpack.c.bf16 %v5212_v56, %v5204_v4  ;;  %v5287_v4 = vld [vmem:[#allocation14 + $0x398] sm:$0xff] }
 0x7e1   :  { %8409 = vmatpush1.bf16.msra.mxu0 %v8408_v17  ;;  %8473 = vmatpush1.bf16.msra.mxu1 %v8472_v18  ;;  %v4757_v17 = vld [vmem:[#allocation14 + $0x7a8] sm:$0xff] }
 0x7e2   :  { %8411 = vmatprep.subr.bf16.mxu0 %v8410_v21  ;;  %8475 = vmatprep.subr.bf16.mxu1 %v8474_v24  ;;  %v4765_v18 = vld [vmem:[#allocation14 + $0x7e8] sm:$0xff]  ;;  %v8428_v21 = vpack.c.bf16 %v4748_v13, %v4740_v26  ;;  %v8492_v24 = vpack.c.bf16 %v4750_v16, %v4742_v32  ;;  %v5223_v13 = vld [vmem:[#allocation14 + $0x198] sm:$0xff]  ;;  %v5220_v32 = vld [vmem:[#allocation14 + $0x180] sm:$0xff] }
 0x7e3   :  { %v8430_v28 = vpack.c.bf16 %v4765_v18, %v4757_v17  ;;  %v5229_v26 = vld [vmem:[#allocation14 + $0x1c8] sm:$0xff]  ;;  %v5228_v16 = vld [vmem:[#allocation14 + $0x1c0] sm:$0xff] }
 0x7e4   :  { %v8512_v18 = vpack.c.bf16 %v5228_v16, %v5220_v32  ;;  %v5303_v32 = vld [vmem:[#allocation14 + $0x418] sm:$0xff] }
 0x7e5   :  { %8413 = vmatpush1.bf16.msra.mxu0 %v8412_v53  ;;  %8477 = vmatpush1.bf16.msra.mxu1 %v8476_v33  ;;  %v8432_v53 = vpack.c.bf16 %v4764_v30, %v4756_v25  ;;  %v8496_v33 = vpack.c.bf16 %v4766_v19, %v4758_v31  ;;  %v5245_v25 = vld [vmem:[#allocation14 + $0x248] sm:$0xff]  ;;  %v5247_v30 = vld [vmem:[#allocation14 + $0x258] sm:$0xff]  ;;  %v5236_v31 = vld [vmem:[#allocation14 + $0x200] sm:$0xff] }
 0x7e6   :  { %8415 = vmatprep.subr.bf16.mxu0 %v8414_v35  ;;  %8479 = vmatprep.subr.bf16.mxu1 %v8478_v36  ;;  %v5175_v35 = vld [vmem:[#allocation14 + $0x18] sm:$0xff]  ;;  %v8498_v36 = vpack.c.bf16 %v5181_v34, %v5173_v50  ;;  %v5244_v19 = vld [vmem:[#allocation14 + $0x240] sm:$0xff]  ;;  %v5238_v50 = vld [vmem:[#allocation14 + $0x210] sm:$0xff] }
 0x7e7   :  { %v8562_v38 = vpack.c.bf16 %v5183_v58, %v5175_v35  ;;  %v5246_v34 = vld [vmem:[#allocation14 + $0x250] sm:$0xff]  ;;  %v5261_v58 = vld [vmem:[#allocation14 + $0x2c8] sm:$0xff] }
 0x7e8   :  { %v8580_v35 = vpack.c.bf16 %v5246_v34, %v5238_v50  ;;  %v5324_v50 = vld [vmem:[#allocation14 + $0x4c0] sm:$0xff] }
 0x7e9   :  { %8417 = vmatpush1.bf16.msra.mxu0 %v8416_v47  ;;  %8481 = vmatpush1.bf16.msra.mxu1 %v8480_v48  ;;  %v5182_v47 = vld [vmem:[#allocation14 + $0x50] sm:$0xff] }
 0x7ea   :  { %8419 = vmatprep.subr.bf16.mxu0 %v8418_v55  ;;  %8483 = vmatprep.subr.bf16.mxu1 %v8482_v27  ;;  %v8564_v48 = vpack.c.bf16 %v5182_v47, %v5174_v45  ;;  %v5191_v55 = vld [vmem:[#allocation14 + $0x98] sm:$0xff]  ;;  %v5252_v45 = vld [vmem:[#allocation14 + $0x280] sm:$0xff] }
 0x7eb   :  { %v5199_v27 = vld [vmem:[#allocation14 + $0xd8] sm:$0xff] }
 0x7ec   :  { %v8566_v59 = vpack.c.bf16 %v5199_v27, %v5191_v55  ;;  %v5277_v27 = vld [vmem:[#allocation14 + $0x348] sm:$0xff] }
 0x7ed   :  { %8421 = vmatpush1.bf16.msra.mxu0 %v8420_v0  ;;  %8485 = vmatpush1.bf16.msra.mxu1 %v8484_v1  ;;  %v8568_v0 = vpack.c.bf16 %v5198_v63, %v5190_v22  ;;  %v5205_v1 = vld [vmem:[#allocation14 + $0x108] sm:$0xff]  ;;  %v5276_v22 = vld [vmem:[#allocation14 + $0x340] sm:$0xff] }
 0x7ee   :  { %8423 = vmatprep.subr.bf16.mxu0 %v8422_v23  ;;  %8487 = vmatprep.subr.bf16.mxu1 %v8486_v39  ;;  %v8506_v23 = vpack.c.bf16 %v5213_v12, %v5205_v1  ;;  %v5215_v39 = vld [vmem:[#allocation14 + $0x158] sm:$0xff]  ;;  %v5270_v1 = vld [vmem:[#allocation14 + $0x310] sm:$0xff] }
 0x7ef   :  { %v8570_v6 = vpack.c.bf16 %v5215_v39, %v5207_v3  ;;  %v5278_v12 = vld [vmem:[#allocation14 + $0x350] sm:$0xff]  ;;  %v5293_v39 = vld [vmem:[#allocation14 + $0x3c8] sm:$0xff] }
 0x7f0   :  { %v8588_v3 = vpack.c.bf16 %v5278_v12, %v5270_v1  ;;  %v5356_v1 = vld [vmem:[#allocation14 + $0x5c0] sm:$0xff] }
 0x7f1   :  { %8425 = vmatpush1.bf16.msra.mxu0 %v8424_v10  ;;  %8489 = vmatpush1.bf16.msra.mxu1 %v8488_v11  ;;  %v8572_v10 = vpack.c.bf16 %v5214_v2, %v5206_v8  ;;  %v5221_v11 = vld [vmem:[#allocation14 + $0x188] sm:$0xff]  ;;  %v5292_v8 = vld [vmem:[#allocation14 + $0x3c0] sm:$0xff] }
 0x7f2   :  { %8427 = vmatprep.subr.bf16.mxu0 %v8426_v14  ;;  %8491 = vmatprep.subr.bf16.mxu1 %v8490_v15  ;;  %v8510_v14 = vpack.c.bf16 %v5229_v26, %v5221_v11  ;;  %v5231_v15 = vld [vmem:[#allocation14 + $0x1d8] sm:$0xff]  ;;  %v5286_v11 = vld [vmem:[#allocation14 + $0x390] sm:$0xff] }
 0x7f3   :  { %v8574_v17 = vpack.c.bf16 %v5231_v15, %v5223_v13  ;;  %v5294_v26 = vld [vmem:[#allocation14 + $0x3d0] sm:$0xff]  ;;  %v5309_v15 = vld [vmem:[#allocation14 + $0x448] sm:$0xff] }
 0x7f4   :  { %v8592_v13 = vpack.c.bf16 %v5294_v26, %v5286_v11  ;;  %v5364_v11 = vld [vmem:[#allocation14 + $0x600] sm:$0xff] }
 0x7f5   :  { %8429 = vmatpush1.bf16.msra.mxu0 %v8428_v21  ;;  %8493 = vmatpush1.bf16.msra.mxu1 %v8492_v24  ;;  %v8576_v21 = vpack.c.bf16 %v5230_v20, %v5222_v40  ;;  %v5237_v24 = vld [vmem:[#allocation14 + $0x208] sm:$0xff]  ;;  %v5308_v40 = vld [vmem:[#allocation14 + $0x440] sm:$0xff] }
 0x7f6   :  { %8431 = vmatprep.subr.bf16.mxu0 %v8430_v28  ;;  %8495 = vmatprep.subr.bf16.mxu1 %v8494_v29  ;;  %v5239_v28 = vld [vmem:[#allocation14 + $0x218] sm:$0xff]  ;;  %v8514_v29 = vpack.c.bf16 %v5245_v25, %v5237_v24  ;;  %v5302_v24 = vld [vmem:[#allocation14 + $0x410] sm:$0xff]  ;;  %v5372_v26 = vld [vmem:[#allocation14 + $0x640] sm:$0xff] }
 0x7f7   :  { %v5310_v25 = vld [vmem:[#allocation14 + $0x450] sm:$0xff] }
 0x7f9   :  { %8433 = vmatpush1.bf16.msra.mxu0 %v8432_v53  ;;  %8497 = vmatpush1.bf16.msra.mxu1 %v8496_v33  ;;  %v8578_v53 = vpack.c.bf16 %v5247_v30, %v5239_v28  ;;  %v8516_v33 = vpack.c.bf16 %v5244_v19, %v5236_v31  ;;  %v8596_v28 = vpack.c.bf16 %v5310_v25, %v5302_v24  ;;  %v5325_v30 = vld [vmem:[#allocation14 + $0x4c8] sm:$0xff]  ;;  %v5319_v31 = vld [vmem:[#allocation14 + $0x498] sm:$0xff]  ;;  %v5388_v25 = vld [vmem:[#allocation14 + $0x6c0] sm:$0xff] }
 0x7fa   :  { %8499 = vmatprep.subr.bf16.mxu0 %v8498_v36  ;;  %8563 = vmatprep.subr.bf16.mxu1 %v8562_v38  ;;  %v5253_v36 = vld [vmem:[#allocation14 + $0x288] sm:$0xff]  ;;  %v5255_v38 = vld [vmem:[#allocation14 + $0x298] sm:$0xff] }
 0x7fb   :  { %v8518_v43 = vpack.c.bf16 %v5261_v58, %v5253_v36  ;;  %v8582_v47 = vpack.c.bf16 %v5263_v44, %v5255_v38  ;;  %v5318_v36 = vld [vmem:[#allocation14 + $0x490] sm:$0xff]  ;;  %v5341_v44 = vld [vmem:[#allocation14 + $0x548] sm:$0xff] }
 0x7fc   :  { %4986 = vmatmul.mubr.f32.vlgmr.msra.gmra.mrb[30].mxu0 %v9761_v42  ;;  %5057 = vmatmul.mubr.f32.vlgmr.msra.gmra.mrb[30].mxu1 %v9761_v42  ;;  %v8502_v42 = vpack.c.bf16 %v5197_v52, %v5189_v49  ;;  %v5254_v49 = vld [vmem:[#allocation14 + $0x290] sm:$0xff] }
 0x7fd   :  { %8501 = vmatpush1.bf16.msra.mxu0 %v8500_v46  ;;  %8565 = vmatpush1.bf16.msra.mxu1 %v8564_v48  ;;  %v5260_v46 = vld [vmem:[#allocation14 + $0x2c0] sm:$0xff]  ;;  %v5262_v52 = vld [vmem:[#allocation14 + $0x2d0] sm:$0xff] }
 0x7fe   :  { %8503 = vmatprep.subr.bf16.mxu0 %v8502_v42  ;;  %8567 = vmatprep.subr.bf16.mxu1 %v8566_v59  ;;  %v8520_v48 = vpack.c.bf16 %v5260_v46, %v5252_v45  ;;  %v8584_v55 = vpack.c.bf16 %v5262_v52, %v5254_v49  ;;  %v5269_v42 = vld [vmem:[#allocation14 + $0x308] sm:$0xff]  ;;  %v5279_v59 = vld [vmem:[#allocation14 + $0x358] sm:$0xff]  ;;  %v5326_v58 = vld [vmem:[#allocation14 + $0x4d0] sm:$0xff] }
 0x7ff   :  { %v8522_v54 = vpack.c.bf16 %v5277_v27, %v5269_v42  ;;  %v8586_v63 = vpack.c.bf16 %v5279_v59, %v5271_v57  ;;  %v8600_v38 = vpack.c.bf16 %v5326_v58, %v5318_v36  ;;  %v5335_v45 = vld [vmem:[#allocation14 + $0x518] sm:$0xff]  ;;  %v5340_v49 = vld [vmem:[#allocation14 + $0x540] sm:$0xff]  ;;  %v5334_v42 = vld [vmem:[#allocation14 + $0x510] sm:$0xff] }
 0x800   :  { %v5342_v27 = vld [vmem:[#allocation14 + $0x550] sm:$0xff]  ;;  %v5357_v59 = vld [vmem:[#allocation14 + $0x5c8] sm:$0xff]  ;;  %v5404_v36 = vld [vmem:[#allocation14 + $0x740] sm:$0xff] }
 0x801   :  { %8505 = vmatpush1.bf16.msra.mxu0 %v8504_v62  ;;  %8569 = vmatpush1.bf16.msra.mxu1 %v8568_v0  ;;  %v5268_v62 = vld [vmem:[#allocation14 + $0x300] sm:$0xff]  ;;  %v8604_v57 = vpack.c.bf16 %v5342_v27, %v5334_v42  ;;  %v5398_v58 = vld [vmem:[#allocation14 + $0x710] sm:$0xff] }
 0x802   :  { %8507 = vmatprep.subr.bf16.mxu0 %v8506_v23  ;;  %8571 = vmatprep.subr.bf16.mxu1 %v8570_v6  ;;  %v8524_v0 = vpack.c.bf16 %v5276_v22, %v5268_v62  ;;  %v5285_v23 = vld [vmem:[#allocation14 + $0x388] sm:$0xff]  ;;  %v5295_v6 = vld [vmem:[#allocation14 + $0x3d8] sm:$0xff]  ;;  %v5420_v42 = vld [vmem:[#allocation14 + $0x7c0] sm:$0xff] }
 0x803   :  { %v8526_v56 = vpack.c.bf16 %v5293_v39, %v5285_v23  ;;  %v8590_v2 = vpack.c.bf16 %v5295_v6, %v5287_v4  ;;  %v5351_v62 = vld [vmem:[#allocation14 + $0x598] sm:$0xff]  ;;  %v5350_v23 = vld [vmem:[#allocation14 + $0x590] sm:$0xff]  ;;  %v5365_v4 = vld [vmem:[#allocation14 + $0x608] sm:$0xff] }
 0x804   :  { %v5358_v39 = vld [vmem:[#allocation14 + $0x5d0] sm:$0xff]  ;;  %v5373_v6 = vld [vmem:[#allocation14 + $0x648] sm:$0xff] }
 0x805   :  { %8509 = vmatpush1.bf16.msra.mxu0 %v8508_v7  ;;  %8573 = vmatpush1.bf16.msra.mxu1 %v8572_v10  ;;  %v5284_v7 = vld [vmem:[#allocation14 + $0x380] sm:$0xff] }
 0x806   :  { %8511 = vmatprep.subr.bf16.mxu0 %v8510_v14  ;;  %8575 = vmatprep.subr.bf16.mxu1 %v8574_v17  ;;  %v8528_v10 = vpack.c.bf16 %v5292_v8, %v5284_v7  ;;  %v5301_v14 = vld [vmem:[#allocation14 + $0x408] sm:$0xff]  ;;  %v5311_v17 = vld [vmem:[#allocation14 + $0x458] sm:$0xff] }
 0x807   :  { %v8530_v16 = vpack.c.bf16 %v5309_v15, %v5301_v14  ;;  %v8594_v20 = vpack.c.bf16 %v5311_v17, %v5303_v32  ;;  %v5367_v7 = vld [vmem:[#allocation14 + $0x618] sm:$0xff]  ;;  %v8548_v14 = vpack.c.bf16 %v5372_v26, %v5364_v11  ;;  %v5374_v15 = vld [vmem:[#allocation14 + $0x650] sm:$0xff]  ;;  %v5381_v32 = vld [vmem:[#allocation14 + $0x688] sm:$0xff] }
 0x808   :  { %v5375_v8 = vld [vmem:[#allocation14 + $0x658] sm:$0xff] }
 0x809   :  { %8513 = vmatpush1.bf16.msra.mxu0 %v8512_v18  ;;  %8577 = vmatpush1.bf16.msra.mxu1 %v8576_v21  ;;  %v5300_v18 = vld [vmem:[#allocation14 + $0x400] sm:$0xff] }
 0x80a   :  { %8515 = vmatprep.subr.bf16.mxu0 %v8514_v29  ;;  %8579 = vmatprep.subr.bf16.mxu1 %v8578_v53  ;;  %v8532_v21 = vpack.c.bf16 %v5308_v40, %v5300_v18  ;;  %v5317_v29 = vld [vmem:[#allocation14 + $0x488] sm:$0xff]  ;;  %v5327_v53 = vld [vmem:[#allocation14 + $0x4d8] sm:$0xff] }
 0x80b   :  { %v8534_v19 = vpack.c.bf16 %v5325_v30, %v5317_v29  ;;  %v8598_v34 = vpack.c.bf16 %v5327_v53, %v5319_v31  ;;  %v5383_v40 = vld [vmem:[#allocation14 + $0x698] sm:$0xff]  ;;  %v5390_v29 = vld [vmem:[#allocation14 + $0x6d0] sm:$0xff]  ;;  %v5397_v30 = vld [vmem:[#allocation14 + $0x708] sm:$0xff] }
 0x80c   :  { %v5405_v31 = vld [vmem:[#allocation14 + $0x748] sm:$0xff] }
 0x80d   :  { %8517 = vmatpush1.bf16.msra.mxu0 %v8516_v33  ;;  %8581 = vmatpush1.bf16.msra.mxu1 %v8580_v35  ;;  %v5316_v33 = vld [vmem:[#allocation14 + $0x480] sm:$0xff] }
 0x80e   :  { %8519 = vmatprep.subr.bf16.mxu0 %v8518_v43  ;;  %8583 = vmatprep.subr.bf16.mxu1 %v8582_v47  ;;  %v8536_v35 = vpack.c.bf16 %v5324_v50, %v5316_v33  ;;  %v5333_v43 = vld [vmem:[#allocation14 + $0x508] sm:$0xff]  ;;  %v5343_v47 = vld [vmem:[#allocation14 + $0x558] sm:$0xff] }
 0x80f   :  { %v8538_v46 = vpack.c.bf16 %v5341_v44, %v5333_v43  ;;  %v8602_v52 = vpack.c.bf16 %v5343_v47, %v5335_v45  ;;  %v5407_v33 = vld [vmem:[#allocation14 + $0x758] sm:$0xff]  ;;  %v5406_v43 = vld [vmem:[#allocation14 + $0x750] sm:$0xff]  ;;  %v5413_v44 = vld [vmem:[#allocation14 + $0x788] sm:$0xff] }
 0x810   :  { %v5421_v45 = vld [vmem:[#allocation14 + $0x7c8] sm:$0xff]  ;;  %v5423_v47 = vld [vmem:[#allocation14 + $0x7d8] sm:$0xff] }
 0x811   :  { %8521 = vmatpush1.bf16.msra.mxu0 %v8520_v48  ;;  %8585 = vmatpush1.bf16.msra.mxu1 %v8584_v55  ;;  %v5332_v48 = vld [vmem:[#allocation14 + $0x500] sm:$0xff] }
 0x812   :  { %8523 = vmatprep.subr.bf16.mxu0 %v8522_v54  ;;  %8587 = vmatprep.subr.bf16.mxu1 %v8586_v63  ;;  %v8540_v55 = vpack.c.bf16 %v5340_v49, %v5332_v48  ;;  %v5349_v54 = vld [vmem:[#allocation14 + $0x588] sm:$0xff]  ;;  %v5359_v63 = vld [vmem:[#allocation14 + $0x5d8] sm:$0xff]  ;;  %v8620_v49 = vpack.c.bf16 %v5406_v43, %v5398_v58  ;;  %v4503_v43 = vmul.f32 0.0, %v9745_v5  ;;  %v5160_v5 = vmul.f32 0.0, %v9752_v61 }
 0x813   :  { %v8542_v22 = vpack.c.bf16 %v5357_v59, %v5349_v54  ;;  %v8606_v12 = vpack.c.bf16 %v5359_v63, %v5351_v62  ;;  %v5422_v54 = vld [vmem:[#allocation14 + $0x7d0] sm:$0xff]  ;;  %v5185_v63 = vld [vmem:[#allocation14 + $0x68] sm:$0xff] }
 0x815   :  { %8525 = vmatpush1.bf16.msra.mxu0 %v8524_v0  ;;  %8589 = vmatpush1.bf16.msra.mxu1 %v8588_v3  ;;  %v5348_v0 = vld [vmem:[#allocation14 + $0x580] sm:$0xff] }
 0x816   :  { %8527 = vmatprep.subr.bf16.mxu0 %v8526_v56  ;;  %8591 = vmatprep.subr.bf16.mxu1 %v8590_v2  ;;  %v8544_v3 = vpack.c.bf16 %v5356_v1, %v5348_v0  ;;  %v8608_v56 = vpack.c.bf16 %v5358_v39, %v5350_v23  ;;  %v8546_v2 = vpack.c.bf16 %v5373_v6, %v5365_v4  ;;  %v5179_v0 = vld [vmem:[#allocation14 + $0x38] sm:$0xff] }
 0x819   :  { %8529 = vmatpush1.bf16.msra.mxu0 %v8528_v10  ;;  %8593 = vmatpush1.bf16.msra.mxu1 %v8592_v13  ;;  %v8610_v10 = vpack.c.bf16 %v5375_v8, %v5367_v7  ;;  %v5366_v13 = vld [vmem:[#allocation14 + $0x610] sm:$0xff] }
 0x81a   :  { %8531 = vmatprep.subr.bf16.mxu0 %v8530_v16  ;;  %8595 = vmatprep.subr.bf16.mxu1 %v8594_v20  ;;  %v5389_v16 = vld [vmem:[#allocation14 + $0x6c8] sm:$0xff]  ;;  %v8612_v17 = vpack.c.bf16 %v5374_v15, %v5366_v13  ;;  %v5391_v20 = vld [vmem:[#allocation14 + $0x6d8] sm:$0xff] }
 0x81b   :  { %v8550_v18 = vpack.c.bf16 %v5389_v16, %v5381_v32  ;;  %v8614_v24 = vpack.c.bf16 %v5391_v20, %v5383_v40  ;;  %v4510_v40 = vld [vmem:[#allocation3 + $0x5] ss:$8 sm:$0xf0] }
 0x81d   :  { %8533 = vmatpush1.bf16.msra.mxu0 %v8532_v21  ;;  %8597 = vmatpush1.bf16.msra.mxu1 %v8596_v28  ;;  %v5380_v21 = vld [vmem:[#allocation14 + $0x680] sm:$0xff]  ;;  %v5382_v28 = vld [vmem:[#allocation14 + $0x690] sm:$0xff] }
 0x81e   :  { %8535 = vmatprep.subr.bf16.mxu0 %v8534_v19  ;;  %8599 = vmatprep.subr.bf16.mxu1 %v8598_v34  ;;  %v5399_v19 = vld [vmem:[#allocation14 + $0x718] sm:$0xff]  ;;  %v8552_v53 = vpack.c.bf16 %v5388_v25, %v5380_v21  ;;  %v8616_v50 = vpack.c.bf16 %v5390_v29, %v5382_v28  ;;  %v8554_v34 = vpack.c.bf16 %v5405_v31, %v5397_v30 }
 0x821   :  { %8537 = vmatpush1.bf16.msra.mxu0 %v8536_v35  ;;  %8601 = vmatpush1.bf16.msra.mxu1 %v8600_v38  ;;  %v5396_v35 = vld [vmem:[#allocation14 + $0x700] sm:$0xff]  ;;  %v8618_v38 = vpack.c.bf16 %v5407_v33, %v5399_v19 }
 0x822   :  { %8539 = vmatprep.subr.bf16.mxu0 %v8538_v46  ;;  %8603 = vmatprep.subr.bf16.mxu1 %v8602_v52  ;;  %v5415_v46 = vld [vmem:[#allocation14 + $0x798] sm:$0xff]  ;;  %v8556_v48 = vpack.c.bf16 %v5404_v36, %v5396_v35  ;;  %v8558_v52 = vpack.c.bf16 %v5421_v45, %v5413_v44 }
 0x823   :  { %v8622_v27 = vpack.c.bf16 %v5423_v47, %v5415_v46  ;;  %v9775_v46 = vadd.f32 %v4503_v43, %v9748_v9  ;;  %v5186_v9 = vld [vmem:[#allocation14 + $0x70] sm:$0xff] }
 0x825   :  { %8541 = vmatpush1.bf16.msra.mxu0 %v8540_v55  ;;  %8605 = vmatpush1.bf16.msra.mxu1 %v8604_v57  ;;  %v5412_v55 = vld [vmem:[#allocation14 + $0x780] sm:$0xff]  ;;  %v5414_v57 = vld [vmem:[#allocation14 + $0x790] sm:$0xff] }
 0x826   :  { %8543 = vmatprep.subr.bf16.mxu0 %v8542_v22  ;;  %8607 = vmatprep.subr.bf16.mxu1 %v8606_v12  ;;  %v8560_v59 = vpack.c.bf16 %v5420_v42, %v5412_v55  ;;  %v8624_v62 = vpack.c.bf16 %v5422_v54, %v5414_v57  ;;  %v5177_v22 = vld [vmem:[#allocation14 + $0x28] sm:$0xff]  ;;  %v5187_v12 = vld [vmem:[#allocation14 + $0x78] sm:$0xff]  ;;  %v5176_v54 = vld [vmem:[#allocation14 + $0x20] sm:$0xff] }
 0x827   :  { %v8626_v1 = vpack.c.bf16 %v5185_v63, %v5177_v22  ;;  %v5193_v63 = vld [vmem:[#allocation14 + $0xa8] sm:$0xff] }
 0x829   :  { %8545 = vmatpush1.bf16.msra.mxu0 %v8544_v3  ;;  %8609 = vmatpush1.bf16.msra.mxu1 %v8608_v56  ;;  %v8690_v3 = vpack.c.bf16 %v5187_v12, %v5179_v0  ;;  %v5201_v0 = vld [vmem:[#allocation14 + $0xe8] sm:$0xff]  ;;  %v5203_v12 = vld [vmem:[#allocation14 + $0xf8] sm:$0xff] }
 0x82a   :  { %8547 = vmatprep.subr.bf16.mxu0 %v8546_v2  ;;  %8611 = vmatprep.subr.bf16.mxu1 %v8610_v10 }
 0x82d   :  { %8549 = vmatpush1.bf16.msra.mxu0 %v8548_v14  ;;  %8613 = vmatpush1.bf16.msra.mxu1 %v8612_v17 }
 0x82e   :  { %8551 = vmatprep.subr.bf16.mxu0 %v8550_v18  ;;  %8615 = vmatprep.subr.bf16.mxu1 %v8614_v24  ;;  %v4509_v24 = vld [vmem:[#allocation3 + $0x5] ss:$8 sm:$0xf] }
 0x82f   :  { %v4511_v25 = vor.u32 %v4510_v40, %v4509_v24  ;;  %v5210_v40 = vld [vmem:[#allocation14 + $0x130] sm:$0xff]  ;;  %v5233_v24 = vld [vmem:[#allocation14 + $0x1e8] sm:$0xff] }
 0x831   :  { %8553 = vmatpush1.bf16.msra.mxu0 %v8552_v53  ;;  %8617 = vmatpush1.bf16.msra.mxu1 %v8616_v50 }
 0x832   :  { %8555 = vmatprep.subr.bf16.mxu0 %v8554_v34  ;;  %8619 = vmatprep.subr.bf16.mxu1 %v8618_v38 }
 0x835   :  { %8557 = vmatpush1.bf16.msra.mxu0 %v8556_v48  ;;  %8621 = vmatpush1.bf16.msra.mxu1 %v8620_v49 }
 0x836   :  { %8559 = vmatprep.subr.bf16.mxu0 %v8558_v52  ;;  %8623 = vmatprep.subr.bf16.mxu1 %v8622_v27 }
 0x839   :  { %8561 = vmatpush1.bf16.msra.mxu0 %v8560_v59  ;;  %8625 = vmatpush1.bf16.msra.mxu1 %v8624_v62  ;;  %v5184_v59 = vld [vmem:[#allocation14 + $0x60] sm:$0xff]  ;;  %v5178_v62 = vld [vmem:[#allocation14 + $0x30] sm:$0xff] }
 0x83a   :  { %8627 = vmatprep.subr.bf16.mxu0 %v8626_v1  ;;  %8691 = vmatprep.subr.bf16.mxu1 %v8690_v3  ;;  %v5195_v1 = vld [vmem:[#allocation14 + $0xb8] sm:$0xff] }
 0x88f   :  { %v4845_v23 = vpop.f32.mrb[28].mxu0  ;;  %v4916_v39 = vpop.f32.mrb[28].mxu1 }
 0x890   :  { %v4847_v4 = vpop.f32.mrb[29].mxu0  ;;  %v4918_v56 = vpop.f32.mrb[29].mxu1 }
 0x891   :  { %v5071_v6 = vcombine.low %v4845_v23, %v4847_v4  ;;  %v5072_v7 = vcombine.low %v4916_v39, %v4918_v56  ;;  %v8628_v23 = vpack.c.bf16 %v5184_v59, %v5176_v54  ;;  %v8692_v39 = vpack.c.bf16 %v5186_v9, %v5178_v62  ;;  %v5192_v4 = vld [vmem:[#allocation14 + $0xa0] sm:$0xff]  ;;  %v5267_v54 = vld [vmem:[#allocation14 + $0x2f8] sm:$0xff] }
 0x892   :  { %v5200_v56 = vld [vmem:[#allocation14 + $0xe0] sm:$0xff] }
 0x893   :  { %v5081_v8 = vrot.slane %v5071_v6, %v9622_v60  ;;  %v5088_v2 = vrot.slane %v5072_v7, %v9622_v60  ;;  %v5194_v6 = vld [vmem:[#allocation14 + $0xb0] sm:$0xff]  ;;  %v5256_v9 = vld [vmem:[#allocation14 + $0x2a0] sm:$0xff] }
 0x894   :  { %v5202_v7 = vld [vmem:[#allocation14 + $0xf0] sm:$0xff] }
 0x895   :  { %v5103_v10 = vcombine.low %v5081_v8, %v5088_v2  ;;  %v5209_v8 = vld [vmem:[#allocation14 + $0x128] sm:$0xff]  ;;  %v8630_v2 = vpack.c.bf16 %v5201_v0, %v5193_v63  ;;  %v5264_v63 = vld [vmem:[#allocation14 + $0x2e0] sm:$0xff] }
 0x897   :  { %v5111_v20 = vrot.slane %v5103_v10, %v9622_v60  ;;  %v8694_v10 = vpack.c.bf16 %v5203_v12, %v5195_v1  ;;  %v5258_v12 = vld [vmem:[#allocation14 + $0x2b0] sm:$0xff] }
 0x8cf   :  { %v4987_v11 = vpop.f32.mrb[30].mxu0  ;;  %v5058_v26 = vpop.f32.mrb[30].mxu1 }
 0x8d0   :  { %v4989_v13 = vpop.f32.mrb[31].mxu0  ;;  %v5060_v14 = vpop.f32.mrb[31].mxu1 }
 0x8d1   :  { %v5073_v15 = vcombine.low %v4987_v11, %v4989_v13  ;;  %v5074_v32 = vcombine.low %v5058_v26, %v5060_v14  ;;  %v5217_v11 = vld [vmem:[#allocation14 + $0x168] sm:$0xff]  ;;  %v5211_v26 = vld [vmem:[#allocation14 + $0x138] sm:$0xff]  ;;  %v8632_v14 = vpack.c.bf16 %v5200_v56, %v5192_v4 }
 0x8d2   :  { %v5219_v13 = vld [vmem:[#allocation14 + $0x178] sm:$0xff] }
 0x8d3   :  { %v5095_v16 = vrot.slane %v5073_v15, %v9622_v60  ;;  %v5102_v17 = vrot.slane %v5074_v32, %v9622_v60  ;;  %v8696_v15 = vpack.c.bf16 %v5202_v7, %v5194_v6  ;;  %v5208_v32 = vld [vmem:[#allocation14 + $0x120] sm:$0xff]  ;;  %v5275_v4 = vld [vmem:[#allocation14 + $0x338] sm:$0xff]  ;;  %v8648_v6 = vpack.c.bf16 %v5264_v63, %v5256_v9 }
 0x8d4   :  { %v5283_v56 = vld [vmem:[#allocation14 + $0x378] sm:$0xff] }
 0x8d5   :  { %v5104_v18 = vcombine.low %v5095_v16, %v5102_v17  ;;  %v5216_v16 = vld [vmem:[#allocation14 + $0x160] sm:$0xff]  ;;  %v8634_v17 = vpack.c.bf16 %v5217_v11, %v5209_v8  ;;  %v8714_v11 = vpack.c.bf16 %v5283_v56, %v5275_v4  ;;  %v5339_v9 = vld [vmem:[#allocation14 + $0x538] sm:$0xff]  ;;  %v5338_v4 = vld [vmem:[#allocation14 + $0x530] sm:$0xff] }
 0x8d6   :  { %v5272_v8 = vld [vmem:[#allocation14 + $0x320] sm:$0xff]  ;;  %v5347_v63 = vld [vmem:[#allocation14 + $0x578] sm:$0xff]  ;;  %v5346_v56 = vld [vmem:[#allocation14 + $0x570] sm:$0xff] }
 0x8d7   :  { %v5118_v21 = vrot.slane %v5104_v18, %v9622_v60  ;;  %v8698_v18 = vpack.c.bf16 %v5219_v13, %v5211_v26  ;;  %v5274_v26 = vld [vmem:[#allocation14 + $0x330] sm:$0xff] }
 0x8d8   :  { %v5282_v13 = vld [vmem:[#allocation14 + $0x370] sm:$0xff] }
 0x8d9   :  { %v5119_v28 = vcombine.low %v5111_v20, %v5118_v21  ;;  %v5218_v20 = vld [vmem:[#allocation14 + $0x170] sm:$0xff]  ;;  %v5225_v21 = vld [vmem:[#allocation14 + $0x1a8] sm:$0xff] }
 0x8db   :  { %v5121_v29 = vadd.f32 %v5119_v28, %v4511_v25  ;;  %v5227_v25 = vld [vmem:[#allocation14 + $0x1b8] sm:$0xff] }
 0x8dc   :  { %v5235_v28 = vld [vmem:[#allocation14 + $0x1f8] sm:$0xff] }
 0x8dd   :  { %v6906_v30 = vmul.f32 -1.442695, %v5121_v29  ;;  %v5129_v31 = vrot.slane %v5121_v29, 2  ;;  %v5140_v53 = vrot.slane %v5121_v29, 6  ;;  %v5137_v34 = vrot.slane %v5121_v29, 4 }
 0x8de   :  { %v8636_v29 = vpack.c.bf16 %v5216_v16, %v5208_v32  ;;  %v5291_v32 = vld [vmem:[#allocation14 + $0x3b8] sm:$0xff] }
 0x8df   :  { %9122 = vpow2.f32 %v6906_v30  ;;  %v6907_v19 = vmul.f32 -1.442695, %v5129_v31  ;;  %v6908_v33 = vmul.f32 -1.442695, %v5140_v53  ;;  %v8700_v30 = vpack.c.bf16 %v5218_v20, %v5210_v40  ;;  %v5224_v31 = vld [vmem:[#allocation14 + $0x1a0] sm:$0xff]  ;;  %v5299_v16 = vld [vmem:[#allocation14 + $0x3f8] sm:$0xff] }
 0x8e0   :  { %v8638_v53 = vpack.c.bf16 %v5233_v24, %v5225_v21  ;;  %v5288_v40 = vld [vmem:[#allocation14 + $0x3a0] sm:$0xff]  ;;  %v8718_v24 = vpack.c.bf16 %v5299_v16, %v5291_v32  ;;  %v5354_v32 = vld [vmem:[#allocation14 + $0x5b0] sm:$0xff] }
 0x8e1   :  { %9124 = vpow2.f32 %v6907_v19  ;;  %v5232_v19 = vld [vmem:[#allocation14 + $0x1e0] sm:$0xff]  ;;  %v5362_v16 = vld [vmem:[#allocation14 + $0x5f0] sm:$0xff] }
 0x8e2   :  { %9126 = vpow2.f32 %v6908_v33  ;;  %v8702_v33 = vpack.c.bf16 %v5235_v28, %v5227_v25  ;;  %v8640_v43 = vpack.c.bf16 %v5232_v19, %v5224_v31  ;;  %v5296_v20 = vld [vmem:[#allocation14 + $0x3e0] sm:$0xff]  ;;  %v5290_v25 = vld [vmem:[#allocation14 + $0x3b0] sm:$0xff]  ;;  %v5307_v31 = vld [vmem:[#allocation14 + $0x438] sm:$0xff] }
 0x8e3   :  { %v5298_v28 = vld [vmem:[#allocation14 + $0x3f0] sm:$0xff]  ;;  %v5315_v19 = vld [vmem:[#allocation14 + $0x478] sm:$0xff] }
 0x8e9   :  { %v9123_v50 = vpop.eup %9122 }
 0x8ea   :  { %v5125_v35 = vadd.f32 1.0, %v9123_v50  ;;  %v5226_v50 = vld [vmem:[#allocation14 + $0x1b0] sm:$0xff] }
 0x8eb   :  { %v9125_v36 = vpop.eup %9124 }
 0x8ec   :  { %9128 = vrcp.f32 %v5125_v35  ;;  %v5134_v58 = vadd.f32 1.0, %v9125_v36  ;;  %v9127_v38 = vpop.eup %9126  ;;  %v5241_v35 = vld [vmem:[#allocation14 + $0x228] sm:$0xff] }
 0x8ed   :  { %9130 = vtanh.f32 %v5137_v34  ;;  %v5145_v48 = vadd.f32 1.0, %v9127_v38  ;;  %v5234_v34 = vld [vmem:[#allocation14 + $0x1f0] sm:$0xff]  ;;  %v5249_v36 = vld [vmem:[#allocation14 + $0x268] sm:$0xff]  ;;  %v5251_v38 = vld [vmem:[#allocation14 + $0x278] sm:$0xff] }
 0x8ee   :  { %9132 = vrcp.f32 %v5134_v58  ;;  %v5243_v58 = vld [vmem:[#allocation14 + $0x238] sm:$0xff] }
 0x8ef   :  { %9134 = vrcp.f32 %v5145_v48  ;;  %v8642_v48 = vpack.c.bf16 %v5249_v36, %v5241_v35  ;;  %v8722_v36 = vpack.c.bf16 %v5315_v19, %v5307_v31  ;;  %v5370_v31 = vld [vmem:[#allocation14 + $0x630] sm:$0xff] }
 0x8f0   :  { %v5378_v19 = vld [vmem:[#allocation14 + $0x670] sm:$0xff] }
 0x8f6   :  { %v9129_v44 = vpop.eup %9128 }
 0x8f7   :  { %v9131_v45 = vpop.eup %9130 }
 0x8f8   :  { %v9133_v47 = vpop.eup %9132  ;;  %v5149_v49 = vmul.f32 %v9131_v45, %v9129_v44  ;;  %v8704_v44 = vpack.c.bf16 %v5234_v34, %v5226_v50  ;;  %v5240_v45 = vld [vmem:[#allocation14 + $0x220] sm:$0xff] }
 0x8f9   :  { %v5148_v52 = vmul.f32 %v9133_v47, %v9775_v46  ;;  %v9135_v42 = vpop.eup %9134  ;;  %v5248_v47 = vld [vmem:[#allocation14 + $0x260] sm:$0xff] }
 0x8fa   :  { %v8644_v59 = vpack.c.bf16 %v5248_v47, %v5240_v45  ;;  %v5304_v50 = vld [vmem:[#allocation14 + $0x420] sm:$0xff]  ;;  %v5323_v45 = vld [vmem:[#allocation14 + $0x4b8] sm:$0xff] }
 0x8fb   :  { %v9778_v55 = vadd.f32 %v5149_v49, %v5148_v52  ;;  %v8706_v49 = vpack.c.bf16 %v5251_v38, %v5243_v58  ;;  %v5242_v52 = vld [vmem:[#allocation14 + $0x230] sm:$0xff]  ;;  %v5312_v34 = vld [vmem:[#allocation14 + $0x460] sm:$0xff]  ;;  %v5331_v47 = vld [vmem:[#allocation14 + $0x4f8] sm:$0xff] }
 0x8fc   :  { %v5306_v58 = vld [vmem:[#allocation14 + $0x430] sm:$0xff] }
 0x8fd   :  { %9136 = vtanh.f32 %v9778_v55  ;;  %v5314_v38 = vld [vmem:[#allocation14 + $0x470] sm:$0xff] }
 0x907   :  { %v9137_v27 = vpop.eup %9136 }
 0x908   :  { %v5152_v57 = vmul.f32 %v9137_v27, %v9135_v42  ;;  %v5250_v42 = vld [vmem:[#allocation14 + $0x270] sm:$0xff]  ;;  %v5257_v27 = vld [vmem:[#allocation14 + $0x2a8] sm:$0xff] }
 0x909   :  { %v8708_v62 = vpack.c.bf16 %v5250_v42, %v5242_v52  ;;  %v5320_v52 = vld [vmem:[#allocation14 + $0x4a0] sm:$0xff] }
 0x90a   :  { %v9782_v22 = vadd.f32 %v5160_v5, %v5152_v57  ;;  %v5265_v57 = vld [vmem:[#allocation14 + $0x2e8] sm:$0xff]  ;;  %v5259_v5 = vld [vmem:[#allocation14 + $0x2b8] sm:$0xff]  ;;  %v5328_v42 = vld [vmem:[#allocation14 + $0x4e0] sm:$0xff] }
 0x90b   :  { %v8646_v0 = vpack.c.bf16 %v5265_v57, %v5257_v27  ;;  %v8710_v1 = vpack.c.bf16 %v5267_v54, %v5259_v5  ;;  %v8726_v57 = vpack.c.bf16 %v5331_v47, %v5323_v45  ;;  %v5322_v5 = vld [vmem:[#allocation14 + $0x4b0] sm:$0xff] }
 0x90c   :  { %5166 = vst.msk [vmem:[#allocation4 + $0x5] ss:$8 sm:$0x3] %vm9531_vm0, %v9782_v22  ;;  %v5436_v3 = vrot.slane %v9782_v22, %v9580_v37  ;;  %v9791_v61 = vrot.slane %v9782_v22, %v9593_v41  ;;  %v5330_v54 = vld [vmem:[#allocation14 + $0x4f0] sm:$0xff] }
 0x90d   :  { %v5386_v45 = vld [vmem:[#allocation14 + $0x6b0] sm:$0xff] }
 0x90e   :  { %5503 = vmatprep.mubr.f32.mxu0 %v5436_v3  ;;  %5574 = vmatprep.mubr.f32.mxu1 %v5436_v3  ;;  %v5394_v47 = vld [vmem:[#allocation14 + $0x6f0] sm:$0xff] }
 0x90f   :  { %5504 = vmatmul.mubr.f32.vlgmr.msra.gmra.mrb[32].mxu0 %v9791_v61  ;;  %5575 = vmatmul.mubr.f32.vlgmr.msra.gmra.mrb[32].mxu1 %v9791_v61 }
 0x910   :  { %8629 = vmatpush1.bf16.msra.mxu0 %v8628_v23  ;;  %8693 = vmatpush1.bf16.msra.mxu1 %v8692_v39  ;;  %v5273_v23 = vld [vmem:[#allocation14 + $0x328] sm:$0xff] }
 0x911   :  { %5645 = vmatprep.mubr.f32.mxu0 %v5436_v3  ;;  %5716 = vmatprep.mubr.f32.mxu1 %v5436_v3  ;;  %v5266_v3 = vld [vmem:[#allocation14 + $0x2f0] sm:$0xff]  ;;  %v5281_v39 = vld [vmem:[#allocation14 + $0x368] sm:$0xff] }
 0x912   :  { %8631 = vmatprep.subr.bf16.mxu0 %v8630_v2  ;;  %8695 = vmatprep.subr.bf16.mxu1 %v8694_v10  ;;  %v8712_v7 = vpack.c.bf16 %v5266_v3, %v5258_v12  ;;  %v5280_v2 = vld [vmem:[#allocation14 + $0x360] sm:$0xff]  ;;  %v8650_v10 = vpack.c.bf16 %v5281_v39, %v5273_v23  ;;  %v8730_v39 = vpack.c.bf16 %v5347_v63, %v5339_v9  ;;  %v5402_v9 = vld [vmem:[#allocation14 + $0x730] sm:$0xff] }
 0x913   :  { %v5336_v12 = vld [vmem:[#allocation14 + $0x520] sm:$0xff]  ;;  %v5410_v63 = vld [vmem:[#allocation14 + $0x770] sm:$0xff] }
 0x914   :  { %8633 = vmatpush1.bf16.msra.mxu0 %v8632_v14  ;;  %8697 = vmatpush1.bf16.msra.mxu1 %v8696_v15  ;;  %v5289_v14 = vld [vmem:[#allocation14 + $0x3a8] sm:$0xff]  ;;  %v5344_v3 = vld [vmem:[#allocation14 + $0x560] sm:$0xff] }
 0x915   :  { %8635 = vmatprep.subr.bf16.mxu0 %v8634_v17  ;;  %8699 = vmatprep.subr.bf16.mxu1 %v8698_v18  ;;  %v5297_v15 = vld [vmem:[#allocation14 + $0x3e8] sm:$0xff]  ;;  %v8652_v17 = vpack.c.bf16 %v5280_v2, %v5272_v8  ;;  %v8716_v18 = vpack.c.bf16 %v5282_v13, %v5274_v26  ;;  %v5355_v8 = vld [vmem:[#allocation14 + $0x5b8] sm:$0xff]  ;;  %v5352_v26 = vld [vmem:[#allocation14 + $0x5a0] sm:$0xff] }
 0x916   :  { %v8654_v21 = vpack.c.bf16 %v5297_v15, %v5289_v14  ;;  %v5363_v2 = vld [vmem:[#allocation14 + $0x5f8] sm:$0xff]  ;;  %v5360_v13 = vld [vmem:[#allocation14 + $0x5e0] sm:$0xff] }
 0x917   :  { %v8734_v15 = vpack.c.bf16 %v5363_v2, %v5355_v8  ;;  %v5418_v8 = vld [vmem:[#allocation14 + $0x7b0] sm:$0xff] }
 0x918   :  { %8637 = vmatpush1.bf16.msra.mxu0 %v8636_v29  ;;  %8701 = vmatpush1.bf16.msra.mxu1 %v8700_v30  ;;  %v5305_v29 = vld [vmem:[#allocation14 + $0x428] sm:$0xff]  ;;  %v5426_v2 = vld [vmem:[#allocation14 + $0x7f0] sm:$0xff] }
 0x919   :  { %8639 = vmatprep.subr.bf16.mxu0 %v8638_v53  ;;  %8703 = vmatprep.subr.bf16.mxu1 %v8702_v33  ;;  %v5313_v30 = vld [vmem:[#allocation14 + $0x468] sm:$0xff]  ;;  %v8656_v53 = vpack.c.bf16 %v5296_v20, %v5288_v40  ;;  %v8720_v33 = vpack.c.bf16 %v5298_v28, %v5290_v25  ;;  %v5371_v40 = vld [vmem:[#allocation14 + $0x638] sm:$0xff]  ;;  %v5368_v25 = vld [vmem:[#allocation14 + $0x620] sm:$0xff] }
 0x91a   :  { %v8658_v35 = vpack.c.bf16 %v5313_v30, %v5305_v29  ;;  %v5379_v20 = vld [vmem:[#allocation14 + $0x678] sm:$0xff]  ;;  %v5376_v28 = vld [vmem:[#allocation14 + $0x660] sm:$0xff] }
 0x91b   :  { %v8738_v30 = vpack.c.bf16 %v5379_v20, %v5371_v40  ;;  %v5834_v40 = vld [vmem:[#allocation14 + $0x10] sm:$0xff] }
 0x91c   :  { %8641 = vmatpush1.bf16.msra.mxu0 %v8640_v43  ;;  %8705 = vmatpush1.bf16.msra.mxu1 %v8704_v44  ;;  %v5321_v43 = vld [vmem:[#allocation14 + $0x4a8] sm:$0xff] }
 0x91d   :  { %8643 = vmatprep.subr.bf16.mxu0 %v8642_v48  ;;  %8707 = vmatprep.subr.bf16.mxu1 %v8706_v49  ;;  %v5329_v44 = vld [vmem:[#allocation14 + $0x4e8] sm:$0xff]  ;;  %v8660_v48 = vpack.c.bf16 %v5312_v34, %v5304_v50  ;;  %v8724_v49 = vpack.c.bf16 %v5314_v38, %v5306_v58  ;;  %v5387_v50 = vld [vmem:[#allocation14 + $0x6b8] sm:$0xff]  ;;  %v5384_v58 = vld [vmem:[#allocation14 + $0x6a0] sm:$0xff] }
 0x91e   :  { %v8662_v27 = vpack.c.bf16 %v5329_v44, %v5321_v43  ;;  %v5395_v34 = vld [vmem:[#allocation14 + $0x6f8] sm:$0xff]  ;;  %v5392_v38 = vld [vmem:[#allocation14 + $0x6e0] sm:$0xff] }
 0x91f   :  { %v8742_v44 = vpack.c.bf16 %v5395_v34, %v5387_v50  ;;  %v5850_v50 = vld [vmem:[#allocation14 + $0x90] sm:$0xff] }
 0x920   :  { %8645 = vmatpush1.bf16.msra.mxu0 %v8644_v59  ;;  %8709 = vmatpush1.bf16.msra.mxu1 %v8708_v62  ;;  %v5337_v59 = vld [vmem:[#allocation14 + $0x528] sm:$0xff]  ;;  %v5858_v34 = vld [vmem:[#allocation14 + $0xd0] sm:$0xff] }
 0x921   :  { %8647 = vmatprep.subr.bf16.mxu0 %v8646_v0  ;;  %8711 = vmatprep.subr.bf16.mxu1 %v8710_v1  ;;  %v5345_v62 = vld [vmem:[#allocation14 + $0x568] sm:$0xff]  ;;  %v8664_v0 = vpack.c.bf16 %v5328_v42, %v5320_v52  ;;  %v8728_v1 = vpack.c.bf16 %v5330_v54, %v5322_v5  ;;  %v5403_v52 = vld [vmem:[#allocation14 + $0x738] sm:$0xff]  ;;  %v5400_v5 = vld [vmem:[#allocation14 + $0x720] sm:$0xff] }
 0x922   :  { %v8666_v23 = vpack.c.bf16 %v5345_v62, %v5337_v59  ;;  %v5411_v42 = vld [vmem:[#allocation14 + $0x778] sm:$0xff]  ;;  %v5408_v54 = vld [vmem:[#allocation14 + $0x760] sm:$0xff] }
 0x923   :  { %v8746_v62 = vpack.c.bf16 %v5411_v42, %v5403_v52  ;;  %v5866_v52 = vld [vmem:[#allocation14 + $0x110] sm:$0xff] }
 0x924   :  { %8649 = vmatpush1.bf16.msra.mxu0 %v8648_v6  ;;  %8713 = vmatpush1.bf16.msra.mxu1 %v8712_v7  ;;  %v5353_v6 = vld [vmem:[#allocation14 + $0x5a8] sm:$0xff]  ;;  %v5874_v42 = vld [vmem:[#allocation14 + $0x150] sm:$0xff] }
 0x925   :  { %8651 = vmatprep.subr.bf16.mxu0 %v8650_v10  ;;  %8715 = vmatprep.subr.bf16.mxu1 %v8714_v11  ;;  %v5361_v7 = vld [vmem:[#allocation14 + $0x5e8] sm:$0xff]  ;;  %v8668_v10 = vpack.c.bf16 %v5344_v3, %v5336_v12  ;;  %v8732_v11 = vpack.c.bf16 %v5346_v56, %v5338_v4  ;;  %v5419_v12 = vld [vmem:[#allocation14 + $0x7b8] sm:$0xff]  ;;  %v5416_v4 = vld [vmem:[#allocation14 + $0x7a0] sm:$0xff] }
 0x926   :  { %v8670_v14 = vpack.c.bf16 %v5361_v7, %v5353_v6  ;;  %v5427_v3 = vld [vmem:[#allocation14 + $0x7f8] sm:$0xff]  ;;  %v5424_v7 = vld [vmem:[#allocation14 + $0x7e0] sm:$0xff] }
 0x927   :  { %v8750_v6 = vpack.c.bf16 %v5427_v3, %v5419_v12  ;;  %v5882_v12 = vld [vmem:[#allocation14 + $0x190] sm:$0xff] }
 0x928   :  { %8653 = vmatpush1.bf16.msra.mxu0 %v8652_v17  ;;  %8717 = vmatpush1.bf16.msra.mxu1 %v8716_v18  ;;  %v5369_v17 = vld [vmem:[#allocation14 + $0x628] sm:$0xff]  ;;  %v5890_v3 = vld [vmem:[#allocation14 + $0x1d0] sm:$0xff] }
 0x929   :  { %8655 = vmatprep.subr.bf16.mxu0 %v8654_v21  ;;  %8719 = vmatprep.subr.bf16.mxu1 %v8718_v24  ;;  %v5377_v18 = vld [vmem:[#allocation14 + $0x668] sm:$0xff]  ;;  %v8672_v21 = vpack.c.bf16 %v5360_v13, %v5352_v26  ;;  %v8736_v24 = vpack.c.bf16 %v5362_v16, %v5354_v32  ;;  %v5843_v32 = vld [vmem:[#allocation14 + $0x58] sm:$0xff] }
 0x92a   :  { %v8674_v29 = vpack.c.bf16 %v5377_v18, %v5369_v17  ;;  %v5833_v26 = vld [vmem:[#allocation14 + $0x8] sm:$0xff]  ;;  %v5832_v17 = vld [vmem:[#allocation14] sm:$0xff] }
 0x92b   :  { %v5841_v13 = vld [vmem:[#allocation14 + $0x48] sm:$0xff]  ;;  %v5840_v18 = vld [vmem:[#allocation14 + $0x40] sm:$0xff] }
 0x92c   :  { %8657 = vmatpush1.bf16.msra.mxu0 %v8656_v53  ;;  %8721 = vmatpush1.bf16.msra.mxu1 %v8720_v33  ;;  %v5385_v53 = vld [vmem:[#allocation14 + $0x6a8] sm:$0xff]  ;;  %v8756_v20 = vpack.c.bf16 %v5840_v18, %v5832_v17  ;;  %v5923_v18 = vld [vmem:[#allocation14 + $0x2d8] sm:$0xff] }
 0x92d   :  { %8659 = vmatprep.subr.bf16.mxu0 %v8658_v35  ;;  %8723 = vmatprep.subr.bf16.mxu1 %v8722_v36  ;;  %v5393_v33 = vld [vmem:[#allocation14 + $0x6e8] sm:$0xff]  ;;  %v8676_v35 = vpack.c.bf16 %v5376_v28, %v5368_v25  ;;  %v8740_v36 = vpack.c.bf16 %v5378_v19, %v5370_v31  ;;  %v5848_v31 = vld [vmem:[#allocation14 + $0x80] sm:$0xff] }
 0x92e   :  { %v8678_v43 = vpack.c.bf16 %v5393_v33, %v5385_v53  ;;  %v5849_v25 = vld [vmem:[#allocation14 + $0x88] sm:$0xff]  ;;  %v5856_v19 = vld [vmem:[#allocation14 + $0xc0] sm:$0xff] }
 0x92f   :  { %v5857_v28 = vld [vmem:[#allocation14 + $0xc8] sm:$0xff]  ;;  %v8760_v33 = vpack.c.bf16 %v5856_v19, %v5848_v31  ;;  %v5931_v31 = vld [vmem:[#allocation14 + $0x318] sm:$0xff] }
 0x930   :  { %8661 = vmatpush1.bf16.msra.mxu0 %v8660_v48  ;;  %8725 = vmatpush1.bf16.msra.mxu1 %v8724_v49  ;;  %v5401_v48 = vld [vmem:[#allocation14 + $0x728] sm:$0xff] }
 0x931   :  { %8663 = vmatprep.subr.bf16.mxu0 %v8662_v27  ;;  %8727 = vmatprep.subr.bf16.mxu1 %v8726_v57  ;;  %v5409_v49 = vld [vmem:[#allocation14 + $0x768] sm:$0xff]  ;;  %v8680_v27 = vpack.c.bf16 %v5392_v38, %v5384_v58  ;;  %v8744_v57 = vpack.c.bf16 %v5394_v47, %v5386_v45  ;;  %v5867_v38 = vld [vmem:[#allocation14 + $0x118] sm:$0xff]  ;;  %v5864_v45 = vld [vmem:[#allocation14 + $0x100] sm:$0xff] }
 0x932   :  { %v8682_v59 = vpack.c.bf16 %v5409_v49, %v5401_v48  ;;  %v5873_v58 = vld [vmem:[#allocation14 + $0x148] sm:$0xff]  ;;  %v5872_v47 = vld [vmem:[#allocation14 + $0x140] sm:$0xff] }
 0x933   :  { %v8764_v49 = vpack.c.bf16 %v5872_v47, %v5864_v45  ;;  %v5947_v45 = vld [vmem:[#allocation14 + $0x398] sm:$0xff] }
 0x934   :  { %8665 = vmatpush1.bf16.msra.mxu0 %v8664_v0  ;;  %8729 = vmatpush1.bf16.msra.mxu1 %v8728_v1  ;;  %v5417_v0 = vld [vmem:[#allocation14 + $0x7a8] sm:$0xff] }
 0x935   :  { %8667 = vmatprep.subr.bf16.mxu0 %v8666_v23  ;;  %8731 = vmatprep.subr.bf16.mxu1 %v8730_v39  ;;  %v5425_v1 = vld [vmem:[#allocation14 + $0x7e8] sm:$0xff]  ;;  %v8684_v23 = vpack.c.bf16 %v5408_v54, %v5400_v5  ;;  %v8748_v39 = vpack.c.bf16 %v5410_v63, %v5402_v9  ;;  %v5883_v54 = vld [vmem:[#allocation14 + $0x198] sm:$0xff]  ;;  %v5880_v9 = vld [vmem:[#allocation14 + $0x180] sm:$0xff] }
 0x936   :  { %v8686_v56 = vpack.c.bf16 %v5425_v1, %v5417_v0  ;;  %v5889_v5 = vld [vmem:[#allocation14 + $0x1c8] sm:$0xff]  ;;  %v5888_v63 = vld [vmem:[#allocation14 + $0x1c0] sm:$0xff] }
 0x937   :  { %v8768_v1 = vpack.c.bf16 %v5888_v63, %v5880_v9  ;;  %v5963_v9 = vld [vmem:[#allocation14 + $0x418] sm:$0xff] }
 0x938   :  { %8669 = vmatpush1.bf16.msra.mxu0 %v8668_v10  ;;  %8733 = vmatpush1.bf16.msra.mxu1 %v8732_v11  ;;  %v8688_v10 = vpack.c.bf16 %v5424_v7, %v5416_v4  ;;  %v8752_v11 = vpack.c.bf16 %v5426_v2, %v5418_v8  ;;  %v5905_v4 = vld [vmem:[#allocation14 + $0x248] sm:$0xff]  ;;  %v5907_v7 = vld [vmem:[#allocation14 + $0x258] sm:$0xff]  ;;  %v5896_v8 = vld [vmem:[#allocation14 + $0x200] sm:$0xff] }
 0x939   :  { %8671 = vmatprep.subr.bf16.mxu0 %v8670_v14  ;;  %8735 = vmatprep.subr.bf16.mxu1 %v8734_v15  ;;  %v5835_v14 = vld [vmem:[#allocation14 + $0x18] sm:$0xff]  ;;  %v8754_v15 = vpack.c.bf16 %v5841_v13, %v5833_v26  ;;  %v5904_v2 = vld [vmem:[#allocation14 + $0x240] sm:$0xff]  ;;  %v5898_v26 = vld [vmem:[#allocation14 + $0x210] sm:$0xff] }
 0x93a   :  { %v8818_v16 = vpack.c.bf16 %v5843_v32, %v5835_v14  ;;  %v5906_v13 = vld [vmem:[#allocation14 + $0x250] sm:$0xff]  ;;  %v5921_v32 = vld [vmem:[#allocation14 + $0x2c8] sm:$0xff] }
 0x93b   :  { %v8836_v14 = vpack.c.bf16 %v5906_v13, %v5898_v26  ;;  %v5984_v26 = vld [vmem:[#allocation14 + $0x4c0] sm:$0xff] }
 0x93c   :  { %8673 = vmatpush1.bf16.msra.mxu0 %v8672_v21  ;;  %8737 = vmatpush1.bf16.msra.mxu1 %v8736_v24  ;;  %v5842_v21 = vld [vmem:[#allocation14 + $0x50] sm:$0xff] }
 0x93d   :  { %8675 = vmatprep.subr.bf16.mxu0 %v8674_v29  ;;  %8739 = vmatprep.subr.bf16.mxu1 %v8738_v30  ;;  %v8820_v24 = vpack.c.bf16 %v5842_v21, %v5834_v40  ;;  %v5851_v29 = vld [vmem:[#allocation14 + $0x98] sm:$0xff]  ;;  %v5912_v40 = vld [vmem:[#allocation14 + $0x280] sm:$0xff] }
 0x93e   :  { %v5859_v30 = vld [vmem:[#allocation14 + $0xd8] sm:$0xff] }
 0x93f   :  { %v8822_v53 = vpack.c.bf16 %v5859_v30, %v5851_v29  ;;  %v5937_v30 = vld [vmem:[#allocation14 + $0x348] sm:$0xff] }
 0x940   :  { %8677 = vmatpush1.bf16.msra.mxu0 %v8676_v35  ;;  %8741 = vmatpush1.bf16.msra.mxu1 %v8740_v36  ;;  %v8824_v35 = vpack.c.bf16 %v5858_v34, %v5850_v50  ;;  %v5865_v36 = vld [vmem:[#allocation14 + $0x108] sm:$0xff]  ;;  %v5936_v50 = vld [vmem:[#allocation14 + $0x340] sm:$0xff] }
 0x941   :  { %8679 = vmatprep.subr.bf16.mxu0 %v8678_v43  ;;  %8743 = vmatprep.subr.bf16.mxu1 %v8742_v44  ;;  %v8762_v43 = vpack.c.bf16 %v5873_v58, %v5865_v36  ;;  %v5875_v44 = vld [vmem:[#allocation14 + $0x158] sm:$0xff]  ;;  %v5930_v36 = vld [vmem:[#allocation14 + $0x310] sm:$0xff] }
 0x942   :  { %v8826_v48 = vpack.c.bf16 %v5875_v44, %v5867_v38  ;;  %v5938_v58 = vld [vmem:[#allocation14 + $0x350] sm:$0xff]  ;;  %v5953_v44 = vld [vmem:[#allocation14 + $0x3c8] sm:$0xff] }
 0x943   :  { %v8844_v38 = vpack.c.bf16 %v5938_v58, %v5930_v36  ;;  %v6008_v36 = vld [vmem:[#allocation14 + $0x580] sm:$0xff] }
 0x944   :  { %8681 = vmatpush1.bf16.msra.mxu0 %v8680_v27  ;;  %8745 = vmatpush1.bf16.msra.mxu1 %v8744_v57  ;;  %v8828_v27 = vpack.c.bf16 %v5874_v42, %v5866_v52  ;;  %v5881_v57 = vld [vmem:[#allocation14 + $0x188] sm:$0xff]  ;;  %v5952_v52 = vld [vmem:[#allocation14 + $0x3c0] sm:$0xff] }
 0x945   :  { %8683 = vmatprep.subr.bf16.mxu0 %v8682_v59  ;;  %8747 = vmatprep.subr.bf16.mxu1 %v8746_v62  ;;  %v8766_v59 = vpack.c.bf16 %v5889_v5, %v5881_v57  ;;  %v5891_v62 = vld [vmem:[#allocation14 + $0x1d8] sm:$0xff]  ;;  %v5946_v57 = vld [vmem:[#allocation14 + $0x390] sm:$0xff]  ;;  %v6016_v58 = vld [vmem:[#allocation14 + $0x5c0] sm:$0xff] }
 0x946   :  { %v8830_v0 = vpack.c.bf16 %v5891_v62, %v5883_v54  ;;  %v5954_v5 = vld [vmem:[#allocation14 + $0x3d0] sm:$0xff]  ;;  %v5969_v62 = vld [vmem:[#allocation14 + $0x448] sm:$0xff] }
 0x947   :  { %v8848_v54 = vpack.c.bf16 %v5954_v5, %v5946_v57  ;;  %v6032_v5 = vld [vmem:[#allocation14 + $0x640] sm:$0xff] }
 0x948   :  { %8685 = vmatpush1.bf16.msra.mxu0 %v8684_v23  ;;  %8749 = vmatpush1.bf16.msra.mxu1 %v8748_v39  ;;  %v8832_v23 = vpack.c.bf16 %v5890_v3, %v5882_v12  ;;  %v5897_v39 = vld [vmem:[#allocation14 + $0x208] sm:$0xff]  ;;  %v5968_v12 = vld [vmem:[#allocation14 + $0x440] sm:$0xff] }
 0x949   :  { %8687 = vmatprep.subr.bf16.mxu0 %v8686_v56  ;;  %8751 = vmatprep.subr.bf16.mxu1 %v8750_v6  ;;  %v5899_v56 = vld [vmem:[#allocation14 + $0x218] sm:$0xff]  ;;  %v8770_v6 = vpack.c.bf16 %v5905_v4, %v5897_v39  ;;  %v5962_v39 = vld [vmem:[#allocation14 + $0x410] sm:$0xff] }
 0x94a   :  { %v5970_v4 = vld [vmem:[#allocation14 + $0x450] sm:$0xff] }
 0x94c   :  { %8689 = vmatpush1.bf16.msra.mxu0 %v8688_v10  ;;  %8753 = vmatpush1.bf16.msra.mxu1 %v8752_v11  ;;  %v8834_v10 = vpack.c.bf16 %v5907_v7, %v5899_v56  ;;  %v8772_v11 = vpack.c.bf16 %v5904_v2, %v5896_v8  ;;  %v8852_v56 = vpack.c.bf16 %v5970_v4, %v5962_v39  ;;  %v5985_v7 = vld [vmem:[#allocation14 + $0x4c8] sm:$0xff]  ;;  %v5979_v8 = vld [vmem:[#allocation14 + $0x498] sm:$0xff]  ;;  %v6048_v39 = vld [vmem:[#allocation14 + $0x6c0] sm:$0xff] }
 0x94d   :  { %8755 = vmatprep.subr.bf16.mxu0 %v8754_v15  ;;  %8819 = vmatprep.subr.bf16.mxu1 %v8818_v16  ;;  %v5913_v15 = vld [vmem:[#allocation14 + $0x288] sm:$0xff]  ;;  %v5915_v16 = vld [vmem:[#allocation14 + $0x298] sm:$0xff] }
 0x94e   :  { %v8774_v17 = vpack.c.bf16 %v5921_v32, %v5913_v15  ;;  %v8838_v21 = vpack.c.bf16 %v5923_v18, %v5915_v16  ;;  %v5978_v15 = vld [vmem:[#allocation14 + $0x490] sm:$0xff]  ;;  %v6001_v18 = vld [vmem:[#allocation14 + $0x548] sm:$0xff] }
 0x94f   :  { %5646 = vmatmul.mubr.f32.vlgmr.msra.gmra.mrb[34].mxu0 %v9791_v61  ;;  %5717 = vmatmul.mubr.f32.vlgmr.msra.gmra.mrb[34].mxu1 %v9791_v61  ;;  %v8758_v61 = vpack.c.bf16 %v5857_v28, %v5849_v25  ;;  %v5914_v25 = vld [vmem:[#allocation14 + $0x290] sm:$0xff] }
 0x950   :  { %8757 = vmatpush1.bf16.msra.mxu0 %v8756_v20  ;;  %8821 = vmatpush1.bf16.msra.mxu1 %v8820_v24  ;;  %v5920_v20 = vld [vmem:[#allocation14 + $0x2c0] sm:$0xff]  ;;  %v5922_v28 = vld [vmem:[#allocation14 + $0x2d0] sm:$0xff] }
 0x951   :  { %8759 = vmatprep.subr.bf16.mxu0 %v8758_v61  ;;  %8823 = vmatprep.subr.bf16.mxu1 %v8822_v53  ;;  %v8776_v24 = vpack.c.bf16 %v5920_v20, %v5912_v40  ;;  %v8840_v29 = vpack.c.bf16 %v5922_v28, %v5914_v25  ;;  %v5929_v61 = vld [vmem:[#allocation14 + $0x308] sm:$0xff]  ;;  %v5939_v53 = vld [vmem:[#allocation14 + $0x358] sm:$0xff]  ;;  %v5986_v32 = vld [vmem:[#allocation14 + $0x4d0] sm:$0xff] }
 0x952   :  { %v8778_v19 = vpack.c.bf16 %v5937_v30, %v5929_v61  ;;  %v8842_v34 = vpack.c.bf16 %v5939_v53, %v5931_v31  ;;  %v8856_v16 = vpack.c.bf16 %v5986_v32, %v5978_v15  ;;  %v5995_v40 = vld [vmem:[#allocation14 + $0x518] sm:$0xff]  ;;  %v6000_v25 = vld [vmem:[#allocation14 + $0x540] sm:$0xff]  ;;  %v5994_v61 = vld [vmem:[#allocation14 + $0x510] sm:$0xff] }
 0x953   :  { %v6002_v30 = vld [vmem:[#allocation14 + $0x550] sm:$0xff]  ;;  %v6009_v31 = vld [vmem:[#allocation14 + $0x588] sm:$0xff]  ;;  %v6064_v15 = vld [vmem:[#allocation14 + $0x740] sm:$0xff] }
 0x954   :  { %8761 = vmatpush1.bf16.msra.mxu0 %v8760_v33  ;;  %8825 = vmatpush1.bf16.msra.mxu1 %v8824_v35  ;;  %v5928_v33 = vld [vmem:[#allocation14 + $0x300] sm:$0xff]  ;;  %v6017_v53 = vld [vmem:[#allocation14 + $0x5c8] sm:$0xff]  ;;  %v6058_v32 = vld [vmem:[#allocation14 + $0x710] sm:$0xff] }
 0x955   :  { %8763 = vmatprep.subr.bf16.mxu0 %v8762_v43  ;;  %8827 = vmatprep.subr.bf16.mxu1 %v8826_v48  ;;  %v8780_v35 = vpack.c.bf16 %v5936_v50, %v5928_v33  ;;  %v5945_v43 = vld [vmem:[#allocation14 + $0x388] sm:$0xff]  ;;  %v5955_v48 = vld [vmem:[#allocation14 + $0x3d8] sm:$0xff] }
 0x956   :  { %v8782_v47 = vpack.c.bf16 %v5953_v44, %v5945_v43  ;;  %v8846_v42 = vpack.c.bf16 %v5955_v48, %v5947_v45  ;;  %v6011_v33 = vld [vmem:[#allocation14 + $0x598] sm:$0xff]  ;;  %v8800_v43 = vpack.c.bf16 %v6016_v58, %v6008_v36  ;;  %v6018_v44 = vld [vmem:[#allocation14 + $0x5d0] sm:$0xff]  ;;  %v6025_v45 = vld [vmem:[#allocation14 + $0x608] sm:$0xff] }
 0x957   :  { %v6019_v50 = vld [vmem:[#allocation14 + $0x5d8] sm:$0xff] }
 0x958   :  { %8765 = vmatpush1.bf16.msra.mxu0 %v8764_v49  ;;  %8829 = vmatpush1.bf16.msra.mxu1 %v8828_v27  ;;  %v5944_v49 = vld [vmem:[#allocation14 + $0x380] sm:$0xff]  ;;  %v5847_v58 = vld [vmem:[#allocation14 + $0x78] sm:$0xff] }
 0x959   :  { %8767 = vmatprep.subr.bf16.mxu0 %v8766_v59  ;;  %8831 = vmatprep.subr.bf16.mxu1 %v8830_v0  ;;  %v8784_v27 = vpack.c.bf16 %v5952_v52, %v5944_v49  ;;  %v5961_v59 = vld [vmem:[#allocation14 + $0x408] sm:$0xff]  ;;  %v5971_v0 = vld [vmem:[#allocation14 + $0x458] sm:$0xff] }
 0x95a   :  { %v8786_v63 = vpack.c.bf16 %v5969_v62, %v5961_v59  ;;  %v8850_v3 = vpack.c.bf16 %v5971_v0, %v5963_v9  ;;  %v6027_v52 = vld [vmem:[#allocation14 + $0x618] sm:$0xff]  ;;  %v6034_v59 = vld [vmem:[#allocation14 + $0x650] sm:$0xff]  ;;  %v6041_v9 = vld [vmem:[#allocation14 + $0x688] sm:$0xff] }
 0x95b   :  { %v6043_v0 = vld [vmem:[#allocation14 + $0x698] sm:$0xff] }
 0x95c   :  { %8769 = vmatpush1.bf16.msra.mxu0 %v8768_v1  ;;  %8833 = vmatpush1.bf16.msra.mxu1 %v8832_v23  ;;  %v5960_v1 = vld [vmem:[#allocation14 + $0x400] sm:$0xff] }
 0x95d   :  { %8771 = vmatprep.subr.bf16.mxu0 %v8770_v6  ;;  %8835 = vmatprep.subr.bf16.mxu1 %v8834_v10  ;;  %v8788_v23 = vpack.c.bf16 %v5968_v12, %v5960_v1  ;;  %v5977_v6 = vld [vmem:[#allocation14 + $0x488] sm:$0xff]  ;;  %v5987_v10 = vld [vmem:[#allocation14 + $0x4d8] sm:$0xff] }
 0x95e   :  { %v8790_v2 = vpack.c.bf16 %v5985_v7, %v5977_v6  ;;  %v8854_v13 = vpack.c.bf16 %v5987_v10, %v5979_v8  ;;  %v6050_v6 = vld [vmem:[#allocation14 + $0x6d0] sm:$0xff]  ;;  %v6057_v7 = vld [vmem:[#allocation14 + $0x708] sm:$0xff]  ;;  %v6067_v10 = vld [vmem:[#allocation14 + $0x758] sm:$0xff] }
 0x95f   :  { %v6065_v8 = vld [vmem:[#allocation14 + $0x748] sm:$0xff] }
 0x960   :  { %8773 = vmatpush1.bf16.msra.mxu0 %v8772_v11  ;;  %8837 = vmatpush1.bf16.msra.mxu1 %v8836_v14  ;;  %v5976_v11 = vld [vmem:[#allocation14 + $0x480] sm:$0xff] }
 0x961   :  { %8775 = vmatprep.subr.bf16.mxu0 %v8774_v17  ;;  %8839 = vmatprep.subr.bf16.mxu1 %v8838_v21  ;;  %v8792_v14 = vpack.c.bf16 %v5984_v26, %v5976_v11  ;;  %v5993_v17 = vld [vmem:[#allocation14 + $0x508] sm:$0xff]  ;;  %v6003_v21 = vld [vmem:[#allocation14 + $0x558] sm:$0xff] }
 0x962   :  { %v8794_v20 = vpack.c.bf16 %v6001_v18, %v5993_v17  ;;  %v8858_v28 = vpack.c.bf16 %v6003_v21, %v5995_v40  ;;  %v6066_v17 = vld [vmem:[#allocation14 + $0x750] sm:$0xff]  ;;  %v6073_v18 = vld [vmem:[#allocation14 + $0x788] sm:$0xff]  ;;  %v6083_v21 = vld [vmem:[#allocation14 + $0x7d8] sm:$0xff] }
 0x963   :  { %v6081_v40 = vld [vmem:[#allocation14 + $0x7c8] sm:$0xff] }
 0x964   :  { %8777 = vmatpush1.bf16.msra.mxu0 %v8776_v24  ;;  %8841 = vmatpush1.bf16.msra.mxu1 %v8840_v29  ;;  %v5992_v24 = vld [vmem:[#allocation14 + $0x500] sm:$0xff] }
 0x965   :  { %8779 = vmatprep.subr.bf16.mxu0 %v8778_v19  ;;  %8843 = vmatprep.subr.bf16.mxu1 %v8842_v34  ;;  %v8796_v29 = vpack.c.bf16 %v6000_v25, %v5992_v24  ;;  %v8860_v19 = vpack.c.bf16 %v6002_v30, %v5994_v61  ;;  %v8798_v34 = vpack.c.bf16 %v6017_v53, %v6009_v31  ;;  %v6080_v61 = vld [vmem:[#allocation14 + $0x7c0] sm:$0xff]  ;;  %v6074_v31 = vld [vmem:[#allocation14 + $0x790] sm:$0xff] }
 0x966   :  { %v8876_v25 = vpack.c.bf16 %v6066_v17, %v6058_v32  ;;  %v5163_v17 = vmul.f32 0.0, %v9775_v46  ;;  %v5820_v46 = vmul.f32 0.0, %v9782_v22 }
 0x968   :  { %8781 = vmatpush1.bf16.msra.mxu0 %v8780_v35  ;;  %8845 = vmatpush1.bf16.msra.mxu1 %v8844_v38  ;;  %v8862_v35 = vpack.c.bf16 %v6019_v50, %v6011_v33  ;;  %v6010_v38 = vld [vmem:[#allocation14 + $0x590] sm:$0xff]  ;;  %v5837_v50 = vld [vmem:[#allocation14 + $0x28] sm:$0xff] }
 0x969   :  { %8783 = vmatprep.subr.bf16.mxu0 %v8782_v47  ;;  %8847 = vmatprep.subr.bf16.mxu1 %v8846_v42  ;;  %v6033_v47 = vld [vmem:[#allocation14 + $0x648] sm:$0xff]  ;;  %v8864_v48 = vpack.c.bf16 %v6018_v44, %v6010_v38  ;;  %v6035_v42 = vld [vmem:[#allocation14 + $0x658] sm:$0xff] }
 0x96a   :  { %v8802_v49 = vpack.c.bf16 %v6033_v47, %v6025_v45  ;;  %v8866_v57 = vpack.c.bf16 %v6035_v42, %v6027_v52 }
 0x96c   :  { %8785 = vmatpush1.bf16.msra.mxu0 %v8784_v27  ;;  %8849 = vmatpush1.bf16.msra.mxu1 %v8848_v54  ;;  %v6024_v27 = vld [vmem:[#allocation14 + $0x600] sm:$0xff]  ;;  %v6026_v54 = vld [vmem:[#allocation14 + $0x610] sm:$0xff] }
 0x96d   :  { %8787 = vmatprep.subr.bf16.mxu0 %v8786_v63  ;;  %8851 = vmatprep.subr.bf16.mxu1 %v8850_v3  ;;  %v8804_v62 = vpack.c.bf16 %v6032_v5, %v6024_v27  ;;  %v6049_v63 = vld [vmem:[#allocation14 + $0x6c8] sm:$0xff]  ;;  %v8868_v1 = vpack.c.bf16 %v6034_v59, %v6026_v54  ;;  %v6051_v3 = vld [vmem:[#allocation14 + $0x6d8] sm:$0xff] }
 0x96e   :  { %v8806_v12 = vpack.c.bf16 %v6049_v63, %v6041_v9  ;;  %v8870_v4 = vpack.c.bf16 %v6051_v3, %v6043_v0 }
 0x970   :  { %8789 = vmatpush1.bf16.msra.mxu0 %v8788_v23  ;;  %8853 = vmatpush1.bf16.msra.mxu1 %v8852_v56  ;;  %v6040_v23 = vld [vmem:[#allocation14 + $0x680] sm:$0xff]  ;;  %v6042_v56 = vld [vmem:[#allocation14 + $0x690] sm:$0xff] }
 0x971   :  { %8791 = vmatprep.subr.bf16.mxu0 %v8790_v2  ;;  %8855 = vmatprep.subr.bf16.mxu1 %v8854_v13  ;;  %v6059_v2 = vld [vmem:[#allocation14 + $0x718] sm:$0xff]  ;;  %v8808_v11 = vpack.c.bf16 %v6048_v39, %v6040_v23  ;;  %v8872_v26 = vpack.c.bf16 %v6050_v6, %v6042_v56  ;;  %v8810_v13 = vpack.c.bf16 %v6065_v8, %v6057_v7 }
 0x972   :  { %v5169_v39 = vld [vmem:[#allocation3 + $0x6] ss:$8 sm:$0xf] }
 0x974   :  { %8793 = vmatpush1.bf16.msra.mxu0 %v8792_v14  ;;  %8857 = vmatpush1.bf16.msra.mxu1 %v8856_v16  ;;  %v6056_v14 = vld [vmem:[#allocation14 + $0x700] sm:$0xff]  ;;  %v8874_v16 = vpack.c.bf16 %v6067_v10, %v6059_v2 }
 0x975   :  { %8795 = vmatprep.subr.bf16.mxu0 %v8794_v20  ;;  %8859 = vmatprep.subr.bf16.mxu1 %v8858_v28  ;;  %v6075_v20 = vld [vmem:[#allocation14 + $0x798] sm:$0xff]  ;;  %v8812_v24 = vpack.c.bf16 %v6064_v15, %v6056_v14  ;;  %v8814_v28 = vpack.c.bf16 %v6081_v40, %v6073_v18 }
 0x976   :  { %v8878_v30 = vpack.c.bf16 %v6083_v21, %v6075_v20  ;;  %v9805_v20 = vadd.f32 %v5163_v17, %v9778_v55  ;;  %v5846_v55 = vld [vmem:[#allocation14 + $0x70] sm:$0xff]  ;;  %v5900_v17 = vld [vmem:[#allocation14 + $0x220] sm:$0xff] }
 0x978   :  { %8797 = vmatpush1.bf16.msra.mxu0 %v8796_v29  ;;  %8861 = vmatpush1.bf16.msra.mxu1 %v8860_v19  ;;  %v6072_v29 = vld [vmem:[#allocation14 + $0x780] sm:$0xff]  ;;  %v6082_v19 = vld [vmem:[#allocation14 + $0x7d0] sm:$0xff] }
 0x979   :  { %8799 = vmatprep.subr.bf16.mxu0 %v8798_v34  ;;  %8863 = vmatprep.subr.bf16.mxu1 %v8862_v35  ;;  %v8816_v53 = vpack.c.bf16 %v6080_v61, %v6072_v29  ;;  %v8880_v33 = vpack.c.bf16 %v6082_v19, %v6074_v31  ;;  %v5845_v34 = vld [vmem:[#allocation14 + $0x68] sm:$0xff]  ;;  %v5839_v35 = vld [vmem:[#allocation14 + $0x38] sm:$0xff]  ;;  %v5836_v19 = vld [vmem:[#allocation14 + $0x20] sm:$0xff] }
 0x97a   :  { %v8882_v36 = vpack.c.bf16 %v5845_v34, %v5837_v50  ;;  %v8946_v44 = vpack.c.bf16 %v5847_v58, %v5839_v35  ;;  %v5853_v34 = vld [vmem:[#allocation14 + $0xa8] sm:$0xff]  ;;  %v5863_v58 = vld [vmem:[#allocation14 + $0xf8] sm:$0xff] }
 0x97b   :  { %v5861_v35 = vld [vmem:[#allocation14 + $0xe8] sm:$0xff] }
 0x97c   :  { %8801 = vmatpush1.bf16.msra.mxu0 %v8800_v43  ;;  %8865 = vmatpush1.bf16.msra.mxu1 %v8864_v48 }
 0x97d   :  { %8803 = vmatprep.subr.bf16.mxu0 %v8802_v49  ;;  %8867 = vmatprep.subr.bf16.mxu1 %v8866_v57 }
 0x980   :  { %8805 = vmatpush1.bf16.msra.mxu0 %v8804_v62  ;;  %8869 = vmatpush1.bf16.msra.mxu1 %v8868_v1 }
 0x981   :  { %8807 = vmatprep.subr.bf16.mxu0 %v8806_v12  ;;  %8871 = vmatprep.subr.bf16.mxu1 %v8870_v4  ;;  %v5170_v12 = vld [vmem:[#allocation3 + $0x6] ss:$8 sm:$0xf0] }
 0x982   :  { %v5171_v4 = vor.u32 %v5170_v12, %v5169_v39  ;;  %v5885_v12 = vld [vmem:[#allocation14 + $0x1a8] sm:$0xff]  ;;  %v5895_v39 = vld [vmem:[#allocation14 + $0x1f8] sm:$0xff] }
 0x984   :  { %8809 = vmatpush1.bf16.msra.mxu0 %v8808_v11  ;;  %8873 = vmatpush1.bf16.msra.mxu1 %v8872_v26 }
 0x985   :  { %8811 = vmatprep.subr.bf16.mxu0 %v8810_v13  ;;  %8875 = vmatprep.subr.bf16.mxu1 %v8874_v16 }
 0x988   :  { %8813 = vmatpush1.bf16.msra.mxu0 %v8812_v24  ;;  %8877 = vmatpush1.bf16.msra.mxu1 %v8876_v25 }
 0x989   :  { %8815 = vmatprep.subr.bf16.mxu0 %v8814_v28  ;;  %8879 = vmatprep.subr.bf16.mxu1 %v8878_v30 }
 0x98c   :  { %8817 = vmatpush1.bf16.msra.mxu0 %v8816_v53  ;;  %8881 = vmatpush1.bf16.msra.mxu1 %v8880_v33  ;;  %v5844_v53 = vld [vmem:[#allocation14 + $0x60] sm:$0xff]  ;;  %v5838_v33 = vld [vmem:[#allocation14 + $0x30] sm:$0xff] }
 0x98d   :  { %8883 = vmatprep.subr.bf16.mxu0 %v8882_v36  ;;  %8947 = vmatprep.subr.bf16.mxu1 %v8946_v44  ;;  %v5855_v36 = vld [vmem:[#allocation14 + $0xb8] sm:$0xff]  ;;  %v8948_v44 = vpack.c.bf16 %v5846_v55, %v5838_v33  ;;  %v5924_v33 = vld [vmem:[#allocation14 + $0x2e0] sm:$0xff] }
 0x9e2   :  { %v5505_v38 = vpop.f32.mrb[32].mxu0  ;;  %v5576_v43 = vpop.f32.mrb[32].mxu1 }
 0x9e3   :  { %v5507_v45 = vpop.f32.mrb[33].mxu0  ;;  %v5578_v47 = vpop.f32.mrb[33].mxu1 }
 0x9e4   :  { %v5731_v48 = vcombine.low %v5505_v38, %v5507_v45  ;;  %v5732_v49 = vcombine.low %v5576_v43, %v5578_v47  ;;  %v8884_v43 = vpack.c.bf16 %v5844_v53, %v5836_v19  ;;  %v5852_v45 = vld [vmem:[#allocation14 + $0xa0] sm:$0xff] }
 0x9e5   :  { %v5860_v47 = vld [vmem:[#allocation14 + $0xe0] sm:$0xff] }
 0x9e6   :  { %v5741_v52 = vrot.slane %v5731_v48, %v9622_v60  ;;  %v5748_v42 = vrot.slane %v5732_v49, %v9622_v60  ;;  %v5854_v48 = vld [vmem:[#allocation14 + $0xb0] sm:$0xff]  ;;  %v5916_v53 = vld [vmem:[#allocation14 + $0x2a0] sm:$0xff] }
 0x9e7   :  { %v5862_v49 = vld [vmem:[#allocation14 + $0xf0] sm:$0xff] }
 0x9e8   :  { %v5763_v27 = vcombine.low %v5741_v52, %v5748_v42  ;;  %v5869_v52 = vld [vmem:[#allocation14 + $0x128] sm:$0xff]  ;;  %v8886_v42 = vpack.c.bf16 %v5861_v35, %v5853_v34  ;;  %v5918_v35 = vld [vmem:[#allocation14 + $0x2b0] sm:$0xff] }
 0x9ea   :  { %v5771_v3 = vrot.slane %v5763_v27, %v9622_v60  ;;  %v8950_v27 = vpack.c.bf16 %v5863_v58, %v5855_v36  ;;  %v5926_v36 = vld [vmem:[#allocation14 + $0x2f0] sm:$0xff]  ;;  %v5933_v58 = vld [vmem:[#allocation14 + $0x328] sm:$0xff] }
 0xa22   :  { %v5647_v57 = vpop.f32.mrb[34].mxu0  ;;  %v5718_v5 = vpop.f32.mrb[34].mxu1 }
 0xa23   :  { %v5649_v54 = vpop.f32.mrb[35].mxu0  ;;  %v5720_v59 = vpop.f32.mrb[35].mxu1 }
 0xa24   :  { %v5733_v62 = vcombine.low %v5647_v57, %v5649_v54  ;;  %v5734_v9 = vcombine.low %v5718_v5, %v5720_v59  ;;  %v5877_v57 = vld [vmem:[#allocation14 + $0x168] sm:$0xff]  ;;  %v5871_v5 = vld [vmem:[#allocation14 + $0x138] sm:$0xff]  ;;  %v5868_v59 = vld [vmem:[#allocation14 + $0x120] sm:$0xff] }
 0xa25   :  { %v5879_v54 = vld [vmem:[#allocation14 + $0x178] sm:$0xff] }
 0xa26   :  { %v5755_v63 = vrot.slane %v5733_v62, %v9622_v60  ;;  %v5762_v0 = vrot.slane %v5734_v9, %v9622_v60  ;;  %v5876_v62 = vld [vmem:[#allocation14 + $0x160] sm:$0xff]  ;;  %v8890_v9 = vpack.c.bf16 %v5877_v57, %v5869_v52  ;;  %v5942_v57 = vld [vmem:[#allocation14 + $0x370] sm:$0xff] }
 0xa28   :  { %v5764_v1 = vcombine.low %v5755_v63, %v5762_v0  ;;  %v8954_v63 = vpack.c.bf16 %v5879_v54, %v5871_v5  ;;  %v5870_v0 = vld [vmem:[#allocation14 + $0x130] sm:$0xff]  ;;  %v5949_v5 = vld [vmem:[#allocation14 + $0x3a8] sm:$0xff] }
 0xa29   :  { %v5957_v54 = vld [vmem:[#allocation14 + $0x3e8] sm:$0xff] }
 0xa2a   :  { %v5778_v23 = vrot.slane %v5764_v1, %v9622_v60  ;;  %v5878_v1 = vld [vmem:[#allocation14 + $0x170] sm:$0xff] }
 0xa2c   :  { %v5779_v56 = vcombine.low %v5771_v3, %v5778_v23  ;;  %v5893_v3 = vld [vmem:[#allocation14 + $0x1e8] sm:$0xff]  ;;  %v5887_v23 = vld [vmem:[#allocation14 + $0x1b8] sm:$0xff] }
 0xa2e   :  { %v5781_v6 = vadd.f32 %v5779_v56, %v5171_v4  ;;  %v8892_v4 = vpack.c.bf16 %v5876_v62, %v5868_v59  ;;  %v8956_v56 = vpack.c.bf16 %v5878_v1, %v5870_v0  ;;  %v8910_v0 = vpack.c.bf16 %v5957_v54, %v5949_v5  ;;  %v6014_v5 = vld [vmem:[#allocation14 + $0x5b0] sm:$0xff] }
 0xa2f   :  { %v6022_v54 = vld [vmem:[#allocation14 + $0x5f0] sm:$0xff] }
 0xa30   :  { %v6909_v7 = vmul.f32 -1.442695, %v5781_v6  ;;  %v5789_v8 = vrot.slane %v5781_v6, 2  ;;  %v5800_v10 = vrot.slane %v5781_v6, 6  ;;  %v5797_v13 = vrot.slane %v5781_v6, 4  ;;  %v5884_v6 = vld [vmem:[#allocation14 + $0x1a0] sm:$0xff] }
 0xa32   :  { %9138 = vpow2.f32 %v6909_v7  ;;  %v6910_v2 = vmul.f32 -1.442695, %v5789_v8  ;;  %v6911_v11 = vmul.f32 -1.442695, %v5800_v10  ;;  %v5892_v7 = vld [vmem:[#allocation14 + $0x1e0] sm:$0xff]  ;;  %v8894_v8 = vpack.c.bf16 %v5893_v3, %v5885_v12  ;;  %v5886_v10 = vld [vmem:[#allocation14 + $0x1b0] sm:$0xff] }
 0xa33   :  { %v5950_v12 = vld [vmem:[#allocation14 + $0x3b0] sm:$0xff] }
 0xa34   :  { %9140 = vpow2.f32 %v6910_v2  ;;  %v8958_v2 = vpack.c.bf16 %v5895_v39, %v5887_v23  ;;  %v5958_v3 = vld [vmem:[#allocation14 + $0x3f0] sm:$0xff]  ;;  %v5965_v23 = vld [vmem:[#allocation14 + $0x428] sm:$0xff] }
 0xa35   :  { %9142 = vpow2.f32 %v6911_v11  ;;  %v5894_v11 = vld [vmem:[#allocation14 + $0x1f0] sm:$0xff]  ;;  %v5973_v39 = vld [vmem:[#allocation14 + $0x468] sm:$0xff] }
 0xa3c   :  { %v9139_v26 = vpop.eup %9138 }
 0xa3d   :  { %v5785_v14 = vadd.f32 1.0, %v9139_v26  ;;  %v5901_v26 = vld [vmem:[#allocation14 + $0x228] sm:$0xff] }
 0xa3e   :  { %v9141_v15 = vpop.eup %9140 }
 0xa3f   :  { %9144 = vrcp.f32 %v5785_v14  ;;  %v5794_v32 = vadd.f32 1.0, %v9141_v15  ;;  %v9143_v16 = vpop.eup %9142  ;;  %v5903_v14 = vld [vmem:[#allocation14 + $0x238] sm:$0xff] }
 0xa40   :  { %9146 = vtanh.f32 %v5797_v13  ;;  %v5805_v24 = vadd.f32 1.0, %v9143_v16  ;;  %v5909_v13 = vld [vmem:[#allocation14 + $0x268] sm:$0xff]  ;;  %v5911_v15 = vld [vmem:[#allocation14 + $0x278] sm:$0xff]  ;;  %v8960_v16 = vpack.c.bf16 %v5894_v11, %v5886_v10  ;;  %v8914_v10 = vpack.c.bf16 %v5973_v39, %v5965_v23  ;;  %v6030_v23 = vld [vmem:[#allocation14 + $0x630] sm:$0xff] }
 0xa41   :  { %9148 = vrcp.f32 %v5794_v32  ;;  %v8896_v32 = vpack.c.bf16 %v5892_v7, %v5884_v6  ;;  %v8976_v7 = vpack.c.bf16 %v5958_v3, %v5950_v12  ;;  %v6038_v39 = vld [vmem:[#allocation14 + $0x670] sm:$0xff] }
 0xa42   :  { %9150 = vrcp.f32 %v5805_v24  ;;  %v5902_v24 = vld [vmem:[#allocation14 + $0x230] sm:$0xff] }
 0xa49   :  { %v9145_v18 = vpop.eup %9144 }
 0xa4a   :  { %v9147_v40 = vpop.eup %9146 }
 0xa4b   :  { %v9149_v21 = vpop.eup %9148  ;;  %v5809_v25 = vmul.f32 %v9147_v40, %v9145_v18  ;;  %v5908_v18 = vld [vmem:[#allocation14 + $0x260] sm:$0xff]  ;;  %v8898_v40 = vpack.c.bf16 %v5909_v13, %v5901_v26  ;;  %v5966_v26 = vld [vmem:[#allocation14 + $0x430] sm:$0xff] }
 0xa4c   :  { %v5808_v28 = vmul.f32 %v9149_v21, %v9805_v20  ;;  %v9151_v61 = vpop.eup %9150  ;;  %v8962_v21 = vpack.c.bf16 %v5911_v15, %v5903_v14  ;;  %v5974_v13 = vld [vmem:[#allocation14 + $0x470] sm:$0xff]  ;;  %v5981_v14 = vld [vmem:[#allocation14 + $0x4a8] sm:$0xff] }
 0xa4d   :  { %v5989_v15 = vld [vmem:[#allocation14 + $0x4e8] sm:$0xff] }
 0xa4e   :  { %v9808_v29 = vadd.f32 %v5809_v25, %v5808_v28  ;;  %v5910_v25 = vld [vmem:[#allocation14 + $0x270] sm:$0xff]  ;;  %v5917_v28 = vld [vmem:[#allocation14 + $0x2a8] sm:$0xff] }
 0xa4f   :  { %v8964_v19 = vpack.c.bf16 %v5910_v25, %v5902_v24  ;;  %v8918_v24 = vpack.c.bf16 %v5989_v15, %v5981_v14  ;;  %v6046_v14 = vld [vmem:[#allocation14 + $0x6b0] sm:$0xff] }
 0xa50   :  { %9152 = vtanh.f32 %v9808_v29  ;;  %v6054_v15 = vld [vmem:[#allocation14 + $0x6f0] sm:$0xff] }
 0xa5a   :  { %v9153_v30 = vpop.eup %9152 }
 0xa5b   :  { %v5812_v31 = vmul.f32 %v9153_v30, %v9151_v61  ;;  %v5925_v61 = vld [vmem:[#allocation14 + $0x2e8] sm:$0xff]  ;;  %v5919_v30 = vld [vmem:[#allocation14 + $0x2b8] sm:$0xff] }
 0xa5c   :  { %v8902_v55 = vpack.c.bf16 %v5925_v61, %v5917_v28  ;;  %v5982_v28 = vld [vmem:[#allocation14 + $0x4b0] sm:$0xff] }
 0xa5d   :  { %v9812_v50 = vadd.f32 %v5820_v46, %v5812_v31  ;;  %v5927_v31 = vld [vmem:[#allocation14 + $0x2f8] sm:$0xff]  ;;  %v8900_v46 = vpack.c.bf16 %v5908_v18, %v5900_v17  ;;  %v8980_v18 = vpack.c.bf16 %v5974_v13, %v5966_v26  ;;  %v5990_v61 = vld [vmem:[#allocation14 + $0x4f0] sm:$0xff] }
 0xa5e   :  { %v8966_v34 = vpack.c.bf16 %v5927_v31, %v5919_v30  ;;  %v5997_v30 = vld [vmem:[#allocation14 + $0x528] sm:$0xff] }
 0xa5f   :  { %5826 = vst.msk [vmem:[#allocation4 + $0x6] ss:$8 sm:$0x3] %vm9531_vm0, %v9812_v50  ;;  %v6096_v38 = vrot.slane %v9812_v50, %v9580_v37  ;;  %v9821_v22 = vrot.slane %v9812_v50, %v9593_v41  ;;  %v8888_v37 = vpack.c.bf16 %v5860_v47, %v5852_v45  ;;  %v8952_v41 = vpack.c.bf16 %v5862_v49, %v5854_v48  ;;  %v5932_v48 = vld [vmem:[#allocation14 + $0x320] sm:$0xff]  ;;  %v6005_v31 = vld [vmem:[#allocation14 + $0x568] sm:$0xff] }
 0xa60   :  { %v8904_v45 = vpack.c.bf16 %v5924_v33, %v5916_v53  ;;  %v8968_v47 = vpack.c.bf16 %v5926_v36, %v5918_v35  ;;  %v5940_v49 = vld [vmem:[#allocation14 + $0x360] sm:$0xff]  ;;  %v8984_v33 = vpack.c.bf16 %v5990_v61, %v5982_v28  ;;  %v8922_v35 = vpack.c.bf16 %v6005_v31, %v5997_v30  ;;  %v6062_v30 = vld [vmem:[#allocation14 + $0x730] sm:$0xff] }
 0xa61   :  { %6163 = vmatprep.mubr.f32.mxu0 %v6096_v38  ;;  %6234 = vmatprep.mubr.f32.mxu1 %v6096_v38  ;;  %v8908_v59 = vpack.c.bf16 %v5940_v49, %v5932_v48  ;;  %v6070_v31 = vld [vmem:[#allocation14 + $0x770] sm:$0xff] }
 0xa62   :  { %6164 = vmatmul.mubr.f32.vlgmr.msra.gmra.mrb[36].mxu0 %v9821_v22  ;;  %6235 = vmatmul.mubr.f32.vlgmr.msra.gmra.mrb[36].mxu1 %v9821_v22 }
 0xa63   :  { %8885 = vmatpush1.bf16.msra.mxu0 %v8884_v43  ;;  %8949 = vmatpush1.bf16.msra.mxu1 %v8948_v44  ;;  %v5935_v43 = vld [vmem:[#allocation14 + $0x338] sm:$0xff] }
 0xa64   :  { %6305 = vmatprep.mubr.f32.mxu0 %v6096_v38  ;;  %6376 = vmatprep.mubr.f32.mxu1 %v6096_v38  ;;  %v5941_v38 = vld [vmem:[#allocation14 + $0x368] sm:$0xff]  ;;  %v5943_v44 = vld [vmem:[#allocation14 + $0x378] sm:$0xff] }
 0xa65   :  { %8887 = vmatprep.subr.bf16.mxu0 %v8886_v42  ;;  %8951 = vmatprep.subr.bf16.mxu1 %v8950_v27  ;;  %v8906_v52 = vpack.c.bf16 %v5941_v38, %v5933_v58  ;;  %v8970_v42 = vpack.c.bf16 %v5943_v44, %v5935_v43  ;;  %v5934_v27 = vld [vmem:[#allocation14 + $0x330] sm:$0xff]  ;;  %v6013_v43 = vld [vmem:[#allocation14 + $0x5a8] sm:$0xff] }
 0xa66   :  { %v8972_v62 = vpack.c.bf16 %v5942_v57, %v5934_v27  ;;  %v5998_v58 = vld [vmem:[#allocation14 + $0x530] sm:$0xff]  ;;  %v6021_v44 = vld [vmem:[#allocation14 + $0x5e8] sm:$0xff] }
 0xa67   :  { %8889 = vmatpush1.bf16.msra.mxu0 %v8888_v37  ;;  %8953 = vmatpush1.bf16.msra.mxu1 %v8952_v41  ;;  %v5951_v37 = vld [vmem:[#allocation14 + $0x3b8] sm:$0xff]  ;;  %v6006_v38 = vld [vmem:[#allocation14 + $0x570] sm:$0xff]  ;;  %v8926_v27 = vpack.c.bf16 %v6021_v44, %v6013_v43 }
 0xa68   :  { %8891 = vmatprep.subr.bf16.mxu0 %v8890_v9  ;;  %8955 = vmatprep.subr.bf16.mxu1 %v8954_v63  ;;  %v5959_v41 = vld [vmem:[#allocation14 + $0x3f8] sm:$0xff]  ;;  %v5948_v9 = vld [vmem:[#allocation14 + $0x3a0] sm:$0xff]  ;;  %v8988_v49 = vpack.c.bf16 %v6006_v38, %v5998_v58  ;;  %v6078_v43 = vld [vmem:[#allocation14 + $0x7b0] sm:$0xff] }
 0xa69   :  { %v5956_v63 = vld [vmem:[#allocation14 + $0x3e0] sm:$0xff]  ;;  %v8974_v1 = vpack.c.bf16 %v5959_v41, %v5951_v37  ;;  %v6029_v37 = vld [vmem:[#allocation14 + $0x628] sm:$0xff]  ;;  %v6086_v44 = vld [vmem:[#allocation14 + $0x7f0] sm:$0xff] }
 0xa6a   :  { %v8912_v6 = vpack.c.bf16 %v5956_v63, %v5948_v9  ;;  %v6037_v41 = vld [vmem:[#allocation14 + $0x668] sm:$0xff]  ;;  %v8992_v63 = vpack.c.bf16 %v6022_v54, %v6014_v5  ;;  %v6084_v38 = vld [vmem:[#allocation14 + $0x7e0] sm:$0xff]  ;;  %v9032_v5 = vld [vmem:[#allocation15 + $0x58] sm:$0xff]  }
 0xa6b   :  { %8893 = vmatpush1.bf16.msra.mxu0 %v8892_v4  ;;  %8957 = vmatpush1.bf16.msra.mxu1 %v8956_v56  ;;  %v5967_v4 = vld [vmem:[#allocation14 + $0x438] sm:$0xff]  ;;  %v8930_v12 = vpack.c.bf16 %v6037_v41, %v6029_v37  ;;  %v9034_v37 = vld [vmem:[#allocation15 + $0x60] sm:$0xff]  }
 0xa6c   :  { %8895 = vmatprep.subr.bf16.mxu0 %v8894_v8  ;;  %8959 = vmatprep.subr.bf16.mxu1 %v8958_v2  ;;  %v5975_v56 = vld [vmem:[#allocation14 + $0x478] sm:$0xff]  ;;  %v5964_v8 = vld [vmem:[#allocation14 + $0x420] sm:$0xff] }
 0xa6d   :  { %v5972_v2 = vld [vmem:[#allocation14 + $0x460] sm:$0xff]  ;;  %v8978_v11 = vpack.c.bf16 %v5975_v56, %v5967_v4  ;;  %v6045_v4 = vld [vmem:[#allocation14 + $0x6a8] sm:$0xff]  ;;  %v9033_v54 = vld [vmem:[#allocation15 + $0x18] sm:$0xff]  }
 0xa6e   :  { %v8916_v17 = vpack.c.bf16 %v5972_v2, %v5964_v8  ;;  %v6053_v56 = vld [vmem:[#allocation14 + $0x6e8] sm:$0xff]  ;;  %v8996_v2 = vpack.c.bf16 %v6038_v39, %v6030_v23  ;;  %v9035_v41 = vld [vmem:[#allocation15 + $0x20] sm:$0xff]  }
 0xa6f   :  { %8897 = vmatpush1.bf16.msra.mxu0 %v8896_v32  ;;  %8961 = vmatpush1.bf16.msra.mxu1 %v8960_v16  ;;  %v5983_v32 = vld [vmem:[#allocation14 + $0x4b8] sm:$0xff]  ;;  %v8934_v26 = vpack.c.bf16 %v6053_v56, %v6045_v4 }
 0xa70   :  { %8899 = vmatprep.subr.bf16.mxu0 %v8898_v40  ;;  %8963 = vmatprep.subr.bf16.mxu1 %v8962_v21  ;;  %v5991_v16 = vld [vmem:[#allocation14 + $0x4f8] sm:$0xff]  ;;  %v5980_v40 = vld [vmem:[#allocation14 + $0x4a0] sm:$0xff] }
 0xa71   :  { %v5988_v21 = vld [vmem:[#allocation14 + $0x4e0] sm:$0xff]  ;;  %v8982_v25 = vpack.c.bf16 %v5991_v16, %v5983_v32  ;;  %v6061_v32 = vld [vmem:[#allocation14 + $0x728] sm:$0xff]  ;;  %v9041_v4 = vld [vmem:[#allocation15 + $0x38] sm:$0xff]  }
 0xa72   :  { %v8920_v53 = vpack.c.bf16 %v5988_v21, %v5980_v40  ;;  %v6069_v16 = vld [vmem:[#allocation14 + $0x768] sm:$0xff]  ;;  %v9000_v21 = vpack.c.bf16 %v6054_v15, %v6046_v14 }
 0xa73   :  { %8901 = vmatpush1.bf16.msra.mxu0 %v8900_v46  ;;  %8965 = vmatpush1.bf16.msra.mxu1 %v8964_v19  ;;  %v5999_v46 = vld [vmem:[#allocation14 + $0x538] sm:$0xff]  ;;  %v8938_v28 = vpack.c.bf16 %v6069_v16, %v6061_v32 }
 0xa74   :  { %8903 = vmatprep.subr.bf16.mxu0 %v8902_v55  ;;  %8967 = vmatprep.subr.bf16.mxu1 %v8966_v34  ;;  %v6007_v19 = vld [vmem:[#allocation14 + $0x578] sm:$0xff]  ;;  %v5996_v55 = vld [vmem:[#allocation14 + $0x520] sm:$0xff] }
 0xa75   :  { %v6004_v34 = vld [vmem:[#allocation14 + $0x560] sm:$0xff]  ;;  %v8986_v36 = vpack.c.bf16 %v6007_v19, %v5999_v46  ;;  %v6077_v46 = vld [vmem:[#allocation14 + $0x7a8] sm:$0xff] }
 0xa76   :  { %v8924_v48 = vpack.c.bf16 %v6004_v34, %v5996_v55  ;;  %v6085_v19 = vld [vmem:[#allocation14 + $0x7e8] sm:$0xff]  ;;  %v9004_v34 = vpack.c.bf16 %v6070_v31, %v6062_v30 }
 0xa77   :  { %8905 = vmatpush1.bf16.msra.mxu0 %v8904_v45  ;;  %8969 = vmatpush1.bf16.msra.mxu1 %v8968_v47  ;;  %v6015_v45 = vld [vmem:[#allocation14 + $0x5b8] sm:$0xff] }
 0xa78   :  { %8907 = vmatprep.subr.bf16.mxu0 %v8906_v52  ;;  %8971 = vmatprep.subr.bf16.mxu1 %v8970_v42  ;;  %v6023_v47 = vld [vmem:[#allocation14 + $0x5f8] sm:$0xff]  ;;  %v6012_v52 = vld [vmem:[#allocation14 + $0x5a0] sm:$0xff] }
 0xa79   :  { %v6020_v42 = vld [vmem:[#allocation14 + $0x5e0] sm:$0xff]  ;;  %v8990_v57 = vpack.c.bf16 %v6023_v47, %v6015_v45  ;;  %v9008_v47 = vpack.c.bf16 %v6086_v44, %v6078_v43 }
 0xa7a   :  { %v8928_v9 = vpack.c.bf16 %v6020_v42, %v6012_v52  ;;  %v9028_v52 = vld [vmem:[#allocation15 + $0x48] sm:$0xff]  }
 0xa7b   :  { %8909 = vmatpush1.bf16.msra.mxu0 %v8908_v59  ;;  %8973 = vmatpush1.bf16.msra.mxu1 %v8972_v62  ;;  %v6031_v59 = vld [vmem:[#allocation14 + $0x638] sm:$0xff]  ;;  %v9029_v42 = vld [vmem:[#allocation15 + $0x8] sm:$0xff]  }
 0xa7c   :  { %8911 = vmatprep.subr.bf16.mxu0 %v8910_v0  ;;  %8975 = vmatprep.subr.bf16.mxu1 %v8974_v1  ;;  %v6039_v62 = vld [vmem:[#allocation14 + $0x678] sm:$0xff]  ;;  %v6028_v0 = vld [vmem:[#allocation14 + $0x620] sm:$0xff] }
 0xa7d   :  { %v6036_v1 = vld [vmem:[#allocation14 + $0x660] sm:$0xff]  ;;  %v8994_v3 = vpack.c.bf16 %v6039_v62, %v6031_v59  ;;  %v9037_v59 = vld [vmem:[#allocation15 + $0x28] sm:$0xff]   ;;  %v9038_v62 = vld [vmem:[#allocation15 + $0x70] sm:$0xff]  }
 0xa7e   :  { %v8932_v8 = vpack.c.bf16 %v6036_v1, %v6028_v0  ;;  %v9040_v1 = vld [vmem:[#allocation15 + $0x78] sm:$0xff]  }
 0xa7f   :  { %8913 = vmatpush1.bf16.msra.mxu0 %v8912_v6  ;;  %8977 = vmatpush1.bf16.msra.mxu1 %v8976_v7  ;;  %v6047_v6 = vld [vmem:[#allocation14 + $0x6b8] sm:$0xff] }
 0xa80   :  { %8915 = vmatprep.subr.bf16.mxu0 %v8914_v10  ;;  %8979 = vmatprep.subr.bf16.mxu1 %v8978_v11  ;;  %v6055_v7 = vld [vmem:[#allocation14 + $0x6f8] sm:$0xff]  ;;  %v6044_v10 = vld [vmem:[#allocation14 + $0x6a0] sm:$0xff] }
 0xa81   :  { %v6052_v11 = vld [vmem:[#allocation14 + $0x6e0] sm:$0xff]  ;;  %v8998_v13 = vpack.c.bf16 %v6055_v7, %v6047_v6 }
 0xa82   :  { %v8936_v40 = vpack.c.bf16 %v6052_v11, %v6044_v10  ;;  %v5830_v16 = vld [vmem:[#allocation3 + $0x7] ss:$8 sm:$0xf0] }
 0xa83   :  { %8917 = vmatpush1.bf16.msra.mxu0 %v8916_v17  ;;  %8981 = vmatpush1.bf16.msra.mxu1 %v8980_v18  ;;  %v6063_v17 = vld [vmem:[#allocation14 + $0x738] sm:$0xff] }
 0xa84   :  { %8919 = vmatprep.subr.bf16.mxu0 %v8918_v24  ;;  %8983 = vmatprep.subr.bf16.mxu1 %v8982_v25  ;;  %v6071_v18 = vld [vmem:[#allocation14 + $0x778] sm:$0xff]  ;;  %v6060_v24 = vld [vmem:[#allocation14 + $0x720] sm:$0xff] }
 0xa85   :  { %v6068_v25 = vld [vmem:[#allocation14 + $0x760] sm:$0xff]  ;;  %v9002_v61 = vpack.c.bf16 %v6071_v18, %v6063_v17 }
 0xa86   :  { %v8940_v55 = vpack.c.bf16 %v6068_v25, %v6060_v24 }
 0xa87   :  { %8921 = vmatpush1.bf16.msra.mxu0 %v8920_v53  ;;  %8985 = vmatpush1.bf16.msra.mxu1 %v8984_v33  ;;  %v6079_v53 = vld [vmem:[#allocation14 + $0x7b8] sm:$0xff] }
 0xa88   :  { %8923 = vmatprep.subr.bf16.mxu0 %v8922_v35  ;;  %8987 = vmatprep.subr.bf16.mxu1 %v8986_v36  ;;  %v6087_v33 = vld [vmem:[#allocation14 + $0x7f8] sm:$0xff]  ;;  %v6076_v35 = vld [vmem:[#allocation14 + $0x7a0] sm:$0xff]  ;;  %v8942_v36 = vpack.c.bf16 %v6085_v19, %v6077_v46 }
 0xa89   :  { %v9006_v58 = vpack.c.bf16 %v6087_v33, %v6079_v53  ;;  %v8944_v45 = vpack.c.bf16 %v6084_v38, %v6076_v35  ;;  %v5823_v35 = vmul.f32 0.0, %v9805_v20 }
 0xa8b   :  { %8925 = vmatpush1.bf16.msra.mxu0 %v8924_v48  ;;  %8989 = vmatpush1.bf16.msra.mxu1 %v8988_v49  ;;  %v9026_v48 = vld [vmem:[#allocation15 + $0x40] sm:$0xff]   ;;  %v5824_v38 = vadd.f32 %v5823_v35, %v9808_v29 }
 0xa8c   :  { %8927 = vmatprep.subr.bf16.mxu0 %v8926_v27  ;;  %8991 = vmatprep.subr.bf16.mxu1 %v8990_v57  ;;  %v9027_v49 = vld [vmem:[#allocation15] sm:$0xff]   ;;  %v9030_v27 = vld [vmem:[#allocation15 + $0x50] sm:$0xff]  }
 0xa8d   :  { %v9031_v57 = vld [vmem:[#allocation15 + $0x10] sm:$0xff]  }
 0xa8f   :  { %8929 = vmatpush1.bf16.msra.mxu0 %v8928_v9  ;;  %8993 = vmatpush1.bf16.msra.mxu1 %v8992_v63  ;;  %v9039_v9 = vld [vmem:[#allocation15 + $0x30] sm:$0xff]  }
 0xa90   :  { %8931 = vmatprep.subr.bf16.mxu0 %v8930_v12  ;;  %8995 = vmatprep.subr.bf16.mxu1 %v8994_v3 }
 0xa93   :  { %8933 = vmatpush1.bf16.msra.mxu0 %v8932_v8  ;;  %8997 = vmatpush1.bf16.msra.mxu1 %v8996_v2 }
 0xa94   :  { %8935 = vmatprep.subr.bf16.mxu0 %v8934_v26  ;;  %8999 = vmatprep.subr.bf16.mxu1 %v8998_v13 }
 0xa97   :  { %8937 = vmatpush1.bf16.msra.mxu0 %v8936_v40  ;;  %9001 = vmatpush1.bf16.msra.mxu1 %v9000_v21  ;;  %v5829_v40 = vld [vmem:[#allocation3 + $0x7] ss:$8 sm:$0xf] }
 0xa98   :  { %8939 = vmatprep.subr.bf16.mxu0 %v8938_v28  ;;  %9003 = vmatprep.subr.bf16.mxu1 %v9002_v61  ;;  %v5831_v21 = vor.u32 %v5830_v16, %v5829_v40 }
 0xa9b   :  { %8941 = vmatpush1.bf16.msra.mxu0 %v8940_v55  ;;  %9005 = vmatpush1.bf16.msra.mxu1 %v9004_v34 }
 0xa9c   :  { %8943 = vmatprep.subr.bf16.mxu0 %v8942_v36  ;;  %9007 = vmatprep.subr.bf16.mxu1 %v9006_v58 }
 0xa9f   :  { %8945 = vmatpush1.bf16.msra.mxu0 %v8944_v45  ;;  %9009 = vmatpush1.bf16.msra.mxu1 %v9008_v47 }
 0xaa0   :  { %6940 = vmatprep.subr.bf16.mxu0 %v9026_v48 }
 0xaa2   :  { %6306 = vmatmul.mubr.f32.vlgmr.msra.gmra.mrb[38].mxu0 %v9821_v22  ;;  %6377 = vmatmul.mubr.f32.vlgmr.msra.gmra.mrb[38].mxu1 %v9821_v22  ;;  %v9036_v22 = vld [vmem:[#allocation15 + $0x68] sm:$0xff]  }
 0xaa3   :  { %6941 = vmatpush3.bf16.msra.mxu0 %v9027_v49  ;;  %v6483_v49 = vmul.f32 0.0, %v5824_v38 }
 0xaa4   :  { %6942 = vmatprep.subr.bf16.mxu0 %v9028_v52 }
 0xaa7   :  { %6943 = vmatpush3.bf16.msra.mxu0 %v9029_v42 }
 0xaa8   :  { %6944 = vmatprep.subr.bf16.mxu0 %v9030_v27  ;;  %v6480_v27 = vmul.f32 0.0, %v9812_v50 }
 0xaab   :  { %6945 = vmatpush3.bf16.msra.mxu0 %v9031_v57 }
 0xaac   :  { %6946 = vmatprep.subr.bf16.mxu0 %v9032_v5 }
 0xaaf   :  { %6947 = vmatpush3.bf16.msra.mxu0 %v9033_v54 }
 0xab0   :  { %6948 = vmatprep.subr.bf16.mxu0 %v9034_v37 }
 0xab3   :  { %6949 = vmatpush3.bf16.msra.mxu0 %v9035_v41 }
 0xab4   :  { %6950 = vmatprep.subr.bf16.mxu0 %v9036_v22 }
 0xab7   :  { %6951 = vmatpush3.bf16.msra.mxu0 %v9037_v59 }
 0xab8   :  { %6952 = vmatprep.subr.bf16.mxu0 %v9038_v62 }
 0xabb   :  { %6953 = vmatpush3.bf16.msra.mxu0 %v9039_v9 }
 0xabc   :  { %6954 = vmatprep.subr.bf16.mxu0 %v9040_v1 }
 0xabf   :  { %6955 = vmatpush3.bf16.msra.mxu0 %v9041_v4 }
 0xb35   :  { %v6165_v63 = vpop.f32.mrb[36].mxu0  ;;  %v6236_v0 = vpop.f32.mrb[36].mxu1 }
 0xb36   :  { %v6167_v12 = vpop.f32.mrb[37].mxu0  ;;  %v6238_v3 = vpop.f32.mrb[37].mxu1 }
 0xb37   :  { %v6391_v23 = vcombine.low %v6165_v63, %v6167_v12  ;;  %v6392_v39 = vcombine.low %v6236_v0, %v6238_v3 }
 0xb39   :  { %v6401_v56 = vrot.slane %v6391_v23, %v9622_v60  ;;  %v6408_v6 = vrot.slane %v6392_v39, %v9622_v60 }
 0xb3b   :  { %v6423_v7 = vcombine.low %v6401_v56, %v6408_v6 }
 0xb3d   :  { %v6431_v17 = vrot.slane %v6423_v7, %v9622_v60 }
 0xb75   :  { %v6307_v8 = vpop.f32.mrb[38].mxu0  ;;  %v6378_v2 = vpop.f32.mrb[38].mxu1 }
 0xb76   :  { %v6309_v10 = vpop.f32.mrb[39].mxu0  ;;  %v6380_v11 = vpop.f32.mrb[39].mxu1 }
 0xb77   :  { %v6393_v26 = vcombine.low %v6307_v8, %v6309_v10  ;;  %v6394_v13 = vcombine.low %v6378_v2, %v6380_v11 }
 0xb79   :  { %v6415_v14 = vrot.slane %v6393_v26, %v9622_v60  ;;  %v6422_v15 = vrot.slane %v6394_v13, %v9622_v60 }
 0xb7b   :  { %v6424_v32 = vcombine.low %v6415_v14, %v6422_v15 }
 0xb7d   :  { %v6438_v18 = vrot.slane %v6424_v32, %v9622_v60 }
 0xb7f   :  { %v6439_v24 = vcombine.low %v6431_v17, %v6438_v18 }
 0xb81   :  { %v6441_v25 = vadd.f32 %v6439_v24, %v5831_v21 }
 0xb83   :  { %v6912_v28 = vmul.f32 -1.442695, %v6441_v25  ;;  %v6449_v61 = vrot.slane %v6441_v25, 2  ;;  %v6460_v31 = vrot.slane %v6441_v25, 6  ;;  %v6457_v53 = vrot.slane %v6441_v25, 4 }
 0xb85   :  { %9154 = vpow2.f32 %v6912_v28  ;;  %v6913_v30 = vmul.f32 -1.442695, %v6449_v61  ;;  %v6914_v46 = vmul.f32 -1.442695, %v6460_v31 }
 0xb87   :  { %9156 = vpow2.f32 %v6913_v30 }
 0xb88   :  { %9158 = vpow2.f32 %v6914_v46 }
 0xb8f   :  { %v9155_v19 = vpop.eup %9154 }
 0xb90   :  { %v6445_v33 = vadd.f32 1.0, %v9155_v19 }
 0xb91   :  { %v9157_v55 = vpop.eup %9156 }
 0xb92   :  { %9160 = vrcp.f32 %v6445_v33  ;;  %v6454_v34 = vadd.f32 1.0, %v9157_v55  ;;  %v9159_v60 = vpop.eup %9158 }
 0xb93   :  { %9162 = vtanh.f32 %v6457_v53  ;;  %v6465_v44 = vadd.f32 1.0, %v9159_v60 }
 0xb94   :  { %9164 = vrcp.f32 %v6454_v34 }
 0xb95   :  { %9166 = vrcp.f32 %v6465_v44 }
 0xb9c   :  { %v9161_v36 = vpop.eup %9160 }
 0xb9d   :  { %v9163_v58 = vpop.eup %9162 }
 0xb9e   :  { %v9165_v43 = vpop.eup %9164  ;;  %v6469_v47 = vmul.f32 %v9163_v58, %v9161_v36 }
 0xb9f   :  { %v6468_v45 = vmul.f32 %v9165_v43, %v5824_v38  ;;  %v9167_v20 = vpop.eup %9166 }
 0xba1   :  { %v6470_v48 = vadd.f32 %v6469_v47, %v6468_v45 }
 0xba3   :  { %9168 = vtanh.f32 %v6470_v48  ;;  %v6484_v52 = vadd.f32 %v6483_v49, %v6470_v48 }
 0xba5   :  { %6489 = vst.msk [vmem:[#allocation6] sm:$0x3] %vm9531_vm0, %v6484_v52  ;;  %6671 = vst.msk [vmem:[#allocation20] sm:$0x3] %vm9531_vm0, %v6484_v52 }
 0xbad   :  { %v9169_v42 = vpop.eup %9168 }
 0xbae   :  { %v6472_v29 = vmul.f32 %v9169_v42, %v9167_v20 }
 0xbb0   :  { %v6481_v57 = vadd.f32 %v6480_v27, %v6472_v29 }
 0xbb2   :  { %6488 = vst.msk [vmem:[#allocation5] sm:$0x3] %vm9531_vm0, %v6481_v57  ;;  %6486 = vst.msk [vmem:[#allocation4 + $0x7] ss:$8 sm:$0x3] %vm9531_vm0, %v6481_v57 }
 0xbb3   :  { %6670 = vst.msk [vmem:[#allocation18] sm:$0x3] %vm9531_vm0, %v6481_v57 }
 0xbb9   :  { %v6491_v5 = vld [vmem:[#allocation4 + $0x8] sm:$0xff]  ;;  %v6490_v54 = vld [vmem:[#allocation4] sm:$0xff] }
 0xbba   :  { %v6493_v37 = vpack.c.bf16 %v6491_v5, %v6491_v5  ;;  %v6492_v41 = vpack.c.bf16 %v6490_v54, %v6490_v54 }
 0xbbc   :  { %6661 = vmatprep.mubr.bf16.mxu0 %v6493_v37 }
 0xbbd   :  { %6662 = vmatmul.mubr.bf16.vlgmr.msra.gmra.mrb[40].mxu0 %v6492_v41 }
 0xbbe   :  { %9281 = shalt.err (!%p9278_p11)
}
 0xbbf   :  { %s9282_s25 = scalar_lea.hbm %s9895_s10, 32 }
 0xbc0   :  { %p9283_p12 = scmp.ne.s32.totalorder %s9895_s10, %s9282_s25  ;;  %p9286_p13 = scmp.lt.u32.totalorder %s9282_s25, %s9895_s10 }
 0xbc2   :  { %p9288_p0 = pnand %p9286_p13, %p9283_p12 }
 0xbc4   :  { %9291 = shalt.err (!%p9288_p0)
}
 0xbc5   :  { %6691 = dma.vmem_to_hbm [thread:$0]  %s6689_s24, 32, %s9895_s10, [#allocation19]  }
 0xbc6   :  { %s9362_s30 = smov [#allocation20]  }
 0xbc7   :  { %s6698_s14 = sshll.u32 %s9362_s30, 4  ;;  %s6699_s14 = int_to_ptr.vmem [resolvable:$true] %s6698_s14 }
 0xbc8   :  { %s9292_s0 = scalar_lea.vmem %s6699_s14, 32  ;;  %p9297_p2 = scmp.lt.s32.totalorder %s6699_s14, %s6699_s14 }
 0xbc9   :  { %p9293_p1 = scmp.ne.s32.totalorder %s6699_s14, %s9292_s0  ;;  %p9298_p3 = scmp.lt.s32.totalorder %s9292_s0, %s9292_s0 }
 0xbcb   :  { %p9299_p4 = por %p9298_p3, %p9297_p2 }
 0xbcd   :  { %p9300_p5 = pnand %p9299_p4, %p9293_p1 }
 0xbcf   :  { %9303 = shalt.err (!%p9300_p5)
}
 0xbd0   :  { %s9304_s12 = scalar_lea.hbm %s9896_s11, 32 }
 0xbd1   :  { %p9305_p6 = scmp.ne.s32.totalorder %s9896_s11, %s9304_s12  ;;  %p9308_p7 = scmp.lt.u32.totalorder %s9304_s12, %s9896_s11 }
 0xbd3   :  { %p9310_p8 = pnand %p9308_p7, %p9305_p6 }
 0xbd5   :  { %9313 = shalt.err (!%p9310_p8)
}
 0xbd6   :  { %6701 = dma.vmem_to_hbm [thread:$0]  %s6699_s14, 32, %s9896_s11, [#allocation19]   ;;  %v6915_v50 = vld [vmem:[%s9893_s8] ss:$0 sm:$0xff] }
 0xbd7   :  { %s9363_s6 = smov [#allocation17]  }
 0xbd8   :  { %s6678_s7 = sshll.u32 %s9363_s6, 4  ;;  %s6679_s7 = int_to_ptr.vmem [resolvable:$true] %s6678_s7 }
 0xbd9   :  { %s9314_s3 = scalar_lea.vmem %s6679_s7, 128  ;;  %p9319_p10 = scmp.lt.s32.totalorder %s6679_s7, %s6679_s7 }
 0xbda   :  { %p9315_p9 = scmp.ne.s32.totalorder %s6679_s7, %s9314_s3  ;;  %p9320_p11 = scmp.lt.s32.totalorder %s9314_s3, %s9314_s3 }
 0xbdc   :  { %p9321_p12 = por %p9320_p11, %p9319_p10 }
 0xbde   :  { %p9322_p13 = pnand %p9321_p12, %p9315_p9 }
 0xc90   :  { %v6956_v51 = vpop.f32.mrb[40].mxu0 }
 0xc91   :  { %v6957_v22 = vpop.f32.mrb[41].mxu0 }
 0xc92   :  { %v6958_v59 = vadd.f32 %v6957_v22, %v6956_v51  ;;  %v6959_v62 = vpop.f32.mrb[42].mxu0 }
 0xc93   :  { %v6960_v9 = vpop.f32.mrb[43].mxu0 }
 0xc94   :  { %v6664_v63 = vadd.f32 %v6958_v59, %v6915_v50 }
 0xc96   :  { %6669 = vst [vmem:[#allocation17] sm:$0xff] %v6664_v63 }
 0xc97   :  { %9325 = shalt.err (!%p9322_p13)
}
 0xc98   :  { %s9326_s8 = scalar_lea.hbm %s9894_s9, 128 }
 0xc99   :  { %p9327_p0 = scmp.ne.s32.totalorder %s9894_s9, %s9326_s8  ;;  %p9330_p1 = scmp.lt.u32.totalorder %s9326_s8, %s9894_s9 }
 0xc9b   :  { %p9332_p2 = pnand %p9330_p1, %p9327_p0 }
 0xc9d   :  { %9335 = shalt.err (!%p9332_p2)
}
 0xc9e   :  { %6681 = dma.vmem_to_hbm [thread:$0]  %s6679_s7, 128, %s9894_s9, [#allocation11]  }
 0xc9f   :  { %9344 = dma.done.wait [#allocation11], 128  }
 0xca0   :  { %9345 = vsyncadd [#allocation11], 4294967168 }
 0xca1   :  { %9346 = dma.done.wait [#allocation19], 64  }
 0xca2   :  { %9347 = vsyncadd [#allocation19], 4294967232 }
 0xca3   :  { %6711 = vsyncpa [#allocation10], 1 }
 0xca4   :  { %6712 = vsyncpa [#allocation13], 1 }
 0xca5   :  { %6713 = vsyncpa [#allocation16], 1 }
 0xca6   :  { %6714 = vsyncpa [#allocation11], 1 }
 0xca7   :  { %6715 = vsyncpa [#allocation19], 1 }

</bundles_post_ra>
